<compile_context>
chip_gen: v5e
topology: v5e:2x2
jax: 0.10.0
libtpu: 0.0.40
codegen_flags: <defaults>
</compile_context>

<pallas_src>
import functools

import jax
import jax.numpy as jnp
import numpy as np
from jax.experimental import pallas as pl
from jax.experimental.pallas import tpu as pltpu

IN_FEATURES = 784
HIDDEN = 1000


def _round_up(x: int, m: int) -> int:
    return (x + m - 1) // m * m


def _mlp_kernel(x_ref, w1_ref, b1_ref, w2_ref, b2_ref, w3_ref, b3_ref, out_ref):
    """Fused fc1 -> ReLU -> fc2 -> ReLU -> fc3 on one batch tile.

    x_ref:  (TM, IN_P)       activation tile (advances with the batch grid)
    w*_ref: (K_P, N_P)       weights, fully VMEM-resident (constant index_map)
    b*_ref: (1, N_P)         biases (f32)
    out_ref:(TM, C_P)        logits tile
    """
    x = x_ref[...]

    # fc1 + ReLU : MXU matmul with f32 accumulation, epilogue on VPU.
    h = jnp.dot(x, w1_ref[...], preferred_element_type=jnp.float32)
    h = jnp.maximum(h + b1_ref[...], 0.0)
    h = h.astype(x_ref.dtype)

    # fc2 + ReLU
    h = jnp.dot(h, w2_ref[...], preferred_element_type=jnp.float32)
    h = jnp.maximum(h + b2_ref[...], 0.0)
    h = h.astype(x_ref.dtype)

    # fc3 (no activation)
    o = jnp.dot(h, w3_ref[...], preferred_element_type=jnp.float32)
    o = o + b3_ref[...]
    out_ref[...] = o.astype(out_ref.dtype)


@functools.partial(jax.jit, static_argnames=("tile_m", "compute_dtype"))
def full_connect_forward(x, w1, b1, w2, b2, w3, b3, *, tile_m=256,
                         compute_dtype=jnp.float32):
    """Forward pass of Full_connect.

    x:  (B, 784) float32
    w*: (in_features, out_features)  -- transposed vs. torch.nn.Linear.weight
    b*: (out_features,)
    Returns (B, num_classes) in `compute_dtype`.
    """
    B = x.shape[0]
    num_classes = w3.shape[1]

    in_p = _round_up(IN_FEATURES, 128)      # 896
    hid_p = _round_up(HIDDEN, 128)          # 1024
    c_p = max(128, _round_up(num_classes, 128))

    # Batch tile: multiple of 8 sublanes; single grid point for small batches.
    tm = min(tile_m, _round_up(B, 8))
    b_p = _round_up(B, tm)
    grid = (b_p // tm,)

    # --- zero-pad everything to lane-dense shapes -------------------------
    xp = jnp.zeros((b_p, in_p), compute_dtype).at[:B, :IN_FEATURES].set(
        x.astype(compute_dtype))

    w1p = jnp.zeros((in_p, hid_p), compute_dtype).at[:IN_FEATURES, :HIDDEN].set(
        w1.astype(compute_dtype))
    w2p = jnp.zeros((hid_p, hid_p), compute_dtype).at[:HIDDEN, :HIDDEN].set(
        w2.astype(compute_dtype))
    w3p = jnp.zeros((hid_p, c_p), compute_dtype).at[:HIDDEN, :num_classes].set(
        w3.astype(compute_dtype))

    b1p = jnp.zeros((1, hid_p), jnp.float32).at[0, :HIDDEN].set(b1.astype(jnp.float32))
    b2p = jnp.zeros((1, hid_p), jnp.float32).at[0, :HIDDEN].set(b2.astype(jnp.float32))
    b3p = jnp.zeros((1, c_p), jnp.float32).at[0, :num_classes].set(b3.astype(jnp.float32))

    # --- BlockSpecs: x/out advance with the grid, params stay resident ----
    x_spec = pl.BlockSpec((tm, in_p), lambda i: (i, 0))
    out_spec = pl.BlockSpec((tm, c_p), lambda i: (i, 0))
    w1_spec = pl.BlockSpec((in_p, hid_p), lambda i: (0, 0))
    w2_spec = pl.BlockSpec((hid_p, hid_p), lambda i: (0, 0))
    w3_spec = pl.BlockSpec((hid_p, c_p), lambda i: (0, 0))
    b1_spec = pl.BlockSpec((1, hid_p), lambda i: (0, 0))
    b2_spec = pl.BlockSpec((1, hid_p), lambda i: (0, 0))
    b3_spec = pl.BlockSpec((1, c_p), lambda i: (0, 0))

    out_padded = pl.pallas_call(
        _mlp_kernel,
        out_shape=jax.ShapeDtypeStruct((b_p, c_p), compute_dtype),
        grid_spec=pltpu.PrefetchScalarGridSpec(
            num_scalar_prefetch=0,
            grid=grid,
            in_specs=[x_spec, w1_spec, b1_spec, w2_spec, b2_spec, w3_spec, b3_spec],
            out_specs=out_spec,
        ),
        compiler_params=pltpu.CompilerParams(
            dimension_semantics=("parallel",),
            vmem_limit_bytes=48 * 1024 * 1024,
        ),
    )(xp, w1p, b1p, w2p, b2p, w3p, b3p)

    return out_padded[:B, :num_classes]


def _reference(x, w1, b1, w2, b2, w3, b3):
    h = jnp.maximum(x @ w1 + b1, 0.0)
    h = jnp.maximum(h @ w2 + b2, 0.0)
    return h @ w3 + b3


def _init_params(key, num_classes):
    """PyTorch-Linear-style init, stored as (in_features, out_features)."""
    ks = jax.random.split(key, 6)

    def lin(kw, kb, fan_in, fan_out):
        bound = 1.0 / np.sqrt(fan_in)
        w = jax.random.uniform(kw, (fan_in, fan_out), jnp.float32, -bound, bound)
        b = jax.random.uniform(kb, (fan_out,), jnp.float32, -bound, bound)
        return w, b

    w1, b1 = lin(ks[0], ks[1], IN_FEATURES, HIDDEN)
    w2, b2 = lin(ks[2], ks[3], HIDDEN, HIDDEN)
    w3, b3 = lin(ks[4], ks[5], HIDDEN, num_classes)
    return w1, b1, w2, b2, w3, b3


if __name__ == "__main__":
    key = jax.random.PRNGKey(0)
    k_params, k_x = jax.random.split(key)

    num_classes = 10
    batch = 16

    w1, b1, w2, b2, w3, b3 = _init_params(k_params, num_classes)
    x = jax.random.normal(k_x, (batch, IN_FEATURES), jnp.float32)

    # f32 run + correctness check against the pure-JAX reference.
    out = full_connect_forward(x, w1, b1, w2, b2, w3, b3,
                               tile_m=256, compute_dtype=jnp.float32)
    out = jax.block_until_ready(out)
    ref = jax.block_until_ready(_reference(x, w1, b1, w2, b2, w3, b3))
    np.testing.assert_allclose(np.asarray(out), np.asarray(ref),
                               rtol=2e-2, atol=2e-2)

    # bf16 weights/activations (f32 accumulate) smoke run — v6e/v7x fast path.
    out_bf16 = full_connect_forward(x, w1, b1, w2, b2, w3, b3,
                                    tile_m=256, compute_dtype=jnp.bfloat16)
    jax.block_until_ready(out_bf16)

    print("KERNEL_OK")
</pallas_src>

<mosaic_0001>
module attributes {stable_mosaic.version = 11 : i64} {
  func.func @_mlp_kernel(%arg0: i32, %arg1: memref<16x896xf32, #tpu.memory_space<vmem>>, %arg2: memref<896x1024xf32, #tpu.memory_space<vmem>>, %arg3: memref<1x1024xf32, #tpu.memory_space<vmem>>, %arg4: memref<1024x1024xf32, #tpu.memory_space<vmem>>, %arg5: memref<1x1024xf32, #tpu.memory_space<vmem>>, %arg6: memref<1024x128xf32, #tpu.memory_space<vmem>>, %arg7: memref<1x128xf32, #tpu.memory_space<vmem>>, %arg8: memref<16x128xf32, #tpu.memory_space<vmem>>) attributes {dimension_semantics = [#tpu.dimension_semantics<parallel>], iteration_bounds = array<i64: 1>, scalar_prefetch = 0 : i64, scratch_operands = 0 : i64, tpu.core_type = #tpu.core_type<tc>, window_params = [{transform_indices = @transform_0, window_bounds = array<i64: 16, 896>}, {pipeline_mode = #tpu.pipeline_mode<synchronous>, transform_indices = @transform_1, window_bounds = array<i64: 896, 1024>}, {pipeline_mode = #tpu.pipeline_mode<synchronous>, transform_indices = @transform_2, window_bounds = array<i64: 1, 1024>}, {pipeline_mode = #tpu.pipeline_mode<synchronous>, transform_indices = @transform_3, window_bounds = array<i64: 1024, 1024>}, {pipeline_mode = #tpu.pipeline_mode<synchronous>, transform_indices = @transform_4, window_bounds = array<i64: 1, 1024>}, {pipeline_mode = #tpu.pipeline_mode<synchronous>, transform_indices = @transform_5, window_bounds = array<i64: 1024, 128>}, {pipeline_mode = #tpu.pipeline_mode<synchronous>, transform_indices = @transform_6, window_bounds = array<i64: 1, 128>}, {transform_indices = @transform_7, window_bounds = array<i64: 16, 128>}]} {
    %c0 = arith.constant 0 : index
    %c0_0 = arith.constant 0 : index
    %0 = vector.load %arg1[%c0, %c0_0] : memref<16x896xf32, #tpu.memory_space<vmem>>, vector<16x896xf32>
    %c0_1 = arith.constant 0 : index
    %c0_2 = arith.constant 0 : index
    %1 = vector.load %arg2[%c0_1, %c0_2] : memref<896x1024xf32, #tpu.memory_space<vmem>>, vector<896x1024xf32>
    %cst = arith.constant dense<0.000000e+00> : vector<16x1024xf32>
    %2 = tpu.matmul %0, %1, %cst {dimension_numbers = #tpu.dot_dimension_numbers<[1], [0], [0], [1], [0, 0, 1, 1], [], []>} : vector<16x896xf32>, vector<896x1024xf32>, vector<16x1024xf32> -> vector<16x1024xf32>
    %c0_3 = arith.constant 0 : index
    %c0_4 = arith.constant 0 : index
    %3 = vector.load %arg3[%c0_3, %c0_4] : memref<1x1024xf32, #tpu.memory_space<vmem>>, vector<1x1024xf32>
    %4 = vector.broadcast %3 : vector<1x1024xf32> to vector<16x1024xf32>
    %5 = arith.addf %2, %4 : vector<16x1024xf32>
    %cst_5 = arith.constant 0.000000e+00 : f32
    %6 = vector.broadcast %cst_5 : f32 to vector<16x1024xf32>
    %7 = arith.maximumf %5, %6 : vector<16x1024xf32>
    %c0_6 = arith.constant 0 : index
    %c0_7 = arith.constant 0 : index
    %8 = vector.load %arg4[%c0_6, %c0_7] : memref<1024x1024xf32, #tpu.memory_space<vmem>>, vector<1024x1024xf32>
    %cst_8 = arith.constant dense<0.000000e+00> : vector<16x1024xf32>
    %9 = tpu.matmul %7, %8, %cst_8 {dimension_numbers = #tpu.dot_dimension_numbers<[1], [0], [0], [1], [0, 0, 1, 1], [], []>} : vector<16x1024xf32>, vector<1024x1024xf32>, vector<16x1024xf32> -> vector<16x1024xf32>
    %c0_9 = arith.constant 0 : index
    %c0_10 = arith.constant 0 : index
    %10 = vector.load %arg5[%c0_9, %c0_10] : memref<1x1024xf32, #tpu.memory_space<vmem>>, vector<1x1024xf32>
    %11 = vector.broadcast %10 : vector<1x1024xf32> to vector<16x1024xf32>
    %12 = arith.addf %9, %11 : vector<16x1024xf32>
    %cst_11 = arith.constant 0.000000e+00 : f32
    %13 = vector.broadcast %cst_11 : f32 to vector<16x1024xf32>
    %14 = arith.maximumf %12, %13 : vector<16x1024xf32>
    %c0_12 = arith.constant 0 : index
    %c0_13 = arith.constant 0 : index
    %15 = vector.load %arg6[%c0_12, %c0_13] : memref<1024x128xf32, #tpu.memory_space<vmem>>, vector<1024x128xf32>
    %cst_14 = arith.constant dense<0.000000e+00> : vector<16x128xf32>
    %16 = tpu.matmul %14, %15, %cst_14 {dimension_numbers = #tpu.dot_dimension_numbers<[1], [0], [0], [1], [0, 0, 1, 1], [], []>} : vector<16x1024xf32>, vector<1024x128xf32>, vector<16x128xf32> -> vector<16x128xf32>
    %c0_15 = arith.constant 0 : index
    %c0_16 = arith.constant 0 : index
    %17 = vector.load %arg7[%c0_15, %c0_16] : memref<1x128xf32, #tpu.memory_space<vmem>>, vector<1x128xf32>
    %18 = vector.broadcast %17 : vector<1x128xf32> to vector<16x128xf32>
    %19 = arith.addf %16, %18 : vector<16x128xf32>
    %c0_17 = arith.constant 0 : index
    %c0_18 = arith.constant 0 : index
    %20 = vector.load %arg8[%c0_17, %c0_18] : memref<16x128xf32, #tpu.memory_space<vmem>>, vector<16x128xf32>
    tpu.vector_store %arg8[%c0_17, %c0_18], %19 {strides = array<i32>} : memref<16x128xf32, #tpu.memory_space<vmem>>, vector<16x128xf32>,
    return
  }
  func.func @transform_0(%arg0: i32) -> (i32, i32) {
    %c0_i32 = arith.constant 0 : i32
    %c0_i32_0 = arith.constant 0 : i32
    return %arg0, %c0_i32 : i32, i32
  }
  func.func @transform_1(%arg0: i32) -> (i32, i32) {
    %c0_i32 = arith.constant 0 : i32
    %c0_i32_0 = arith.constant 0 : i32
    %c0_i32_1 = arith.constant 0 : i32
    return %c0_i32, %c0_i32_0 : i32, i32
  }
  func.func @transform_2(%arg0: i32) -> (i32, i32) {
    %c0_i32 = arith.constant 0 : i32
    %c0_i32_0 = arith.constant 0 : i32
    %c0_i32_1 = arith.constant 0 : i32
    return %c0_i32, %c0_i32_0 : i32, i32
  }
  func.func @transform_3(%arg0: i32) -> (i32, i32) {
    %c0_i32 = arith.constant 0 : i32
    %c0_i32_0 = arith.constant 0 : i32
    %c0_i32_1 = arith.constant 0 : i32
    return %c0_i32, %c0_i32_0 : i32, i32
  }
  func.func @transform_4(%arg0: i32) -> (i32, i32) {
    %c0_i32 = arith.constant 0 : i32
    %c0_i32_0 = arith.constant 0 : i32
    %c0_i32_1 = arith.constant 0 : i32
    return %c0_i32, %c0_i32_0 : i32, i32
  }
  func.func @transform_5(%arg0: i32) -> (i32, i32) {
    %c0_i32 = arith.constant 0 : i32
    %c0_i32_0 = arith.constant 0 : i32
    %c0_i32_1 = arith.constant 0 : i32
    return %c0_i32, %c0_i32_0 : i32, i32
  }
  func.func @transform_6(%arg0: i32) -> (i32, i32) {
    %c0_i32 = arith.constant 0 : i32
    %c0_i32_0 = arith.constant 0 : i32
    %c0_i32_1 = arith.constant 0 : i32
    return %c0_i32, %c0_i32_0 : i32, i32
  }
  func.func @transform_7(%arg0: i32) -> (i32, i32) {
    %c0_i32 = arith.constant 0 : i32
    %c0_i32_0 = arith.constant 0 : i32
    return %arg0, %c0_i32 : i32, i32
  }
}

</mosaic_0001>

<bundles_post_ra>
// kernel: full_connect_forward.1
= control target key start
LH: loop header
LB: loop body
LE: loop exit
PB: predicated region body
PF: predicated region fallthrough
CT: control target
= control target key end

     0   :  { %s12336_s0 = inlined_call_operand.vmem [shape: f32[16,896], index: 0, kind: input, shape index: {}]   ;;  %s12337_s1 = inlined_call_operand.vmem [shape: f32[896,1024], index: 1, kind: input, shape index: {}]   ;;  %s12338_s2 = inlined_call_operand.vmem [shape: f32[1,1024], index: 2, kind: input, shape index: {}]   ;;  %s12339_s3 = inlined_call_operand.vmem [shape: f32[1024,1024], index: 3, kind: input, shape index: {}]   ;;  %s12340_s4 = inlined_call_operand.vmem [shape: f32[1,1024], index: 4, kind: input, shape index: {}]   ;;  %s12341_s5 = inlined_call_operand.vmem [shape: f32[1024,128], index: 5, kind: input, shape index: {}]   ;;  %s12342_s6 = inlined_call_operand.vmem [shape: f32[1,128], index: 6, kind: input, shape index: {}]   ;;  %s12343_s7 = inlined_call_operand.hbm [shape: f32[16,128], index: 7, kind: output, shape index: {}]  }
   0x1   :  { %v161_v0 = vld [vmem:[%s12337_s1 + $0x3c0] sm:$0xff] }
   0x2   :  { %v289_v1 = vld [vmem:[%s12337_s1 + $0x7c0] sm:$0xff]  ;;  %955 = vmatpush.msra.mxu0 %v161_v0 }
   0x3   :  { %v417_v2 = vld [vmem:[%s12337_s1 + $0xbc0] sm:$0xff]  ;;  %978 = vmatpush.msra.mxu1 %v289_v1 }
   0x4   :  { %v545_v3 = vld [vmem:[%s12337_s1 + $0xfc0] sm:$0xff]  ;;  %1001 = vmatpush.msra.mxu2 %v417_v2 }
   0x5   :  { %v153_v4 = vld [vmem:[%s12337_s1 + $0x380] sm:$0xff]  ;;  %1024 = vmatpush.msra.mxu3 %v545_v3  ;;  %v162_v3 = vld [vmem:[%s12337_s1 + $0x3c8] sm:$0xff] }
   0x6   :  { %v281_v5 = vld [vmem:[%s12337_s1 + $0x780] sm:$0xff]  ;;  %956 = vmatpush.msra.mxu0 %v153_v4 }
   0x7   :  { %v409_v6 = vld [vmem:[%s12337_s1 + $0xb80] sm:$0xff]  ;;  %979 = vmatpush.msra.mxu1 %v281_v5 }
   0x8   :  { %v537_v7 = vld [vmem:[%s12337_s1 + $0xf80] sm:$0xff]  ;;  %1002 = vmatpush.msra.mxu2 %v409_v6 }
   0x9   :  { %v145_v8 = vld [vmem:[%s12337_s1 + $0x340] sm:$0xff]  ;;  %1025 = vmatpush.msra.mxu3 %v537_v7  ;;  %v154_v7 = vld [vmem:[%s12337_s1 + $0x388] sm:$0xff] }
   0xa   :  { %v273_v9 = vld [vmem:[%s12337_s1 + $0x740] sm:$0xff]  ;;  %957 = vmatpush.msra.mxu0 %v145_v8 }
   0xb   :  { %v401_v10 = vld [vmem:[%s12337_s1 + $0xb40] sm:$0xff]  ;;  %980 = vmatpush.msra.mxu1 %v273_v9 }
   0xc   :  { %v529_v11 = vld [vmem:[%s12337_s1 + $0xf40] sm:$0xff]  ;;  %1003 = vmatpush.msra.mxu2 %v401_v10 }
   0xd   :  { %v137_v12 = vld [vmem:[%s12337_s1 + $0x300] sm:$0xff]  ;;  %1026 = vmatpush.msra.mxu3 %v529_v11  ;;  %v146_v11 = vld [vmem:[%s12337_s1 + $0x348] sm:$0xff] }
   0xe   :  { %v265_v13 = vld [vmem:[%s12337_s1 + $0x700] sm:$0xff]  ;;  %958 = vmatpush.msra.mxu0 %v137_v12 }
   0xf   :  { %v393_v14 = vld [vmem:[%s12337_s1 + $0xb00] sm:$0xff]  ;;  %981 = vmatpush.msra.mxu1 %v265_v13 }
  0x10   :  { %v521_v15 = vld [vmem:[%s12337_s1 + $0xf00] sm:$0xff]  ;;  %1004 = vmatpush.msra.mxu2 %v393_v14 }
  0x11   :  { %v129_v16 = vld [vmem:[%s12337_s1 + $0x2c0] sm:$0xff]  ;;  %1027 = vmatpush.msra.mxu3 %v521_v15  ;;  %v138_v15 = vld [vmem:[%s12337_s1 + $0x308] sm:$0xff] }
  0x12   :  { %v257_v17 = vld [vmem:[%s12337_s1 + $0x6c0] sm:$0xff]  ;;  %959 = vmatpush.msra.mxu0 %v129_v16 }
  0x13   :  { %v385_v18 = vld [vmem:[%s12337_s1 + $0xac0] sm:$0xff]  ;;  %982 = vmatpush.msra.mxu1 %v257_v17 }
  0x14   :  { %v513_v19 = vld [vmem:[%s12337_s1 + $0xec0] sm:$0xff]  ;;  %1005 = vmatpush.msra.mxu2 %v385_v18 }
  0x15   :  { %v121_v20 = vld [vmem:[%s12337_s1 + $0x280] sm:$0xff]  ;;  %1028 = vmatpush.msra.mxu3 %v513_v19  ;;  %v130_v19 = vld [vmem:[%s12337_s1 + $0x2c8] sm:$0xff] }
  0x16   :  { %v249_v21 = vld [vmem:[%s12337_s1 + $0x680] sm:$0xff]  ;;  %960 = vmatpush.msra.mxu0 %v121_v20 }
  0x17   :  { %v377_v22 = vld [vmem:[%s12337_s1 + $0xa80] sm:$0xff]  ;;  %983 = vmatpush.msra.mxu1 %v249_v21 }
  0x18   :  { %v505_v23 = vld [vmem:[%s12337_s1 + $0xe80] sm:$0xff]  ;;  %1006 = vmatpush.msra.mxu2 %v377_v22 }
  0x19   :  { %v113_v24 = vld [vmem:[%s12337_s1 + $0x240] sm:$0xff]  ;;  %1029 = vmatpush.msra.mxu3 %v505_v23  ;;  %v122_v23 = vld [vmem:[%s12337_s1 + $0x288] sm:$0xff] }
  0x1a   :  { %v241_v25 = vld [vmem:[%s12337_s1 + $0x640] sm:$0xff]  ;;  %961 = vmatpush.msra.mxu0 %v113_v24 }
  0x1b   :  { %v369_v26 = vld [vmem:[%s12337_s1 + $0xa40] sm:$0xff]  ;;  %984 = vmatpush.msra.mxu1 %v241_v25 }
  0x1c   :  { %v497_v27 = vld [vmem:[%s12337_s1 + $0xe40] sm:$0xff]  ;;  %1007 = vmatpush.msra.mxu2 %v369_v26 }
  0x1d   :  { %v105_v28 = vld [vmem:[%s12337_s1 + $0x200] sm:$0xff]  ;;  %1030 = vmatpush.msra.mxu3 %v497_v27  ;;  %v114_v27 = vld [vmem:[%s12337_s1 + $0x248] sm:$0xff] }
  0x1e   :  { %v233_v29 = vld [vmem:[%s12337_s1 + $0x600] sm:$0xff]  ;;  %962 = vmatpush.msra.mxu0 %v105_v28 }
  0x1f   :  { %v361_v30 = vld [vmem:[%s12337_s1 + $0xa00] sm:$0xff]  ;;  %985 = vmatpush.msra.mxu1 %v233_v29 }
  0x20   :  { %v489_v31 = vld [vmem:[%s12337_s1 + $0xe00] sm:$0xff]  ;;  %1008 = vmatpush.msra.mxu2 %v361_v30 }
  0x21   :  { %v97_v32 = vld [vmem:[%s12337_s1 + $0x1c0] sm:$0xff]  ;;  %1031 = vmatpush.msra.mxu3 %v489_v31  ;;  %v106_v31 = vld [vmem:[%s12337_s1 + $0x208] sm:$0xff] }
  0x22   :  { %v225_v33 = vld [vmem:[%s12337_s1 + $0x5c0] sm:$0xff]  ;;  %963 = vmatpush.msra.mxu0 %v97_v32 }
  0x23   :  { %v353_v34 = vld [vmem:[%s12337_s1 + $0x9c0] sm:$0xff]  ;;  %986 = vmatpush.msra.mxu1 %v225_v33 }
  0x24   :  { %v481_v35 = vld [vmem:[%s12337_s1 + $0xdc0] sm:$0xff]  ;;  %1009 = vmatpush.msra.mxu2 %v353_v34 }
  0x25   :  { %v89_v36 = vld [vmem:[%s12337_s1 + $0x180] sm:$0xff]  ;;  %1032 = vmatpush.msra.mxu3 %v481_v35  ;;  %v98_v35 = vld [vmem:[%s12337_s1 + $0x1c8] sm:$0xff] }
  0x26   :  { %v217_v37 = vld [vmem:[%s12337_s1 + $0x580] sm:$0xff]  ;;  %964 = vmatpush.msra.mxu0 %v89_v36 }
  0x27   :  { %v345_v38 = vld [vmem:[%s12337_s1 + $0x980] sm:$0xff]  ;;  %987 = vmatpush.msra.mxu1 %v217_v37 }
  0x28   :  { %v473_v39 = vld [vmem:[%s12337_s1 + $0xd80] sm:$0xff]  ;;  %1010 = vmatpush.msra.mxu2 %v345_v38 }
  0x29   :  { %v81_v40 = vld [vmem:[%s12337_s1 + $0x140] sm:$0xff]  ;;  %1033 = vmatpush.msra.mxu3 %v473_v39  ;;  %v90_v39 = vld [vmem:[%s12337_s1 + $0x188] sm:$0xff] }
  0x2a   :  { %v209_v41 = vld [vmem:[%s12337_s1 + $0x540] sm:$0xff]  ;;  %965 = vmatpush.msra.mxu0 %v81_v40 }
  0x2b   :  { %v337_v42 = vld [vmem:[%s12337_s1 + $0x940] sm:$0xff]  ;;  %988 = vmatpush.msra.mxu1 %v209_v41 }
  0x2c   :  { %v465_v43 = vld [vmem:[%s12337_s1 + $0xd40] sm:$0xff]  ;;  %1011 = vmatpush.msra.mxu2 %v337_v42 }
  0x2d   :  { %v73_v44 = vld [vmem:[%s12337_s1 + $0x100] sm:$0xff]  ;;  %1034 = vmatpush.msra.mxu3 %v465_v43  ;;  %v82_v43 = vld [vmem:[%s12337_s1 + $0x148] sm:$0xff] }
  0x2e   :  { %v201_v45 = vld [vmem:[%s12337_s1 + $0x500] sm:$0xff]  ;;  %966 = vmatpush.msra.mxu0 %v73_v44 }
  0x2f   :  { %v329_v46 = vld [vmem:[%s12337_s1 + $0x900] sm:$0xff]  ;;  %989 = vmatpush.msra.mxu1 %v201_v45 }
  0x30   :  { %v457_v47 = vld [vmem:[%s12337_s1 + $0xd00] sm:$0xff]  ;;  %1012 = vmatpush.msra.mxu2 %v329_v46 }
  0x31   :  { %v65_v48 = vld [vmem:[%s12337_s1 + $0xc0] sm:$0xff]  ;;  %1035 = vmatpush.msra.mxu3 %v457_v47  ;;  %v74_v47 = vld [vmem:[%s12337_s1 + $0x108] sm:$0xff] }
  0x32   :  { %v193_v49 = vld [vmem:[%s12337_s1 + $0x4c0] sm:$0xff]  ;;  %967 = vmatpush.msra.mxu0 %v65_v48  ;;  %v5567_v48 = vld [vmem:[%s12336_s0 + $0x10] sm:$0xff] }
  0x33   :  { %v321_v50 = vld [vmem:[%s12337_s1 + $0x8c0] sm:$0xff]  ;;  %990 = vmatpush.msra.mxu1 %v193_v49 }
  0x34   :  { %v449_v51 = vld [vmem:[%s12337_s1 + $0xcc0] sm:$0xff]  ;;  %1013 = vmatpush.msra.mxu2 %v321_v50 }
  0x35   :  { %v57_v52 = vld [vmem:[%s12337_s1 + $0x80] sm:$0xff]  ;;  %1036 = vmatpush.msra.mxu3 %v449_v51 }
  0x36   :  { %v185_v53 = vld [vmem:[%s12337_s1 + $0x480] sm:$0xff]  ;;  %968 = vmatpush.msra.mxu0 %v57_v52  ;;  %v66_v52 = vld [vmem:[%s12337_s1 + $0xc8] sm:$0xff] }
  0x37   :  { %v313_v54 = vld [vmem:[%s12337_s1 + $0x880] sm:$0xff]  ;;  %991 = vmatpush.msra.mxu1 %v185_v53 }
  0x38   :  { %v441_v55 = vld [vmem:[%s12337_s1 + $0xc80] sm:$0xff]  ;;  %1014 = vmatpush.msra.mxu2 %v313_v54 }
  0x39   :  { %v49_v56 = vld [vmem:[%s12337_s1 + $0x40] sm:$0xff]  ;;  %1037 = vmatpush.msra.mxu3 %v441_v55 }
  0x3a   :  { %v177_v57 = vld [vmem:[%s12337_s1 + $0x440] sm:$0xff]  ;;  %969 = vmatpush.msra.mxu0 %v49_v56 }
  0x3b   :  { %v305_v58 = vld [vmem:[%s12337_s1 + $0x840] sm:$0xff]  ;;  %992 = vmatpush.msra.mxu1 %v177_v57  ;;  %v58_v57 = vld [vmem:[%s12337_s1 + $0x88] sm:$0xff] }
  0x3c   :  { %v433_v59 = vld [vmem:[%s12337_s1 + $0xc40] sm:$0xff]  ;;  %1015 = vmatpush.msra.mxu2 %v305_v58  ;;  %v5603_v58 = vld [vmem:[%s12336_s0 + $0x8] sm:$0xff] }
  0x3d   :  { %v41_v60 = vld [vmem:[%s12337_s1] sm:$0xff]  ;;  %1038 = vmatpush.msra.mxu3 %v433_v59 }
  0x3e   :  { %v169_v61 = vld [vmem:[%s12337_s1 + $0x400] sm:$0xff]  ;;  %970 = vmatpush.msra.mxu0 %v41_v60 }
  0x3f   :  { %v297_v62 = vld [vmem:[%s12337_s1 + $0x800] sm:$0xff]  ;;  %993 = vmatpush.msra.mxu1 %v169_v61 }
  0x40   :  { %v425_v63 = vld [vmem:[%s12337_s1 + $0xc00] sm:$0xff]  ;;  %1016 = vmatpush.msra.mxu2 %v297_v62  ;;  %v50_v62 = vld [vmem:[%s12337_s1 + $0x48] sm:$0xff]  ;;  %994 = vmatmul.f32.vlgmr.msra.gmra.mxu1 %v5603_v58 }
  0x41   :  { %v673_v0 = vld [vmem:[%s12337_s1 + $0x13c0] sm:$0xff]  ;;  %1039 = vmatpush.msra.mxu3 %v425_v63  ;;  %1017 = vmatmul.f32.vlgmr.msra.gmra.mxu2 %v5567_v48 }
  0x42   :  { %v801_v1 = vld [vmem:[%s12337_s1 + $0x17c0] sm:$0xff]  ;;  %1047 = vmatpush.msrb.mxu0 %v673_v0 }
  0x43   :  { %v929_v2 = vld [vmem:[%s12337_s1 + $0x1bc0] sm:$0xff]  ;;  %1070 = vmatpush.msrb.mxu1 %v801_v1  ;;  %1116 = vmatpush.msrb.mxu3 %v162_v3  ;;  %v5633_v3 = vld [vmem:[%s12336_s0 + $0x48] sm:$0xff] }
  0x44   :  { %v665_v4 = vld [vmem:[%s12337_s1 + $0x1380] sm:$0xff]  ;;  %1093 = vmatpush.msrb.mxu2 %v929_v2  ;;  %v42_v2 = vld [vmem:[%s12337_s1 + $0x8] sm:$0xff] }
  0x45   :  { %v793_v5 = vld [vmem:[%s12337_s1 + $0x1780] sm:$0xff]  ;;  %1048 = vmatpush.msrb.mxu0 %v665_v4  ;;  %1117 = vmatpush.msrb.mxu3 %v154_v7  ;;  %v5638_v4 = vld [vmem:[%s12336_s0 + $0x18] sm:$0xff] }
  0x46   :  { %v921_v6 = vld [vmem:[%s12337_s1 + $0x1b80] sm:$0xff]  ;;  %1071 = vmatpush.msrb.mxu1 %v793_v5  ;;  %v290_v5 = vld [vmem:[%s12337_s1 + $0x7c8] sm:$0xff] }
  0x47   :  { %v657_v8 = vld [vmem:[%s12337_s1 + $0x1340] sm:$0xff]  ;;  %1094 = vmatpush.msrb.mxu2 %v921_v6  ;;  %1118 = vmatpush.msrb.mxu3 %v146_v11 }
  0x48   :  { %v785_v9 = vld [vmem:[%s12337_s1 + $0x1740] sm:$0xff]  ;;  %1049 = vmatpush.msrb.mxu0 %v657_v8 }
  0x49   :  { %v913_v10 = vld [vmem:[%s12337_s1 + $0x1b40] sm:$0xff]  ;;  %1072 = vmatpush.msrb.mxu1 %v785_v9  ;;  %1119 = vmatpush.msrb.mxu3 %v138_v15 }
  0x4a   :  { %v649_v12 = vld [vmem:[%s12337_s1 + $0x1300] sm:$0xff]  ;;  %1095 = vmatpush.msrb.mxu2 %v913_v10 }
  0x4b   :  { %v777_v13 = vld [vmem:[%s12337_s1 + $0x1700] sm:$0xff]  ;;  %1050 = vmatpush.msrb.mxu0 %v649_v12  ;;  %1120 = vmatpush.msrb.mxu3 %v130_v19 }
  0x4c   :  { %v905_v14 = vld [vmem:[%s12337_s1 + $0x1b00] sm:$0xff]  ;;  %1073 = vmatpush.msrb.mxu1 %v777_v13 }
  0x4d   :  { %v641_v16 = vld [vmem:[%s12337_s1 + $0x12c0] sm:$0xff]  ;;  %1096 = vmatpush.msrb.mxu2 %v905_v14  ;;  %1121 = vmatpush.msrb.mxu3 %v122_v23 }
  0x4e   :  { %v769_v17 = vld [vmem:[%s12337_s1 + $0x16c0] sm:$0xff]  ;;  %1051 = vmatpush.msrb.mxu0 %v641_v16 }
  0x4f   :  { %v897_v18 = vld [vmem:[%s12337_s1 + $0x1ac0] sm:$0xff]  ;;  %1074 = vmatpush.msrb.mxu1 %v769_v17  ;;  %1122 = vmatpush.msrb.mxu3 %v114_v27 }
  0x50   :  { %v633_v20 = vld [vmem:[%s12337_s1 + $0x1280] sm:$0xff]  ;;  %1097 = vmatpush.msrb.mxu2 %v897_v18 }
  0x51   :  { %v761_v21 = vld [vmem:[%s12337_s1 + $0x1680] sm:$0xff]  ;;  %1052 = vmatpush.msrb.mxu0 %v633_v20  ;;  %1123 = vmatpush.msrb.mxu3 %v106_v31 }
  0x52   :  { %v889_v22 = vld [vmem:[%s12337_s1 + $0x1a80] sm:$0xff]  ;;  %1075 = vmatpush.msrb.mxu1 %v761_v21 }
  0x53   :  { %v625_v24 = vld [vmem:[%s12337_s1 + $0x1240] sm:$0xff]  ;;  %1098 = vmatpush.msrb.mxu2 %v889_v22  ;;  %1124 = vmatpush.msrb.mxu3 %v98_v35 }
  0x54   :  { %v753_v25 = vld [vmem:[%s12337_s1 + $0x1640] sm:$0xff]  ;;  %1053 = vmatpush.msrb.mxu0 %v625_v24 }
  0x55   :  { %v881_v26 = vld [vmem:[%s12337_s1 + $0x1a40] sm:$0xff]  ;;  %1076 = vmatpush.msrb.mxu1 %v753_v25  ;;  %1125 = vmatpush.msrb.mxu3 %v90_v39 }
  0x56   :  { %v617_v28 = vld [vmem:[%s12337_s1 + $0x1200] sm:$0xff]  ;;  %1099 = vmatpush.msrb.mxu2 %v881_v26 }
  0x57   :  { %v745_v29 = vld [vmem:[%s12337_s1 + $0x1600] sm:$0xff]  ;;  %1054 = vmatpush.msrb.mxu0 %v617_v28  ;;  %1126 = vmatpush.msrb.mxu3 %v82_v43 }
  0x58   :  { %v873_v30 = vld [vmem:[%s12337_s1 + $0x1a00] sm:$0xff]  ;;  %1077 = vmatpush.msrb.mxu1 %v745_v29 }
  0x59   :  { %v609_v32 = vld [vmem:[%s12337_s1 + $0x11c0] sm:$0xff]  ;;  %1100 = vmatpush.msrb.mxu2 %v873_v30  ;;  %1127 = vmatpush.msrb.mxu3 %v74_v47 }
  0x5a   :  { %v737_v33 = vld [vmem:[%s12337_s1 + $0x15c0] sm:$0xff]  ;;  %1055 = vmatpush.msrb.mxu0 %v609_v32 }
  0x5b   :  { %v865_v34 = vld [vmem:[%s12337_s1 + $0x19c0] sm:$0xff]  ;;  %1078 = vmatpush.msrb.mxu1 %v737_v33  ;;  %1128 = vmatpush.msrb.mxu3 %v66_v52 }
  0x5c   :  { %v601_v36 = vld [vmem:[%s12337_s1 + $0x1180] sm:$0xff]  ;;  %1101 = vmatpush.msrb.mxu2 %v865_v34 }
  0x5d   :  { %v729_v37 = vld [vmem:[%s12337_s1 + $0x1580] sm:$0xff]  ;;  %1056 = vmatpush.msrb.mxu0 %v601_v36  ;;  %1129 = vmatpush.msrb.mxu3 %v58_v57 }
  0x5e   :  { %v857_v38 = vld [vmem:[%s12337_s1 + $0x1980] sm:$0xff]  ;;  %1079 = vmatpush.msrb.mxu1 %v729_v37 }
  0x5f   :  { %v593_v40 = vld [vmem:[%s12337_s1 + $0x1140] sm:$0xff]  ;;  %1102 = vmatpush.msrb.mxu2 %v857_v38  ;;  %1130 = vmatpush.msrb.mxu3 %v50_v62 }
  0x60   :  { %v721_v41 = vld [vmem:[%s12337_s1 + $0x1540] sm:$0xff]  ;;  %1057 = vmatpush.msrb.mxu0 %v593_v40 }
  0x61   :  { %v849_v42 = vld [vmem:[%s12337_s1 + $0x1940] sm:$0xff]  ;;  %1080 = vmatpush.msrb.mxu1 %v721_v41 }
  0x62   :  { %v585_v44 = vld [vmem:[%s12337_s1 + $0x1100] sm:$0xff]  ;;  %1103 = vmatpush.msrb.mxu2 %v849_v42 }
  0x63   :  { %v713_v45 = vld [vmem:[%s12337_s1 + $0x1500] sm:$0xff]  ;;  %1058 = vmatpush.msrb.mxu0 %v585_v44 }
  0x64   :  { %v841_v46 = vld [vmem:[%s12337_s1 + $0x1900] sm:$0xff]  ;;  %1081 = vmatpush.msrb.mxu1 %v713_v45 }
  0x65   :  { %v577_v49 = vld [vmem:[%s12337_s1 + $0x10c0] sm:$0xff]  ;;  %1104 = vmatpush.msrb.mxu2 %v841_v46 }
  0x66   :  { %v705_v50 = vld [vmem:[%s12337_s1 + $0x14c0] sm:$0xff]  ;;  %1059 = vmatpush.msrb.mxu0 %v577_v49 }
  0x67   :  { %v833_v51 = vld [vmem:[%s12337_s1 + $0x18c0] sm:$0xff]  ;;  %1082 = vmatpush.msrb.mxu1 %v705_v50 }
  0x68   :  { %v5584_v53 = vld [vmem:[%s12336_s0] sm:$0xff]  ;;  %1105 = vmatpush.msrb.mxu2 %v833_v51 }
  0x69   :  { %v569_v54 = vld [vmem:[%s12337_s1 + $0x1080] sm:$0xff]  ;;  %971 = vmatmul.f32.vlgmr.msra.gmra.mxu0 %v5584_v53 }
  0x6a   :  { %v697_v55 = vld [vmem:[%s12337_s1 + $0x1480] sm:$0xff]  ;;  %1060 = vmatpush.msrb.mxu0 %v569_v54 }
  0x6b   :  { %v825_v56 = vld [vmem:[%s12337_s1 + $0x1880] sm:$0xff]  ;;  %1083 = vmatpush.msrb.mxu1 %v697_v55 }
  0x6c   :  { %v561_v59 = vld [vmem:[%s12337_s1 + $0x1040] sm:$0xff]  ;;  %1106 = vmatpush.msrb.mxu2 %v825_v56 }
  0x6d   :  { %v689_v60 = vld [vmem:[%s12337_s1 + $0x1440] sm:$0xff]  ;;  %1061 = vmatpush.msrb.mxu0 %v561_v59 }
  0x6e   :  { %v817_v61 = vld [vmem:[%s12337_s1 + $0x1840] sm:$0xff]  ;;  %1084 = vmatpush.msrb.mxu1 %v689_v60 }
  0x6f   :  { %v553_v63 = vld [vmem:[%s12337_s1 + $0x1000] sm:$0xff]  ;;  %1107 = vmatpush.msrb.mxu2 %v817_v61 }
  0x70   :  { %v681_v0 = vld [vmem:[%s12337_s1 + $0x1400] sm:$0xff]  ;;  %1062 = vmatpush.msrb.mxu0 %v553_v63 }
  0x71   :  { %v809_v1 = vld [vmem:[%s12337_s1 + $0x1800] sm:$0xff] }
  0x72   :  { %12 = vsyncpa [#allocation3], 0  ;;  %1085 = vmatpush.msrb.mxu1 %v681_v0  ;;  %1108 = vmatpush.msrb.mxu2 %v809_v1  ;;  %v418_v6 = vld [vmem:[%s12337_s1 + $0xbc8] sm:$0xff]  ;;  %v5656_v9 = vld [vmem:[%s12336_s0 + $0x38] sm:$0xff]  ;;  %s5113_s12 = sshll.u32 %s12343_s7, 4  ;;  %s5186_s13 = smov 128   ;;  %s5114_s12 = int_to_ptr.hbm [resolvable:$true] %s5113_s12 }
  0x73   :  { %v546_v7 = vld [vmem:[%s12337_s1 + $0xfc8] sm:$0xff]  ;;  %1131 = vmatpush.msrb.mxu3 %v42_v2  ;;  %1020 = vmatmul.f32.gmra.mxu2 %v5633_v3  ;;  %v5675_v14 = vld [vmem:[%s12336_s0 + $0x40] sm:$0xff]  ;;  %v5705_v23 = vld [vmem:[%s12336_s0 + $0x30] sm:$0xff]  ;;  %s5187_s14 = smov 8  }
  0x74   :  { %v674_v8 = vld [vmem:[%s12337_s1 + $0x13c8] sm:$0xff]  ;;  %1040 = vmatmul.f32.vlgmr.msra.gmra.mxu3 %v5638_v4  ;;  %1139 = vmatpush.msra.mxu0 %v290_v5  ;;  %v5723_v28 = vld [vmem:[%s12336_s0 + $0x20] sm:$0xff]  ;;  %v5783_v46 = vld [vmem:[%s12336_s0 + $0x50] sm:$0xff] }
  0x75   :  { %v282_v10 = vld [vmem:[%s12337_s1 + $0x788] sm:$0xff]  ;;  %1162 = vmatpush.msra.mxu1 %v418_v6  ;;  %1185 = vmatpush.msra.mxu2 %v546_v7 }
  0x76   :  { %v410_v11 = vld [vmem:[%s12337_s1 + $0xb88] sm:$0xff]  ;;  %1208 = vmatpush.msra.mxu3 %v674_v8  ;;  %974 = vmatmul.f32.gmra.mxu0 %v5656_v9 }
  0x77   :  { %v538_v12 = vld [vmem:[%s12337_s1 + $0xf88] sm:$0xff]  ;;  %1140 = vmatpush.msra.mxu0 %v282_v10  ;;  %1163 = vmatpush.msra.mxu1 %v410_v11 }
  0x78   :  { %v666_v13 = vld [vmem:[%s12337_s1 + $0x1388] sm:$0xff]  ;;  %1186 = vmatpush.msra.mxu2 %v538_v12  ;;  %997 = vmatmul.f32.gmra.mxu1 %v5675_v14 }
  0x79   :  { %v274_v15 = vld [vmem:[%s12337_s1 + $0x748] sm:$0xff]  ;;  %1209 = vmatpush.msra.mxu3 %v666_v13 }
  0x7a   :  { %v402_v16 = vld [vmem:[%s12337_s1 + $0xb48] sm:$0xff]  ;;  %1141 = vmatpush.msra.mxu0 %v274_v15 }
  0x7b   :  { %v530_v17 = vld [vmem:[%s12337_s1 + $0xf48] sm:$0xff]  ;;  %1164 = vmatpush.msra.mxu1 %v402_v16  ;;  %1109 = vmatmul.f32.vlgmr.msrb.gmra.mxu2 %v5705_v23 }
  0x7c   :  { %v658_v18 = vld [vmem:[%s12337_s1 + $0x1348] sm:$0xff]  ;;  %1187 = vmatpush.msra.mxu2 %v530_v17  ;;  %1043 = vmatmul.f32.gmra.mxu3 %v5783_v46 }
  0x7d   :  { %v266_v19 = vld [vmem:[%s12337_s1 + $0x708] sm:$0xff]  ;;  %1210 = vmatpush.msra.mxu3 %v658_v18 }
  0x7e   :  { %v394_v20 = vld [vmem:[%s12337_s1 + $0xb08] sm:$0xff]  ;;  %1142 = vmatpush.msra.mxu0 %v266_v19 }
  0x7f   :  { %v522_v21 = vld [vmem:[%s12337_s1 + $0xf08] sm:$0xff]  ;;  %1165 = vmatpush.msra.mxu1 %v394_v20  ;;  %1063 = vmatmul.f32.vlgmr.msrb.gmra.mxu0 %v5723_v28 }
  0x80   :  { %v650_v22 = vld [vmem:[%s12337_s1 + $0x1308] sm:$0xff]  ;;  %1188 = vmatpush.msra.mxu2 %v522_v21  ;;  %v163_v21 = vld [vmem:[%s12337_s1 + $0x3d0] sm:$0xff] }
  0x81   :  { %v258_v24 = vld [vmem:[%s12337_s1 + $0x6c8] sm:$0xff]  ;;  %1211 = vmatpush.msra.mxu3 %v650_v22  ;;  %v291_v22 = vld [vmem:[%s12337_s1 + $0x7d0] sm:$0xff] }
  0x82   :  { %v386_v25 = vld [vmem:[%s12337_s1 + $0xac8] sm:$0xff]  ;;  %1143 = vmatpush.msra.mxu0 %v258_v24  ;;  %v5891_v24 = vld [vmem:[%s12336_s0 + $0x58] sm:$0xff] }
  0x83   :  { %v514_v26 = vld [vmem:[%s12337_s1 + $0xec8] sm:$0xff]  ;;  %1166 = vmatpush.msra.mxu1 %v386_v25 }
  0x84   :  { %v642_v27 = vld [vmem:[%s12337_s1 + $0x12c8] sm:$0xff]  ;;  %1189 = vmatpush.msra.mxu2 %v514_v26  ;;  %1132 = vmatmul.f32.vlgmr.msrb.gmra.mxu3 %v5584_v53 }
  0x85   :  { %v378_v29 = vld [vmem:[%s12337_s1 + $0xa88] sm:$0xff]  ;;  %1212 = vmatpush.msra.mxu3 %v642_v27  ;;  %v155_v27 = vld [vmem:[%s12337_s1 + $0x390] sm:$0xff] }
  0x86   :  { %v250_v30 = vld [vmem:[%s12337_s1 + $0x688] sm:$0xff]  ;;  %1167 = vmatpush.msra.mxu1 %v378_v29  ;;  %v283_v29 = vld [vmem:[%s12337_s1 + $0x790] sm:$0xff] }
  0x87   :  { %v506_v31 = vld [vmem:[%s12337_s1 + $0xe88] sm:$0xff]  ;;  %1144 = vmatpush.msra.mxu0 %v250_v30  ;;  %v5910_v30 = vld [vmem:[%s12336_s0 + $0x60] sm:$0xff] }
  0x88   :  { %v634_v32 = vld [vmem:[%s12337_s1 + $0x1288] sm:$0xff]  ;;  %1190 = vmatpush.msra.mxu2 %v506_v31  ;;  %1066 = vmatmul.f32.gmra.mxu0 %v5891_v24 }
  0x89   :  { %v5740_v33 = vld [vmem:[%s12336_s0 + $0x28] sm:$0xff]  ;;  %1213 = vmatpush.msra.mxu3 %v634_v32 }
  0x8a   :  { %v242_v34 = vld [vmem:[%s12337_s1 + $0x648] sm:$0xff]  ;;  %1086 = vmatmul.f32.vlgmr.msrb.gmra.mxu1 %v5740_v33 }
  0x8b   :  { %v370_v35 = vld [vmem:[%s12337_s1 + $0xa48] sm:$0xff]  ;;  %1145 = vmatpush.msra.mxu0 %v242_v34  ;;  %v147_v34 = vld [vmem:[%s12337_s1 + $0x350] sm:$0xff] }
  0x8c   :  { %v498_v36 = vld [vmem:[%s12337_s1 + $0xe48] sm:$0xff]  ;;  %1168 = vmatpush.msra.mxu1 %v370_v35  ;;  %1135 = vmatmul.f32.gmra.mxu3 %v5656_v9  ;;  %v275_v35 = vld [vmem:[%s12337_s1 + $0x750] sm:$0xff] }
  0x8d   :  { %v626_v37 = vld [vmem:[%s12337_s1 + $0x1248] sm:$0xff]  ;;  %1191 = vmatpush.msra.mxu2 %v498_v36 }
  0x8e   :  { %v234_v38 = vld [vmem:[%s12337_s1 + $0x608] sm:$0xff]  ;;  %1214 = vmatpush.msra.mxu3 %v626_v37 }
  0x8f   :  { %v362_v39 = vld [vmem:[%s12337_s1 + $0xa08] sm:$0xff]  ;;  %1146 = vmatpush.msra.mxu0 %v234_v38  ;;  %v139_v38 = vld [vmem:[%s12337_s1 + $0x310] sm:$0xff] }
  0x90   :  { %v490_v40 = vld [vmem:[%s12337_s1 + $0xe08] sm:$0xff]  ;;  %1169 = vmatpush.msra.mxu1 %v362_v39  ;;  %v267_v39 = vld [vmem:[%s12337_s1 + $0x710] sm:$0xff] }
  0x91   :  { %v618_v41 = vld [vmem:[%s12337_s1 + $0x1208] sm:$0xff]  ;;  %1192 = vmatpush.msra.mxu2 %v490_v40 }
  0x92   :  { %v226_v42 = vld [vmem:[%s12337_s1 + $0x5c8] sm:$0xff]  ;;  %1215 = vmatpush.msra.mxu3 %v618_v41  ;;  %1089 = vmatmul.f32.gmra.mxu1 %v5910_v30 }
  0x93   :  { %v354_v43 = vld [vmem:[%s12337_s1 + $0x9c8] sm:$0xff]  ;;  %1147 = vmatpush.msra.mxu0 %v226_v42  ;;  %v131_v42 = vld [vmem:[%s12337_s1 + $0x2d0] sm:$0xff] }
  0x94   :  { %v482_v44 = vld [vmem:[%s12337_s1 + $0xdc8] sm:$0xff]  ;;  %1170 = vmatpush.msra.mxu1 %v354_v43  ;;  %v259_v43 = vld [vmem:[%s12337_s1 + $0x6d0] sm:$0xff] }
  0x95   :  { %v610_v45 = vld [vmem:[%s12337_s1 + $0x11c8] sm:$0xff]  ;;  %1193 = vmatpush.msra.mxu2 %v482_v44 }
  0x96   :  { %v218_v47 = vld [vmem:[%s12337_s1 + $0x588] sm:$0xff]  ;;  %1216 = vmatpush.msra.mxu3 %v610_v45 }
  0x97   :  { %v346_v49 = vld [vmem:[%s12337_s1 + $0x988] sm:$0xff]  ;;  %1148 = vmatpush.msra.mxu0 %v218_v47  ;;  %v123_v47 = vld [vmem:[%s12337_s1 + $0x290] sm:$0xff] }
  0x98   :  { %v474_v50 = vld [vmem:[%s12337_s1 + $0xd88] sm:$0xff]  ;;  %1171 = vmatpush.msra.mxu1 %v346_v49  ;;  %v251_v49 = vld [vmem:[%s12337_s1 + $0x690] sm:$0xff] }
  0x99   :  { %v602_v51 = vld [vmem:[%s12337_s1 + $0x1188] sm:$0xff]  ;;  %1194 = vmatpush.msra.mxu2 %v474_v50 }
  0x9a   :  { %v210_v52 = vld [vmem:[%s12337_s1 + $0x548] sm:$0xff]  ;;  %1217 = vmatpush.msra.mxu3 %v602_v51 }
  0x9b   :  { %v338_v54 = vld [vmem:[%s12337_s1 + $0x948] sm:$0xff]  ;;  %1149 = vmatpush.msra.mxu0 %v210_v52  ;;  %v115_v52 = vld [vmem:[%s12337_s1 + $0x250] sm:$0xff] }
  0x9c   :  { %v466_v55 = vld [vmem:[%s12337_s1 + $0xd48] sm:$0xff]  ;;  %1172 = vmatpush.msra.mxu1 %v338_v54  ;;  %v243_v54 = vld [vmem:[%s12337_s1 + $0x650] sm:$0xff] }
  0x9d   :  { %v594_v56 = vld [vmem:[%s12337_s1 + $0x1148] sm:$0xff]  ;;  %1195 = vmatpush.msra.mxu2 %v466_v55 }
  0x9e   :  { %v202_v57 = vld [vmem:[%s12337_s1 + $0x508] sm:$0xff]  ;;  %1218 = vmatpush.msra.mxu3 %v594_v56 }
  0x9f   :  { %v330_v59 = vld [vmem:[%s12337_s1 + $0x908] sm:$0xff]  ;;  %1150 = vmatpush.msra.mxu0 %v202_v57  ;;  %v107_v57 = vld [vmem:[%s12337_s1 + $0x210] sm:$0xff] }
  0xa0   :  { %v458_v60 = vld [vmem:[%s12337_s1 + $0xd08] sm:$0xff]  ;;  %1173 = vmatpush.msra.mxu1 %v330_v59  ;;  %v235_v59 = vld [vmem:[%s12337_s1 + $0x610] sm:$0xff] }
  0xa1   :  { %v586_v61 = vld [vmem:[%s12337_s1 + $0x1108] sm:$0xff]  ;;  %1196 = vmatpush.msra.mxu2 %v458_v60 }
  0xa2   :  { %v194_v62 = vld [vmem:[%s12337_s1 + $0x4c8] sm:$0xff]  ;;  %1219 = vmatpush.msra.mxu3 %v586_v61  ;;  %v99_v61 = vld [vmem:[%s12337_s1 + $0x1d0] sm:$0xff] }
  0xa3   :  { %v322_v63 = vld [vmem:[%s12337_s1 + $0x8c8] sm:$0xff]  ;;  %1151 = vmatpush.msra.mxu0 %v194_v62  ;;  %v227_v62 = vld [vmem:[%s12337_s1 + $0x5d0] sm:$0xff] }
  0xa4   :  { %v450_v0 = vld [vmem:[%s12337_s1 + $0xcc8] sm:$0xff]  ;;  %1174 = vmatpush.msra.mxu1 %v322_v63 }
  0xa5   :  { %v578_v1 = vld [vmem:[%s12337_s1 + $0x10c8] sm:$0xff]  ;;  %1197 = vmatpush.msra.mxu2 %v450_v0 }
  0xa6   :  { %v186_v2 = vld [vmem:[%s12337_s1 + $0x488] sm:$0xff]  ;;  %1220 = vmatpush.msra.mxu3 %v578_v1  ;;  %v91_v1 = vld [vmem:[%s12337_s1 + $0x190] sm:$0xff] }
  0xa7   :  { %v314_v5 = vld [vmem:[%s12337_s1 + $0x888] sm:$0xff]  ;;  %1152 = vmatpush.msra.mxu0 %v186_v2  ;;  %v219_v2 = vld [vmem:[%s12337_s1 + $0x590] sm:$0xff] }
  0xa8   :  { %v442_v6 = vld [vmem:[%s12337_s1 + $0xc88] sm:$0xff]  ;;  %1175 = vmatpush.msra.mxu1 %v314_v5 }
  0xa9   :  { %v570_v7 = vld [vmem:[%s12337_s1 + $0x1088] sm:$0xff]  ;;  %1198 = vmatpush.msra.mxu2 %v442_v6 }
  0xaa   :  { %v178_v8 = vld [vmem:[%s12337_s1 + $0x448] sm:$0xff]  ;;  %1221 = vmatpush.msra.mxu3 %v570_v7  ;;  %v83_v7 = vld [vmem:[%s12337_s1 + $0x150] sm:$0xff] }
  0xab   :  { %v306_v10 = vld [vmem:[%s12337_s1 + $0x848] sm:$0xff]  ;;  %1153 = vmatpush.msra.mxu0 %v178_v8  ;;  %v211_v8 = vld [vmem:[%s12337_s1 + $0x550] sm:$0xff] }
  0xac   :  { %v434_v11 = vld [vmem:[%s12337_s1 + $0xc48] sm:$0xff]  ;;  %1176 = vmatpush.msra.mxu1 %v306_v10 }
  0xad   :  { %v562_v12 = vld [vmem:[%s12337_s1 + $0x1048] sm:$0xff]  ;;  %1199 = vmatpush.msra.mxu2 %v434_v11 }
  0xae   :  { %v170_v13 = vld [vmem:[%s12337_s1 + $0x408] sm:$0xff]  ;;  %1222 = vmatpush.msra.mxu3 %v562_v12  ;;  %v75_v12 = vld [vmem:[%s12337_s1 + $0x110] sm:$0xff] }
  0xaf   :  { %v298_v15 = vld [vmem:[%s12337_s1 + $0x808] sm:$0xff]  ;;  %1154 = vmatpush.msra.mxu0 %v170_v13  ;;  %v203_v13 = vld [vmem:[%s12337_s1 + $0x510] sm:$0xff] }
  0xb0   :  { %v426_v16 = vld [vmem:[%s12337_s1 + $0xc08] sm:$0xff]  ;;  %1177 = vmatpush.msra.mxu1 %v298_v15  ;;  %1155 = vmatmul.f32.vlgmr.msra.gmra.mxu0 %v5603_v58 }
  0xb1   :  { %v554_v17 = vld [vmem:[%s12337_s1 + $0x1008] sm:$0xff]  ;;  %1200 = vmatpush.msra.mxu2 %v426_v16  ;;  %1178 = vmatmul.f32.vlgmr.msra.gmra.mxu1 %v5567_v48 }
  0xb2   :  { %v5874_v18 = vld [vmem:[%s12336_s0 + $0x68] sm:$0xff]  ;;  %1223 = vmatpush.msra.mxu3 %v554_v17  ;;  %v67_v17 = vld [vmem:[%s12337_s1 + $0xd0] sm:$0xff] }
  0xb3   :  { %v802_v19 = vld [vmem:[%s12337_s1 + $0x17c8] sm:$0xff]  ;;  %1112 = vmatmul.f32.gmra.mxu2 %v5874_v18  ;;  %1224 = vmatmul.f32.vlgmr.msra.gmra.mxu3 %v5723_v28 }
  0xb4   :  { %v930_v20 = vld [vmem:[%s12337_s1 + $0x1bc8] sm:$0xff]  ;;  %1231 = vmatpush.msrb.mxu0 %v802_v19  ;;  %1277 = vmatpush.msrb.mxu2 %v163_v21  ;;  %v195_v19 = vld [vmem:[%s12337_s1 + $0x4d0] sm:$0xff] }
  0xb5   :  { %v794_v25 = vld [vmem:[%s12337_s1 + $0x1788] sm:$0xff]  ;;  %1254 = vmatpush.msrb.mxu1 %v930_v20  ;;  %1300 = vmatpush.msrb.mxu3 %v291_v22  ;;  %v59_v22 = vld [vmem:[%s12337_s1 + $0x90] sm:$0xff] }
  0xb6   :  { %v922_v26 = vld [vmem:[%s12337_s1 + $0x1b88] sm:$0xff]  ;;  %1232 = vmatpush.msrb.mxu0 %v794_v25  ;;  %1278 = vmatpush.msrb.mxu2 %v155_v27  ;;  %v187_v25 = vld [vmem:[%s12337_s1 + $0x490] sm:$0xff] }
  0xb7   :  { %v786_v31 = vld [vmem:[%s12337_s1 + $0x1748] sm:$0xff]  ;;  %1255 = vmatpush.msrb.mxu1 %v922_v26  ;;  %1301 = vmatpush.msrb.mxu3 %v283_v29  ;;  %v51_v29 = vld [vmem:[%s12337_s1 + $0x50] sm:$0xff] }
  0xb8   :  { %v914_v32 = vld [vmem:[%s12337_s1 + $0x1b48] sm:$0xff]  ;;  %1233 = vmatpush.msrb.mxu0 %v786_v31  ;;  %1279 = vmatpush.msrb.mxu2 %v147_v34  ;;  %v179_v31 = vld [vmem:[%s12337_s1 + $0x450] sm:$0xff] }
  0xb9   :  { %v778_v36 = vld [vmem:[%s12337_s1 + $0x1708] sm:$0xff]  ;;  %1256 = vmatpush.msrb.mxu1 %v914_v32  ;;  %1302 = vmatpush.msrb.mxu3 %v275_v35  ;;  %v43_v34 = vld [vmem:[%s12337_s1 + $0x10] sm:$0xff] }
  0xba   :  { %v906_v37 = vld [vmem:[%s12337_s1 + $0x1b08] sm:$0xff]  ;;  %1234 = vmatpush.msrb.mxu0 %v778_v36  ;;  %1280 = vmatpush.msrb.mxu2 %v139_v38  ;;  %v171_v35 = vld [vmem:[%s12337_s1 + $0x410] sm:$0xff] }
  0xbb   :  { %v770_v40 = vld [vmem:[%s12337_s1 + $0x16c8] sm:$0xff]  ;;  %1257 = vmatpush.msrb.mxu1 %v906_v37  ;;  %1303 = vmatpush.msrb.mxu3 %v267_v39  ;;  %v419_v36 = vld [vmem:[%s12337_s1 + $0xbd0] sm:$0xff] }
  0xbc   :  { %v898_v41 = vld [vmem:[%s12337_s1 + $0x1ac8] sm:$0xff]  ;;  %1201 = vmatmul.f32.vlgmr.msra.gmra.mxu2 %v5638_v4  ;;  %1235 = vmatpush.msrb.mxu0 %v770_v40  ;;  %v547_v37 = vld [vmem:[%s12337_s1 + $0xfd0] sm:$0xff] }
  0xbd   :  { %v762_v44 = vld [vmem:[%s12337_s1 + $0x1688] sm:$0xff]  ;;  %1258 = vmatpush.msrb.mxu1 %v898_v41  ;;  %1281 = vmatpush.msrb.mxu2 %v131_v42  ;;  %v675_v38 = vld [vmem:[%s12337_s1 + $0x13d0] sm:$0xff] }
  0xbe   :  { %v890_v45 = vld [vmem:[%s12337_s1 + $0x1a88] sm:$0xff]  ;;  %1304 = vmatpush.msrb.mxu3 %v259_v43  ;;  %1236 = vmatpush.msrb.mxu0 %v762_v44  ;;  %v803_v39 = vld [vmem:[%s12337_s1 + $0x17d0] sm:$0xff] }
  0xbf   :  { %v754_v50 = vld [vmem:[%s12337_s1 + $0x1648] sm:$0xff]  ;;  %1259 = vmatpush.msrb.mxu1 %v890_v45  ;;  %1282 = vmatpush.msrb.mxu2 %v123_v47  ;;  %v411_v40 = vld [vmem:[%s12337_s1 + $0xb90] sm:$0xff] }
  0xc0   :  { %v882_v51 = vld [vmem:[%s12337_s1 + $0x1a48] sm:$0xff]  ;;  %1305 = vmatpush.msrb.mxu3 %v251_v49  ;;  %1237 = vmatpush.msrb.mxu0 %v754_v50  ;;  %v539_v41 = vld [vmem:[%s12337_s1 + $0xf90] sm:$0xff] }
  0xc1   :  { %v746_v55 = vld [vmem:[%s12337_s1 + $0x1608] sm:$0xff]  ;;  %1260 = vmatpush.msrb.mxu1 %v882_v51  ;;  %1283 = vmatpush.msrb.mxu2 %v115_v52  ;;  %v667_v42 = vld [vmem:[%s12337_s1 + $0x1390] sm:$0xff] }
  0xc2   :  { %v874_v56 = vld [vmem:[%s12337_s1 + $0x1a08] sm:$0xff]  ;;  %1306 = vmatpush.msrb.mxu3 %v243_v54  ;;  %1238 = vmatpush.msrb.mxu0 %v746_v55  ;;  %v795_v43 = vld [vmem:[%s12337_s1 + $0x1790] sm:$0xff] }
  0xc3   :  { %v738_v48 = vld [vmem:[%s12337_s1 + $0x15c8] sm:$0xff]  ;;  %1261 = vmatpush.msrb.mxu1 %v874_v56  ;;  %1284 = vmatpush.msrb.mxu2 %v107_v57  ;;  %v403_v44 = vld [vmem:[%s12337_s1 + $0xb50] sm:$0xff] }
  0xc4   :  { %v866_v60 = vld [vmem:[%s12337_s1 + $0x19c8] sm:$0xff]  ;;  %1307 = vmatpush.msrb.mxu3 %v235_v59  ;;  %1239 = vmatpush.msrb.mxu0 %v738_v48  ;;  %v531_v45 = vld [vmem:[%s12337_s1 + $0xf50] sm:$0xff] }
  0xc5   :  { %v730_v63 = vld [vmem:[%s12337_s1 + $0x1588] sm:$0xff]  ;;  %1262 = vmatpush.msrb.mxu1 %v866_v60  ;;  %1285 = vmatpush.msrb.mxu2 %v99_v61  ;;  %v659_v47 = vld [vmem:[%s12337_s1 + $0x1350] sm:$0xff] }
  0xc6   :  { %v858_v0 = vld [vmem:[%s12337_s1 + $0x1988] sm:$0xff]  ;;  %1308 = vmatpush.msrb.mxu3 %v227_v62  ;;  %1240 = vmatpush.msrb.mxu0 %v730_v63  ;;  %v787_v49 = vld [vmem:[%s12337_s1 + $0x1750] sm:$0xff] }
  0xc7   :  { %v722_v5 = vld [vmem:[%s12337_s1 + $0x1548] sm:$0xff]  ;;  %1263 = vmatpush.msrb.mxu1 %v858_v0  ;;  %1286 = vmatpush.msrb.mxu2 %v91_v1  ;;  %v523_v50 = vld [vmem:[%s12337_s1 + $0xf10] sm:$0xff] }
  0xc8   :  { %v850_v6 = vld [vmem:[%s12337_s1 + $0x1948] sm:$0xff]  ;;  %1309 = vmatpush.msrb.mxu3 %v219_v2  ;;  %1241 = vmatpush.msrb.mxu0 %v722_v5  ;;  %v651_v51 = vld [vmem:[%s12337_s1 + $0x1310] sm:$0xff] }
  0xc9   :  { %v714_v10 = vld [vmem:[%s12337_s1 + $0x1508] sm:$0xff]  ;;  %1264 = vmatpush.msrb.mxu1 %v850_v6  ;;  %1287 = vmatpush.msrb.mxu2 %v83_v7  ;;  %v779_v52 = vld [vmem:[%s12337_s1 + $0x1710] sm:$0xff] }
  0xca   :  { %v842_v11 = vld [vmem:[%s12337_s1 + $0x1908] sm:$0xff]  ;;  %1310 = vmatpush.msrb.mxu3 %v211_v8  ;;  %1242 = vmatpush.msrb.mxu0 %v714_v10  ;;  %v387_v54 = vld [vmem:[%s12337_s1 + $0xad0] sm:$0xff] }
  0xcb   :  { %v834_v15 = vld [vmem:[%s12337_s1 + $0x18c8] sm:$0xff]  ;;  %1265 = vmatpush.msrb.mxu1 %v842_v11  ;;  %1288 = vmatpush.msrb.mxu2 %v75_v12  ;;  %v515_v55 = vld [vmem:[%s12337_s1 + $0xed0] sm:$0xff] }
  0xcc   :  { %v706_v16 = vld [vmem:[%s12337_s1 + $0x14c8] sm:$0xff]  ;;  %1311 = vmatpush.msrb.mxu3 %v203_v13  ;;  %1158 = vmatmul.f32.gmra.mxu0 %v5675_v14  ;;  %v643_v56 = vld [vmem:[%s12337_s1 + $0x12d0] sm:$0xff] }
  0xcd   :  { %1266 = vmatpush.msrb.mxu1 %v834_v15  ;;  %v698_v20 = vld [vmem:[%s12337_s1 + $0x1488] sm:$0xff]  ;;  %1243 = vmatpush.msrb.mxu0 %v706_v16  ;;  %v771_v57 = vld [vmem:[%s12337_s1 + $0x16d0] sm:$0xff] }
  0xce   :  { %v826_v21 = vld [vmem:[%s12337_s1 + $0x1888] sm:$0xff]  ;;  %1289 = vmatpush.msrb.mxu2 %v67_v17  ;;  %1312 = vmatpush.msrb.mxu3 %v195_v19  ;;  %v507_v59 = vld [vmem:[%s12337_s1 + $0xe90] sm:$0xff] }
  0xcf   :  { %1181 = vmatmul.f32.gmra.mxu1 %v5633_v3  ;;  %v690_v26 = vld [vmem:[%s12337_s1 + $0x1448] sm:$0xff]  ;;  %1244 = vmatpush.msrb.mxu0 %v698_v20  ;;  %v379_v48 = vld [vmem:[%s12337_s1 + $0xa90] sm:$0xff] }
  0xd0   :  { %v818_v27 = vld [vmem:[%s12337_s1 + $0x1848] sm:$0xff]  ;;  %1267 = vmatpush.msrb.mxu1 %v826_v21  ;;  %1290 = vmatpush.msrb.mxu2 %v59_v22  ;;  %v635_v60 = vld [vmem:[%s12337_s1 + $0x1290] sm:$0xff] }
  0xd1   :  { %1313 = vmatpush.msrb.mxu3 %v187_v25  ;;  %v682_v3 = vld [vmem:[%s12337_s1 + $0x1408] sm:$0xff]  ;;  %1245 = vmatpush.msrb.mxu0 %v690_v26  ;;  %v763_v61 = vld [vmem:[%s12337_s1 + $0x1690] sm:$0xff] }
  0xd2   :  { %v810_v32 = vld [vmem:[%s12337_s1 + $0x1808] sm:$0xff]  ;;  %1268 = vmatpush.msrb.mxu1 %v818_v27  ;;  %1291 = vmatpush.msrb.mxu2 %v51_v29  ;;  %v371_v62 = vld [vmem:[%s12337_s1 + $0xa50] sm:$0xff] }
  0xd3   :  { %1314 = vmatpush.msrb.mxu3 %v179_v31  ;;  %1246 = vmatpush.msrb.mxu0 %v682_v3  ;;  %v499_v63 = vld [vmem:[%s12337_s1 + $0xe50] sm:$0xff] }
  0xd4   :  { %1269 = vmatpush.msrb.mxu1 %v810_v32  ;;  %1292 = vmatpush.msrb.mxu2 %v43_v34  ;;  %v627_v0 = vld [vmem:[%s12337_s1 + $0x1250] sm:$0xff] }
  0xd5   :  { %1315 = vmatpush.msrb.mxu3 %v171_v35  ;;  %1204 = vmatmul.f32.gmra.mxu2 %v5783_v46  ;;  %v755_v1 = vld [vmem:[%s12337_s1 + $0x1650] sm:$0xff] }
  0xd6   :  { %1247 = vmatmul.f32.vlgmr.msrb.gmra.mxu0 %v5740_v33  ;;  %1346 = vmatpush.msra.mxu1 %v547_v37  ;;  %v363_v2 = vld [vmem:[%s12337_s1 + $0xa10] sm:$0xff] }
  0xd7   :  { %1323 = vmatpush.msra.mxu0 %v419_v36  ;;  %1369 = vmatpush.msra.mxu2 %v675_v38  ;;  %v491_v5 = vld [vmem:[%s12337_s1 + $0xe10] sm:$0xff] }
  0xd8   :  { %1392 = vmatpush.msra.mxu3 %v803_v39  ;;  %1270 = vmatmul.f32.vlgmr.msrb.gmra.mxu1 %v5705_v23  ;;  %v395_v23 = vld [vmem:[%s12337_s1 + $0xb10] sm:$0xff] }
  0xd9   :  { %1227 = vmatmul.f32.gmra.mxu3 %v5891_v24  ;;  %1324 = vmatpush.msra.mxu0 %v411_v40  ;;  %v619_v6 = vld [vmem:[%s12337_s1 + $0x1210] sm:$0xff] }
  0xda   :  { %1347 = vmatpush.msra.mxu1 %v539_v41  ;;  %1370 = vmatpush.msra.mxu2 %v667_v42  ;;  %v747_v7 = vld [vmem:[%s12337_s1 + $0x1610] sm:$0xff] }
  0xdb   :  { %1393 = vmatpush.msra.mxu3 %v795_v43  ;;  %1325 = vmatpush.msra.mxu0 %v403_v44  ;;  %v355_v8 = vld [vmem:[%s12337_s1 + $0x9d0] sm:$0xff] }
  0xdc   :  { %1348 = vmatpush.msra.mxu1 %v531_v45  ;;  %1371 = vmatpush.msra.mxu2 %v659_v47  ;;  %v483_v10 = vld [vmem:[%s12337_s1 + $0xdd0] sm:$0xff]  ;;  %v164_v47 = vld [vmem:[%s12337_s1 + $0x3d8] sm:$0xff] }
  0xdd   :  { %1394 = vmatpush.msra.mxu3 %v787_v49  ;;  %1326 = vmatpush.msra.mxu0 %v395_v23  ;;  %v611_v11 = vld [vmem:[%s12337_s1 + $0x11d0] sm:$0xff]  ;;  %v292_v49 = vld [vmem:[%s12337_s1 + $0x7d8] sm:$0xff] }
  0xde   :  { %1349 = vmatpush.msra.mxu1 %v523_v50  ;;  %1372 = vmatpush.msra.mxu2 %v651_v51  ;;  %v739_v12 = vld [vmem:[%s12337_s1 + $0x15d0] sm:$0xff]  ;;  %v420_v23 = vld [vmem:[%s12337_s1 + $0xbd8] sm:$0xff] }
  0xdf   :  { %1395 = vmatpush.msra.mxu3 %v779_v52  ;;  %1327 = vmatpush.msra.mxu0 %v387_v54  ;;  %v347_v13 = vld [vmem:[%s12337_s1 + $0x990] sm:$0xff]  ;;  %v156_v51 = vld [vmem:[%s12337_s1 + $0x398] sm:$0xff] }
  0xe0   :  { %1350 = vmatpush.msra.mxu1 %v515_v55  ;;  %1373 = vmatpush.msra.mxu2 %v643_v56  ;;  %v475_v15 = vld [vmem:[%s12337_s1 + $0xd90] sm:$0xff]  ;;  %v284_v52 = vld [vmem:[%s12337_s1 + $0x798] sm:$0xff] }
  0xe1   :  { %1396 = vmatpush.msra.mxu3 %v771_v57  ;;  %1250 = vmatmul.f32.gmra.mxu0 %v5910_v30  ;;  %v603_v16 = vld [vmem:[%s12337_s1 + $0x1190] sm:$0xff]  ;;  %v412_v54 = vld [vmem:[%s12337_s1 + $0xb98] sm:$0xff] }
  0xe2   :  { %1351 = vmatpush.msra.mxu1 %v507_v59  ;;  %1328 = vmatpush.msra.mxu0 %v379_v48  ;;  %v731_v17 = vld [vmem:[%s12337_s1 + $0x1590] sm:$0xff]  ;;  %v148_v55 = vld [vmem:[%s12337_s1 + $0x358] sm:$0xff] }
  0xe3   :  { %1374 = vmatpush.msra.mxu2 %v635_v60  ;;  %1397 = vmatpush.msra.mxu3 %v763_v61  ;;  %v339_v19 = vld [vmem:[%s12337_s1 + $0x950] sm:$0xff]  ;;  %v276_v56 = vld [vmem:[%s12337_s1 + $0x758] sm:$0xff] }
  0xe4   :  { %1273 = vmatmul.f32.gmra.mxu1 %v5874_v18  ;;  %1329 = vmatpush.msra.mxu0 %v371_v62  ;;  %v467_v20 = vld [vmem:[%s12337_s1 + $0xd50] sm:$0xff]  ;;  %v404_v57 = vld [vmem:[%s12337_s1 + $0xb58] sm:$0xff] }
  0xe5   :  { %1352 = vmatpush.msra.mxu1 %v499_v63  ;;  %1375 = vmatpush.msra.mxu2 %v627_v0  ;;  %v595_v21 = vld [vmem:[%s12337_s1 + $0x1150] sm:$0xff]  ;;  %v140_v48 = vld [vmem:[%s12337_s1 + $0x318] sm:$0xff] }
  0xe6   :  { %1398 = vmatpush.msra.mxu3 %v755_v1  ;;  %1330 = vmatpush.msra.mxu0 %v363_v2  ;;  %v723_v22 = vld [vmem:[%s12337_s1 + $0x1550] sm:$0xff]  ;;  %v396_v60 = vld [vmem:[%s12337_s1 + $0xb18] sm:$0xff] }
  0xe7   :  { %1353 = vmatpush.msra.mxu1 %v491_v5  ;;  %1376 = vmatpush.msra.mxu2 %v619_v6  ;;  %v331_v25 = vld [vmem:[%s12337_s1 + $0x910] sm:$0xff]  ;;  %v132_v62 = vld [vmem:[%s12337_s1 + $0x2d8] sm:$0xff] }
  0xe8   :  { %1399 = vmatpush.msra.mxu3 %v747_v7  ;;  %1331 = vmatpush.msra.mxu0 %v355_v8  ;;  %v459_v26 = vld [vmem:[%s12337_s1 + $0xd10] sm:$0xff]  ;;  %v260_v63 = vld [vmem:[%s12337_s1 + $0x6d8] sm:$0xff] }
  0xe9   :  { %1354 = vmatpush.msra.mxu1 %v483_v10  ;;  %1377 = vmatpush.msra.mxu2 %v611_v11  ;;  %v587_v27 = vld [vmem:[%s12337_s1 + $0x1110] sm:$0xff]  ;;  %v388_v0 = vld [vmem:[%s12337_s1 + $0xad8] sm:$0xff] }
  0xea   :  { %1400 = vmatpush.msra.mxu3 %v739_v12  ;;  %1332 = vmatpush.msra.mxu0 %v347_v13  ;;  %v715_v29 = vld [vmem:[%s12337_s1 + $0x1510] sm:$0xff]  ;;  %v124_v2 = vld [vmem:[%s12337_s1 + $0x298] sm:$0xff] }
  0xeb   :  { %1355 = vmatpush.msra.mxu1 %v475_v15  ;;  %1378 = vmatpush.msra.mxu2 %v603_v16  ;;  %v323_v31 = vld [vmem:[%s12337_s1 + $0x8d0] sm:$0xff]  ;;  %v252_v5 = vld [vmem:[%s12337_s1 + $0x698] sm:$0xff] }
  0xec   :  { %1401 = vmatpush.msra.mxu3 %v731_v17  ;;  %1333 = vmatpush.msra.mxu0 %v339_v19  ;;  %v451_v3 = vld [vmem:[%s12337_s1 + $0xcd0] sm:$0xff]  ;;  %v380_v6 = vld [vmem:[%s12337_s1 + $0xa98] sm:$0xff] }
  0xed   :  { %1356 = vmatpush.msra.mxu1 %v467_v20  ;;  %1379 = vmatpush.msra.mxu2 %v595_v21  ;;  %v579_v32 = vld [vmem:[%s12337_s1 + $0x10d0] sm:$0xff]  ;;  %v116_v8 = vld [vmem:[%s12337_s1 + $0x258] sm:$0xff] }
  0xee   :  { %1402 = vmatpush.msra.mxu3 %v723_v22  ;;  %1334 = vmatpush.msra.mxu0 %v331_v25  ;;  %v707_v34 = vld [vmem:[%s12337_s1 + $0x14d0] sm:$0xff]  ;;  %v244_v10 = vld [vmem:[%s12337_s1 + $0x658] sm:$0xff] }
  0xef   :  { %1357 = vmatpush.msra.mxu1 %v459_v26  ;;  %1380 = vmatpush.msra.mxu2 %v587_v27  ;;  %v315_v35 = vld [vmem:[%s12337_s1 + $0x890] sm:$0xff]  ;;  %v372_v11 = vld [vmem:[%s12337_s1 + $0xa58] sm:$0xff] }
  0xf0   :  { %1403 = vmatpush.msra.mxu3 %v715_v29  ;;  %1293 = vmatmul.f32.vlgmr.msrb.gmra.mxu2 %v5584_v53  ;;  %v443_v36 = vld [vmem:[%s12337_s1 + $0xc90] sm:$0xff]  ;;  %v108_v12 = vld [vmem:[%s12337_s1 + $0x218] sm:$0xff] }
  0xf1   :  { %1335 = vmatpush.msra.mxu0 %v323_v31  ;;  %1358 = vmatpush.msra.mxu1 %v451_v3  ;;  %v571_v37 = vld [vmem:[%s12337_s1 + $0x1090] sm:$0xff]  ;;  %v236_v13 = vld [vmem:[%s12337_s1 + $0x618] sm:$0xff] }
  0xf2   :  { %1381 = vmatpush.msra.mxu2 %v579_v32  ;;  %v699_v38 = vld [vmem:[%s12337_s1 + $0x1490] sm:$0xff]  ;;  %1404 = vmatpush.msra.mxu3 %v707_v34  ;;  %v364_v15 = vld [vmem:[%s12337_s1 + $0xa18] sm:$0xff] }
  0xf3   :  { %1336 = vmatpush.msra.mxu0 %v315_v35  ;;  %v307_v53 = vld [vmem:[%s12337_s1 + $0x850] sm:$0xff]  ;;  %1316 = vmatmul.f32.vlgmr.msrb.gmra.mxu3 %v5603_v58  ;;  %v100_v16 = vld [vmem:[%s12337_s1 + $0x1d8] sm:$0xff] }
  0xf4   :  { %v435_v39 = vld [vmem:[%s12337_s1 + $0xc50] sm:$0xff]  ;;  %1359 = vmatpush.msra.mxu1 %v443_v36  ;;  %1382 = vmatpush.msra.mxu2 %v571_v37  ;;  %v228_v17 = vld [vmem:[%s12337_s1 + $0x5d8] sm:$0xff] }
  0xf5   :  { %v563_v40 = vld [vmem:[%s12337_s1 + $0x1050] sm:$0xff]  ;;  %1405 = vmatpush.msra.mxu3 %v699_v38  ;;  %1337 = vmatpush.msra.mxu0 %v307_v53  ;;  %v356_v19 = vld [vmem:[%s12337_s1 + $0x9d8] sm:$0xff] }
  0xf6   :  { %v691_v41 = vld [vmem:[%s12337_s1 + $0x1450] sm:$0xff]  ;;  %1360 = vmatpush.msra.mxu1 %v435_v39  ;;  %1383 = vmatpush.msra.mxu2 %v563_v40  ;;  %v92_v21 = vld [vmem:[%s12337_s1 + $0x198] sm:$0xff]  ;;  %v6461_v40 = vld [vmem:[%s12336_s0 + $0x48] sm:$0xff] }
  0xf7   :  { %v299_v42 = vld [vmem:[%s12337_s1 + $0x810] sm:$0xff]  ;;  %1406 = vmatpush.msra.mxu3 %v691_v41  ;;  %v220_v22 = vld [vmem:[%s12337_s1 + $0x598] sm:$0xff] }
  0xf8   :  { %v427_v43 = vld [vmem:[%s12337_s1 + $0xc10] sm:$0xff]  ;;  %1338 = vmatpush.msra.mxu0 %v299_v42  ;;  %1296 = vmatmul.f32.gmra.mxu2 %v5656_v9  ;;  %v348_v25 = vld [vmem:[%s12337_s1 + $0x998] sm:$0xff] }
  0xf9   :  { %v555_v58 = vld [vmem:[%s12337_s1 + $0x1010] sm:$0xff]  ;;  %1361 = vmatpush.msra.mxu1 %v427_v43  ;;  %v84_v27 = vld [vmem:[%s12337_s1 + $0x158] sm:$0xff] }
  0xfa   :  { %v683_v44 = vld [vmem:[%s12337_s1 + $0x1410] sm:$0xff]  ;;  %1384 = vmatpush.msra.mxu2 %v555_v58  ;;  %1362 = vmatmul.f32.vlgmr.msra.gmra.mxu1 %v5638_v4  ;;  %v212_v29 = vld [vmem:[%s12337_s1 + $0x558] sm:$0xff] }
  0xfb   :  { %v931_v45 = vld [vmem:[%s12337_s1 + $0x1bd0] sm:$0xff]  ;;  %1407 = vmatpush.msra.mxu3 %v683_v44  ;;  %1438 = vmatpush.msrb.mxu1 %v164_v47  ;;  %v340_v31 = vld [vmem:[%s12337_s1 + $0x958] sm:$0xff] }
  0xfc   :  { %v923_v50 = vld [vmem:[%s12337_s1 + $0x1b90] sm:$0xff]  ;;  %1415 = vmatpush.msrb.mxu0 %v931_v45  ;;  %1461 = vmatpush.msrb.mxu2 %v292_v49  ;;  %v76_v32 = vld [vmem:[%s12337_s1 + $0x118] sm:$0xff] }
  0xfd   :  { %1484 = vmatpush.msrb.mxu3 %v420_v23  ;;  %v915_v9 = vld [vmem:[%s12337_s1 + $0x1b50] sm:$0xff]  ;;  %1439 = vmatpush.msrb.mxu1 %v156_v51  ;;  %v204_v34 = vld [vmem:[%s12337_s1 + $0x518] sm:$0xff] }
  0xfe   :  { %1416 = vmatpush.msrb.mxu0 %v923_v50  ;;  %1319 = vmatmul.f32.gmra.mxu3 %v5675_v14  ;;  %v907_v59 = vld [vmem:[%s12337_s1 + $0x1b10] sm:$0xff]  ;;  %v268_v14 = vld [vmem:[%s12337_s1 + $0x718] sm:$0xff] }
  0xff   :  { %1462 = vmatpush.msrb.mxu2 %v284_v52  ;;  %1485 = vmatpush.msrb.mxu3 %v412_v54  ;;  %v899_v61 = vld [vmem:[%s12337_s1 + $0x1ad0] sm:$0xff]  ;;  %v332_v35 = vld [vmem:[%s12337_s1 + $0x918] sm:$0xff] }
 0x100   :  { %1417 = vmatpush.msrb.mxu0 %v915_v9  ;;  %1440 = vmatpush.msrb.mxu1 %v148_v55  ;;  %v891_v1 = vld [vmem:[%s12337_s1 + $0x1a90] sm:$0xff]  ;;  %v68_v36 = vld [vmem:[%s12337_s1 + $0xd8] sm:$0xff] }
 0x101   :  { %1463 = vmatpush.msrb.mxu2 %v276_v56  ;;  %1486 = vmatpush.msrb.mxu3 %v404_v57  ;;  %v883_v7 = vld [vmem:[%s12337_s1 + $0x1a50] sm:$0xff]  ;;  %v196_v38 = vld [vmem:[%s12337_s1 + $0x4d8] sm:$0xff] }
 0x102   :  { %1418 = vmatpush.msrb.mxu0 %v907_v59  ;;  %1441 = vmatpush.msrb.mxu1 %v140_v48  ;;  %v867_v4 = vld [vmem:[%s12337_s1 + $0x19d0] sm:$0xff]  ;;  %v324_v53 = vld [vmem:[%s12337_s1 + $0x8d8] sm:$0xff] }
 0x103   :  { %1464 = vmatpush.msrb.mxu2 %v268_v14  ;;  %1487 = vmatpush.msrb.mxu3 %v396_v60  ;;  %v859_v20 = vld [vmem:[%s12337_s1 + $0x1990] sm:$0xff]  ;;  %v60_v39 = vld [vmem:[%s12337_s1 + $0x98] sm:$0xff] }
 0x104   :  { %1385 = vmatmul.f32.vlgmr.msra.gmra.mxu2 %v5723_v28  ;;  %1419 = vmatpush.msrb.mxu0 %v899_v61  ;;  %v6363_v28 = vld [vmem:[%s12336_s0 + $0x10] sm:$0xff]  ;;  %v188_v42 = vld [vmem:[%s12337_s1 + $0x498] sm:$0xff] }
 0x105   :  { %1442 = vmatpush.msrb.mxu1 %v132_v62  ;;  %1465 = vmatpush.msrb.mxu2 %v260_v63  ;;  %v851_v26 = vld [vmem:[%s12337_s1 + $0x1950] sm:$0xff]  ;;  %v316_v43 = vld [vmem:[%s12337_s1 + $0x898] sm:$0xff] }
 0x106   :  { %1488 = vmatpush.msrb.mxu3 %v388_v0  ;;  %1339 = vmatmul.f32.vlgmr.msra.gmra.mxu0 %v6363_v28  ;;  %v843_v3 = vld [vmem:[%s12337_s1 + $0x1910] sm:$0xff]  ;;  %v52_v58 = vld [vmem:[%s12337_s1 + $0x58] sm:$0xff] }
 0x107   :  { %1408 = vmatmul.f32.vlgmr.msra.gmra.mxu3 %v5740_v33  ;;  %1420 = vmatpush.msrb.mxu0 %v891_v1  ;;  %v875_v33 = vld [vmem:[%s12337_s1 + $0x1a10] sm:$0xff]  ;;  %v180_v45 = vld [vmem:[%s12337_s1 + $0x458] sm:$0xff] }
 0x108   :  { %1443 = vmatpush.msrb.mxu1 %v124_v2  ;;  %1466 = vmatpush.msrb.mxu2 %v252_v5  ;;  %v835_v37 = vld [vmem:[%s12337_s1 + $0x18d0] sm:$0xff]  ;;  %v308_v47 = vld [vmem:[%s12337_s1 + $0x858] sm:$0xff] }
 0x109   :  { %1489 = vmatpush.msrb.mxu3 %v380_v6  ;;  %1421 = vmatpush.msrb.mxu0 %v883_v7  ;;  %v827_v41 = vld [vmem:[%s12337_s1 + $0x1890] sm:$0xff]  ;;  %v44_v49 = vld [vmem:[%s12337_s1 + $0x18] sm:$0xff] }
 0x10a   :  { %1444 = vmatpush.msrb.mxu1 %v116_v8  ;;  %1467 = vmatpush.msrb.mxu2 %v244_v10  ;;  %v819_v44 = vld [vmem:[%s12337_s1 + $0x1850] sm:$0xff]  ;;  %v172_v50 = vld [vmem:[%s12337_s1 + $0x418] sm:$0xff] }
 0x10b   :  { %1490 = vmatpush.msrb.mxu3 %v372_v11  ;;  %1422 = vmatpush.msrb.mxu0 %v875_v33  ;;  %v811_v23 = vld [vmem:[%s12337_s1 + $0x1810] sm:$0xff]  ;;  %v300_v51 = vld [vmem:[%s12337_s1 + $0x818] sm:$0xff] }
 0x10c   :  { %1445 = vmatpush.msrb.mxu1 %v108_v12  ;;  %1468 = vmatpush.msrb.mxu2 %v236_v13  ;;  %v676_v52 = vld [vmem:[%s12337_s1 + $0x13d8] sm:$0xff]  ;;  %v6516_v57 = vld [vmem:[%s12336_s0 + $0x30] sm:$0xff] }
 0x10d   :  { %1491 = vmatpush.msrb.mxu3 %v364_v15  ;;  %1423 = vmatpush.msrb.mxu0 %v867_v4  ;;  %v548_v54 = vld [vmem:[%s12337_s1 + $0xfd8] sm:$0xff] }
 0x10e   :  { %1446 = vmatpush.msrb.mxu1 %v100_v16  ;;  %1469 = vmatpush.msrb.mxu2 %v228_v17  ;;  %v804_v9 = vld [vmem:[%s12337_s1 + $0x17d8] sm:$0xff] }
 0x10f   :  { %1492 = vmatpush.msrb.mxu3 %v356_v19  ;;  %1424 = vmatpush.msrb.mxu0 %v859_v20  ;;  %v932_v55 = vld [vmem:[%s12337_s1 + $0x1bd8] sm:$0xff] }
 0x110   :  { %1447 = vmatpush.msrb.mxu1 %v92_v21  ;;  %1470 = vmatpush.msrb.mxu2 %v220_v22  ;;  %v668_v56 = vld [vmem:[%s12337_s1 + $0x1398] sm:$0xff] }
 0x111   :  { %1493 = vmatpush.msrb.mxu3 %v348_v25  ;;  %1425 = vmatpush.msrb.mxu0 %v851_v26  ;;  %v796_v59 = vld [vmem:[%s12337_s1 + $0x1798] sm:$0xff] }
 0x112   :  { %1448 = vmatpush.msrb.mxu1 %v84_v27  ;;  %1471 = vmatpush.msrb.mxu2 %v212_v29  ;;  %v924_v48 = vld [vmem:[%s12337_s1 + $0x1b98] sm:$0xff] }
 0x113   :  { %1494 = vmatpush.msrb.mxu3 %v340_v31  ;;  %1426 = vmatpush.msrb.mxu0 %v843_v3  ;;  %v532_v14 = vld [vmem:[%s12337_s1 + $0xf58] sm:$0xff] }
 0x114   :  { %1449 = vmatpush.msrb.mxu1 %v76_v32  ;;  %1472 = vmatpush.msrb.mxu2 %v204_v34  ;;  %v660_v60 = vld [vmem:[%s12337_s1 + $0x1358] sm:$0xff] }
 0x115   :  { %1495 = vmatpush.msrb.mxu3 %v332_v35  ;;  %1342 = vmatmul.f32.gmra.mxu0 %v6461_v40  ;;  %v788_v61 = vld [vmem:[%s12337_s1 + $0x1758] sm:$0xff] }
 0x116   :  { %1450 = vmatpush.msrb.mxu1 %v68_v36  ;;  %1427 = vmatpush.msrb.mxu0 %v835_v37  ;;  %v916_v62 = vld [vmem:[%s12337_s1 + $0x1b58] sm:$0xff] }
 0x117   :  { %1473 = vmatpush.msrb.mxu2 %v196_v38  ;;  %1496 = vmatpush.msrb.mxu3 %v324_v53  ;;  %v524_v63 = vld [vmem:[%s12337_s1 + $0xf18] sm:$0xff] }
 0x118   :  { %1451 = vmatpush.msrb.mxu1 %v60_v39  ;;  %1428 = vmatpush.msrb.mxu0 %v827_v41  ;;  %v780_v0 = vld [vmem:[%s12337_s1 + $0x1718] sm:$0xff] }
 0x119   :  { %1474 = vmatpush.msrb.mxu2 %v188_v42  ;;  %1497 = vmatpush.msrb.mxu3 %v316_v43  ;;  %v908_v1 = vld [vmem:[%s12337_s1 + $0x1b18] sm:$0xff] }
 0x11a   :  { %1452 = vmatpush.msrb.mxu1 %v52_v58  ;;  %1429 = vmatpush.msrb.mxu0 %v819_v44  ;;  %v516_v2 = vld [vmem:[%s12337_s1 + $0xed8] sm:$0xff]  ;;  %v6669_v58 = vld [vmem:[%s12336_s0 + $0x8] sm:$0xff] }
 0x11b   :  { %1475 = vmatpush.msrb.mxu2 %v180_v45  ;;  %1498 = vmatpush.msrb.mxu3 %v308_v47  ;;  %v772_v5 = vld [vmem:[%s12337_s1 + $0x16d8] sm:$0xff] }
 0x11c   :  { %1453 = vmatpush.msrb.mxu1 %v44_v49  ;;  %1430 = vmatpush.msrb.mxu0 %v811_v23  ;;  %v900_v6 = vld [vmem:[%s12337_s1 + $0x1ad8] sm:$0xff] }
 0x11d   :  { %1476 = vmatpush.msrb.mxu2 %v172_v50  ;;  %1499 = vmatpush.msrb.mxu3 %v300_v51  ;;  %v508_v7 = vld [vmem:[%s12337_s1 + $0xe98] sm:$0xff] }
 0x11e   :  { %1388 = vmatmul.f32.gmra.mxu2 %v5891_v24  ;;  %1431 = vmatmul.f32.vlgmr.msrb.gmra.mxu0 %v6516_v57  ;;  %v540_v24 = vld [vmem:[%s12337_s1 + $0xf98] sm:$0xff] }
 0x11f   :  { %1530 = vmatpush.msra.mxu1 %v676_v52  ;;  %1507 = vmatpush.msra.mxu0 %v548_v54  ;;  %v636_v8 = vld [vmem:[%s12337_s1 + $0x1298] sm:$0xff]  ;;  %v6700_v54 = vld [vmem:[%s12336_s0] sm:$0xff] }
 0x120   :  { %1553 = vmatpush.msra.mxu2 %v804_v9  ;;  %1576 = vmatpush.msra.mxu3 %v932_v55  ;;  %v764_v10 = vld [vmem:[%s12337_s1 + $0x1698] sm:$0xff] }
 0x121   :  { %1531 = vmatpush.msra.mxu1 %v668_v56  ;;  %1411 = vmatmul.f32.gmra.mxu3 %v5910_v30  ;;  %v652_v30 = vld [vmem:[%s12337_s1 + $0x1318] sm:$0xff] }
 0x122   :  { %1508 = vmatpush.msra.mxu0 %v540_v24  ;;  %1554 = vmatpush.msra.mxu2 %v796_v59  ;;  %v892_v11 = vld [vmem:[%s12337_s1 + $0x1a98] sm:$0xff]  ;;  %v165_v24 = vld [vmem:[%s12337_s1 + $0x3e0] sm:$0xff] }
 0x123   :  { %1577 = vmatpush.msra.mxu3 %v924_v48  ;;  %1365 = vmatmul.f32.gmra.mxu1 %v5783_v46  ;;  %v644_v46 = vld [vmem:[%s12337_s1 + $0x12d8] sm:$0xff]  ;;  %v293_v59 = vld [vmem:[%s12337_s1 + $0x7e0] sm:$0xff] }
 0x124   :  { %1509 = vmatpush.msra.mxu0 %v532_v14  ;;  %1532 = vmatpush.msra.mxu1 %v660_v60  ;;  %v500_v33 = vld [vmem:[%s12337_s1 + $0xe58] sm:$0xff]  ;;  %v421_v48 = vld [vmem:[%s12337_s1 + $0xbe0] sm:$0xff] }
 0x125   :  { %1555 = vmatpush.msra.mxu2 %v788_v61  ;;  %1578 = vmatpush.msra.mxu3 %v916_v62  ;;  %v628_v12 = vld [vmem:[%s12337_s1 + $0x1258] sm:$0xff]  ;;  %v549_v14 = vld [vmem:[%s12337_s1 + $0xfe0] sm:$0xff] }
 0x126   :  { %1510 = vmatpush.msra.mxu0 %v524_v63  ;;  %1533 = vmatpush.msra.mxu1 %v652_v30  ;;  %v756_v13 = vld [vmem:[%s12337_s1 + $0x1658] sm:$0xff]  ;;  %v6727_v60 = vld [vmem:[%s12336_s0 + $0x40] sm:$0xff] }
 0x127   :  { %1556 = vmatpush.msra.mxu2 %v780_v0  ;;  %1579 = vmatpush.msra.mxu3 %v908_v1  ;;  %v884_v15 = vld [vmem:[%s12337_s1 + $0x1a58] sm:$0xff]  ;;  %v157_v61 = vld [vmem:[%s12337_s1 + $0x3a0] sm:$0xff] }
 0x128   :  { %1511 = vmatpush.msra.mxu0 %v516_v2  ;;  %1534 = vmatpush.msra.mxu1 %v644_v46  ;;  %v620_v4 = vld [vmem:[%s12337_s1 + $0x1218] sm:$0xff]  ;;  %v285_v62 = vld [vmem:[%s12337_s1 + $0x7a0] sm:$0xff] }
 0x129   :  { %1557 = vmatpush.msra.mxu2 %v772_v5  ;;  %1580 = vmatpush.msra.mxu3 %v900_v6  ;;  %v748_v16 = vld [vmem:[%s12337_s1 + $0x1618] sm:$0xff]  ;;  %v413_v63 = vld [vmem:[%s12337_s1 + $0xba0] sm:$0xff] }
 0x12a   :  { %1434 = vmatmul.f32.gmra.mxu0 %v5874_v18  ;;  %1535 = vmatpush.msra.mxu1 %v636_v8  ;;  %v492_v18 = vld [vmem:[%s12337_s1 + $0xe18] sm:$0xff]  ;;  %v541_v30 = vld [vmem:[%s12337_s1 + $0xfa0] sm:$0xff] }
 0x12b   :  { %1512 = vmatpush.msra.mxu0 %v508_v7  ;;  %1558 = vmatpush.msra.mxu2 %v764_v10  ;;  %v876_v17 = vld [vmem:[%s12337_s1 + $0x1a18] sm:$0xff]  ;;  %v149_v0 = vld [vmem:[%s12337_s1 + $0x360] sm:$0xff] }
 0x12c   :  { %1581 = vmatpush.msra.mxu3 %v892_v11  ;;  %1536 = vmatpush.msra.mxu1 %v628_v12  ;;  %v484_v19 = vld [vmem:[%s12337_s1 + $0xdd8] sm:$0xff]  ;;  %v277_v1 = vld [vmem:[%s12337_s1 + $0x760] sm:$0xff] }
 0x12d   :  { %1513 = vmatpush.msra.mxu0 %v500_v33  ;;  %1559 = vmatpush.msra.mxu2 %v756_v13  ;;  %v612_v20 = vld [vmem:[%s12337_s1 + $0x11d8] sm:$0xff]  ;;  %v405_v2 = vld [vmem:[%s12337_s1 + $0xb60] sm:$0xff] }
 0x12e   :  { %1582 = vmatpush.msra.mxu3 %v884_v15  ;;  %1537 = vmatpush.msra.mxu1 %v620_v4  ;;  %v740_v21 = vld [vmem:[%s12337_s1 + $0x15d8] sm:$0xff]  ;;  %v533_v46 = vld [vmem:[%s12337_s1 + $0xf60] sm:$0xff]  ;;  %v6788_v15 = vld [vmem:[%s12336_s0 + $0x28] sm:$0xff] }
 0x12f   :  { %1514 = vmatpush.msra.mxu0 %v492_v18  ;;  %v868_v22 = vld [vmem:[%s12337_s1 + $0x19d8] sm:$0xff]  ;;  %1560 = vmatpush.msra.mxu2 %v748_v16  ;;  %v141_v6 = vld [vmem:[%s12337_s1 + $0x320] sm:$0xff] }
 0x130   :  { %1583 = vmatpush.msra.mxu3 %v876_v17  ;;  %v476_v25 = vld [vmem:[%s12337_s1 + $0xd98] sm:$0xff]  ;;  %1538 = vmatpush.msra.mxu1 %v612_v20  ;;  %v269_v7 = vld [vmem:[%s12337_s1 + $0x720] sm:$0xff] }
 0x131   :  { %v604_v26 = vld [vmem:[%s12337_s1 + $0x1198] sm:$0xff]  ;;  %1515 = vmatpush.msra.mxu0 %v484_v19  ;;  %1561 = vmatpush.msra.mxu2 %v740_v21  ;;  %v397_v8 = vld [vmem:[%s12337_s1 + $0xb20] sm:$0xff] }
 0x132   :  { %v732_v27 = vld [vmem:[%s12337_s1 + $0x1598] sm:$0xff]  ;;  %1584 = vmatpush.msra.mxu3 %v868_v22  ;;  %1539 = vmatpush.msra.mxu1 %v604_v26  ;;  %v525_v10 = vld [vmem:[%s12337_s1 + $0xf20] sm:$0xff] }
 0x133   :  { %v860_v29 = vld [vmem:[%s12337_s1 + $0x1998] sm:$0xff]  ;;  %1516 = vmatpush.msra.mxu0 %v476_v25  ;;  %1562 = vmatpush.msra.mxu2 %v732_v27  ;;  %v133_v11 = vld [vmem:[%s12337_s1 + $0x2e0] sm:$0xff] }
 0x134   :  { %v468_v31 = vld [vmem:[%s12337_s1 + $0xd58] sm:$0xff]  ;;  %1585 = vmatpush.msra.mxu3 %v860_v29  ;;  %1477 = vmatmul.f32.vlgmr.msrb.gmra.mxu2 %v6669_v58  ;;  %v261_v33 = vld [vmem:[%s12337_s1 + $0x6e0] sm:$0xff] }
 0x135   :  { %v596_v3 = vld [vmem:[%s12337_s1 + $0x1158] sm:$0xff]  ;;  %1517 = vmatpush.msra.mxu0 %v468_v31  ;;  %1500 = vmatmul.f32.vlgmr.msrb.gmra.mxu3 %v6363_v28  ;;  %v389_v12 = vld [vmem:[%s12337_s1 + $0xae0] sm:$0xff] }
 0x136   :  { %v724_v32 = vld [vmem:[%s12337_s1 + $0x1558] sm:$0xff]  ;;  %1540 = vmatpush.msra.mxu1 %v596_v3  ;;  %v517_v13 = vld [vmem:[%s12337_s1 + $0xee0] sm:$0xff] }
 0x137   :  { %v852_v34 = vld [vmem:[%s12337_s1 + $0x1958] sm:$0xff]  ;;  %1563 = vmatpush.msra.mxu2 %v724_v32  ;;  %1454 = vmatmul.f32.vlgmr.msrb.gmra.mxu1 %v6700_v54  ;;  %v125_v18 = vld [vmem:[%s12337_s1 + $0x2a0] sm:$0xff] }
 0x138   :  { %v460_v35 = vld [vmem:[%s12337_s1 + $0xd18] sm:$0xff]  ;;  %1586 = vmatpush.msra.mxu3 %v852_v34  ;;  %v253_v4 = vld [vmem:[%s12337_s1 + $0x6a0] sm:$0xff] }
 0x139   :  { %v588_v36 = vld [vmem:[%s12337_s1 + $0x1118] sm:$0xff]  ;;  %1518 = vmatpush.msra.mxu0 %v460_v35  ;;  %v381_v16 = vld [vmem:[%s12337_s1 + $0xaa0] sm:$0xff] }
 0x13a   :  { %v716_v37 = vld [vmem:[%s12337_s1 + $0x1518] sm:$0xff]  ;;  %1541 = vmatpush.msra.mxu1 %v588_v36  ;;  %v509_v19 = vld [vmem:[%s12337_s1 + $0xea0] sm:$0xff] }
 0x13b   :  { %v844_v38 = vld [vmem:[%s12337_s1 + $0x1918] sm:$0xff]  ;;  %1564 = vmatpush.msra.mxu2 %v716_v37  ;;  %v117_v20 = vld [vmem:[%s12337_s1 + $0x260] sm:$0xff] }
 0x13c   :  { %v452_v53 = vld [vmem:[%s12337_s1 + $0xcd8] sm:$0xff]  ;;  %1587 = vmatpush.msra.mxu3 %v844_v38  ;;  %1480 = vmatmul.f32.gmra.mxu2 %v6727_v60  ;;  %v245_v21 = vld [vmem:[%s12337_s1 + $0x660] sm:$0xff] }
 0x13d   :  { %v580_v39 = vld [vmem:[%s12337_s1 + $0x10d8] sm:$0xff]  ;;  %1519 = vmatpush.msra.mxu0 %v452_v53  ;;  %1503 = vmatmul.f32.gmra.mxu3 %v6461_v40  ;;  %v373_v22 = vld [vmem:[%s12337_s1 + $0xa60] sm:$0xff] }
 0x13e   :  { %v708_v41 = vld [vmem:[%s12337_s1 + $0x14d8] sm:$0xff]  ;;  %1542 = vmatpush.msra.mxu1 %v580_v39  ;;  %v501_v25 = vld [vmem:[%s12337_s1 + $0xe60] sm:$0xff] }
 0x13f   :  { %v836_v42 = vld [vmem:[%s12337_s1 + $0x18d8] sm:$0xff]  ;;  %1565 = vmatpush.msra.mxu2 %v708_v41  ;;  %v6825_v26 = vld [vmem:[%s12336_s0 + $0x20] sm:$0xff] }
 0x140   :  { %v444_v43 = vld [vmem:[%s12337_s1 + $0xc98] sm:$0xff]  ;;  %1588 = vmatpush.msra.mxu3 %v836_v42  ;;  %v109_v27 = vld [vmem:[%s12337_s1 + $0x220] sm:$0xff] }
 0x141   :  { %v572_v44 = vld [vmem:[%s12337_s1 + $0x1098] sm:$0xff]  ;;  %1520 = vmatpush.msra.mxu0 %v444_v43  ;;  %v237_v29 = vld [vmem:[%s12337_s1 + $0x620] sm:$0xff] }
 0x142   :  { %v700_v45 = vld [vmem:[%s12337_s1 + $0x1498] sm:$0xff]  ;;  %1543 = vmatpush.msra.mxu1 %v572_v44  ;;  %v365_v31 = vld [vmem:[%s12337_s1 + $0xa20] sm:$0xff] }
 0x143   :  { %v828_v47 = vld [vmem:[%s12337_s1 + $0x1898] sm:$0xff]  ;;  %1566 = vmatpush.msra.mxu2 %v700_v45  ;;  %v493_v3 = vld [vmem:[%s12337_s1 + $0xe20] sm:$0xff] }
 0x144   :  { %v436_v49 = vld [vmem:[%s12337_s1 + $0xc58] sm:$0xff]  ;;  %1589 = vmatpush.msra.mxu3 %v828_v47  ;;  %v101_v32 = vld [vmem:[%s12337_s1 + $0x1e0] sm:$0xff] }
 0x145   :  { %v564_v23 = vld [vmem:[%s12337_s1 + $0x1058] sm:$0xff]  ;;  %1521 = vmatpush.msra.mxu0 %v436_v49  ;;  %v229_v34 = vld [vmem:[%s12337_s1 + $0x5e0] sm:$0xff] }
 0x146   :  { %v692_v50 = vld [vmem:[%s12337_s1 + $0x1458] sm:$0xff]  ;;  %1544 = vmatpush.msra.mxu1 %v564_v23  ;;  %v357_v35 = vld [vmem:[%s12337_s1 + $0x9e0] sm:$0xff] }
 0x147   :  { %v820_v51 = vld [vmem:[%s12337_s1 + $0x1858] sm:$0xff]  ;;  %1567 = vmatpush.msra.mxu2 %v692_v50  ;;  %v485_v36 = vld [vmem:[%s12337_s1 + $0xde0] sm:$0xff] }
 0x148   :  { %v428_v52 = vld [vmem:[%s12337_s1 + $0xc18] sm:$0xff]  ;;  %1590 = vmatpush.msra.mxu3 %v820_v51  ;;  %v93_v37 = vld [vmem:[%s12337_s1 + $0x1a0] sm:$0xff] }
 0x149   :  { %v556_v9 = vld [vmem:[%s12337_s1 + $0x1018] sm:$0xff]  ;;  %1522 = vmatpush.msra.mxu0 %v428_v52  ;;  %v221_v38 = vld [vmem:[%s12337_s1 + $0x5a0] sm:$0xff] }
 0x14a   :  { %v684_v55 = vld [vmem:[%s12337_s1 + $0x1418] sm:$0xff]  ;;  %1545 = vmatpush.msra.mxu1 %v556_v9  ;;  %v349_v53 = vld [vmem:[%s12337_s1 + $0x9a0] sm:$0xff] }
 0x14b   :  { %v812_v56 = vld [vmem:[%s12337_s1 + $0x1818] sm:$0xff]  ;;  %1568 = vmatpush.msra.mxu2 %v684_v55  ;;  %1599 = vmatpush.msrb.mxu0 %v165_v24  ;;  %v477_v39 = vld [vmem:[%s12337_s1 + $0xda0] sm:$0xff] }
 0x14c   :  { %1591 = vmatpush.msra.mxu3 %v812_v56  ;;  %1622 = vmatpush.msrb.mxu1 %v293_v59  ;;  %v6758_v5 = vld [vmem:[%s12336_s0 + $0x38] sm:$0xff]  ;;  %v85_v41 = vld [vmem:[%s12337_s1 + $0x160] sm:$0xff] }
 0x14d   :  { %1645 = vmatpush.msrb.mxu2 %v421_v48  ;;  %1600 = vmatpush.msrb.mxu0 %v157_v61  ;;  %v6803_v17 = vld [vmem:[%s12336_s0 + $0x18] sm:$0xff]  ;;  %v213_v42 = vld [vmem:[%s12337_s1 + $0x560] sm:$0xff] }
 0x14e   :  { %1668 = vmatpush.msrb.mxu3 %v549_v14  ;;  %1623 = vmatpush.msrb.mxu1 %v285_v62  ;;  %v341_v43 = vld [vmem:[%s12337_s1 + $0x960] sm:$0xff] }
 0x14f   :  { %1646 = vmatpush.msrb.mxu2 %v413_v63  ;;  %1457 = vmatmul.f32.gmra.mxu1 %v6758_v5  ;;  %v469_v44 = vld [vmem:[%s12337_s1 + $0xd60] sm:$0xff] }
 0x150   :  { %1669 = vmatpush.msrb.mxu3 %v541_v30  ;;  %1601 = vmatpush.msrb.mxu0 %v149_v0  ;;  %v77_v45 = vld [vmem:[%s12337_s1 + $0x120] sm:$0xff] }
 0x151   :  { %1624 = vmatpush.msrb.mxu1 %v277_v1  ;;  %1647 = vmatpush.msrb.mxu2 %v405_v2  ;;  %v205_v47 = vld [vmem:[%s12337_s1 + $0x520] sm:$0xff] }
 0x152   :  { %1670 = vmatpush.msrb.mxu3 %v533_v46  ;;  %1602 = vmatpush.msrb.mxu0 %v141_v6  ;;  %v333_v49 = vld [vmem:[%s12337_s1 + $0x920] sm:$0xff] }
 0x153   :  { %1625 = vmatpush.msrb.mxu1 %v269_v7  ;;  %1648 = vmatpush.msrb.mxu2 %v397_v8  ;;  %v461_v23 = vld [vmem:[%s12337_s1 + $0xd20] sm:$0xff]  ;;  %v166_v7 = vld [vmem:[%s12337_s1 + $0x3e8] sm:$0xff] }
 0x154   :  { %1671 = vmatpush.msrb.mxu3 %v525_v10  ;;  %1569 = vmatmul.f32.vlgmr.msra.gmra.mxu2 %v6788_v15  ;;  %v69_v50 = vld [vmem:[%s12337_s1 + $0xe0] sm:$0xff] }
 0x155   :  { %1603 = vmatpush.msrb.mxu0 %v133_v11  ;;  %1626 = vmatpush.msrb.mxu1 %v261_v33  ;;  %v197_v51 = vld [vmem:[%s12337_s1 + $0x4e0] sm:$0xff] }
 0x156   :  { %1649 = vmatpush.msrb.mxu2 %v389_v12  ;;  %1672 = vmatpush.msrb.mxu3 %v517_v13  ;;  %v325_v52 = vld [vmem:[%s12337_s1 + $0x8e0] sm:$0xff]  ;;  %v6966_v12 = vld [vmem:[%s12336_s0 + $0x50] sm:$0xff]  ;;  %v158_v13 = vld [vmem:[%s12337_s1 + $0x3a8] sm:$0xff] }
 0x157   :  { %1523 = vmatmul.f32.vlgmr.msra.gmra.mxu0 %v6803_v17  ;;  %1592 = vmatmul.f32.vlgmr.msra.gmra.mxu3 %v6516_v57  ;;  %v453_v9 = vld [vmem:[%s12337_s1 + $0xce0] sm:$0xff] }
 0x158   :  { %1604 = vmatpush.msrb.mxu0 %v125_v18  ;;  %1627 = vmatpush.msrb.mxu1 %v253_v4  ;;  %v61_v55 = vld [vmem:[%s12337_s1 + $0xa0] sm:$0xff]  ;;  %v6975_v18 = vld [vmem:[%s12336_s0 + $0x68] sm:$0xff] }
 0x159   :  { %1650 = vmatpush.msrb.mxu2 %v381_v16  ;;  %1673 = vmatpush.msrb.mxu3 %v509_v19  ;;  %v189_v56 = vld [vmem:[%s12337_s1 + $0x4a0] sm:$0xff] }
 0x15a   :  { %1546 = vmatmul.f32.vlgmr.msra.gmra.mxu1 %v6825_v26  ;;  %1605 = vmatpush.msrb.mxu0 %v117_v20  ;;  %v317_v24 = vld [vmem:[%s12337_s1 + $0x8a0] sm:$0xff]  ;;  %v150_v20 = vld [vmem:[%s12337_s1 + $0x368] sm:$0xff] }
 0x15b   :  { %1628 = vmatpush.msrb.mxu1 %v245_v21  ;;  %1651 = vmatpush.msrb.mxu2 %v373_v22  ;;  %v445_v59 = vld [vmem:[%s12337_s1 + $0xca0] sm:$0xff]  ;;  %v6993_v21 = vld [vmem:[%s12336_s0 + $0x58] sm:$0xff] }
 0x15c   :  { %1674 = vmatpush.msrb.mxu3 %v501_v25  ;;  %1606 = vmatpush.msrb.mxu0 %v109_v27  ;;  %v53_v48 = vld [vmem:[%s12337_s1 + $0x60] sm:$0xff] }
 0x15d   :  { %1629 = vmatpush.msrb.mxu1 %v237_v29  ;;  %1652 = vmatpush.msrb.mxu2 %v365_v31  ;;  %v181_v14 = vld [vmem:[%s12337_s1 + $0x460] sm:$0xff]  ;;  %v142_v29 = vld [vmem:[%s12337_s1 + $0x328] sm:$0xff] }
 0x15e   :  { %1675 = vmatpush.msrb.mxu3 %v493_v3  ;;  %1607 = vmatpush.msrb.mxu0 %v101_v32  ;;  %v309_v61 = vld [vmem:[%s12337_s1 + $0x860] sm:$0xff] }
 0x15f   :  { %1630 = vmatpush.msrb.mxu1 %v229_v34  ;;  %1653 = vmatpush.msrb.mxu2 %v357_v35  ;;  %v437_v62 = vld [vmem:[%s12337_s1 + $0xc60] sm:$0xff]  ;;  %v134_v34 = vld [vmem:[%s12337_s1 + $0x2e8] sm:$0xff] }
 0x160   :  { %1676 = vmatpush.msrb.mxu3 %v485_v36  ;;  %1608 = vmatpush.msrb.mxu0 %v93_v37  ;;  %v45_v63 = vld [vmem:[%s12337_s1 + $0x20] sm:$0xff] }
 0x161   :  { %1631 = vmatpush.msrb.mxu1 %v221_v38  ;;  %1654 = vmatpush.msrb.mxu2 %v349_v53  ;;  %v173_v30 = vld [vmem:[%s12337_s1 + $0x420] sm:$0xff]  ;;  %v126_v38 = vld [vmem:[%s12337_s1 + $0x2a8] sm:$0xff] }
 0x162   :  { %1677 = vmatpush.msrb.mxu3 %v477_v39  ;;  %1609 = vmatpush.msrb.mxu0 %v85_v41  ;;  %v301_v0 = vld [vmem:[%s12337_s1 + $0x820] sm:$0xff] }
 0x163   :  { %1632 = vmatpush.msrb.mxu1 %v213_v42  ;;  %1655 = vmatpush.msrb.mxu2 %v341_v43  ;;  %v429_v1 = vld [vmem:[%s12337_s1 + $0xc20] sm:$0xff]  ;;  %v118_v42 = vld [vmem:[%s12337_s1 + $0x268] sm:$0xff] }
 0x164   :  { %1678 = vmatpush.msrb.mxu3 %v469_v44  ;;  %1610 = vmatpush.msrb.mxu0 %v77_v45  ;;  %v677_v2 = vld [vmem:[%s12337_s1 + $0x13e0] sm:$0xff] }
 0x165   :  { %1633 = vmatpush.msrb.mxu1 %v205_v47  ;;  %1656 = vmatpush.msrb.mxu2 %v333_v49  ;;  %v805_v46 = vld [vmem:[%s12337_s1 + $0x17e0] sm:$0xff]  ;;  %v110_v47 = vld [vmem:[%s12337_s1 + $0x228] sm:$0xff] }
 0x166   :  { %1679 = vmatpush.msrb.mxu3 %v461_v23  ;;  %1611 = vmatpush.msrb.mxu0 %v69_v50  ;;  %v933_v6 = vld [vmem:[%s12337_s1 + $0x1be0] sm:$0xff] }
 0x167   :  { %1634 = vmatpush.msrb.mxu1 %v197_v51  ;;  %1657 = vmatpush.msrb.mxu2 %v325_v52  ;;  %v6951_v8 = vld [vmem:[%s12336_s0 + $0x60] sm:$0xff]  ;;  %v102_v51 = vld [vmem:[%s12337_s1 + $0x1e8] sm:$0xff] }
 0x168   :  { %1680 = vmatpush.msrb.mxu3 %v453_v9  ;;  %1612 = vmatpush.msrb.mxu0 %v61_v55  ;;  %v669_v10 = vld [vmem:[%s12337_s1 + $0x13a0] sm:$0xff] }
 0x169   :  { %1635 = vmatpush.msrb.mxu1 %v189_v56  ;;  %1658 = vmatpush.msrb.mxu2 %v317_v24  ;;  %v797_v11 = vld [vmem:[%s12337_s1 + $0x17a0] sm:$0xff]  ;;  %v94_v56 = vld [vmem:[%s12337_s1 + $0x1a8] sm:$0xff] }
 0x16a   :  { %1681 = vmatpush.msrb.mxu3 %v445_v59  ;;  %1613 = vmatpush.msrb.mxu0 %v53_v48  ;;  %v925_v33 = vld [vmem:[%s12337_s1 + $0x1ba0] sm:$0xff] }
 0x16b   :  { %1636 = vmatpush.msrb.mxu1 %v181_v14  ;;  %1659 = vmatpush.msrb.mxu2 %v309_v61  ;;  %v661_v4 = vld [vmem:[%s12337_s1 + $0x1360] sm:$0xff]  ;;  %v86_v14 = vld [vmem:[%s12337_s1 + $0x168] sm:$0xff] }
 0x16c   :  { %1682 = vmatpush.msrb.mxu3 %v437_v62  ;;  %1614 = vmatpush.msrb.mxu0 %v45_v63  ;;  %v789_v16 = vld [vmem:[%s12337_s1 + $0x1760] sm:$0xff] }
 0x16d   :  { %1637 = vmatpush.msrb.mxu1 %v173_v30  ;;  %1660 = vmatpush.msrb.mxu2 %v301_v0  ;;  %v917_v19 = vld [vmem:[%s12337_s1 + $0x1b60] sm:$0xff]  ;;  %v78_v30 = vld [vmem:[%s12337_s1 + $0x128] sm:$0xff] }
 0x16e   :  { %1683 = vmatpush.msrb.mxu3 %v429_v1  ;;  %1572 = vmatmul.f32.gmra.mxu2 %v6951_v8  ;;  %v653_v22 = vld [vmem:[%s12337_s1 + $0x1320] sm:$0xff] }
 0x16f   :  { %1691 = vmatpush.msra.mxu0 %v677_v2  ;;  %1714 = vmatpush.msra.mxu1 %v805_v46  ;;  %v781_v25 = vld [vmem:[%s12337_s1 + $0x1720] sm:$0xff]  ;;  %v70_v46 = vld [vmem:[%s12337_s1 + $0xe8] sm:$0xff] }
 0x170   :  { %1737 = vmatpush.msra.mxu2 %v933_v6  ;;  %1760 = vmatpush.msra.mxu3 %v166_v7  ;;  %v909_v27 = vld [vmem:[%s12337_s1 + $0x1b20] sm:$0xff] }
 0x171   :  { %1526 = vmatmul.f32.gmra.mxu0 %v6966_v12  ;;  %1595 = vmatmul.f32.gmra.mxu3 %v6975_v18  ;;  %v645_v31 = vld [vmem:[%s12337_s1 + $0x12e0] sm:$0xff] }
 0x172   :  { %1692 = vmatpush.msra.mxu0 %v669_v10  ;;  %1715 = vmatpush.msra.mxu1 %v797_v11  ;;  %v773_v3 = vld [vmem:[%s12337_s1 + $0x16e0] sm:$0xff]  ;;  %v62_v11 = vld [vmem:[%s12337_s1 + $0xa8] sm:$0xff] }
 0x173   :  { %1738 = vmatpush.msra.mxu2 %v925_v33  ;;  %1761 = vmatpush.msra.mxu3 %v158_v13  ;;  %v901_v32 = vld [vmem:[%s12337_s1 + $0x1ae0] sm:$0xff] }
 0x174   :  { %1549 = vmatmul.f32.gmra.mxu1 %v6993_v21  ;;  %1693 = vmatpush.msra.mxu0 %v661_v4  ;;  %v637_v35 = vld [vmem:[%s12337_s1 + $0x12a0] sm:$0xff]  ;;  %v54_v4 = vld [vmem:[%s12337_s1 + $0x68] sm:$0xff] }
 0x175   :  { %1716 = vmatpush.msra.mxu1 %v789_v16  ;;  %1739 = vmatpush.msra.mxu2 %v917_v19  ;;  %v765_v36 = vld [vmem:[%s12337_s1 + $0x16a0] sm:$0xff] }
 0x176   :  { %1762 = vmatpush.msra.mxu3 %v150_v20  ;;  %1694 = vmatpush.msra.mxu0 %v653_v22  ;;  %v893_v37 = vld [vmem:[%s12337_s1 + $0x1aa0] sm:$0xff]  ;;  %v46_v22 = vld [vmem:[%s12337_s1 + $0x28] sm:$0xff] }
 0x177   :  { %1717 = vmatpush.msra.mxu1 %v781_v25  ;;  %1740 = vmatpush.msra.mxu2 %v909_v27  ;;  %v629_v53 = vld [vmem:[%s12337_s1 + $0x1260] sm:$0xff]  ;;  %v294_v25 = vld [vmem:[%s12337_s1 + $0x7e8] sm:$0xff] }
 0x178   :  { %1763 = vmatpush.msra.mxu3 %v142_v29  ;;  %1695 = vmatpush.msra.mxu0 %v645_v31  ;;  %v757_v39 = vld [vmem:[%s12337_s1 + $0x1660] sm:$0xff]  ;;  %v422_v27 = vld [vmem:[%s12337_s1 + $0xbe8] sm:$0xff] }
 0x179   :  { %1718 = vmatpush.msra.mxu1 %v773_v3  ;;  %1741 = vmatpush.msra.mxu2 %v901_v32  ;;  %v885_v41 = vld [vmem:[%s12337_s1 + $0x1a60] sm:$0xff]  ;;  %v550_v29 = vld [vmem:[%s12337_s1 + $0xfe8] sm:$0xff] }
 0x17a   :  { %1764 = vmatpush.msra.mxu3 %v134_v34  ;;  %1696 = vmatpush.msra.mxu0 %v637_v35  ;;  %v621_v43 = vld [vmem:[%s12337_s1 + $0x1220] sm:$0xff]  ;;  %v678_v31 = vld [vmem:[%s12337_s1 + $0x13e8] sm:$0xff] }
 0x17b   :  { %1719 = vmatpush.msra.mxu1 %v765_v36  ;;  %1742 = vmatpush.msra.mxu2 %v893_v37  ;;  %v749_v44 = vld [vmem:[%s12337_s1 + $0x1620] sm:$0xff]  ;;  %v286_v3 = vld [vmem:[%s12337_s1 + $0x7a8] sm:$0xff] }
 0x17c   :  { %1765 = vmatpush.msra.mxu3 %v126_v38  ;;  %1697 = vmatpush.msra.mxu0 %v629_v53  ;;  %v877_v45 = vld [vmem:[%s12337_s1 + $0x1a20] sm:$0xff]  ;;  %v414_v32 = vld [vmem:[%s12337_s1 + $0xba8] sm:$0xff] }
 0x17d   :  { %1720 = vmatpush.msra.mxu1 %v757_v39  ;;  %1743 = vmatpush.msra.mxu2 %v885_v41  ;;  %v613_v49 = vld [vmem:[%s12337_s1 + $0x11e0] sm:$0xff]  ;;  %v670_v34 = vld [vmem:[%s12337_s1 + $0x13a8] sm:$0xff] }
 0x17e   :  { %1766 = vmatpush.msra.mxu3 %v118_v42  ;;  %v741_v23 = vld [vmem:[%s12337_s1 + $0x15e0] sm:$0xff]  ;;  %1698 = vmatpush.msra.mxu0 %v621_v43  ;;  %v278_v35 = vld [vmem:[%s12337_s1 + $0x768] sm:$0xff] }
 0x17f   :  { %1721 = vmatpush.msra.mxu1 %v749_v44  ;;  %v869_v50 = vld [vmem:[%s12337_s1 + $0x19e0] sm:$0xff]  ;;  %1744 = vmatpush.msra.mxu2 %v877_v45  ;;  %v406_v36 = vld [vmem:[%s12337_s1 + $0xb68] sm:$0xff] }
 0x180   :  { %1767 = vmatpush.msra.mxu3 %v110_v47  ;;  %v605_v52 = vld [vmem:[%s12337_s1 + $0x11a0] sm:$0xff]  ;;  %1699 = vmatpush.msra.mxu0 %v613_v49  ;;  %v534_v37 = vld [vmem:[%s12337_s1 + $0xf68] sm:$0xff] }
 0x181   :  { %v733_v9 = vld [vmem:[%s12337_s1 + $0x15a0] sm:$0xff]  ;;  %1722 = vmatpush.msra.mxu1 %v741_v23  ;;  %1745 = vmatpush.msra.mxu2 %v869_v50  ;;  %v662_v38 = vld [vmem:[%s12337_s1 + $0x1368] sm:$0xff] }
 0x182   :  { %v861_v55 = vld [vmem:[%s12337_s1 + $0x19a0] sm:$0xff]  ;;  %1768 = vmatpush.msra.mxu3 %v102_v51  ;;  %1700 = vmatpush.msra.mxu0 %v605_v52  ;;  %v270_v53 = vld [vmem:[%s12337_s1 + $0x728] sm:$0xff] }
 0x183   :  { %v597_v24 = vld [vmem:[%s12337_s1 + $0x1160] sm:$0xff]  ;;  %1723 = vmatpush.msra.mxu1 %v733_v9  ;;  %1746 = vmatpush.msra.mxu2 %v861_v55  ;;  %v398_v39 = vld [vmem:[%s12337_s1 + $0xb28] sm:$0xff] }
 0x184   :  { %v725_v59 = vld [vmem:[%s12337_s1 + $0x1560] sm:$0xff]  ;;  %1769 = vmatpush.msra.mxu3 %v94_v56  ;;  %1701 = vmatpush.msra.mxu0 %v597_v24  ;;  %v526_v41 = vld [vmem:[%s12337_s1 + $0xf28] sm:$0xff] }
 0x185   :  { %v853_v48 = vld [vmem:[%s12337_s1 + $0x1960] sm:$0xff]  ;;  %1724 = vmatpush.msra.mxu1 %v725_v59  ;;  %1661 = vmatmul.f32.vlgmr.msrb.gmra.mxu2 %v6363_v28  ;;  %v654_v42 = vld [vmem:[%s12337_s1 + $0x1328] sm:$0xff] }
 0x186   :  { %v589_v61 = vld [vmem:[%s12337_s1 + $0x1120] sm:$0xff]  ;;  %1747 = vmatpush.msra.mxu2 %v853_v48  ;;  %1770 = vmatpush.msra.mxu3 %v86_v14  ;;  %v390_v43 = vld [vmem:[%s12337_s1 + $0xae8] sm:$0xff] }
 0x187   :  { %v717_v62 = vld [vmem:[%s12337_s1 + $0x1520] sm:$0xff]  ;;  %1702 = vmatpush.msra.mxu0 %v589_v61  ;;  %1638 = vmatmul.f32.vlgmr.msrb.gmra.mxu1 %v6669_v58  ;;  %v518_v44 = vld [vmem:[%s12337_s1 + $0xee8] sm:$0xff] }
 0x188   :  { %v845_v63 = vld [vmem:[%s12337_s1 + $0x1920] sm:$0xff]  ;;  %1725 = vmatpush.msra.mxu1 %v717_v62  ;;  %1771 = vmatpush.msra.mxu3 %v78_v30  ;;  %v646_v45 = vld [vmem:[%s12337_s1 + $0x12e8] sm:$0xff] }
 0x189   :  { %v581_v0 = vld [vmem:[%s12337_s1 + $0x10e0] sm:$0xff]  ;;  %1748 = vmatpush.msra.mxu2 %v845_v63  ;;  %1615 = vmatmul.f32.vlgmr.msrb.gmra.mxu0 %v6700_v54  ;;  %v382_v47 = vld [vmem:[%s12337_s1 + $0xaa8] sm:$0xff] }
 0x18a   :  { %v709_v1 = vld [vmem:[%s12337_s1 + $0x14e0] sm:$0xff]  ;;  %1703 = vmatpush.msra.mxu0 %v581_v0  ;;  %1772 = vmatpush.msra.mxu3 %v70_v46  ;;  %v254_v49 = vld [vmem:[%s12337_s1 + $0x6a8] sm:$0xff] }
 0x18b   :  { %v837_v2 = vld [vmem:[%s12337_s1 + $0x18e0] sm:$0xff]  ;;  %1726 = vmatpush.msra.mxu1 %v709_v1  ;;  %1684 = vmatmul.f32.vlgmr.msrb.gmra.mxu3 %v6803_v17  ;;  %v510_v23 = vld [vmem:[%s12337_s1 + $0xea8] sm:$0xff] }
 0x18c   :  { %v573_v6 = vld [vmem:[%s12337_s1 + $0x10a0] sm:$0xff]  ;;  %1749 = vmatpush.msra.mxu2 %v837_v2  ;;  %1773 = vmatpush.msra.mxu3 %v62_v11  ;;  %v246_v50 = vld [vmem:[%s12337_s1 + $0x668] sm:$0xff] }
 0x18d   :  { %v701_v7 = vld [vmem:[%s12337_s1 + $0x14a0] sm:$0xff]  ;;  %1704 = vmatpush.msra.mxu0 %v573_v6  ;;  %1664 = vmatmul.f32.gmra.mxu2 %v6461_v40  ;;  %v542_v40 = vld [vmem:[%s12337_s1 + $0xfa8] sm:$0xff] }
 0x18e   :  { %v829_v10 = vld [vmem:[%s12337_s1 + $0x18a0] sm:$0xff]  ;;  %1727 = vmatpush.msra.mxu1 %v701_v7  ;;  %1774 = vmatpush.msra.mxu3 %v54_v4  ;;  %v374_v51 = vld [vmem:[%s12337_s1 + $0xa68] sm:$0xff] }
 0x18f   :  { %v565_v28 = vld [vmem:[%s12337_s1 + $0x1060] sm:$0xff]  ;;  %1750 = vmatpush.msra.mxu2 %v829_v10  ;;  %1641 = vmatmul.f32.gmra.mxu1 %v6727_v60  ;;  %v262_v60 = vld [vmem:[%s12337_s1 + $0x6e8] sm:$0xff] }
 0x190   :  { %v693_v33 = vld [vmem:[%s12337_s1 + $0x1460] sm:$0xff]  ;;  %1705 = vmatpush.msra.mxu0 %v565_v28  ;;  %1775 = vmatpush.msra.mxu3 %v46_v22  ;;  %v502_v52 = vld [vmem:[%s12337_s1 + $0xe68] sm:$0xff] }
 0x191   :  { %v821_v13 = vld [vmem:[%s12337_s1 + $0x1860] sm:$0xff]  ;;  %1728 = vmatpush.msra.mxu1 %v693_v33  ;;  %1618 = vmatmul.f32.gmra.mxu0 %v6758_v5  ;;  %v630_v9 = vld [vmem:[%s12337_s1 + $0x1268] sm:$0xff] }
 0x192   :  { %v557_v16 = vld [vmem:[%s12337_s1 + $0x1020] sm:$0xff]  ;;  %1751 = vmatpush.msra.mxu2 %v821_v13  ;;  %1852 = vmatpush.msrb.mxu3 %v678_v31  ;;  %v238_v55 = vld [vmem:[%s12337_s1 + $0x628] sm:$0xff] }
 0x193   :  { %v685_v19 = vld [vmem:[%s12337_s1 + $0x1420] sm:$0xff]  ;;  %1706 = vmatpush.msra.mxu0 %v557_v16  ;;  %v366_v56 = vld [vmem:[%s12337_s1 + $0xa28] sm:$0xff]  ;;  %1687 = vmatmul.f32.gmra.mxu3 %v6966_v12 }
 0x194   :  { %v813_v20 = vld [vmem:[%s12337_s1 + $0x1820] sm:$0xff]  ;;  %1729 = vmatpush.msra.mxu1 %v685_v19  ;;  %1853 = vmatpush.msrb.mxu3 %v670_v34  ;;  %v494_v24 = vld [vmem:[%s12337_s1 + $0xe28] sm:$0xff] }
 0x195   :  { %1752 = vmatpush.msra.mxu2 %v813_v20  ;;  %1783 = vmatpush.msrb.mxu0 %v294_v25  ;;  %v622_v59 = vld [vmem:[%s12337_s1 + $0x1228] sm:$0xff] }
 0x196   :  { %1806 = vmatpush.msrb.mxu1 %v422_v27  ;;  %1854 = vmatpush.msrb.mxu3 %v662_v38  ;;  %v358_v48 = vld [vmem:[%s12337_s1 + $0x9e8] sm:$0xff]  ;;  %v295_v38 = vld [vmem:[%s12337_s1 + $0x7f0] sm:$0xff] }
 0x197   :  { %1829 = vmatpush.msrb.mxu2 %v550_v29  ;;  %1784 = vmatpush.msrb.mxu0 %v286_v3  ;;  %v486_v14 = vld [vmem:[%s12337_s1 + $0xde8] sm:$0xff] }
 0x198   :  { %1807 = vmatpush.msrb.mxu1 %v414_v32  ;;  %1855 = vmatpush.msrb.mxu3 %v654_v42  ;;  %v614_v61 = vld [vmem:[%s12337_s1 + $0x11e8] sm:$0xff]  ;;  %v287_v42 = vld [vmem:[%s12337_s1 + $0x7b0] sm:$0xff] }
 0x199   :  { %1830 = vmatpush.msrb.mxu2 %v542_v40  ;;  %1785 = vmatpush.msrb.mxu0 %v278_v35  ;;  %v222_v62 = vld [vmem:[%s12337_s1 + $0x5a8] sm:$0xff] }
 0x19a   :  { %1808 = vmatpush.msrb.mxu1 %v406_v36  ;;  %1753 = vmatmul.f32.vlgmr.msra.gmra.mxu2 %v6516_v57  ;;  %v638_v57 = vld [vmem:[%s12337_s1 + $0x12a8] sm:$0xff] }
 0x19b   :  { %1831 = vmatpush.msrb.mxu2 %v534_v37  ;;  %1786 = vmatpush.msrb.mxu0 %v270_v53  ;;  %v350_v63 = vld [vmem:[%s12337_s1 + $0x9a8] sm:$0xff]  ;;  %v167_v37 = vld [vmem:[%s12337_s1 + $0x3f0] sm:$0xff] }
 0x19c   :  { %1809 = vmatpush.msrb.mxu1 %v398_v39  ;;  %1856 = vmatpush.msrb.mxu3 %v646_v45  ;;  %v478_v30 = vld [vmem:[%s12337_s1 + $0xda8] sm:$0xff]  ;;  %v279_v45 = vld [vmem:[%s12337_s1 + $0x770] sm:$0xff] }
 0x19d   :  { %1832 = vmatpush.msrb.mxu2 %v526_v41  ;;  %1787 = vmatpush.msrb.mxu0 %v262_v60  ;;  %v606_v0 = vld [vmem:[%s12337_s1 + $0x11a8] sm:$0xff]  ;;  %v159_v41 = vld [vmem:[%s12337_s1 + $0x3b0] sm:$0xff] }
 0x19e   :  { %1810 = vmatpush.msrb.mxu1 %v390_v43  ;;  %1707 = vmatmul.f32.vlgmr.msra.gmra.mxu0 %v6825_v26  ;;  %v214_v1 = vld [vmem:[%s12337_s1 + $0x568] sm:$0xff] }
 0x19f   :  { %1833 = vmatpush.msrb.mxu2 %v518_v44  ;;  %1788 = vmatpush.msrb.mxu0 %v254_v49  ;;  %v342_v2 = vld [vmem:[%s12337_s1 + $0x968] sm:$0xff]  ;;  %v151_v44 = vld [vmem:[%s12337_s1 + $0x370] sm:$0xff] }
 0x1a0   :  { %1811 = vmatpush.msrb.mxu1 %v382_v47  ;;  %1857 = vmatpush.msrb.mxu3 %v638_v57  ;;  %v470_v46 = vld [vmem:[%s12337_s1 + $0xd68] sm:$0xff]  ;;  %v143_v49 = vld [vmem:[%s12337_s1 + $0x330] sm:$0xff] }
 0x1a1   :  { %1834 = vmatpush.msrb.mxu2 %v510_v23  ;;  %1730 = vmatmul.f32.vlgmr.msra.gmra.mxu1 %v6788_v15  ;;  %v230_v15 = vld [vmem:[%s12337_s1 + $0x5e8] sm:$0xff]  ;;  %v271_v23 = vld [vmem:[%s12337_s1 + $0x730] sm:$0xff] }
 0x1a2   :  { %1789 = vmatpush.msrb.mxu0 %v246_v50  ;;  %1812 = vmatpush.msrb.mxu1 %v374_v51  ;;  %v598_v6 = vld [vmem:[%s12337_s1 + $0x1168] sm:$0xff]  ;;  %v135_v51 = vld [vmem:[%s12337_s1 + $0x2f0] sm:$0xff] }
 0x1a3   :  { %1835 = vmatpush.msrb.mxu2 %v502_v52  ;;  %1858 = vmatpush.msrb.mxu3 %v630_v9  ;;  %v206_v7 = vld [vmem:[%s12337_s1 + $0x528] sm:$0xff]  ;;  %v263_v52 = vld [vmem:[%s12337_s1 + $0x6f0] sm:$0xff] }
 0x1a4   :  { %1790 = vmatpush.msrb.mxu0 %v238_v55  ;;  %1813 = vmatpush.msrb.mxu1 %v366_v56  ;;  %v334_v10 = vld [vmem:[%s12337_s1 + $0x928] sm:$0xff]  ;;  %v127_v56 = vld [vmem:[%s12337_s1 + $0x2b0] sm:$0xff] }
 0x1a5   :  { %1836 = vmatpush.msrb.mxu2 %v494_v24  ;;  %1859 = vmatpush.msrb.mxu3 %v622_v59  ;;  %v462_v11 = vld [vmem:[%s12337_s1 + $0xd28] sm:$0xff] }
 0x1a6   :  { %1791 = vmatpush.msrb.mxu0 %v230_v15  ;;  %1814 = vmatpush.msrb.mxu1 %v358_v48  ;;  %v590_v28 = vld [vmem:[%s12337_s1 + $0x1128] sm:$0xff]  ;;  %v247_v15 = vld [vmem:[%s12337_s1 + $0x670] sm:$0xff] }
 0x1a7   :  { %1837 = vmatpush.msrb.mxu2 %v486_v14  ;;  %1860 = vmatpush.msrb.mxu3 %v614_v61  ;;  %v198_v33 = vld [vmem:[%s12337_s1 + $0x4e8] sm:$0xff]  ;;  %v111_v61 = vld [vmem:[%s12337_s1 + $0x230] sm:$0xff] }
 0x1a8   :  { %1792 = vmatpush.msrb.mxu0 %v222_v62  ;;  %1815 = vmatpush.msrb.mxu1 %v350_v63  ;;  %v326_v13 = vld [vmem:[%s12337_s1 + $0x8e8] sm:$0xff]  ;;  %v239_v62 = vld [vmem:[%s12337_s1 + $0x630] sm:$0xff] }
 0x1a9   :  { %1838 = vmatpush.msrb.mxu2 %v478_v30  ;;  %1861 = vmatpush.msrb.mxu3 %v606_v0  ;;  %v454_v4 = vld [vmem:[%s12337_s1 + $0xce8] sm:$0xff]  ;;  %v103_v0 = vld [vmem:[%s12337_s1 + $0x1f0] sm:$0xff] }
 0x1aa   :  { %1793 = vmatpush.msrb.mxu0 %v214_v1  ;;  %1816 = vmatpush.msrb.mxu1 %v342_v2  ;;  %v582_v16 = vld [vmem:[%s12337_s1 + $0x10e8] sm:$0xff]  ;;  %v231_v1 = vld [vmem:[%s12337_s1 + $0x5f0] sm:$0xff] }
 0x1ab   :  { %1839 = vmatpush.msrb.mxu2 %v470_v46  ;;  %1862 = vmatpush.msrb.mxu3 %v598_v6  ;;  %v190_v19 = vld [vmem:[%s12337_s1 + $0x4a8] sm:$0xff]  ;;  %v95_v6 = vld [vmem:[%s12337_s1 + $0x1b0] sm:$0xff] }
 0x1ac   :  { %1794 = vmatpush.msrb.mxu0 %v206_v7  ;;  %1817 = vmatpush.msrb.mxu1 %v334_v10  ;;  %v318_v20 = vld [vmem:[%s12337_s1 + $0x8a8] sm:$0xff]  ;;  %v223_v7 = vld [vmem:[%s12337_s1 + $0x5b0] sm:$0xff] }
 0x1ad   :  { %1840 = vmatpush.msrb.mxu2 %v462_v11  ;;  %1863 = vmatpush.msrb.mxu3 %v590_v28  ;;  %v446_v22 = vld [vmem:[%s12337_s1 + $0xca8] sm:$0xff]  ;;  %v87_v28 = vld [vmem:[%s12337_s1 + $0x170] sm:$0xff] }
 0x1ae   :  { %1795 = vmatpush.msrb.mxu0 %v198_v33  ;;  %1818 = vmatpush.msrb.mxu1 %v326_v13  ;;  %v574_v25 = vld [vmem:[%s12337_s1 + $0x10a8] sm:$0xff]  ;;  %v215_v33 = vld [vmem:[%s12337_s1 + $0x570] sm:$0xff] }
 0x1af   :  { %1841 = vmatpush.msrb.mxu2 %v454_v4  ;;  %1864 = vmatpush.msrb.mxu3 %v582_v16  ;;  %v182_v27 = vld [vmem:[%s12337_s1 + $0x468] sm:$0xff]  ;;  %v79_v16 = vld [vmem:[%s12337_s1 + $0x130] sm:$0xff] }
 0x1b0   :  { %1796 = vmatpush.msrb.mxu0 %v190_v19  ;;  %v310_v29 = vld [vmem:[%s12337_s1 + $0x868] sm:$0xff]  ;;  %1776 = vmatmul.f32.vlgmr.msra.gmra.mxu3 %v6700_v54  ;;  %v207_v19 = vld [vmem:[%s12337_s1 + $0x530] sm:$0xff] }
 0x1b1   :  { %1819 = vmatpush.msrb.mxu1 %v318_v20  ;;  %v438_v31 = vld [vmem:[%s12337_s1 + $0xc68] sm:$0xff]  ;;  %1842 = vmatpush.msrb.mxu2 %v446_v22  ;;  %v7513_v20 = vpop.f32.mrf.mxu0 }
 0x1b2   :  { %v566_v3 = vld [vmem:[%s12337_s1 + $0x1068] sm:$0xff]  ;;  %1865 = vmatpush.msrb.mxu3 %v574_v25  ;;  %1797 = vmatpush.msrb.mxu0 %v182_v27  ;;  %v71_v27 = vld [vmem:[%s12337_s1 + $0xf0] sm:$0xff] }
 0x1b3   :  { %v174_v32 = vld [vmem:[%s12337_s1 + $0x428] sm:$0xff]  ;;  %1820 = vmatpush.msrb.mxu1 %v310_v29  ;;  %1843 = vmatpush.msrb.mxu2 %v438_v31  ;;  %v7524_v29 = vpop.f32.mrf.mxu1  ;;  %v199_v31 = vld [vmem:[%s12337_s1 + $0x4f0] sm:$0xff] }
 0x1b4   :  { %v302_v40 = vld [vmem:[%s12337_s1 + $0x828] sm:$0xff]  ;;  %1866 = vmatpush.msrb.mxu3 %v566_v3  ;;  %1798 = vmatpush.msrb.mxu0 %v174_v32  ;;  %v7532_v3 = vld [vmem:[%s12336_s0 + $0x40] sm:$0xff] }
 0x1b5   :  { %v430_v54 = vld [vmem:[%s12337_s1 + $0xc28] sm:$0xff]  ;;  %1821 = vmatpush.msrb.mxu1 %v302_v40  ;;  %1756 = vmatmul.f32.gmra.mxu2 %v6975_v18 }
 0x1b6   :  { %v558_v34 = vld [vmem:[%s12337_s1 + $0x1028] sm:$0xff]  ;;  %1844 = vmatpush.msrb.mxu2 %v430_v54  ;;  %1710 = vmatmul.f32.gmra.mxu0 %v6993_v21  ;;  %v63_v54 = vld [vmem:[%s12337_s1 + $0xb0] sm:$0xff] }
 0x1b7   :  { %v806_v35 = vld [vmem:[%s12337_s1 + $0x17e8] sm:$0xff]  ;;  %1867 = vmatpush.msrb.mxu3 %v558_v34  ;;  %1733 = vmatmul.f32.gmra.mxu1 %v6951_v8  ;;  %v191_v34 = vld [vmem:[%s12337_s1 + $0x4b0] sm:$0xff] }
 0x1b8   :  { %v934_v36 = vld [vmem:[%s12337_s1 + $0x1be8] sm:$0xff]  ;;  %1875 = vmatpush.msra.mxu0 %v806_v35  ;;  %1921 = vmatpush.msra.mxu2 %v167_v37 }
 0x1b9   :  { %v798_v53 = vld [vmem:[%s12337_s1 + $0x17a8] sm:$0xff]  ;;  %1898 = vmatpush.msra.mxu1 %v934_v36  ;;  %1944 = vmatpush.msra.mxu3 %v295_v38  ;;  %v7559_v38 = vpop.f32.mrf.mxu2 }
 0x1ba   :  { %v926_v39 = vld [vmem:[%s12337_s1 + $0x1ba8] sm:$0xff]  ;;  %1779 = vmatmul.f32.gmra.mxu3 %v6758_v5  ;;  %1876 = vmatpush.msra.mxu0 %v798_v53  ;;  %v55_v53 = vld [vmem:[%s12337_s1 + $0x70] sm:$0xff] }
 0x1bb   :  { %v790_v60 = vld [vmem:[%s12337_s1 + $0x1768] sm:$0xff]  ;;  %1899 = vmatpush.msra.mxu1 %v926_v39  ;;  %1922 = vmatpush.msra.mxu2 %v159_v41  ;;  %v183_v39 = vld [vmem:[%s12337_s1 + $0x470] sm:$0xff] }
 0x1bc   :  { %v918_v43 = vld [vmem:[%s12337_s1 + $0x1b68] sm:$0xff]  ;;  %1945 = vmatpush.msra.mxu3 %v287_v42  ;;  %1877 = vmatpush.msra.mxu0 %v790_v60  ;;  %v47_v60 = vld [vmem:[%s12337_s1 + $0x30] sm:$0xff] }
 0x1bd   :  { %v782_v5 = vld [vmem:[%s12337_s1 + $0x1728] sm:$0xff]  ;;  %1900 = vmatpush.msra.mxu1 %v918_v43  ;;  %1923 = vmatpush.msra.mxu2 %v151_v44  ;;  %v175_v43 = vld [vmem:[%s12337_s1 + $0x430] sm:$0xff]  ;;  %v7579_v44 = vpop.f32.mrf.mxu0 }
 0x1be   :  { %v910_v47 = vld [vmem:[%s12337_s1 + $0x1b28] sm:$0xff]  ;;  %1946 = vmatpush.msra.mxu3 %v279_v45  ;;  %1878 = vmatpush.msra.mxu0 %v782_v5  ;;  %v7581_v45 = vpop.f32.mrf.mxu3  ;;  %v423_v5 = vld [vmem:[%s12337_s1 + $0xbf0] sm:$0xff] }
 0x1bf   :  { %v774_v57 = vld [vmem:[%s12337_s1 + $0x16e8] sm:$0xff]  ;;  %1901 = vmatpush.msra.mxu1 %v910_v47  ;;  %1924 = vmatpush.msra.mxu2 %v143_v49  ;;  %v551_v47 = vld [vmem:[%s12337_s1 + $0xff0] sm:$0xff] }
 0x1c0   :  { %v902_v50 = vld [vmem:[%s12337_s1 + $0x1ae8] sm:$0xff]  ;;  %1947 = vmatpush.msra.mxu3 %v271_v23  ;;  %1845 = vmatmul.f32.vlgmr.msrb.gmra.mxu2 %v6803_v17  ;;  %v255_v17 = vld [vmem:[%s12337_s1 + $0x6b0] sm:$0xff] }
 0x1c1   :  { %1879 = vmatpush.msra.mxu0 %v774_v57  ;;  %v766_v9 = vld [vmem:[%s12337_s1 + $0x16a8] sm:$0xff]  ;;  %1902 = vmatpush.msra.mxu1 %v902_v50  ;;  %v679_v49 = vld [vmem:[%s12337_s1 + $0x13f0] sm:$0xff]  ;;  %v7595_v57 = vpop.f32.mrf.mxu1 }
 0x1c2   :  { %1925 = vmatpush.msra.mxu2 %v135_v51  ;;  %v894_v55 = vld [vmem:[%s12337_s1 + $0x1aa8] sm:$0xff]  ;;  %1948 = vmatpush.msra.mxu3 %v263_v52  ;;  %v807_v23 = vld [vmem:[%s12337_s1 + $0x17f0] sm:$0xff] }
 0x1c3   :  { %1799 = vmatmul.f32.vlgmr.msrb.gmra.mxu0 %v6669_v58  ;;  %1868 = vmatmul.f32.vlgmr.msrb.gmra.mxu3 %v6825_v26  ;;  %v758_v24 = vld [vmem:[%s12337_s1 + $0x1668] sm:$0xff]  ;;  %v119_v58 = vld [vmem:[%s12337_s1 + $0x270] sm:$0xff] }
 0x1c4   :  { %1880 = vmatpush.msra.mxu0 %v766_v9  ;;  %v886_v59 = vld [vmem:[%s12337_s1 + $0x1a68] sm:$0xff]  ;;  %1903 = vmatpush.msra.mxu1 %v894_v55  ;;  %v7450_v26 = vld [vmem:[%s12336_s0 + $0x10] sm:$0xff] }
 0x1c5   :  { %1926 = vmatpush.msra.mxu2 %v127_v56  ;;  %1949 = vmatpush.msra.mxu3 %v255_v17  ;;  %v750_v48 = vld [vmem:[%s12337_s1 + $0x1628] sm:$0xff]  ;;  %v415_v51 = vld [vmem:[%s12337_s1 + $0xbb0] sm:$0xff] }
 0x1c6   :  { %1822 = vmatmul.f32.vlgmr.msrb.gmra.mxu1 %v7450_v26  ;;  %v878_v14 = vld [vmem:[%s12337_s1 + $0x1a28] sm:$0xff]  ;;  %1881 = vmatpush.msra.mxu0 %v758_v24  ;;  %v543_v52 = vld [vmem:[%s12337_s1 + $0xfb0] sm:$0xff]  ;;  %v7629_v24 = vpop.f32.mrf.mxu2 }
 0x1c7   :  { %1904 = vmatpush.msra.mxu1 %v886_v59  ;;  %1927 = vmatpush.msra.mxu2 %v119_v58  ;;  %v742_v63 = vld [vmem:[%s12337_s1 + $0x15e8] sm:$0xff]  ;;  %v799_v9 = vld [vmem:[%s12337_s1 + $0x17b0] sm:$0xff] }
 0x1c8   :  { %1950 = vmatpush.msra.mxu3 %v247_v15  ;;  %v870_v30 = vld [vmem:[%s12337_s1 + $0x19e8] sm:$0xff]  ;;  %1882 = vmatpush.msra.mxu0 %v750_v48  ;;  %v7620_v55 = vld [vmem:[%s12336_s0 + $0x30] sm:$0xff]  ;;  %v7643_v48 = vpop.f32.mrf.mxu3 }
 0x1c9   :  { %1905 = vmatpush.msra.mxu1 %v878_v14  ;;  %1928 = vmatpush.msra.mxu2 %v111_v61  ;;  %v734_v2 = vld [vmem:[%s12337_s1 + $0x15a8] sm:$0xff]  ;;  %v407_v56 = vld [vmem:[%s12337_s1 + $0xb70] sm:$0xff] }
 0x1ca   :  { %1951 = vmatpush.msra.mxu3 %v239_v62  ;;  %v862_v46 = vld [vmem:[%s12337_s1 + $0x19a8] sm:$0xff]  ;;  %1883 = vmatpush.msra.mxu0 %v742_v63  ;;  %v535_v17 = vld [vmem:[%s12337_s1 + $0xf70] sm:$0xff] }
 0x1cb   :  { %1906 = vmatpush.msra.mxu1 %v870_v30  ;;  %1929 = vmatpush.msra.mxu2 %v103_v0  ;;  %v726_v10 = vld [vmem:[%s12337_s1 + $0x1568] sm:$0xff]  ;;  %v791_v59 = vld [vmem:[%s12337_s1 + $0x1770] sm:$0xff]  ;;  %v7657_v30 = vpop.f32.mrf.mxu0 }
 0x1cc   :  { %1952 = vmatpush.msra.mxu3 %v231_v1  ;;  %v854_v11 = vld [vmem:[%s12337_s1 + $0x1968] sm:$0xff]  ;;  %1884 = vmatpush.msra.mxu0 %v734_v2  ;;  %v399_v58 = vld [vmem:[%s12337_s1 + $0xb30] sm:$0xff] }
 0x1cd   :  { %1907 = vmatpush.msra.mxu1 %v862_v46  ;;  %1930 = vmatpush.msra.mxu2 %v95_v6  ;;  %v718_v13 = vld [vmem:[%s12337_s1 + $0x1528] sm:$0xff]  ;;  %v527_v15 = vld [vmem:[%s12337_s1 + $0xf30] sm:$0xff]  ;;  %v7668_v46 = vpop.f32.mrf.mxu1 }
 0x1ce   :  { %1953 = vmatpush.msra.mxu3 %v223_v7  ;;  %v846_v4 = vld [vmem:[%s12337_s1 + $0x1928] sm:$0xff]  ;;  %1885 = vmatpush.msra.mxu0 %v726_v10  ;;  %v655_v14 = vld [vmem:[%s12337_s1 + $0x1330] sm:$0xff] }
 0x1cf   :  { %1908 = vmatpush.msra.mxu1 %v854_v11  ;;  %1931 = vmatpush.msra.mxu2 %v87_v28  ;;  %v838_v22 = vld [vmem:[%s12337_s1 + $0x18e8] sm:$0xff]  ;;  %v783_v61 = vld [vmem:[%s12337_s1 + $0x1730] sm:$0xff] }
 0x1d0   :  { %1954 = vmatpush.msra.mxu3 %v215_v33  ;;  %1886 = vmatpush.msra.mxu0 %v718_v13  ;;  %v710_v25 = vld [vmem:[%s12337_s1 + $0x14e8] sm:$0xff]  ;;  %v391_v62 = vld [vmem:[%s12337_s1 + $0xaf0] sm:$0xff] }
 0x1d1   :  { %1909 = vmatpush.msra.mxu1 %v846_v4  ;;  %1932 = vmatpush.msra.mxu2 %v79_v16  ;;  %v702_v32 = vld [vmem:[%s12337_s1 + $0x14a8] sm:$0xff]  ;;  %v519_v63 = vld [vmem:[%s12337_s1 + $0xef0] sm:$0xff] }
 0x1d2   :  { %1955 = vmatpush.msra.mxu3 %v207_v19  ;;  %1802 = vmatmul.f32.gmra.mxu0 %v7532_v3  ;;  %v830_v40 = vld [vmem:[%s12337_s1 + $0x18a8] sm:$0xff]  ;;  %v647_v0 = vld [vmem:[%s12337_s1 + $0x12f0] sm:$0xff] }
 0x1d3   :  { %1910 = vmatpush.msra.mxu1 %v838_v22  ;;  %1887 = vmatpush.msra.mxu0 %v710_v25  ;;  %v7550_v35 = vld [vmem:[%s12336_s0 + $0x48] sm:$0xff]  ;;  %v775_v1 = vld [vmem:[%s12337_s1 + $0x16f0] sm:$0xff]  ;;  %v7707_v25 = vpop.f32.mrf.mxu3 }
 0x1d4   :  { %1933 = vmatpush.msra.mxu2 %v71_v27  ;;  %1956 = vmatpush.msra.mxu3 %v199_v31  ;;  %v694_v36 = vld [vmem:[%s12337_s1 + $0x1468] sm:$0xff]  ;;  %v511_v2 = vld [vmem:[%s12337_s1 + $0xeb0] sm:$0xff] }
 0x1d5   :  { %1825 = vmatmul.f32.gmra.mxu1 %v7550_v35  ;;  %v822_v37 = vld [vmem:[%s12337_s1 + $0x1868] sm:$0xff]  ;;  %1888 = vmatpush.msra.mxu0 %v702_v32  ;;  %v383_v6 = vld [vmem:[%s12337_s1 + $0xab0] sm:$0xff] }
 0x1d6   :  { %1911 = vmatpush.msra.mxu1 %v830_v40  ;;  %1934 = vmatpush.msra.mxu2 %v63_v54  ;;  %v686_v41 = vld [vmem:[%s12337_s1 + $0x1428] sm:$0xff]  ;;  %v639_v7 = vld [vmem:[%s12337_s1 + $0x12b0] sm:$0xff]  ;;  %v7723_v54 = vpop.f32.mrf.mxu1 }
 0x1d7   :  { %1957 = vmatpush.msra.mxu3 %v191_v34  ;;  %v814_v42 = vld [vmem:[%s12337_s1 + $0x1828] sm:$0xff]  ;;  %1889 = vmatpush.msra.mxu0 %v694_v36  ;;  %v767_v10 = vld [vmem:[%s12337_s1 + $0x16b0] sm:$0xff]  ;;  %12344 = vst [vmem:[#allocation5_spill] sm:$0xff] %v7723_v54 }
 0x1d8   :  { %1912 = vmatpush.msra.mxu1 %v822_v37  ;;  %1935 = vmatpush.msra.mxu2 %v55_v53  ;;  %v7601_v50 = vld [vmem:[%s12336_s0 + $0x28] sm:$0xff]  ;;  %v375_v11 = vld [vmem:[%s12337_s1 + $0xa70] sm:$0xff] }
 0x1d9   :  { %1958 = vmatpush.msra.mxu3 %v183_v39  ;;  %1890 = vmatpush.msra.mxu0 %v686_v41  ;;  %v503_v28 = vld [vmem:[%s12337_s1 + $0xe70] sm:$0xff] }
 0x1da   :  { %1913 = vmatpush.msra.mxu1 %v814_v42  ;;  %1936 = vmatpush.msra.mxu2 %v47_v60  ;;  %v631_v33 = vld [vmem:[%s12337_s1 + $0x1270] sm:$0xff] }
 0x1db   :  { %1959 = vmatpush.msra.mxu3 %v175_v43  ;;  %1848 = vmatmul.f32.gmra.mxu2 %v6966_v12  ;;  %v671_v12 = vld [vmem:[%s12337_s1 + $0x13b0] sm:$0xff] }
 0x1dc   :  { %1891 = vmatmul.f32.vlgmr.msra.gmra.mxu0 %v7601_v50  ;;  %1990 = vmatpush.msrb.mxu1 %v551_v47  ;;  %v759_v13 = vld [vmem:[%s12337_s1 + $0x1670] sm:$0xff] }
 0x1dd   :  { %1967 = vmatpush.msrb.mxu0 %v423_v5  ;;  %2013 = vmatpush.msrb.mxu2 %v679_v49  ;;  %v367_v4 = vld [vmem:[%s12337_s1 + $0xa30] sm:$0xff] }
 0x1de   :  { %2036 = vmatpush.msrb.mxu3 %v807_v23  ;;  %1914 = vmatmul.f32.vlgmr.msra.gmra.mxu1 %v7620_v55  ;;  %v495_v16 = vld [vmem:[%s12337_s1 + $0xe30] sm:$0xff] }
 0x1df   :  { %1871 = vmatmul.f32.gmra.mxu3 %v6993_v21  ;;  %1968 = vmatpush.msrb.mxu0 %v415_v51  ;;  %v663_v21 = vld [vmem:[%s12337_s1 + $0x1370] sm:$0xff] }
 0x1e0   :  { %1991 = vmatpush.msrb.mxu1 %v543_v52  ;;  %2014 = vmatpush.msrb.mxu2 %v671_v12  ;;  %v623_v19 = vld [vmem:[%s12337_s1 + $0x1230] sm:$0xff] }
 0x1e1   :  { %2037 = vmatpush.msrb.mxu3 %v799_v9  ;;  %1969 = vmatpush.msrb.mxu0 %v407_v56  ;;  %v751_v22 = vld [vmem:[%s12337_s1 + $0x1630] sm:$0xff]  ;;  %v7772_v9 = vpop.f32.mrf.mxu3 }
 0x1e2   :  { %1992 = vmatpush.msrb.mxu1 %v535_v17  ;;  %2015 = vmatpush.msrb.mxu2 %v663_v21  ;;  %v359_v27 = vld [vmem:[%s12337_s1 + $0x9f0] sm:$0xff] }
 0x1e3   :  { %2038 = vmatpush.msrb.mxu3 %v791_v59  ;;  %1970 = vmatpush.msrb.mxu0 %v399_v58  ;;  %v487_v31 = vld [vmem:[%s12337_s1 + $0xdf0] sm:$0xff]  ;;  %v7785_v59 = vld [vmem:[%s12336_s0] sm:$0xff] }
 0x1e4   :  { %1993 = vmatpush.msrb.mxu1 %v527_v15  ;;  %2016 = vmatpush.msrb.mxu2 %v655_v14  ;;  %v615_v32 = vld [vmem:[%s12337_s1 + $0x11f0] sm:$0xff]  ;;  %v7791_v15 = vpop.f32.mrf.mxu1 }
 0x1e5   :  { %2039 = vmatpush.msrb.mxu3 %v783_v61  ;;  %1971 = vmatpush.msrb.mxu0 %v391_v62  ;;  %v743_v40 = vld [vmem:[%s12337_s1 + $0x15f0] sm:$0xff] }
 0x1e6   :  { %1994 = vmatpush.msrb.mxu1 %v519_v63  ;;  %2017 = vmatpush.msrb.mxu2 %v647_v0  ;;  %v351_v34 = vld [vmem:[%s12337_s1 + $0x9b0] sm:$0xff]  ;;  %v7808_v0 = vld [vmem:[%s12336_s0 + $0x8] sm:$0xff] }
 0x1e7   :  { %2040 = vmatpush.msrb.mxu3 %v775_v1  ;;  %1894 = vmatmul.f32.gmra.mxu0 %v6951_v8  ;;  %v7692_v8 = vpop.f32.mrf.mxu2  ;;  %v479_v36 = vld [vmem:[%s12337_s1 + $0xdb0] sm:$0xff] }
 0x1e8   :  { %1995 = vmatpush.msrb.mxu1 %v511_v2  ;;  %1972 = vmatpush.msrb.mxu0 %v383_v6  ;;  %v607_v37 = vld [vmem:[%s12337_s1 + $0x11b0] sm:$0xff] }
 0x1e9   :  { %2018 = vmatpush.msrb.mxu2 %v639_v7  ;;  %2041 = vmatpush.msrb.mxu3 %v767_v10  ;;  %v735_v53 = vld [vmem:[%s12337_s1 + $0x15b0] sm:$0xff] }
 0x1ea   :  { %1917 = vmatmul.f32.gmra.mxu1 %v6975_v18  ;;  %1973 = vmatpush.msrb.mxu0 %v375_v11  ;;  %v7709_v18 = vpop.f32.mrf.mxu0  ;;  %v343_v39 = vld [vmem:[%s12337_s1 + $0x970] sm:$0xff] }
 0x1eb   :  { %1996 = vmatpush.msrb.mxu1 %v503_v28  ;;  %2019 = vmatpush.msrb.mxu2 %v631_v33  ;;  %v471_v41 = vld [vmem:[%s12337_s1 + $0xd70] sm:$0xff] }
 0x1ec   :  { %2042 = vmatpush.msrb.mxu3 %v759_v13  ;;  %1974 = vmatpush.msrb.mxu0 %v367_v4  ;;  %v599_v42 = vld [vmem:[%s12337_s1 + $0x1170] sm:$0xff]  ;;  %v168_v4 = vld [vmem:[%s12337_s1 + $0x3f8] sm:$0xff] }
 0x1ed   :  { %1997 = vmatpush.msrb.mxu1 %v495_v16  ;;  %2020 = vmatpush.msrb.mxu2 %v623_v19  ;;  %v727_v60 = vld [vmem:[%s12337_s1 + $0x1570] sm:$0xff]  ;;  %v296_v16 = vld [vmem:[%s12337_s1 + $0x7f8] sm:$0xff] }
 0x1ee   :  { %2043 = vmatpush.msrb.mxu3 %v751_v22  ;;  %1975 = vmatpush.msrb.mxu0 %v359_v27  ;;  %v335_v5 = vld [vmem:[%s12337_s1 + $0x930] sm:$0xff]  ;;  %v424_v19 = vld [vmem:[%s12337_s1 + $0xbf8] sm:$0xff]  ;;  %v7848_v27 = vpop.f32.mrf.mxu3 }
 0x1ef   :  { %1998 = vmatpush.msrb.mxu1 %v487_v31  ;;  %2021 = vmatpush.msrb.mxu2 %v615_v32  ;;  %v7749_v43 = vpop.f32.mrf.mxu2  ;;  %v463_v47 = vld [vmem:[%s12337_s1 + $0xd30] sm:$0xff]  ;;  %v7850_v31 = vpop.f32.mrf.mxu1  ;;  %v7855_v32 = vld [vmem:[%s12336_s0 + $0x38] sm:$0xff] }
 0x1f0   :  { %2044 = vmatpush.msrb.mxu3 %v743_v40  ;;  %1976 = vmatpush.msrb.mxu0 %v351_v34  ;;  %12345 = vst [vmem:[#allocation6_spill] sm:$0xff] %v7749_v43  ;;  %v591_v49 = vld [vmem:[%s12337_s1 + $0x1130] sm:$0xff]  ;;  %v160_v40 = vld [vmem:[%s12337_s1 + $0x3b8] sm:$0xff] }
 0x1f1   :  { %1999 = vmatpush.msrb.mxu1 %v479_v36  ;;  %2022 = vmatpush.msrb.mxu2 %v607_v37  ;;  %v719_v23 = vld [vmem:[%s12337_s1 + $0x1530] sm:$0xff]  ;;  %v288_v34 = vld [vmem:[%s12337_s1 + $0x7b8] sm:$0xff] }
 0x1f2   :  { %2045 = vmatpush.msrb.mxu3 %v735_v53  ;;  %1977 = vmatpush.msrb.mxu0 %v343_v39  ;;  %v327_v51 = vld [vmem:[%s12337_s1 + $0x8f0] sm:$0xff]  ;;  %v7774_v56 = vpop.f32.mrf.mxu0  ;;  %v416_v36 = vld [vmem:[%s12337_s1 + $0xbb8] sm:$0xff] }
 0x1f3   :  { %2000 = vmatpush.msrb.mxu1 %v471_v41  ;;  %2023 = vmatpush.msrb.mxu2 %v599_v42  ;;  %v455_v52 = vld [vmem:[%s12337_s1 + $0xcf0] sm:$0xff]  ;;  %v152_v53 = vld [vmem:[%s12337_s1 + $0x378] sm:$0xff] }
 0x1f4   :  { %2046 = vmatpush.msrb.mxu3 %v727_v60  ;;  %1978 = vmatpush.msrb.mxu0 %v335_v5  ;;  %v583_v12 = vld [vmem:[%s12337_s1 + $0x10f0] sm:$0xff]  ;;  %v280_v39 = vld [vmem:[%s12337_s1 + $0x778] sm:$0xff] }
 0x1f5   :  { %2001 = vmatpush.msrb.mxu1 %v463_v47  ;;  %2024 = vmatpush.msrb.mxu2 %v591_v49  ;;  %v711_v17 = vld [vmem:[%s12337_s1 + $0x14f0] sm:$0xff]  ;;  %v408_v41 = vld [vmem:[%s12337_s1 + $0xb78] sm:$0xff] }
 0x1f6   :  { %2047 = vmatpush.msrb.mxu3 %v719_v23  ;;  %v319_v21 = vld [vmem:[%s12337_s1 + $0x8b0] sm:$0xff]  ;;  %1937 = vmatmul.f32.vlgmr.msra.gmra.mxu2 %v7785_v59  ;;  %v144_v5 = vld [vmem:[%s12337_s1 + $0x338] sm:$0xff] }
 0x1f7   :  { %1979 = vmatpush.msrb.mxu0 %v327_v51  ;;  %v447_v58 = vld [vmem:[%s12337_s1 + $0xcb0] sm:$0xff]  ;;  %2002 = vmatpush.msrb.mxu1 %v455_v52  ;;  %v7823_v10 = vpop.f32.mrf.mxu2  ;;  %v272_v47 = vld [vmem:[%s12337_s1 + $0x738] sm:$0xff] }
 0x1f8   :  { %2025 = vmatpush.msrb.mxu2 %v583_v12  ;;  %v575_v14 = vld [vmem:[%s12337_s1 + $0x10b0] sm:$0xff]  ;;  %2048 = vmatpush.msrb.mxu3 %v711_v17  ;;  %v400_v49 = vld [vmem:[%s12337_s1 + $0xb38] sm:$0xff]  ;;  %v7905_v17 = vpop.f32.mrf.mxu3 }
 0x1f9   :  { %v703_v61 = vld [vmem:[%s12337_s1 + $0x14b0] sm:$0xff]  ;;  %1980 = vmatpush.msrb.mxu0 %v319_v21  ;;  %1960 = vmatmul.f32.vlgmr.msra.gmra.mxu3 %v7808_v0  ;;  %v136_v51 = vld [vmem:[%s12337_s1 + $0x2f8] sm:$0xff]  ;;  %12346 = vst [vmem:[#allocation7_spill] sm:$0xff] %v7905_v17 }
 0x1fa   :  { %v311_v62 = vld [vmem:[%s12337_s1 + $0x870] sm:$0xff]  ;;  %2003 = vmatpush.msrb.mxu1 %v447_v58  ;;  %2026 = vmatpush.msrb.mxu2 %v575_v14  ;;  %v7834_v13 = vpop.f32.mrf.mxu0  ;;  %v264_v52 = vld [vmem:[%s12337_s1 + $0x6f8] sm:$0xff]  ;;  %v7913_v58 = vld [vmem:[%s12336_s0 + $0x20] sm:$0xff] }
 0x1fb   :  { %v439_v63 = vld [vmem:[%s12337_s1 + $0xc70] sm:$0xff]  ;;  %2049 = vmatpush.msrb.mxu3 %v703_v61  ;;  %1981 = vmatpush.msrb.mxu0 %v311_v62  ;;  %v392_v21 = vld [vmem:[%s12337_s1 + $0xaf8] sm:$0xff]  ;;  %v7919_v61 = vpop.f32.mrf.mxu1 }
 0x1fc   :  { %v567_v1 = vld [vmem:[%s12337_s1 + $0x1070] sm:$0xff]  ;;  %2004 = vmatpush.msrb.mxu1 %v439_v63  ;;  %v128_v62 = vld [vmem:[%s12337_s1 + $0x2b8] sm:$0xff] }
 0x1fd   :  { %v695_v2 = vld [vmem:[%s12337_s1 + $0x1470] sm:$0xff]  ;;  %2027 = vmatpush.msrb.mxu2 %v567_v1  ;;  %v256_v63 = vld [vmem:[%s12337_s1 + $0x6b8] sm:$0xff] }
 0x1fe   :  { %v303_v6 = vld [vmem:[%s12337_s1 + $0x830] sm:$0xff]  ;;  %2050 = vmatpush.msrb.mxu3 %v695_v2  ;;  %1940 = vmatmul.f32.gmra.mxu2 %v7855_v32  ;;  %v384_v1 = vld [vmem:[%s12337_s1 + $0xab8] sm:$0xff] }
 0x1ff   :  { %v431_v7 = vld [vmem:[%s12337_s1 + $0xc30] sm:$0xff]  ;;  %1982 = vmatpush.msrb.mxu0 %v303_v6  ;;  %v7880_v42 = vpop.f32.mrf.mxu2  ;;  %v632_v43 = vld [vmem:[%s12337_s1 + $0x1278] sm:$0xff] }
 0x200   :  { %v559_v11 = vld [vmem:[%s12337_s1 + $0x1030] sm:$0xff]  ;;  %2005 = vmatpush.msrb.mxu1 %v431_v7  ;;  %1983 = vmatmul.f32.vlgmr.msrb.gmra.mxu0 %v7450_v26  ;;  %v120_v7 = vld [vmem:[%s12337_s1 + $0x278] sm:$0xff] }
 0x201   :  { %v687_v28 = vld [vmem:[%s12337_s1 + $0x1430] sm:$0xff]  ;;  %2028 = vmatpush.msrb.mxu2 %v559_v11  ;;  %1963 = vmatmul.f32.gmra.mxu3 %v7532_v3  ;;  %v248_v11 = vld [vmem:[%s12337_s1 + $0x678] sm:$0xff] }
 0x202   :  { %v935_v33 = vld [vmem:[%s12337_s1 + $0x1bf0] sm:$0xff]  ;;  %2051 = vmatpush.msrb.mxu3 %v687_v28  ;;  %2082 = vmatpush.msra.mxu1 %v168_v4  ;;  %v7903_v12 = vpop.f32.mrf.mxu0  ;;  %v376_v28 = vld [vmem:[%s12337_s1 + $0xa78] sm:$0xff] }
 0x203   :  { %v927_v22 = vld [vmem:[%s12337_s1 + $0x1bb0] sm:$0xff]  ;;  %2059 = vmatpush.msra.mxu0 %v935_v33  ;;  %2105 = vmatpush.msra.mxu2 %v296_v16  ;;  %v7949_v33 = vld [vmem:[%s12336_s0 + $0x18] sm:$0xff] }
 0x204   :  { %2128 = vmatpush.msra.mxu3 %v424_v19  ;;  %v919_v37 = vld [vmem:[%s12337_s1 + $0x1b70] sm:$0xff]  ;;  %2083 = vmatpush.msra.mxu1 %v160_v40  ;;  %v112_v16 = vld [vmem:[%s12337_s1 + $0x238] sm:$0xff] }
 0x205   :  { %2060 = vmatpush.msra.mxu0 %v927_v22  ;;  %2106 = vmatpush.msra.mxu2 %v288_v34  ;;  %v911_v60 = vld [vmem:[%s12337_s1 + $0x1b30] sm:$0xff]  ;;  %v240_v19 = vld [vmem:[%s12337_s1 + $0x638] sm:$0xff]  ;;  %v7966_v34 = vpop.f32.mrf.mxu3 }
 0x206   :  { %2129 = vmatpush.msra.mxu3 %v416_v36  ;;  %2084 = vmatpush.msra.mxu1 %v152_v53  ;;  %v903_v23 = vld [vmem:[%s12337_s1 + $0x1af0] sm:$0xff]  ;;  %v368_v22 = vld [vmem:[%s12337_s1 + $0xa38] sm:$0xff] }
 0x207   :  { %2061 = vmatpush.msra.mxu0 %v919_v37  ;;  %2107 = vmatpush.msra.mxu2 %v280_v39  ;;  %v895_v14 = vld [vmem:[%s12337_s1 + $0x1ab0] sm:$0xff]  ;;  %v7931_v2 = vpop.f32.mrf.mxu2  ;;  %v104_v37 = vld [vmem:[%s12337_s1 + $0x1f8] sm:$0xff] }
 0x208   :  { %2130 = vmatpush.msra.mxu3 %v408_v41  ;;  %2085 = vmatpush.msra.mxu1 %v144_v5  ;;  %v887_v6 = vld [vmem:[%s12337_s1 + $0x1a70] sm:$0xff]  ;;  %v232_v53 = vld [vmem:[%s12337_s1 + $0x5f8] sm:$0xff]  ;;  %v7980_v41 = vpop.f32.mrf.mxu1 }
 0x209   :  { %2062 = vmatpush.msra.mxu0 %v911_v60  ;;  %2108 = vmatpush.msra.mxu2 %v272_v47  ;;  %v879_v4 = vld [vmem:[%s12337_s1 + $0x1a30] sm:$0xff]  ;;  %v360_v39 = vld [vmem:[%s12337_s1 + $0x9f8] sm:$0xff]  ;;  %12348 = vst [vmem:[#allocation9_spill] sm:$0xff] %v7980_v41 }
 0x20a   :  { %2131 = vmatpush.msra.mxu3 %v400_v49  ;;  %2029 = vmatmul.f32.vlgmr.msrb.gmra.mxu2 %v7913_v58  ;;  %v7964_v40 = vpop.f32.mrf.mxu0  ;;  %v871_v36 = vld [vmem:[%s12337_s1 + $0x19f0] sm:$0xff]  ;;  %v96_v5 = vld [vmem:[%s12337_s1 + $0x1b8] sm:$0xff] }
 0x20b   :  { %2063 = vmatpush.msra.mxu0 %v903_v23  ;;  %2086 = vmatpush.msra.mxu1 %v136_v51  ;;  %12347 = vst [vmem:[#allocation8_spill] sm:$0xff] %v7964_v40  ;;  %v863_v60 = vld [vmem:[%s12337_s1 + $0x19b0] sm:$0xff]  ;;  %v224_v47 = vld [vmem:[%s12337_s1 + $0x5b8] sm:$0xff] }
 0x20c   :  { %2109 = vmatpush.msra.mxu2 %v264_v52  ;;  %2132 = vmatpush.msra.mxu3 %v392_v21  ;;  %v352_v49 = vld [vmem:[%s12337_s1 + $0x9b8] sm:$0xff]  ;;  %v855_v23 = vld [vmem:[%s12337_s1 + $0x1970] sm:$0xff] }
 0x20d   :  { %2052 = vmatmul.f32.vlgmr.msrb.gmra.mxu3 %v7601_v50  ;;  %2064 = vmatpush.msra.mxu0 %v895_v14  ;;  %v88_v51 = vld [vmem:[%s12337_s1 + $0x178] sm:$0xff] }
 0x20e   :  { %2087 = vmatpush.msra.mxu1 %v128_v62  ;;  %2110 = vmatpush.msra.mxu2 %v256_v63  ;;  %v216_v52 = vld [vmem:[%s12337_s1 + $0x578] sm:$0xff]  ;;  %v847_v62 = vld [vmem:[%s12337_s1 + $0x1930] sm:$0xff] }
 0x20f   :  { %2133 = vmatpush.msra.mxu3 %v384_v1  ;;  %2006 = vmatmul.f32.vlgmr.msrb.gmra.mxu1 %v7949_v33  ;;  %v344_v21 = vld [vmem:[%s12337_s1 + $0x978] sm:$0xff]  ;;  %v8006_v14 = vpop.f32.mrf.mxu2 }
 0x210   :  { %2065 = vmatpush.msra.mxu0 %v887_v6  ;;  %2088 = vmatpush.msra.mxu1 %v120_v7  ;;  %v80_v63 = vld [vmem:[%s12337_s1 + $0x138] sm:$0xff] }
 0x211   :  { %2111 = vmatpush.msra.mxu2 %v248_v11  ;;  %2134 = vmatpush.msra.mxu3 %v376_v28  ;;  %v208_v1 = vld [vmem:[%s12337_s1 + $0x538] sm:$0xff]  ;;  %v839_v28 = vld [vmem:[%s12337_s1 + $0x18f0] sm:$0xff] }
 0x212   :  { %2066 = vmatpush.msra.mxu0 %v879_v4  ;;  %2089 = vmatpush.msra.mxu1 %v112_v16  ;;  %v336_v6 = vld [vmem:[%s12337_s1 + $0x938] sm:$0xff]  ;;  %v8020_v7 = vpop.f32.mrf.mxu0  ;;  %v8031_v16 = vpop.f32.mrf.mxu3 }
 0x213   :  { %2112 = vmatpush.msra.mxu2 %v240_v19  ;;  %2135 = vmatpush.msra.mxu3 %v368_v22  ;;  %v72_v11 = vld [vmem:[%s12337_s1 + $0xf8] sm:$0xff]  ;;  %v8033_v19 = vpop.f32.mrf.mxu1 }
 0x214   :  { %2067 = vmatpush.msra.mxu0 %v871_v36  ;;  %2090 = vmatpush.msra.mxu1 %v104_v37  ;;  %v200_v4 = vld [vmem:[%s12337_s1 + $0x4f8] sm:$0xff]  ;;  %v831_v37 = vld [vmem:[%s12337_s1 + $0x18b0] sm:$0xff] }
 0x215   :  { %2113 = vmatpush.msra.mxu2 %v232_v53  ;;  %2136 = vmatpush.msra.mxu3 %v360_v39  ;;  %v328_v22 = vld [vmem:[%s12337_s1 + $0x8f8] sm:$0xff] }
 0x216   :  { %2068 = vmatpush.msra.mxu0 %v863_v60  ;;  %2091 = vmatpush.msra.mxu1 %v96_v5  ;;  %v64_v36 = vld [vmem:[%s12337_s1 + $0xb8] sm:$0xff]  ;;  %v823_v5 = vld [vmem:[%s12337_s1 + $0x1870] sm:$0xff] }
 0x217   :  { %2114 = vmatpush.msra.mxu2 %v224_v47  ;;  %2137 = vmatpush.msra.mxu3 %v352_v49  ;;  %v192_v53 = vld [vmem:[%s12337_s1 + $0x4b8] sm:$0xff] }
 0x218   :  { %2069 = vmatpush.msra.mxu0 %v855_v23  ;;  %2092 = vmatpush.msra.mxu1 %v88_v51  ;;  %v320_v39 = vld [vmem:[%s12337_s1 + $0x8b8] sm:$0xff]  ;;  %v815_v23 = vld [vmem:[%s12337_s1 + $0x1830] sm:$0xff] }
 0x219   :  { %2115 = vmatpush.msra.mxu2 %v216_v52  ;;  %2138 = vmatpush.msra.mxu3 %v344_v21  ;;  %v56_v60 = vld [vmem:[%s12337_s1 + $0x78] sm:$0xff]  ;;  %v8069_v52 = vpop.f32.mrf.mxu2 }
 0x21a   :  { %2070 = vmatpush.msra.mxu0 %v847_v62  ;;  %2093 = vmatpush.msra.mxu1 %v80_v63  ;;  %v184_v47 = vld [vmem:[%s12337_s1 + $0x478] sm:$0xff]  ;;  %v8071_v21 = vpop.f32.mrf.mxu0 }
 0x21b   :  { %2116 = vmatpush.msra.mxu2 %v208_v1  ;;  %2139 = vmatpush.msra.mxu3 %v336_v6  ;;  %v312_v49 = vld [vmem:[%s12337_s1 + $0x878] sm:$0xff]  ;;  %v8085_v6 = vpop.f32.mrf.mxu1 }
 0x21c   :  { %1986 = vmatmul.f32.gmra.mxu0 %v7550_v35  ;;  %2094 = vmatpush.msra.mxu1 %v72_v11  ;;  %v48_v51 = vld [vmem:[%s12337_s1 + $0x38] sm:$0xff] }
 0x21d   :  { %2071 = vmatpush.msra.mxu0 %v839_v28  ;;  %2117 = vmatpush.msra.mxu2 %v200_v4  ;;  %v176_v62 = vld [vmem:[%s12337_s1 + $0x438] sm:$0xff] }
 0x21e   :  { %2140 = vmatpush.msra.mxu3 %v328_v22  ;;  %2095 = vmatpush.msra.mxu1 %v64_v36  ;;  %v304_v63 = vld [vmem:[%s12337_s1 + $0x838] sm:$0xff]  ;;  %v8099_v36 = vpop.f32.mrf.mxu3 }
 0x21f   :  { %2072 = vmatpush.msra.mxu0 %v831_v37  ;;  %2118 = vmatpush.msra.mxu2 %v192_v53  ;;  %v8082_v1 = vld [vmem:[%s12336_s0 + $0x58] sm:$0xff]  ;;  %v8104_v37 = vld [vmem:[%s12336_s0 + $0x60] sm:$0xff] }
 0x220   :  { %2141 = vmatpush.msra.mxu3 %v320_v39  ;;  %2096 = vmatpush.msra.mxu1 %v56_v60  ;;  %v552_v11 = vld [vmem:[%s12337_s1 + $0xff8] sm:$0xff] }
 0x221   :  { %2073 = vmatpush.msra.mxu0 %v823_v5  ;;  %2119 = vmatpush.msra.mxu2 %v184_v47  ;;  %v680_v28 = vld [vmem:[%s12337_s1 + $0x13f8] sm:$0xff] }
 0x222   :  { %2142 = vmatpush.msra.mxu3 %v312_v49  ;;  %2032 = vmatmul.f32.gmra.mxu2 %v8082_v1  ;;  %v808_v4 = vld [vmem:[%s12337_s1 + $0x17f8] sm:$0xff]  ;;  %v8126_v49 = vld [vmem:[%s12336_s0 + $0x50] sm:$0xff] }
 0x223   :  { %2074 = vmatpush.msra.mxu0 %v815_v23  ;;  %2097 = vmatpush.msra.mxu1 %v48_v51  ;;  %v936_v22 = vld [vmem:[%s12337_s1 + $0x1bf8] sm:$0xff] }
 0x224   :  { %2120 = vmatpush.msra.mxu2 %v176_v62  ;;  %2143 = vmatpush.msra.mxu3 %v304_v63  ;;  %v544_v53 = vld [vmem:[%s12337_s1 + $0xfb8] sm:$0xff]  ;;  %v8135_v62 = vpop.f32.mrf.mxu2 }
 0x225   :  { %2055 = vmatmul.f32.gmra.mxu3 %v8104_v37  ;;  %2075 = vmatmul.f32.vlgmr.msra.gmra.mxu0 %v7620_v55  ;;  %v672_v39 = vld [vmem:[%s12337_s1 + $0x13b8] sm:$0xff]  ;;  %12349 = vst [vmem:[#allocation10_spill] sm:$0xff] %v8135_v62 }
 0x226   :  { %2151 = vmatpush.msrb.mxu0 %v552_v11  ;;  %2174 = vmatpush.msrb.mxu1 %v680_v28  ;;  %v800_v60 = vld [vmem:[%s12337_s1 + $0x17b8] sm:$0xff] }
 0x227   :  { %2197 = vmatpush.msrb.mxu2 %v808_v4  ;;  %2220 = vmatpush.msrb.mxu3 %v936_v22  ;;  %v928_v5 = vld [vmem:[%s12337_s1 + $0x1bb8] sm:$0xff]  ;;  %v8149_v22 = vpop.f32.mrf.mxu0 }
 0x228   :  { %v536_v47 = vld [vmem:[%s12337_s1 + $0xf78] sm:$0xff]  ;;  %2009 = vmatmul.f32.gmra.mxu1 %v8126_v49  ;;  %2152 = vmatpush.msrb.mxu0 %v544_v53  ;;  %12350 = vst [vmem:[#allocation11_spill] sm:$0xff] %v8149_v22  ;;  %v8151_v53 = vpop.f32.mrf.mxu1 }
 0x229   :  { %v664_v23 = vld [vmem:[%s12337_s1 + $0x1378] sm:$0xff]  ;;  %2175 = vmatpush.msrb.mxu1 %v672_v39  ;;  %2198 = vmatpush.msrb.mxu2 %v800_v60 }
 0x22a   :  { %v792_v51 = vld [vmem:[%s12337_s1 + $0x1778] sm:$0xff]  ;;  %2221 = vmatpush.msrb.mxu3 %v928_v5  ;;  %2153 = vmatpush.msrb.mxu0 %v536_v47  ;;  %v8162_v47 = vpop.f32.mrf.mxu3 }
 0x22b   :  { %v920_v63 = vld [vmem:[%s12337_s1 + $0x1b78] sm:$0xff]  ;;  %2176 = vmatpush.msrb.mxu1 %v664_v23  ;;  %2199 = vmatpush.msrb.mxu2 %v792_v51  ;;  %12351 = vst [vmem:[#allocation12_spill] sm:$0xff] %v8162_v47 }
 0x22c   :  { %v528_v11 = vld [vmem:[%s12337_s1 + $0xf38] sm:$0xff]  ;;  %2222 = vmatpush.msrb.mxu3 %v920_v63  ;;  %v8173_v63 = vld [vmem:[%s12336_s0 + $0x68] sm:$0xff]  ;;  %2121 = vmatmul.f32.vlgmr.msra.gmra.mxu2 %v7808_v0 }
 0x22d   :  { %v656_v28 = vld [vmem:[%s12337_s1 + $0x1338] sm:$0xff]  ;;  %2154 = vmatpush.msrb.mxu0 %v528_v11  ;;  %2144 = vmatmul.f32.vlgmr.msra.gmra.mxu3 %v7450_v26 }
 0x22e   :  { %v784_v4 = vld [vmem:[%s12337_s1 + $0x1738] sm:$0xff]  ;;  %2177 = vmatpush.msrb.mxu1 %v656_v28  ;;  %2078 = vmatmul.f32.gmra.mxu0 %v8173_v63 }
 0x22f   :  { %v912_v39 = vld [vmem:[%s12337_s1 + $0x1b38] sm:$0xff]  ;;  %2200 = vmatpush.msrb.mxu2 %v784_v4 }
 0x230   :  { %v520_v60 = vld [vmem:[%s12337_s1 + $0xef8] sm:$0xff]  ;;  %2223 = vmatpush.msrb.mxu3 %v912_v39  ;;  %v8221_v54 = vpop.f32.mrf.mxu1  ;;  %2098 = vmatmul.f32.vlgmr.msra.gmra.mxu1 %v7785_v59 }
 0x231   :  { %v648_v5 = vld [vmem:[%s12337_s1 + $0x12f8] sm:$0xff]  ;;  %2155 = vmatpush.msrb.mxu0 %v520_v60  ;;  %v8194_v60 = vpop.f32.mrf.mxu2 }
 0x232   :  { %v776_v23 = vld [vmem:[%s12337_s1 + $0x16f8] sm:$0xff]  ;;  %2178 = vmatpush.msrb.mxu1 %v648_v5  ;;  %v8219_v40 = vpop.f32.mrf.mxu3 }
 0x233   :  { %v904_v51 = vld [vmem:[%s12337_s1 + $0x1af8] sm:$0xff]  ;;  %2201 = vmatpush.msrb.mxu2 %v776_v23 }
 0x234   :  { %v512_v11 = vld [vmem:[%s12337_s1 + $0xeb8] sm:$0xff]  ;;  %2224 = vmatpush.msrb.mxu3 %v904_v51  ;;  %2124 = vmatmul.f32.gmra.mxu2 %v7532_v3 }
 0x235   :  { %v640_v28 = vld [vmem:[%s12337_s1 + $0x12b8] sm:$0xff]  ;;  %2156 = vmatpush.msrb.mxu0 %v512_v11  ;;  %v8208_v11 = vpop.f32.mrf.mxu0  ;;  %2147 = vmatmul.f32.gmra.mxu3 %v7550_v35 }
 0x236   :  { %v768_v4 = vld [vmem:[%s12337_s1 + $0x16b8] sm:$0xff]  ;;  %2179 = vmatpush.msrb.mxu1 %v640_v28  ;;  %12352 = vst [vmem:[#allocation13_spill] sm:$0xff] %v8208_v11 }
 0x237   :  { %v896_v39 = vld [vmem:[%s12337_s1 + $0x1ab8] sm:$0xff]  ;;  %2202 = vmatpush.msrb.mxu2 %v768_v4 }
 0x238   :  { %v504_v41 = vld [vmem:[%s12337_s1 + $0xe78] sm:$0xff]  ;;  %2225 = vmatpush.msrb.mxu3 %v896_v39  ;;  %2180 = vmatpush.msrb.mxu1 %v632_v43  ;;  %v8283_v11 = vpop.f32.mrf.mxu1 }
 0x239   :  { %v760_v5 = vld [vmem:[%s12337_s1 + $0x1678] sm:$0xff]  ;;  %2157 = vmatpush.msrb.mxu0 %v504_v41  ;;  %v8256_v59 = vpop.f32.mrf.mxu2  ;;  %2101 = vmatmul.f32.gmra.mxu1 %v7855_v32 }
 0x23a   :  { %v888_v23 = vld [vmem:[%s12337_s1 + $0x1a78] sm:$0xff]  ;;  %2203 = vmatpush.msrb.mxu2 %v760_v5 }
 0x23b   :  { %v496_v51 = vld [vmem:[%s12337_s1 + $0xe38] sm:$0xff]  ;;  %2226 = vmatpush.msrb.mxu3 %v888_v23 }
 0x23c   :  { %v624_v47 = vld [vmem:[%s12337_s1 + $0x1238] sm:$0xff]  ;;  %2158 = vmatpush.msrb.mxu0 %v496_v51 }
 0x23d   :  { %v752_v28 = vld [vmem:[%s12337_s1 + $0x1638] sm:$0xff]  ;;  %2181 = vmatpush.msrb.mxu1 %v624_v47 }
 0x23e   :  { %v880_v4 = vld [vmem:[%s12337_s1 + $0x1a38] sm:$0xff]  ;;  %2204 = vmatpush.msrb.mxu2 %v752_v28 }
 0x23f   :  { %v488_v39 = vld [vmem:[%s12337_s1 + $0xdf8] sm:$0xff]  ;;  %2227 = vmatpush.msrb.mxu3 %v880_v4 }
 0x240   :  { %v616_v43 = vld [vmem:[%s12337_s1 + $0x11f8] sm:$0xff]  ;;  %2159 = vmatpush.msrb.mxu0 %v488_v39 }
 0x241   :  { %v744_v41 = vld [vmem:[%s12337_s1 + $0x15f8] sm:$0xff]  ;;  %2182 = vmatpush.msrb.mxu1 %v616_v43  ;;  %v8258_v43 = vpop.f32.mrf.mxu0 }
 0x242   :  { %v872_v5 = vld [vmem:[%s12337_s1 + $0x19f8] sm:$0xff]  ;;  %2205 = vmatpush.msrb.mxu2 %v744_v41 }
 0x243   :  { %v480_v47 = vld [vmem:[%s12337_s1 + $0xdb8] sm:$0xff]  ;;  %2228 = vmatpush.msrb.mxu3 %v872_v5 }
 0x244   :  { %v608_v23 = vld [vmem:[%s12337_s1 + $0x11b8] sm:$0xff]  ;;  %2160 = vmatpush.msrb.mxu0 %v480_v47 }
 0x245   :  { %v736_v51 = vld [vmem:[%s12337_s1 + $0x15b8] sm:$0xff]  ;;  %2183 = vmatpush.msrb.mxu1 %v608_v23 }
 0x246   :  { %v864_v0 = vld [vmem:[%s12337_s1 + $0x19b8] sm:$0xff]  ;;  %2206 = vmatpush.msrb.mxu2 %v736_v51 }
 0x247   :  { %v472_v28 = vld [vmem:[%s12337_s1 + $0xd78] sm:$0xff]  ;;  %2229 = vmatpush.msrb.mxu3 %v864_v0 }
 0x248   :  { %v600_v4 = vld [vmem:[%s12337_s1 + $0x1178] sm:$0xff]  ;;  %2161 = vmatpush.msrb.mxu0 %v472_v28  ;;  %v8281_v28 = vpop.f32.mrf.mxu3 }
 0x249   :  { %v728_v39 = vld [vmem:[%s12337_s1 + $0x1578] sm:$0xff]  ;;  %2184 = vmatpush.msrb.mxu1 %v600_v4 }
 0x24a   :  { %v856_v41 = vld [vmem:[%s12337_s1 + $0x1978] sm:$0xff]  ;;  %2207 = vmatpush.msrb.mxu2 %v728_v39 }
 0x24b   :  { %v464_v26 = vld [vmem:[%s12337_s1 + $0xd38] sm:$0xff]  ;;  %2230 = vmatpush.msrb.mxu3 %v856_v41 }
 0x24c   :  { %v592_v5 = vld [vmem:[%s12337_s1 + $0x1138] sm:$0xff]  ;;  %2162 = vmatpush.msrb.mxu0 %v464_v26 }
 0x24d   :  { %v720_v47 = vld [vmem:[%s12337_s1 + $0x1538] sm:$0xff]  ;;  %2185 = vmatpush.msrb.mxu1 %v592_v5 }
 0x24e   :  { %v848_v23 = vld [vmem:[%s12337_s1 + $0x1938] sm:$0xff]  ;;  %2208 = vmatpush.msrb.mxu2 %v720_v47  ;;  %v8304_v47 = vpop.f32.mrf.mxu0 }
 0x24f   :  { %v456_v51 = vld [vmem:[%s12337_s1 + $0xcf8] sm:$0xff]  ;;  %2231 = vmatpush.msrb.mxu3 %v848_v23 }
 0x250   :  { %v584_v0 = vld [vmem:[%s12337_s1 + $0x10f8] sm:$0xff]  ;;  %2163 = vmatpush.msrb.mxu0 %v456_v51  ;;  %v8347_v62 = vpop.f32.mrf.mxu3 }
 0x251   :  { %v712_v4 = vld [vmem:[%s12337_s1 + $0x14f8] sm:$0xff]  ;;  %2186 = vmatpush.msrb.mxu1 %v584_v0  ;;  %12354 = vst [vmem:[#allocation15_spill] sm:$0xff] %v8347_v62  ;;  %v2611_v62 = vld [vmem:[%s12339_s3 + $0xb00] sm:$0xff] }
 0x252   :  { %v840_v39 = vld [vmem:[%s12337_s1 + $0x18f8] sm:$0xff]  ;;  %2209 = vmatpush.msrb.mxu2 %v712_v4  ;;  %v8320_v4 = vpop.f32.mrf.mxu2 }
 0x253   :  { %v448_v41 = vld [vmem:[%s12337_s1 + $0xcb8] sm:$0xff]  ;;  %2232 = vmatpush.msrb.mxu3 %v840_v39 }
 0x254   :  { %v576_v26 = vld [vmem:[%s12337_s1 + $0x10b8] sm:$0xff]  ;;  %2164 = vmatpush.msrb.mxu0 %v448_v41 }
 0x255   :  { %v704_v5 = vld [vmem:[%s12337_s1 + $0x14b8] sm:$0xff]  ;;  %2187 = vmatpush.msrb.mxu1 %v576_v26 }
 0x256   :  { %v832_v3 = vld [vmem:[%s12337_s1 + $0x18b8] sm:$0xff]  ;;  %2210 = vmatpush.msrb.mxu2 %v704_v5  ;;  %v8334_v5 = vpop.f32.mrf.mxu1 }
 0x257   :  { %v440_v23 = vld [vmem:[%s12337_s1 + $0xc78] sm:$0xff]  ;;  %2233 = vmatpush.msrb.mxu3 %v832_v3  ;;  %12353 = vst [vmem:[#allocation14_spill] sm:$0xff] %v8334_v5  ;;  %v2379_v3 = vld [vmem:[%s12339_s3 + $0x3c0] sm:$0xff] }
 0x258   :  { %v568_v51 = vld [vmem:[%s12337_s1 + $0x1078] sm:$0xff]  ;;  %2165 = vmatpush.msrb.mxu0 %v440_v23  ;;  %v2507_v23 = vld [vmem:[%s12339_s3 + $0x7c0] sm:$0xff]  ;;  %v8409_v22 = vpop.f32.mrf.mxu3 }
 0x259   :  { %v696_v0 = vld [vmem:[%s12337_s1 + $0x1478] sm:$0xff]  ;;  %2188 = vmatpush.msrb.mxu1 %v568_v51  ;;  %v8345_v51 = vld [vmem:[%s12338_s2] sm:$0xff] }
 0x25a   :  { %v824_v32 = vld [vmem:[%s12337_s1 + $0x1878] sm:$0xff]  ;;  %2211 = vmatpush.msrb.mxu2 %v696_v0  ;;  %v2635_v0 = vld [vmem:[%s12339_s3 + $0xbc0] sm:$0xff] }
 0x25b   :  { %v432_v35 = vld [vmem:[%s12337_s1 + $0xc38] sm:$0xff]  ;;  %2234 = vmatpush.msrb.mxu3 %v824_v32  ;;  %v2763_v32 = vld [vmem:[%s12339_s3 + $0xfc0] sm:$0xff] }
 0x25c   :  { %v560_v39 = vld [vmem:[%s12337_s1 + $0x1038] sm:$0xff]  ;;  %2166 = vmatpush.msrb.mxu0 %v432_v35  ;;  %v8357_v35 = vpop.f32.mrf.mxu0  ;;  %v2355_v5 = vld [vmem:[%s12339_s3 + $0x300] sm:$0xff] }
 0x25d   :  { %v688_v41 = vld [vmem:[%s12337_s1 + $0x1438] sm:$0xff]  ;;  %2189 = vmatpush.msrb.mxu1 %v560_v39  ;;  %2167 = vmatmul.f32.vlgmr.msrb.gmra.mxu0 %v7949_v33  ;;  %12355 = vst [vmem:[#allocation16_spill] sm:$0xff] %v8357_v35  ;;  %v2371_v39 = vld [vmem:[%s12339_s3 + $0x380] sm:$0xff]  ;;  %v940_v35 = vperm.slane %v8345_v51, 1 }
 0x25e   :  { %v816_v26 = vld [vmem:[%s12337_s1 + $0x1838] sm:$0xff]  ;;  %2212 = vmatpush.msrb.mxu2 %v688_v41  ;;  %3301 = vmatpush.msra.mxu0 %v2379_v3  ;;  %v2499_v41 = vld [vmem:[%s12339_s3 + $0x780] sm:$0xff] }
 0x25f   :  { %2235 = vmatpush.msrb.mxu3 %v816_v26  ;;  %2213 = vmatmul.f32.vlgmr.msrb.gmra.mxu2 %v7601_v50  ;;  %v939_v26 = vperm.slane %v8345_v51, 0  ;;  %v2627_v50 = vld [vmem:[%s12339_s3 + $0xb80] sm:$0xff] }
 0x260   :  { %3324 = vmatpush.msra.mxu1 %v2507_v23  ;;  %3347 = vmatpush.msra.mxu2 %v2635_v0  ;;  %v2755_v33 = vld [vmem:[%s12339_s3 + $0xf80] sm:$0xff]  ;;  %v8373_v23 = vpop.f32.mrf.mxu2 }
 0x261   :  { %3370 = vmatpush.msra.mxu3 %v2763_v32  ;;  %12356 = vst [vmem:[#allocation17_spill] sm:$0xff] %v8373_v23  ;;  %2190 = vmatmul.f32.vlgmr.msrb.gmra.mxu1 %v7913_v58  ;;  %v2363_v0 = vld [vmem:[%s12339_s3 + $0x340] sm:$0xff]  ;;  %v941_v58 = vperm.slane %v8345_v51, 2  ;;  %v8391_v23 = vpop.f32.mrf.mxu1 }
 0x262   :  { %2236 = vmatmul.f32.vlgmr.msrb.gmra.mxu3 %v7620_v55  ;;  %v2491_v32 = vld [vmem:[%s12339_s3 + $0x740] sm:$0xff]  ;;  %3302 = vmatpush.msra.mxu0 %v2371_v39  ;;  %12357 = vst [vmem:[#allocation18_spill] sm:$0xff] %v8391_v23 }
 0x263   :  { %3325 = vmatpush.msra.mxu1 %v2499_v41  ;;  %v2619_v3 = vld [vmem:[%s12339_s3 + $0xb40] sm:$0xff]  ;;  %3348 = vmatpush.msra.mxu2 %v2627_v50  ;;  %v973_v41 = vadd.f32 %v7513_v20, %v939_v26  ;;  %v1134_v20 = vadd.f32 %v7707_v25, %v940_v35  ;;  %v1295_v17 = vadd.f32 %v7931_v2, %v941_v58 }
 0x264   :  { %v2747_v55 = vld [vmem:[%s12339_s3 + $0xf40] sm:$0xff]  ;;  %3371 = vmatpush.msra.mxu3 %v2755_v33  ;;  %3303 = vmatpush.msra.mxu0 %v2363_v0  ;;  %v12358_v33 = vperm.slane %v8345_v51, 3  ;;  %v8431_v2 = vpop.f32.mrf.mxu0 }
 0x265   :  { %v2483_v39 = vld [vmem:[%s12339_s3 + $0x700] sm:$0xff]  ;;  %3326 = vmatpush.msra.mxu1 %v2491_v32  ;;  %3349 = vmatpush.msra.mxu2 %v2619_v3 }
 0x266   :  { %v2739_v50 = vld [vmem:[%s12339_s3 + $0xf00] sm:$0xff]  ;;  %v1456_v23 = vadd.f32 %v8151_v53, %v12358_v33  ;;  %3372 = vmatpush.msra.mxu3 %v2747_v55  ;;  %3304 = vmatpush.msra.mxu0 %v2355_v5  ;;  %v996_v5 = vadd.f32 %v7524_v29, %v973_v41 }
 0x267   :  { %3327 = vmatpush.msra.mxu1 %v2483_v39  ;;  %v2347_v0 = vld [vmem:[%s12339_s3 + $0x2c0] sm:$0xff]  ;;  %3350 = vmatpush.msra.mxu2 %v2611_v62 }
 0x268   :  { %v2475_v32 = vld [vmem:[%s12339_s3 + $0x6c0] sm:$0xff]  ;;  %3373 = vmatpush.msra.mxu3 %v2739_v50  ;;  %2170 = vmatmul.f32.gmra.mxu0 %v8126_v49  ;;  %v1479_v3 = vadd.f32 %v8194_v60, %v1456_v23  ;;  %v8429_v55 = vpop.f32.mrf.mxu2  ;;  %v1157_v49 = vadd.f32 %v7774_v56, %v1134_v20  ;;  %v1318_v23 = vadd.f32 %v7966_v34, %v1295_v17  ;;  %v8467_v20 = vpop.f32.mrf.mxu3 }
 0x269   :  { %v2603_v53 = vld [vmem:[%s12339_s3 + $0xac0] sm:$0xff]  ;;  %2216 = vmatmul.f32.gmra.mxu2 %v8104_v37  ;;  %3305 = vmatpush.msra.mxu0 %v2347_v0  ;;  %v1019_v41 = vadd.f32 %v7559_v38, %v996_v5  ;;  %v976_v50 = vadd.f32 %v7579_v44, %v939_v26  ;;  %v8465_v33 = vpop.f32.mrf.mxu1 }
 0x26a   :  { %v2731_v25 = vld [vmem:[%s12339_s3 + $0xec0] sm:$0xff]  ;;  %3328 = vmatpush.msra.mxu1 %v2475_v32  ;;  %3351 = vmatpush.msra.mxu2 %v2603_v53  ;;  %v1180_v26 = vadd.f32 %v7791_v15, %v1157_v49  ;;  %v1341_v53 = vadd.f32 %v8020_v7, %v1318_v23 }
 0x26b   :  { %v2339_v62 = vld [vmem:[%s12339_s3 + $0x280] sm:$0xff]  ;;  %3374 = vmatpush.msra.mxu3 %v2731_v25  ;;  %2193 = vmatmul.f32.gmra.mxu1 %v8082_v1  ;;  %v1137_v1 = vadd.f32 %v7772_v9, %v940_v35  ;;  %v1298_v9 = vadd.f32 %v8006_v14, %v941_v58  ;;  %v999_v14 = vadd.f32 %v7595_v57, %v976_v50 }
 0x26c   :  { %v2467_v29 = vld [vmem:[%s12339_s3 + $0x680] sm:$0xff]  ;;  %2239 = vmatmul.f32.gmra.mxu3 %v8173_v63  ;;  %3306 = vmatpush.msra.mxu0 %v2339_v62  ;;  %v1502_v63 = vadd.f32 %v8219_v40, %v1479_v3  ;;  %v12359_v40 = vperm.slane %v8345_v51, 3  ;;  %v1042_v58 = vadd.f32 %v7581_v45, %v1019_v41  ;;  %v1203_v62 = vadd.f32 %v7823_v10, %v1180_v26  ;;  %v8521_v23 = vpop.f32.mrf.mxu0 }
 0x26d   :  { %v2595_v37 = vld [vmem:[%s12339_s3 + $0xa80] sm:$0xff]  ;;  %3329 = vmatpush.msra.mxu1 %v2467_v29  ;;  %v1160_v5 = vadd.f32 %v7834_v13, %v1137_v1  ;;  %v1321_v29 = vadd.f32 %v8031_v16, %v1298_v9 }
 0x26e   :  { %v2723_v60 = vld [vmem:[%s12339_s3 + $0xe80] sm:$0xff]  ;;  %3352 = vmatpush.msra.mxu2 %v2595_v37  ;;  %v1459_v35 = vadd.f32 %v8221_v54, %v12359_v40  ;;  %v1525_v3 = vadd.f32 %v8258_v43, %v1502_v63  ;;  %v1364_v37 = vadd.f32 %v8033_v19, %v1341_v53 }
 0x26f   :  { %v2331_v56 = vld [vmem:[%s12339_s3 + $0x240] sm:$0xff]  ;;  %3375 = vmatpush.msra.mxu3 %v2723_v60  ;;  %v1183_v41 = vadd.f32 %v7850_v31, %v1160_v5  ;;  %v1344_v1 = vadd.f32 %v8071_v21, %v1321_v29  ;;  %v12363_v29 = vld [vmem:[#allocation10_spill] sm:$0xff] }
 0x270   :  { %v2459_v39 = vld [vmem:[%s12339_s3 + $0x640] sm:$0xff]  ;;  %3307 = vmatpush.msra.mxu0 %v2331_v56  ;;  %v1482_v49 = vadd.f32 %v8256_v59, %v1459_v35  ;;  %v8519_v60 = vpop.f32.mrf.mxu2  ;;  %v1022_v59 = vadd.f32 %v7629_v24, %v999_v14  ;;  %v1065_v56 = vadd.f32 %v7657_v30, %v1042_v58  ;;  %v1548_v50 = vadd.f32 %v8283_v11, %v1525_v3 }
 0x271   :  { %v2587_v17 = vld [vmem:[%s12339_s3 + $0xa40] sm:$0xff]  ;;  %3330 = vmatpush.msra.mxu1 %v2459_v39  ;;  %v1206_v35 = vadd.f32 %v7880_v42, %v1183_v41 }
 0x272   :  { %v2715_v34 = vld [vmem:[%s12339_s3 + $0xe40] sm:$0xff]  ;;  %3353 = vmatpush.msra.mxu2 %v2587_v17  ;;  %v8539_v17 = vpop.f32.mrf.mxu3  ;;  %v1505_v31 = vadd.f32 %v8281_v28, %v1482_v49  ;;  %v1088_v28 = vadd.f32 %v7668_v46, %v1065_v56  ;;  %v1045_v26 = vadd.f32 %v7643_v48, %v1022_v59 }
 0x273   :  { %v2323_v38 = vld [vmem:[%s12339_s3 + $0x200] sm:$0xff]  ;;  %3376 = vmatpush.msra.mxu3 %v2715_v34  ;;  %v1226_v34 = vadd.f32 %v7848_v27, %v1203_v62 }
 0x274   :  { %v2451_v44 = vld [vmem:[%s12339_s3 + $0x600] sm:$0xff]  ;;  %3308 = vmatpush.msra.mxu0 %v2323_v38  ;;  %v1387_v38 = vadd.f32 %v8069_v52, %v1364_v37  ;;  %v1068_v14 = vadd.f32 %v7709_v18, %v1045_v26 }
 0x275   :  { %v2579_v0 = vld [vmem:[%s12339_s3 + $0xa00] sm:$0xff]  ;;  %3331 = vmatpush.msra.mxu1 %v2451_v44  ;;  %v8557_v44 = vpop.f32.mrf.mxu1  ;;  %v1249_v9 = vadd.f32 %v7903_v12, %v1226_v34  ;;  %v1367_v12 = vadd.f32 %v8085_v6, %v1344_v1  ;;  %v943_v1 = vperm.slane %v8345_v51, 4 }
 0x276   :  { %v2707_v32 = vld [vmem:[%s12339_s3 + $0xe00] sm:$0xff]  ;;  %3354 = vmatpush.msra.mxu2 %v2579_v0  ;;  %v1571_v0 = vadd.f32 %v8320_v4, %v1548_v50  ;;  %v1410_v53 = vadd.f32 %v8099_v36, %v1387_v38  ;;  %v12366_v50 = vld [vmem:[#allocation8_spill] sm:$0xff] }
 0x277   :  { %v2315_v15 = vld [vmem:[%s12339_s3 + $0x1c0] sm:$0xff]  ;;  %3377 = vmatpush.msra.mxu3 %v2707_v32  ;;  %v1528_v32 = vadd.f32 %v8304_v47, %v1505_v31  ;;  %v1272_v58 = vadd.f32 %v7919_v61, %v1249_v9  ;;  %v1390_v49 = vadd.f32 %v12363_v29, %v1367_v12  ;;  %v12371_v12 = vld [vmem:[#allocation16_spill] sm:$0xff] }
 0x278   :  { %v2443_v54 = vld [vmem:[%s12339_s3 + $0x5c0] sm:$0xff]  ;;  %3309 = vmatpush.msra.mxu0 %v2315_v15  ;;  %v8591_v15 = vpop.f32.mrf.mxu0  ;;  %v8611_v62 = vpop.f32.mrf.mxu2 }
 0x279   :  { %v2571_v7 = vld [vmem:[%s12339_s3 + $0x9c0] sm:$0xff]  ;;  %3332 = vmatpush.msra.mxu1 %v2443_v54  ;;  %v1111_v54 = vadd.f32 %v7692_v8, %v1088_v28  ;;  %v8632_v41 = vmax.f32 %v1272_v58, 0.0 }
 0x27a   :  { %v2699_v25 = vld [vmem:[%s12339_s3 + $0xdc0] sm:$0xff]  ;;  %3355 = vmatpush.msra.mxu2 %v2571_v7 }
 0x27b   :  { %v2307_v45 = vld [vmem:[%s12339_s3 + $0x180] sm:$0xff]  ;;  %3378 = vmatpush.msra.mxu3 %v2699_v25  ;;  %v8629_v56 = vmax.f32 %v1111_v54, 0.0 }
 0x27c   :  { %v2435_v57 = vld [vmem:[%s12339_s3 + $0x580] sm:$0xff]  ;;  %3310 = vmatpush.msra.mxu0 %v2307_v45 }
 0x27d   :  { %v2563_v13 = vld [vmem:[%s12339_s3 + $0x980] sm:$0xff]  ;;  %3333 = vmatpush.msra.mxu1 %v2435_v57  ;;  %v8627_v59 = vpop.f32.mrf.mxu1 }
 0x27e   :  { %v2691_v43 = vld [vmem:[%s12339_s3 + $0xd80] sm:$0xff]  ;;  %3356 = vmatpush.msra.mxu2 %v2563_v13  ;;  %v12364_v13 = vld [vmem:[#allocation14_spill] sm:$0xff] }
 0x27f   :  { %v2299_v10 = vld [vmem:[%s12339_s3 + $0x140] sm:$0xff]  ;;  %3379 = vmatpush.msra.mxu3 %v2691_v43  ;;  %v1551_v43 = vadd.f32 %v12364_v13, %v1528_v32  ;;  %v1617_v32 = vadd.f32 %v12371_v12, %v943_v1 }
 0x280   :  { %v2427_v16 = vld [vmem:[%s12339_s3 + $0x540] sm:$0xff]  ;;  %3311 = vmatpush.msra.mxu0 %v2299_v10 }
 0x281   :  { %v2555_v19 = vld [vmem:[%s12339_s3 + $0x940] sm:$0xff]  ;;  %3334 = vmatpush.msra.mxu1 %v2427_v16  ;;  %v1777_v16 = vpop.f32.mrf.mxu3 }
 0x282   :  { %v2683_v39 = vld [vmem:[%s12339_s3 + $0xd40] sm:$0xff]  ;;  %3357 = vmatpush.msra.mxu2 %v2555_v19  ;;  %v12365_v19 = vld [vmem:[#allocation5_spill] sm:$0xff] }
 0x283   :  { %v2291_v24 = vld [vmem:[%s12339_s3 + $0x100] sm:$0xff]  ;;  %3380 = vmatpush.msra.mxu3 %v2683_v39  ;;  %v1091_v39 = vadd.f32 %v12365_v19, %v1068_v14 }
 0x284   :  { %v2419_v30 = vld [vmem:[%s12339_s3 + $0x500] sm:$0xff]  ;;  %3312 = vmatpush.msra.mxu0 %v2291_v24 }
 0x285   :  { %v2547_v11 = vld [vmem:[%s12339_s3 + $0x900] sm:$0xff]  ;;  %3335 = vmatpush.msra.mxu1 %v2419_v30 }
 0x286   :  { %v2675_v63 = vld [vmem:[%s12339_s3 + $0xd00] sm:$0xff]  ;;  %3358 = vmatpush.msra.mxu2 %v2547_v11 }
 0x287   :  { %v2283_v27 = vld [vmem:[%s12339_s3 + $0xc0] sm:$0xff]  ;;  %3381 = vmatpush.msra.mxu3 %v2675_v63  ;;  %v12367_v63 = vld [vmem:[#allocation12_spill] sm:$0xff] }
 0x288   :  { %v2411_v21 = vld [vmem:[%s12339_s3 + $0x4c0] sm:$0xff]  ;;  %3313 = vmatpush.msra.mxu0 %v2283_v27  ;;  %v1413_v38 = vadd.f32 %v12367_v63, %v1390_v49  ;;  %v12368_v27 = vld [vmem:[#allocation17_spill] sm:$0xff] }
 0x289   :  { %v2539_v52 = vld [vmem:[%s12339_s3 + $0x8c0] sm:$0xff]  ;;  %3336 = vmatpush.msra.mxu1 %v2411_v21  ;;  %v1574_v21 = vadd.f32 %v12368_v27, %v1551_v43 }
 0x28a   :  { %v2667_v40 = vld [vmem:[%s12339_s3 + $0xcc0] sm:$0xff]  ;;  %3359 = vmatpush.msra.mxu2 %v2539_v52  ;;  %v944_v52 = vperm.slane %v8345_v51, 5 }
 0x28b   :  { %v2275_v48 = vld [vmem:[%s12339_s3 + $0x80] sm:$0xff]  ;;  %3382 = vmatpush.msra.mxu3 %v2667_v40  ;;  %v1597_v14 = vadd.f32 %v8409_v22, %v1574_v21 }
 0x28c   :  { %v2403_v46 = vld [vmem:[%s12339_s3 + $0x480] sm:$0xff]  ;;  %3314 = vmatpush.msra.mxu0 %v2275_v48  ;;  %v12370_v48 = vld [vmem:[#allocation9_spill] sm:$0xff] }
 0x28d   :  { %v2531_v42 = vld [vmem:[%s12339_s3 + $0x880] sm:$0xff]  ;;  %3337 = vmatpush.msra.mxu1 %v2403_v46 }
 0x28e   :  { %v2659_v4 = vld [vmem:[%s12339_s3 + $0xc80] sm:$0xff]  ;;  %3360 = vmatpush.msra.mxu2 %v2531_v42  ;;  %v8668_v42 = vpop.f32.mrf.mxu2 }
 0x28f   :  { %v2267_v6 = vld [vmem:[%s12339_s3 + $0x40] sm:$0xff]  ;;  %3383 = vmatpush.msra.mxu3 %v2659_v4  ;;  %v1800_v4 = vpop.f32.mrf.mxu0 }
 0x290   :  { %v2395_v47 = vld [vmem:[%s12339_s3 + $0x440] sm:$0xff]  ;;  %3315 = vmatpush.msra.mxu0 %v2267_v6 }
 0x291   :  { %v2523_v36 = vld [vmem:[%s12339_s3 + $0x840] sm:$0xff]  ;;  %3338 = vmatpush.msra.mxu1 %v2395_v47  ;;  %v12372_v47 = vld [vmem:[#allocation13_spill] sm:$0xff] }
 0x292   :  { %v2651_v7 = vld [vmem:[%s12339_s3 + $0xc40] sm:$0xff]  ;;  %3361 = vmatpush.msra.mxu2 %v2523_v36  ;;  %v1436_v54 = vadd.f32 %v12372_v47, %v1413_v38 }
 0x293   :  { %v12360_v25 = vld [vmem:[#allocation7_spill] sm:$0xff]  ;;  %3384 = vmatpush.msra.mxu3 %v2651_v7 }
 0x294   :  { %v1229_v5 = vadd.f32 %v12360_v25, %v1206_v35  ;;  %v12361_v3 = vld [vmem:[#allocation11_spill] sm:$0xff]  ;;  %v12369_v35 = vld [vmem:[#allocation6_spill] sm:$0xff]  ;;  %v1778_v25 = vadd.f32 %v1777_v16, %v944_v52 }
 0x295   :  { %v1433_v45 = vadd.f32 %v12361_v3, %v1410_v53  ;;  %v12362_v57 = vld [vmem:[#allocation15_spill] sm:$0xff]  ;;  %v12373_v3 = vld [vmem:[#allocation18_spill] sm:$0xff] }
 0x296   :  { %v1594_v8 = vadd.f32 %v12362_v57, %v1571_v0  ;;  %v2259_v18 = vld [vmem:[%s12339_s3] sm:$0xff]  ;;  %v1252_v24 = vadd.f32 %v12366_v50, %v1229_v5  ;;  %v1114_v0 = vadd.f32 %v12369_v35, %v1091_v39  ;;  %v1780_v57 = vpop.f32.mrf.mxu3  ;;  %v1801_v43 = vadd.f32 %v1800_v4, %v1778_v25 }
 0x297   :  { %v2387_v61 = vld [vmem:[%s12339_s3 + $0x400] sm:$0xff]  ;;  %3316 = vmatpush.msra.mxu0 %v2259_v18  ;;  %v8635_v30 = vmax.f32 %v1433_v45, 0.0  ;;  %v1640_v45 = vadd.f32 %v12373_v3, %v1617_v32  ;;  %v8692_v18 = vmax.f32 %v1436_v54, 0.0  ;;  %v1803_v19 = vpop.f32.mrf.mxu0  ;;  %v1620_v50 = vadd.f32 %v8431_v2, %v943_v1 }
 0x298   :  { %v2515_v37 = vld [vmem:[%s12339_s3 + $0x800] sm:$0xff]  ;;  %3339 = vmatpush.msra.mxu1 %v2387_v61  ;;  %v8637_v34 = vmax.f32 %v1594_v8, 0.0  ;;  %3317 = vmatmul.f32.vlgmr.msra.gmra.mxu0 %v8629_v56  ;;  %v1275_v46 = vadd.f32 %v12370_v48, %v1252_v24  ;;  %v8687_v5 = vmax.f32 %v1114_v0, 0.0  ;;  %v1823_v8 = vpop.f32.mrf.mxu1  ;;  %v8694_v61 = vmax.f32 %v1597_v14, 0.0 }
 0x299   :  { %v2643_v10 = vld [vmem:[%s12339_s3 + $0xc00] sm:$0xff]  ;;  %3362 = vmatpush.msra.mxu2 %v2515_v37  ;;  %3340 = vmatmul.f32.vlgmr.msra.gmra.mxu1 %v8632_v41  ;;  %v1663_v16 = vadd.f32 %v8429_v55, %v1640_v45  ;;  %v1781_v24 = vadd.f32 %v1780_v57, %v944_v52  ;;  %v1846_v55 = vpop.f32.mrf.mxu2  ;;  %v1824_v38 = vadd.f32 %v1823_v8, %v1801_v43 }
 0x29a   :  { %3385 = vmatpush.msra.mxu3 %v2643_v10  ;;  %v2891_v31 = vld [vmem:[%s12339_s3 + $0x13c0] sm:$0xff]  ;;  %3363 = vmatmul.f32.vlgmr.msra.gmra.mxu2 %v8635_v30  ;;  %v8689_v22 = vmax.f32 %v1275_v46, 0.0 }
 0x29b   :  { %v3019_v11 = vld [vmem:[%s12339_s3 + $0x17c0] sm:$0xff]  ;;  %3386 = vmatmul.f32.vlgmr.msra.gmra.mxu3 %v8637_v34  ;;  %3393 = vmatpush.msrb.mxu0 %v2891_v31  ;;  %v1686_v27 = vadd.f32 %v8467_v20, %v1663_v16  ;;  %v1847_v0 = vadd.f32 %v1846_v55, %v1824_v38 }
 0x29c   :  { %v3147_v28 = vld [vmem:[%s12339_s3 + $0x1bc0] sm:$0xff]  ;;  %3416 = vmatpush.msrb.mxu1 %v3019_v11 }
 0x29d   :  { %v2883_v26 = vld [vmem:[%s12339_s3 + $0x1380] sm:$0xff]  ;;  %3439 = vmatpush.msrb.mxu2 %v3147_v28  ;;  %v1709_v32 = vadd.f32 %v8521_v23, %v1686_v27 }
 0x29e   :  { %v3011_v9 = vld [vmem:[%s12339_s3 + $0x1780] sm:$0xff]  ;;  %3394 = vmatpush.msrb.mxu0 %v2883_v26  ;;  %v1643_v26 = vadd.f32 %v8465_v33, %v1620_v50  ;;  %v1869_v35 = vpop.f32.mrf.mxu3 }
 0x29f   :  { %v3139_v40 = vld [vmem:[%s12339_s3 + $0x1b80] sm:$0xff]  ;;  %3417 = vmatpush.msrb.mxu1 %v3011_v9  ;;  %v1804_v9 = vadd.f32 %v1803_v19, %v1781_v24  ;;  %v1892_v14 = vpop.f32.mrf.mxu0  ;;  %v1732_v45 = vadd.f32 %v8557_v44, %v1709_v32  ;;  %v945_v32 = vperm.slane %v8345_v51, 6 }
 0x2a0   :  { %v2875_v53 = vld [vmem:[%s12339_s3 + $0x1340] sm:$0xff]  ;;  %3440 = vmatpush.msrb.mxu2 %v3139_v40  ;;  %3320 = vmatmul.f32.gmra.mxu0 %v8687_v5  ;;  %v1826_v21 = vpop.f32.mrf.mxu1 }
 0x2a1   :  { %v3003_v6 = vld [vmem:[%s12339_s3 + $0x1740] sm:$0xff]  ;;  %3395 = vmatpush.msrb.mxu0 %v2875_v53  ;;  %3343 = vmatmul.f32.gmra.mxu1 %v8689_v22  ;;  %v1666_v53 = vadd.f32 %v8519_v60, %v1643_v26  ;;  %v1755_v50 = vadd.f32 %v8611_v62, %v1732_v45  ;;  %v2348_v45 = vld [vmem:[%s12339_s3 + $0x2c8] sm:$0xff] }
 0x2a2   :  { %v3131_v58 = vld [vmem:[%s12339_s3 + $0x1b40] sm:$0xff]  ;;  %3418 = vmatpush.msrb.mxu1 %v3003_v6  ;;  %3366 = vmatmul.f32.gmra.mxu2 %v8692_v18  ;;  %v1827_v6 = vadd.f32 %v1826_v21, %v1804_v9 }
 0x2a3   :  { %v2867_v36 = vld [vmem:[%s12339_s3 + $0x1300] sm:$0xff]  ;;  %3441 = vmatpush.msrb.mxu2 %v3131_v58  ;;  %3389 = vmatmul.f32.gmra.mxu3 %v8694_v61  ;;  %v1849_v58 = vpop.f32.mrf.mxu2  ;;  %v1689_v8 = vadd.f32 %v8539_v17, %v1666_v53  ;;  %v8839_v26 = vmax.f32 %v1755_v50, 0.0 }
 0x2a4   :  { %v2995_v7 = vld [vmem:[%s12339_s3 + $0x1700] sm:$0xff]  ;;  %3396 = vmatpush.msrb.mxu0 %v2867_v36  ;;  %v1870_v36 = vadd.f32 %v1869_v35, %v1847_v0  ;;  %v2508_v35 = vld [vmem:[%s12339_s3 + $0x7c8] sm:$0xff] }
 0x2a5   :  { %3419 = vmatpush.msrb.mxu1 %v2995_v7  ;;  %v2859_v29 = vld [vmem:[%s12339_s3 + $0x12c0] sm:$0xff] }
 0x2a6   :  { %v2987_v49 = vld [vmem:[%s12339_s3 + $0x16c0] sm:$0xff]  ;;  %3397 = vmatpush.msrb.mxu0 %v2859_v29  ;;  %v1893_v29 = vadd.f32 %v1892_v14, %v1870_v36  ;;  %v2484_v14 = vld [vmem:[%s12339_s3 + $0x708] sm:$0xff] }
 0x2a7   :  { %v3123_v13 = vld [vmem:[%s12339_s3 + $0x1b00] sm:$0xff]  ;;  %3420 = vmatpush.msrb.mxu1 %v2987_v49  ;;  %v1850_v49 = vadd.f32 %v1849_v58, %v1827_v6 }
 0x2a8   :  { %v2851_v37 = vld [vmem:[%s12339_s3 + $0x1280] sm:$0xff]  ;;  %3442 = vmatpush.msrb.mxu2 %v3123_v13 }
 0x2a9   :  { %v2979_v10 = vld [vmem:[%s12339_s3 + $0x1680] sm:$0xff]  ;;  %3398 = vmatpush.msrb.mxu0 %v2851_v37  ;;  %v1915_v37 = vpop.f32.mrf.mxu1 }
 0x2aa   :  { %v3115_v39 = vld [vmem:[%s12339_s3 + $0x1ac0] sm:$0xff]  ;;  %3421 = vmatpush.msrb.mxu1 %v2979_v10  ;;  %v1872_v10 = vpop.f32.mrf.mxu3 }
 0x2ab   :  { %v2843_v31 = vld [vmem:[%s12339_s3 + $0x1240] sm:$0xff]  ;;  %3443 = vmatpush.msrb.mxu2 %v3115_v39  ;;  %v1873_v55 = vadd.f32 %v1872_v10, %v1850_v49  ;;  %v2340_v49 = vld [vmem:[%s12339_s3 + $0x288] sm:$0xff] }
 0x2ac   :  { %v2971_v11 = vld [vmem:[%s12339_s3 + $0x1640] sm:$0xff]  ;;  %3399 = vmatpush.msrb.mxu0 %v2843_v31  ;;  %v1712_v31 = vadd.f32 %v8591_v15, %v1689_v8  ;;  %v2628_v8 = vld [vmem:[%s12339_s3 + $0xb88] sm:$0xff] }
 0x2ad   :  { %v3107_v63 = vld [vmem:[%s12339_s3 + $0x1a80] sm:$0xff]  ;;  %3422 = vmatpush.msrb.mxu1 %v2971_v11  ;;  %v1916_v11 = vadd.f32 %v1915_v37, %v1893_v29 }
 0x2ae   :  { %v2835_v2 = vld [vmem:[%s12339_s3 + $0x1200] sm:$0xff]  ;;  %3444 = vmatpush.msrb.mxu2 %v3107_v63  ;;  %v1735_v9 = vadd.f32 %v8627_v59, %v1712_v31  ;;  %v2452_v31 = vld [vmem:[%s12339_s3 + $0x608] sm:$0xff] }
 0x2af   :  { %v2963_v1 = vld [vmem:[%s12339_s3 + $0x1600] sm:$0xff]  ;;  %3400 = vmatpush.msrb.mxu0 %v2835_v2  ;;  %v1895_v2 = vpop.f32.mrf.mxu0 }
 0x2b0   :  { %v3099_v28 = vld [vmem:[%s12339_s3 + $0x1a40] sm:$0xff]  ;;  %3423 = vmatpush.msrb.mxu1 %v2963_v1  ;;  %v1938_v1 = vpop.f32.mrf.mxu2  ;;  %v1758_v53 = vadd.f32 %v8668_v42, %v1735_v9  ;;  %v2636_v42 = vld [vmem:[%s12339_s3 + $0xbc8] sm:$0xff] }
 0x2b1   :  { %v2827_v52 = vld [vmem:[%s12339_s3 + $0x11c0] sm:$0xff]  ;;  %3445 = vmatpush.msrb.mxu2 %v3099_v28  ;;  %v1939_v36 = vadd.f32 %v1938_v1, %v945_v32  ;;  %v2308_v9 = vld [vmem:[%s12339_s3 + $0x188] sm:$0xff] }
 0x2b2   :  { %v2955_v40 = vld [vmem:[%s12339_s3 + $0x15c0] sm:$0xff]  ;;  %3401 = vmatpush.msrb.mxu0 %v2827_v52  ;;  %v8842_v52 = vmax.f32 %v1916_v11, 0.0 }
 0x2b3   :  { %v3275_v20 = vld [vmem:[%s12339_s3 + $0x1fc0] sm:$0xff]  ;;  %3424 = vmatpush.msrb.mxu1 %v2955_v40  ;;  %v1896_v40 = vadd.f32 %v1895_v2, %v1873_v55  ;;  %v2316_v2 = vld [vmem:[%s12339_s3 + $0x1c8] sm:$0xff] }
 0x2b4   :  { %v3091_v33 = vld [vmem:[%s12339_s3 + $0x1a00] sm:$0xff]  ;;  %3462 = vmatpush.msrb.mxu3 %v3275_v20  ;;  %v2380_v20 = vld [vmem:[%s12339_s3 + $0x3c8] sm:$0xff] }
 0x2b5   :  { %v2819_v48 = vld [vmem:[%s12339_s3 + $0x1180] sm:$0xff]  ;;  %3446 = vmatpush.msrb.mxu2 %v3091_v33  ;;  %v1918_v33 = vpop.f32.mrf.mxu1 }
 0x2b6   :  { %v2947_v46 = vld [vmem:[%s12339_s3 + $0x1580] sm:$0xff]  ;;  %3402 = vmatpush.msrb.mxu0 %v2819_v48  ;;  %v1961_v48 = vpop.f32.mrf.mxu3  ;;  %v1919_v6 = vadd.f32 %v1918_v33, %v1896_v40  ;;  %v2436_v40 = vld [vmem:[%s12339_s3 + $0x588] sm:$0xff] }
 0x2b7   :  { %v3267_v12 = vld [vmem:[%s12339_s3 + $0x1f80] sm:$0xff]  ;;  %3425 = vmatpush.msrb.mxu1 %v2947_v46  ;;  %v2372_v46 = vld [vmem:[%s12339_s3 + $0x388] sm:$0xff]  ;;  %v1984_v58 = vpop.f32.mrf.mxu0 }
 0x2b8   :  { %v3083_v4 = vld [vmem:[%s12339_s3 + $0x19c0] sm:$0xff]  ;;  %3463 = vmatpush.msrb.mxu3 %v3267_v12  ;;  %v2500_v12 = vld [vmem:[%s12339_s3 + $0x788] sm:$0xff] }
 0x2b9   :  { %v2811_v47 = vld [vmem:[%s12339_s3 + $0x1140] sm:$0xff]  ;;  %3447 = vmatpush.msrb.mxu2 %v3083_v4  ;;  %v2764_v33 = vld [vmem:[%s12339_s3 + $0xfc8] sm:$0xff] }
 0x2ba   :  { %v2939_v54 = vld [vmem:[%s12339_s3 + $0x1540] sm:$0xff]  ;;  %3403 = vmatpush.msrb.mxu0 %v2811_v47  ;;  %v2364_v47 = vld [vmem:[%s12339_s3 + $0x348] sm:$0xff] }
 0x2bb   :  { %v3259_v23 = vld [vmem:[%s12339_s3 + $0x1f40] sm:$0xff]  ;;  %3426 = vmatpush.msrb.mxu1 %v2939_v54  ;;  %v2492_v54 = vld [vmem:[%s12339_s3 + $0x748] sm:$0xff] }
 0x2bc   :  { %v3075_v60 = vld [vmem:[%s12339_s3 + $0x1980] sm:$0xff]  ;;  %3464 = vmatpush.msrb.mxu3 %v3259_v23  ;;  %v2356_v23 = vld [vmem:[%s12339_s3 + $0x308] sm:$0xff] }
 0x2bd   :  { %v2803_v7 = vld [vmem:[%s12339_s3 + $0x1100] sm:$0xff]  ;;  %3448 = vmatpush.msrb.mxu2 %v3075_v60 }
 0x2be   :  { %v2931_v25 = vld [vmem:[%s12339_s3 + $0x1500] sm:$0xff]  ;;  %3404 = vmatpush.msrb.mxu0 %v2803_v7  ;;  %v8890_v7 = vmax.f32 %v1758_v53, 0.0  ;;  %v1964_v10 = vpop.f32.mrf.mxu3  ;;  %v2420_v53 = vld [vmem:[%s12339_s3 + $0x508] sm:$0xff] }
 0x2bf   :  { %v3251_v3 = vld [vmem:[%s12339_s3 + $0x1f00] sm:$0xff]  ;;  %3427 = vmatpush.msrb.mxu1 %v2931_v25  ;;  %v8892_v25 = vmax.f32 %v1919_v6, 0.0  ;;  %v1987_v11 = vpop.f32.mrf.mxu0 }
 0x2c0   :  { %v3067_v57 = vld [vmem:[%s12339_s3 + $0x1940] sm:$0xff]  ;;  %3465 = vmatpush.msrb.mxu3 %v3251_v3  ;;  %v1941_v3 = vpop.f32.mrf.mxu2 }
 0x2c1   :  { %v2795_v13 = vld [vmem:[%s12339_s3 + $0x10c0] sm:$0xff]  ;;  %3449 = vmatpush.msrb.mxu2 %v3067_v57  ;;  %v2476_v57 = vld [vmem:[%s12339_s3 + $0x6c8] sm:$0xff] }
 0x2c2   :  { %v2923_v43 = vld [vmem:[%s12339_s3 + $0x14c0] sm:$0xff]  ;;  %3405 = vmatpush.msrb.mxu0 %v2795_v13  ;;  %v2468_v13 = vld [vmem:[%s12339_s3 + $0x688] sm:$0xff] }
 0x2c3   :  { %v3243_v44 = vld [vmem:[%s12339_s3 + $0x1ec0] sm:$0xff]  ;;  %3428 = vmatpush.msrb.mxu1 %v2923_v43  ;;  %v1962_v43 = vadd.f32 %v1961_v48, %v1939_v36  ;;  %v2580_v48 = vld [vmem:[%s12339_s3 + $0xa08] sm:$0xff] }
 0x2c4   :  { %v3059_v17 = vld [vmem:[%s12339_s3 + $0x1900] sm:$0xff]  ;;  %3466 = vmatpush.msrb.mxu3 %v3243_v44  ;;  %v2620_v44 = vld [vmem:[%s12339_s3 + $0xb48] sm:$0xff] }
 0x2c5   :  { %v2787_v16 = vld [vmem:[%s12339_s3 + $0x1080] sm:$0xff]  ;;  %3450 = vmatpush.msrb.mxu2 %v3059_v17  ;;  %v2332_v17 = vld [vmem:[%s12339_s3 + $0x248] sm:$0xff]  ;;  %v1985_v55 = vadd.f32 %v1984_v58, %v1962_v43 }
 0x2c6   :  { %v2915_v19 = vld [vmem:[%s12339_s3 + $0x1480] sm:$0xff]  ;;  %3406 = vmatpush.msrb.mxu0 %v2787_v16  ;;  %v2460_v16 = vld [vmem:[%s12339_s3 + $0x648] sm:$0xff] }
 0x2c7   :  { %v3235_v39 = vld [vmem:[%s12339_s3 + $0x1e80] sm:$0xff]  ;;  %3429 = vmatpush.msrb.mxu1 %v2915_v19  ;;  %v1942_v19 = vadd.f32 %v1941_v3, %v945_v32  ;;  %v2053_v32 = vpop.f32.mrf.mxu3  ;;  %v2564_v58 = vld [vmem:[%s12339_s3 + $0x988] sm:$0xff] }
 0x2c8   :  { %v3051_v24 = vld [vmem:[%s12339_s3 + $0x18c0] sm:$0xff]  ;;  %3467 = vmatpush.msrb.mxu3 %v3235_v39  ;;  %v2612_v39 = vld [vmem:[%s12339_s3 + $0xb08] sm:$0xff] }
 0x2c9   :  { %v2779_v63 = vld [vmem:[%s12339_s3 + $0x1040] sm:$0xff]  ;;  %3451 = vmatpush.msrb.mxu2 %v3051_v24  ;;  %v2324_v24 = vld [vmem:[%s12339_s3 + $0x208] sm:$0xff]  ;;  %v1965_v1 = vadd.f32 %v1964_v10, %v1942_v19 }
 0x2ca   :  { %v2907_v38 = vld [vmem:[%s12339_s3 + $0x1440] sm:$0xff]  ;;  %3407 = vmatpush.msrb.mxu0 %v2779_v63  ;;  %v2007_v63 = vpop.f32.mrf.mxu1  ;;  %v2740_v36 = vld [vmem:[%s12339_s3 + $0xf08] sm:$0xff] }
 0x2cb   :  { %v3227_v62 = vld [vmem:[%s12339_s3 + $0x1e40] sm:$0xff]  ;;  %3430 = vmatpush.msrb.mxu1 %v2907_v38  ;;  %v2604_v38 = vld [vmem:[%s12339_s3 + $0xac8] sm:$0xff] }
 0x2cc   :  { %v3043_v15 = vld [vmem:[%s12339_s3 + $0x1880] sm:$0xff]  ;;  %3468 = vmatpush.msrb.mxu3 %v3227_v62  ;;  %v2276_v3 = vld [vmem:[%s12339_s3 + $0x88] sm:$0xff] }
 0x2cd   :  { %v2771_v27 = vld [vmem:[%s12339_s3 + $0x1000] sm:$0xff]  ;;  %3452 = vmatpush.msrb.mxu2 %v3043_v15  ;;  %v2444_v15 = vld [vmem:[%s12339_s3 + $0x5c8] sm:$0xff] }
 0x2ce   :  { %v2899_v21 = vld [vmem:[%s12339_s3 + $0x1400] sm:$0xff]  ;;  %3408 = vmatpush.msrb.mxu0 %v2771_v27  ;;  %v2596_v27 = vld [vmem:[%s12339_s3 + $0xa88] sm:$0xff] }
 0x2cf   :  { %v3219_v28 = vld [vmem:[%s12339_s3 + $0x1e00] sm:$0xff]  ;;  %3431 = vmatpush.msrb.mxu1 %v2899_v21  ;;  %3409 = vmatmul.f32.vlgmr.msrb.gmra.mxu0 %v8839_v26  ;;  %v2396_v43 = vld [vmem:[%s12339_s3 + $0x448] sm:$0xff] }
 0x2d0   :  { %3469 = vmatpush.msrb.mxu3 %v3219_v28  ;;  %v3035_v59 = vld [vmem:[%s12339_s3 + $0x1840] sm:$0xff]  ;;  %3432 = vmatmul.f32.vlgmr.msrb.gmra.mxu1 %v8842_v52  ;;  %v2030_v28 = vpop.f32.mrf.mxu2  ;;  %v2388_v19 = vld [vmem:[%s12339_s3 + $0x408] sm:$0xff] }
 0x2d1   :  { %v3211_v0 = vld [vmem:[%s12339_s3 + $0x1dc0] sm:$0xff]  ;;  %3485 = vmatpush.msra.mxu0 %v2380_v20  ;;  %3508 = vmatpush.msra.mxu1 %v2508_v35  ;;  %v2008_v20 = vadd.f32 %v2007_v63, %v1985_v55  ;;  %v2588_v35 = vld [vmem:[%s12339_s3 + $0xa48] sm:$0xff] }
 0x2d2   :  { %v3027_v4 = vld [vmem:[%s12339_s3 + $0x1800] sm:$0xff]  ;;  %3453 = vmatpush.msrb.mxu2 %v3035_v59  ;;  %3470 = vmatpush.msrb.mxu3 %v3211_v0  ;;  %v2300_v59 = vld [vmem:[%s12339_s3 + $0x148] sm:$0xff] }
 0x2d3   :  { %v3203_v51 = vld [vmem:[%s12339_s3 + $0x1d80] sm:$0xff]  ;;  %3486 = vmatpush.msra.mxu0 %v2372_v46  ;;  %3509 = vmatpush.msra.mxu1 %v2500_v12  ;;  %v2428_v0 = vld [vmem:[%s12339_s3 + $0x548] sm:$0xff]  ;;  %v1988_v46 = vadd.f32 %v1987_v11, %v1965_v1  ;;  %v2031_v6 = vadd.f32 %v2030_v28, %v2008_v20 }
 0x2d4   :  { %3454 = vmatpush.msrb.mxu2 %v3027_v4  ;;  %3471 = vmatpush.msrb.mxu3 %v3203_v51  ;;  %v3195_v60 = vld [vmem:[%s12339_s3 + $0x1d40] sm:$0xff]  ;;  %v2756_v12 = vld [vmem:[%s12339_s3 + $0xf88] sm:$0xff] }
 0x2d5   :  { %3487 = vmatpush.msra.mxu0 %v2364_v47  ;;  %3510 = vmatpush.msra.mxu1 %v2492_v54  ;;  %v3187_v29 = vld [vmem:[%s12339_s3 + $0x1d00] sm:$0xff]  ;;  %v2292_v4 = vld [vmem:[%s12339_s3 + $0x108] sm:$0xff]  ;;  %v2010_v54 = vpop.f32.mrf.mxu1 }
 0x2d6   :  { %3531 = vmatpush.msra.mxu2 %v2636_v42  ;;  %3472 = vmatpush.msrb.mxu3 %v3195_v60  ;;  %v3179_v37 = vld [vmem:[%s12339_s3 + $0x1cc0] sm:$0xff]  ;;  %v2572_v47 = vld [vmem:[%s12339_s3 + $0x9c8] sm:$0xff]  ;;  %v2011_v60 = vadd.f32 %v2010_v54, %v1988_v46 }
 0x2d7   :  { %3488 = vmatpush.msra.mxu0 %v2356_v23  ;;  %3511 = vmatpush.msra.mxu1 %v2484_v14  ;;  %v3171_v50 = vld [vmem:[%s12339_s3 + $0x1c80] sm:$0xff]  ;;  %v2748_v51 = vld [vmem:[%s12339_s3 + $0xf48] sm:$0xff]  ;;  %v2076_v14 = vpop.f32.mrf.mxu0 }
 0x2d8   :  { %3412 = vmatmul.f32.gmra.mxu0 %v8890_v7  ;;  %3435 = vmatmul.f32.gmra.mxu1 %v8892_v25  ;;  %v3163_v62 = vld [vmem:[%s12339_s3 + $0x1c40] sm:$0xff]  ;;  %v2284_v42 = vld [vmem:[%s12339_s3 + $0xc8] sm:$0xff] }
 0x2d9   :  { %3489 = vmatpush.msra.mxu0 %v2348_v45  ;;  %3512 = vmatpush.msra.mxu1 %v2476_v57  ;;  %v3155_v21 = vld [vmem:[%s12339_s3 + $0x1c00] sm:$0xff]  ;;  %v2412_v23 = vld [vmem:[%s12339_s3 + $0x4c8] sm:$0xff]  ;;  %v2033_v57 = vpop.f32.mrf.mxu2 }
 0x2da   :  { %3532 = vmatpush.msra.mxu2 %v2628_v8  ;;  %3473 = vmatpush.msrb.mxu3 %v3187_v29  ;;  %v2404_v45 = vld [vmem:[%s12339_s3 + $0x488] sm:$0xff]  ;;  %v2054_v8 = vadd.f32 %v2053_v32, %v2031_v6  ;;  %v2034_v10 = vadd.f32 %v2033_v57, %v2011_v60  ;;  %v9109_v6 = vld [vmem:[%s12338_s2] sm:$0xff] }
 0x2db   :  { %3490 = vmatpush.msra.mxu0 %v2340_v49  ;;  %3513 = vmatpush.msra.mxu1 %v2468_v13  ;;  %v2556_v29 = vld [vmem:[%s12339_s3 + $0x948] sm:$0xff] }
 0x2dc   :  { %3533 = vmatpush.msra.mxu2 %v2620_v44  ;;  %3474 = vmatpush.msrb.mxu3 %v3179_v37  ;;  %v2732_v49 = vld [vmem:[%s12339_s3 + $0xec8] sm:$0xff]  ;;  %v2077_v37 = vadd.f32 %v2076_v14, %v2054_v8 }
 0x2dd   :  { %3491 = vmatpush.msra.mxu0 %v2332_v17  ;;  %3514 = vmatpush.msra.mxu1 %v2460_v16  ;;  %v2268_v13 = vld [vmem:[%s12339_s3 + $0x48] sm:$0xff] }
 0x2de   :  { %3534 = vmatpush.msra.mxu2 %v2612_v39  ;;  %3475 = vmatpush.msrb.mxu3 %v3171_v50  ;;  %v2548_v44 = vld [vmem:[%s12339_s3 + $0x908] sm:$0xff]  ;;  %v2056_v39 = vpop.f32.mrf.mxu3  ;;  %v9043_v11 = vmax.f32 %v2077_v37, 0.0 }
 0x2df   :  { %3492 = vmatpush.msra.mxu0 %v2324_v24  ;;  %3515 = vmatpush.msra.mxu1 %v2452_v31  ;;  %v2724_v17 = vld [vmem:[%s12339_s3 + $0xe88] sm:$0xff]  ;;  %v2057_v63 = vadd.f32 %v2056_v39, %v2034_v10 }
 0x2e0   :  { %3535 = vmatpush.msra.mxu2 %v2604_v38  ;;  %3476 = vmatpush.msrb.mxu3 %v3163_v62  ;;  %v2260_v16 = vld [vmem:[%s12339_s3 + $0x8] sm:$0xff]  ;;  %v2079_v62 = vpop.f32.mrf.mxu0 }
 0x2e1   :  { %3493 = vmatpush.msra.mxu0 %v2316_v2  ;;  %3516 = vmatpush.msra.mxu1 %v2444_v15  ;;  %v2540_v50 = vld [vmem:[%s12339_s3 + $0x8c8] sm:$0xff]  ;;  %v2122_v54 = vpop.f32.mrf.mxu2 }
 0x2e2   :  { %3536 = vmatpush.msra.mxu2 %v2596_v27  ;;  %3477 = vmatpush.msrb.mxu3 %v3155_v21  ;;  %v2892_v24 = vld [vmem:[%s12339_s3 + $0x13c8] sm:$0xff] }
 0x2e3   :  { %3494 = vmatpush.msra.mxu0 %v2308_v9  ;;  %3517 = vmatpush.msra.mxu1 %v2436_v40  ;;  %v3020_v31 = vld [vmem:[%s12339_s3 + $0x17c8] sm:$0xff]  ;;  %v2080_v9 = vadd.f32 %v2079_v62, %v2057_v63 }
 0x2e4   :  { %3537 = vmatpush.msra.mxu2 %v2588_v35  ;;  %3554 = vmatpush.msra.mxu3 %v2764_v33  ;;  %v2532_v55 = vld [vmem:[%s12339_s3 + $0x888] sm:$0xff] }
 0x2e5   :  { %3495 = vmatpush.msra.mxu0 %v2300_v59  ;;  %3518 = vmatpush.msra.mxu1 %v2428_v0  ;;  %v2884_v38 = vld [vmem:[%s12339_s3 + $0x1388] sm:$0xff]  ;;  %v2099_v59 = vpop.f32.mrf.mxu1  ;;  %v9090_v46 = vmax.f32 %v2080_v9, 0.0 }
 0x2e6   :  { %3538 = vmatpush.msra.mxu2 %v2580_v48  ;;  %3555 = vmatpush.msra.mxu3 %v2756_v12  ;;  %v3012_v2 = vld [vmem:[%s12339_s3 + $0x1788] sm:$0xff] }
 0x2e7   :  { %3496 = vmatpush.msra.mxu0 %v2292_v4  ;;  %3519 = vmatpush.msra.mxu1 %v2420_v53  ;;  %v2524_v15 = vld [vmem:[%s12339_s3 + $0x848] sm:$0xff] }
 0x2e8   :  { %3539 = vmatpush.msra.mxu2 %v2572_v47  ;;  %3556 = vmatpush.msra.mxu3 %v2748_v51  ;;  %v2876_v1 = vld [vmem:[%s12339_s3 + $0x1348] sm:$0xff]  ;;  %v946_v47 = vperm.slane %v9109_v6, 7 }
 0x2e9   :  { %3497 = vmatpush.msra.mxu0 %v2284_v42  ;;  %3520 = vmatpush.msra.mxu1 %v2412_v23  ;;  %v2716_v27 = vld [vmem:[%s12339_s3 + $0xe48] sm:$0xff] }
 0x2ea   :  { %3540 = vmatpush.msra.mxu2 %v2564_v58  ;;  %3557 = vmatpush.msra.mxu3 %v2740_v36  ;;  %v3004_v21 = vld [vmem:[%s12339_s3 + $0x1748] sm:$0xff]  ;;  %v2100_v57 = vadd.f32 %v2099_v59, %v946_v47 }
 0x2eb   :  { %3498 = vmatpush.msra.mxu0 %v2276_v3  ;;  %3521 = vmatpush.msra.mxu1 %v2404_v45  ;;  %v2516_v28 = vld [vmem:[%s12339_s3 + $0x808] sm:$0xff]  ;;  %v2145_v3 = vpop.f32.mrf.mxu3 }
 0x2ec   :  { %3541 = vmatpush.msra.mxu2 %v2556_v29  ;;  %3558 = vmatpush.msra.mxu3 %v2732_v49  ;;  %v2868_v40 = vld [vmem:[%s12339_s3 + $0x1308] sm:$0xff] }
 0x2ed   :  { %3499 = vmatpush.msra.mxu0 %v2268_v13  ;;  %3522 = vmatpush.msra.mxu1 %v2396_v43  ;;  %v3148_v20 = vld [vmem:[%s12339_s3 + $0x1bc8] sm:$0xff]  ;;  %v2102_v43 = vpop.f32.mrf.mxu1 }
 0x2ee   :  { %3542 = vmatpush.msra.mxu2 %v2548_v44  ;;  %3559 = vmatpush.msra.mxu3 %v2724_v17  ;;  %v2996_v35 = vld [vmem:[%s12339_s3 + $0x1708] sm:$0xff]  ;;  %v2123_v17 = vadd.f32 %v2122_v54, %v2100_v57  ;;  %v2501_v57 = vld [vmem:[%s12339_s3 + $0x790] sm:$0xff] }
 0x2ef   :  { %3500 = vmatpush.msra.mxu0 %v2260_v16  ;;  %3523 = vmatpush.msra.mxu1 %v2388_v19  ;;  %v2860_v33 = vld [vmem:[%s12339_s3 + $0x12c8] sm:$0xff] }
 0x2f0   :  { %3543 = vmatpush.msra.mxu2 %v2540_v50  ;;  %3501 = vmatmul.f32.vlgmr.msra.gmra.mxu0 %v8629_v56  ;;  %v2988_v0 = vld [vmem:[%s12339_s3 + $0x16c8] sm:$0xff]  ;;  %v2125_v50 = vpop.f32.mrf.mxu2 }
 0x2f1   :  { %3524 = vmatmul.f32.vlgmr.msra.gmra.mxu1 %v8632_v41  ;;  %3577 = vmatpush.msrb.mxu0 %v2892_v24  ;;  %v3140_v48 = vld [vmem:[%s12339_s3 + $0x1b88] sm:$0xff] }
 0x2f2   :  { %3600 = vmatpush.msrb.mxu1 %v3020_v31  ;;  %3544 = vmatpush.msra.mxu2 %v2532_v55  ;;  %v2852_v12 = vld [vmem:[%s12339_s3 + $0x1288] sm:$0xff] }
 0x2f3   :  { %3578 = vmatpush.msrb.mxu0 %v2884_v38  ;;  %3455 = vmatmul.f32.vlgmr.msrb.gmra.mxu2 %v9043_v11  ;;  %v2980_v32 = vld [vmem:[%s12339_s3 + $0x1688] sm:$0xff]  ;;  %v2146_v38 = vadd.f32 %v2145_v3, %v2123_v17 }
 0x2f4   :  { %3601 = vmatpush.msrb.mxu1 %v3012_v2  ;;  %3545 = vmatpush.msra.mxu2 %v2524_v15  ;;  %v3132_v4 = vld [vmem:[%s12339_s3 + $0x1b48] sm:$0xff]  ;;  %v2148_v2 = vpop.f32.mrf.mxu3 }
 0x2f5   :  { %3579 = vmatpush.msrb.mxu0 %v2876_v1  ;;  %3560 = vmatpush.msra.mxu3 %v2716_v27  ;;  %v2844_v53 = vld [vmem:[%s12339_s3 + $0x1248] sm:$0xff]  ;;  %v2191_v59 = vpop.f32.mrf.mxu1 }
 0x2f6   :  { %3602 = vmatpush.msrb.mxu1 %v3004_v21  ;;  %3546 = vmatpush.msra.mxu2 %v2516_v28  ;;  %v2708_v51 = vld [vmem:[%s12339_s3 + $0xe08] sm:$0xff]  ;;  %v2168_v21 = vpop.f32.mrf.mxu0  ;;  %v2103_v28 = vadd.f32 %v2102_v43, %v946_v47  ;;  %v2365_v43 = vld [vmem:[%s12339_s3 + $0x350] sm:$0xff] }
 0x2f7   :  { %3580 = vmatpush.msrb.mxu0 %v2868_v40  ;;  %v2972_v42 = vld [vmem:[%s12339_s3 + $0x1648] sm:$0xff]  ;;  %3561 = vmatpush.msra.mxu3 %v2708_v51  ;;  %v2169_v40 = vadd.f32 %v2168_v21, %v2146_v38  ;;  %v2621_v21 = vld [vmem:[%s12339_s3 + $0xb50] sm:$0xff] }
 0x2f8   :  { %3623 = vmatpush.msrb.mxu2 %v3148_v20  ;;  %3603 = vmatpush.msrb.mxu1 %v2996_v35  ;;  %v3124_v23 = vld [vmem:[%s12339_s3 + $0x1b08] sm:$0xff]  ;;  %v2214_v51 = vpop.f32.mrf.mxu2 }
 0x2f9   :  { %3504 = vmatmul.f32.gmra.mxu0 %v8687_v5  ;;  %3527 = vmatmul.f32.gmra.mxu1 %v8689_v22  ;;  %v2836_v14 = vld [vmem:[%s12339_s3 + $0x1208] sm:$0xff] }
 0x2fa   :  { %3581 = vmatpush.msrb.mxu0 %v2860_v33  ;;  %3604 = vmatpush.msrb.mxu1 %v2988_v0  ;;  %v2700_v58 = vld [vmem:[%s12339_s3 + $0xdc8] sm:$0xff] }
 0x2fb   :  { %3624 = vmatpush.msrb.mxu2 %v3140_v48  ;;  %v2964_v60 = vld [vmem:[%s12339_s3 + $0x1608] sm:$0xff]  ;;  %3562 = vmatpush.msra.mxu3 %v2700_v58 }
 0x2fc   :  { %3582 = vmatpush.msrb.mxu0 %v2852_v12  ;;  %3458 = vmatmul.f32.gmra.mxu2 %v9090_v46  ;;  %v3116_v36 = vld [vmem:[%s12339_s3 + $0x1ac8] sm:$0xff] }
 0x2fd   :  { %3605 = vmatpush.msrb.mxu1 %v2980_v32  ;;  %3625 = vmatpush.msrb.mxu2 %v3132_v4  ;;  %v2828_v45 = vld [vmem:[%s12339_s3 + $0x11c8] sm:$0xff]  ;;  %v2126_v32 = vadd.f32 %v2125_v50, %v2103_v28  ;;  %v2194_v17 = vpop.f32.mrf.mxu1  ;;  %v2637_v50 = vld [vmem:[%s12339_s3 + $0xbd0] sm:$0xff] }
 0x2fe   :  { %3583 = vmatpush.msrb.mxu0 %v2844_v53  ;;  %v2692_v8 = vld [vmem:[%s12339_s3 + $0xd88] sm:$0xff]  ;;  %v2192_v53 = vadd.f32 %v2191_v59, %v2169_v40  ;;  %v2333_v40 = vld [vmem:[%s12339_s3 + $0x250] sm:$0xff] }
 0x2ff   :  { %3606 = vmatpush.msrb.mxu1 %v2972_v42  ;;  %3626 = vmatpush.msrb.mxu2 %v3124_v23  ;;  %v2956_v29 = vld [vmem:[%s12339_s3 + $0x15c8] sm:$0xff]  ;;  %v2381_v23 = vld [vmem:[%s12339_s3 + $0x3d0] sm:$0xff]  ;;  %v2149_v58 = vadd.f32 %v2148_v2, %v2126_v32 }
 0x300   :  { %3584 = vmatpush.msrb.mxu0 %v2836_v14  ;;  %v3108_v49 = vld [vmem:[%s12339_s3 + $0x1a88] sm:$0xff]  ;;  %3563 = vmatpush.msra.mxu3 %v2692_v8  ;;  %v2215_v42 = vadd.f32 %v2214_v51, %v2192_v53  ;;  %v2509_v14 = vld [vmem:[%s12339_s3 + $0x7d0] sm:$0xff]  ;;  %v2171_v8 = vpop.f32.mrf.mxu0 }
 0x301   :  { %3607 = vmatpush.msrb.mxu1 %v2964_v60  ;;  %3627 = vmatpush.msrb.mxu2 %v3116_v36  ;;  %v2820_v13 = vld [vmem:[%s12339_s3 + $0x1188] sm:$0xff]  ;;  %v2237_v36 = vpop.f32.mrf.mxu3  ;;  %v2325_v59 = vld [vmem:[%s12339_s3 + $0x210] sm:$0xff] }
 0x302   :  { %3585 = vmatpush.msrb.mxu0 %v2828_v45  ;;  %v2948_v44 = vld [vmem:[%s12339_s3 + $0x1588] sm:$0xff]  ;;  %v2373_v45 = vld [vmem:[%s12339_s3 + $0x390] sm:$0xff] }
 0x303   :  { %v3100_v37 = vld [vmem:[%s12339_s3 + $0x1a48] sm:$0xff]  ;;  %3608 = vmatpush.msrb.mxu1 %v2956_v29  ;;  %3628 = vmatpush.msrb.mxu2 %v3108_v49  ;;  %v2238_v29 = vadd.f32 %v2237_v36, %v2215_v42  ;;  %v2317_v32 = vld [vmem:[%s12339_s3 + $0x1d0] sm:$0xff] }
 0x304   :  { %v2812_v10 = vld [vmem:[%s12339_s3 + $0x1148] sm:$0xff]  ;;  %3586 = vmatpush.msrb.mxu0 %v2820_v13  ;;  %3547 = vmatmul.f32.vlgmr.msra.gmra.mxu2 %v8635_v30  ;;  %v2172_v13 = vadd.f32 %v2171_v8, %v2149_v58  ;;  %v2597_v53 = vld [vmem:[%s12339_s3 + $0xa90] sm:$0xff] }
 0x305   :  { %v2684_v16 = vld [vmem:[%s12339_s3 + $0xd48] sm:$0xff]  ;;  %3609 = vmatpush.msrb.mxu1 %v2948_v44  ;;  %3629 = vmatpush.msrb.mxu2 %v3100_v37  ;;  %v2493_v44 = vld [vmem:[%s12339_s3 + $0x750] sm:$0xff]  ;;  %v9259_v37 = vmax.f32 %v2238_v29, 0.0 }
 0x306   :  { %v2940_v19 = vld [vmem:[%s12339_s3 + $0x1548] sm:$0xff]  ;;  %3587 = vmatpush.msrb.mxu0 %v2812_v10  ;;  %3564 = vmatpush.msra.mxu3 %v2684_v16  ;;  %v2589_v51 = vld [vmem:[%s12339_s3 + $0xa50] sm:$0xff] }
 0x307   :  { %v3092_v39 = vld [vmem:[%s12339_s3 + $0x1a08] sm:$0xff]  ;;  %3610 = vmatpush.msrb.mxu1 %v2940_v19  ;;  %v2357_v19 = vld [vmem:[%s12339_s3 + $0x310] sm:$0xff]  ;;  %3478 = vmatmul.f32.vlgmr.msrb.gmra.mxu3 %v9259_v37 }
 0x308   :  { %v2804_v24 = vld [vmem:[%s12339_s3 + $0x1108] sm:$0xff]  ;;  %3630 = vmatpush.msrb.mxu2 %v3092_v39  ;;  %v2485_v39 = vld [vmem:[%s12339_s3 + $0x710] sm:$0xff] }
 0x309   :  { %v2676_v31 = vld [vmem:[%s12339_s3 + $0xd08] sm:$0xff]  ;;  %3588 = vmatpush.msrb.mxu0 %v2804_v24  ;;  %v2195_v24 = vadd.f32 %v2194_v17, %v2172_v13  ;;  %v2301_v42 = vld [vmem:[%s12339_s3 + $0x150] sm:$0xff] }
 0x30a   :  { %v2932_v55 = vld [vmem:[%s12339_s3 + $0x1508] sm:$0xff]  ;;  %3565 = vmatpush.msra.mxu3 %v2676_v31  ;;  %v2217_v31 = vpop.f32.mrf.mxu2  ;;  %v2581_v58 = vld [vmem:[%s12339_s3 + $0xa10] sm:$0xff] }
 0x30b   :  { %v3084_v63 = vld [vmem:[%s12339_s3 + $0x19c8] sm:$0xff]  ;;  %3611 = vmatpush.msrb.mxu1 %v2932_v55  ;;  %v2349_v55 = vld [vmem:[%s12339_s3 + $0x2d0] sm:$0xff]  ;;  %v2218_v38 = vadd.f32 %v2217_v31, %v2195_v24 }
 0x30c   :  { %v2796_v62 = vld [vmem:[%s12339_s3 + $0x10c8] sm:$0xff]  ;;  %3631 = vmatpush.msrb.mxu2 %v3084_v63  ;;  %v2477_v63 = vld [vmem:[%s12339_s3 + $0x6d0] sm:$0xff] }
 0x30d   :  { %v2668_v15 = vld [vmem:[%s12339_s3 + $0xcc8] sm:$0xff]  ;;  %3589 = vmatpush.msrb.mxu0 %v2796_v62  ;;  %3550 = vmatmul.f32.gmra.mxu2 %v8692_v18  ;;  %v2629_v62 = vld [vmem:[%s12339_s3 + $0xb90] sm:$0xff] }
 0x30e   :  { %v2924_v1 = vld [vmem:[%s12339_s3 + $0x14c8] sm:$0xff]  ;;  %3566 = vmatpush.msra.mxu3 %v2668_v15  ;;  %v2341_v15 = vld [vmem:[%s12339_s3 + $0x290] sm:$0xff] }
 0x30f   :  { %v3076_v27 = vld [vmem:[%s12339_s3 + $0x1988] sm:$0xff]  ;;  %3612 = vmatpush.msrb.mxu1 %v2924_v1  ;;  %v2469_v1 = vld [vmem:[%s12339_s3 + $0x690] sm:$0xff] }
 0x310   :  { %v2788_v9 = vld [vmem:[%s12339_s3 + $0x1088] sm:$0xff]  ;;  %3632 = vmatpush.msrb.mxu2 %v3076_v27  ;;  %v2240_v27 = vpop.f32.mrf.mxu3  ;;  %v2413_v29 = vld [vmem:[%s12339_s3 + $0x4d0] sm:$0xff] }
 0x311   :  { %v2916_v20 = vld [vmem:[%s12339_s3 + $0x1488] sm:$0xff]  ;;  %3590 = vmatpush.msrb.mxu0 %v2788_v9  ;;  %v2241_v28 = vadd.f32 %v2240_v27, %v2218_v38  ;;  %v2277_v13 = vld [vmem:[%s12339_s3 + $0x90] sm:$0xff] }
 0x312   :  { %v3068_v35 = vld [vmem:[%s12339_s3 + $0x1948] sm:$0xff]  ;;  %3613 = vmatpush.msrb.mxu1 %v2916_v20  ;;  %v2461_v20 = vld [vmem:[%s12339_s3 + $0x650] sm:$0xff] }
 0x313   :  { %v2780_v33 = vld [vmem:[%s12339_s3 + $0x1048] sm:$0xff]  ;;  %3633 = vmatpush.msrb.mxu2 %v3068_v35  ;;  %v2613_v35 = vld [vmem:[%s12339_s3 + $0xb10] sm:$0xff] }
 0x314   :  { %v2660_v0 = vld [vmem:[%s12339_s3 + $0xc88] sm:$0xff]  ;;  %3591 = vmatpush.msrb.mxu0 %v2780_v33  ;;  %v2389_v24 = vld [vmem:[%s12339_s3 + $0x410] sm:$0xff] }
 0x315   :  { %v2908_v48 = vld [vmem:[%s12339_s3 + $0x1448] sm:$0xff]  ;;  %3567 = vmatpush.msra.mxu3 %v2660_v0  ;;  %v2453_v0 = vld [vmem:[%s12339_s3 + $0x610] sm:$0xff] }
 0x316   :  { %v3060_v12 = vld [vmem:[%s12339_s3 + $0x1908] sm:$0xff]  ;;  %3614 = vmatpush.msrb.mxu1 %v2908_v48  ;;  %v9322_v48 = vmax.f32 %v2241_v28, 0.0  ;;  %v2541_v31 = vld [vmem:[%s12339_s3 + $0x8d0] sm:$0xff] }
 0x317   :  { %v2772_v4 = vld [vmem:[%s12339_s3 + $0x1008] sm:$0xff]  ;;  %3634 = vmatpush.msrb.mxu2 %v3060_v12  ;;  %v2605_v12 = vld [vmem:[%s12339_s3 + $0xad0] sm:$0xff] }
 0x318   :  { %v2652_v6 = vld [vmem:[%s12339_s3 + $0xc48] sm:$0xff]  ;;  %3592 = vmatpush.msrb.mxu0 %v2772_v4  ;;  %v2445_v4 = vld [vmem:[%s12339_s3 + $0x5d0] sm:$0xff]  ;;  %3481 = vmatmul.f32.gmra.mxu3 %v9322_v48 }
 0x319   :  { %v2900_v47 = vld [vmem:[%s12339_s3 + $0x1408] sm:$0xff]  ;;  %3568 = vmatpush.msra.mxu3 %v2652_v6  ;;  %3593 = vmatmul.f32.vlgmr.msrb.gmra.mxu0 %v8839_v26  ;;  %v2309_v6 = vld [vmem:[%s12339_s3 + $0x190] sm:$0xff] }
 0x31a   :  { %v3052_v54 = vld [vmem:[%s12339_s3 + $0x18c8] sm:$0xff]  ;;  %3615 = vmatpush.msrb.mxu1 %v2900_v47  ;;  %3669 = vmatpush.msra.mxu0 %v2381_v23  ;;  %v2533_v38 = vld [vmem:[%s12339_s3 + $0x890] sm:$0xff] }
 0x31b   :  { %3635 = vmatpush.msrb.mxu2 %v3052_v54  ;;  %v3044_v60 = vld [vmem:[%s12339_s3 + $0x1888] sm:$0xff]  ;;  %3616 = vmatmul.f32.vlgmr.msrb.gmra.mxu1 %v8842_v52  ;;  %v2437_v54 = vld [vmem:[%s12339_s3 + $0x590] sm:$0xff] }
 0x31c   :  { %v2644_v3 = vld [vmem:[%s12339_s3 + $0xc08] sm:$0xff]  ;;  %3692 = vmatpush.msra.mxu1 %v2509_v14  ;;  %3670 = vmatpush.msra.mxu0 %v2373_v45  ;;  %v2429_v14 = vld [vmem:[%s12339_s3 + $0x550] sm:$0xff] }
 0x31d   :  { %v3036_v49 = vld [vmem:[%s12339_s3 + $0x1848] sm:$0xff]  ;;  %3636 = vmatpush.msrb.mxu2 %v3044_v60  ;;  %3569 = vmatpush.msra.mxu3 %v2644_v3  ;;  %v2293_v60 = vld [vmem:[%s12339_s3 + $0x110] sm:$0xff] }
 0x31e   :  { %3693 = vmatpush.msra.mxu1 %v2501_v57  ;;  %v3028_v10 = vld [vmem:[%s12339_s3 + $0x1808] sm:$0xff]  ;;  %3671 = vmatpush.msra.mxu0 %v2365_v43  ;;  %v2421_v3 = vld [vmem:[%s12339_s3 + $0x510] sm:$0xff] }
 0x31f   :  { %v3276_v16 = vld [vmem:[%s12339_s3 + $0x1fc8] sm:$0xff]  ;;  %3637 = vmatpush.msrb.mxu2 %v3036_v49  ;;  %v2573_v45 = vld [vmem:[%s12339_s3 + $0x9d0] sm:$0xff] }
 0x320   :  { %3694 = vmatpush.msra.mxu1 %v2493_v44  ;;  %3646 = vmatpush.msrb.mxu3 %v3276_v16  ;;  %v3268_v2 = vld [vmem:[%s12339_s3 + $0x1f88] sm:$0xff]  ;;  %v2285_v57 = vld [vmem:[%s12339_s3 + $0xd0] sm:$0xff] }
 0x321   :  { %3638 = vmatpush.msrb.mxu2 %v3028_v10  ;;  %3672 = vmatpush.msra.mxu0 %v2357_v19  ;;  %v3260_v9 = vld [vmem:[%s12339_s3 + $0x1f48] sm:$0xff]  ;;  %v2565_v49 = vld [vmem:[%s12339_s3 + $0x990] sm:$0xff] }
 0x322   :  { %3695 = vmatpush.msra.mxu1 %v2485_v39  ;;  %3596 = vmatmul.f32.gmra.mxu0 %v8890_v7  ;;  %v3252_v33 = vld [vmem:[%s12339_s3 + $0x1f08] sm:$0xff]  ;;  %v2405_v43 = vld [vmem:[%s12339_s3 + $0x490] sm:$0xff] }
 0x323   :  { %3715 = vmatpush.msra.mxu2 %v2637_v50  ;;  %3619 = vmatmul.f32.gmra.mxu1 %v8892_v25  ;;  %v3244_v47 = vld [vmem:[%s12339_s3 + $0x1ec8] sm:$0xff]  ;;  %v2557_v44 = vld [vmem:[%s12339_s3 + $0x950] sm:$0xff] }
 0x324   :  { %3639 = vmatmul.f32.vlgmr.msrb.gmra.mxu2 %v9043_v11  ;;  %3673 = vmatpush.msra.mxu0 %v2349_v55  ;;  %v3236_v23 = vld [vmem:[%s12339_s3 + $0x1e88] sm:$0xff]  ;;  %v2269_v10 = vld [vmem:[%s12339_s3 + $0x50] sm:$0xff] }
 0x325   :  { %3696 = vmatpush.msra.mxu1 %v2477_v63  ;;  %3716 = vmatpush.msra.mxu2 %v2629_v62  ;;  %v3228_v36 = vld [vmem:[%s12339_s3 + $0x1e48] sm:$0xff]  ;;  %v2397_v16 = vld [vmem:[%s12339_s3 + $0x450] sm:$0xff] }
 0x326   :  { %3647 = vmatpush.msrb.mxu3 %v3268_v2  ;;  %3674 = vmatpush.msra.mxu0 %v2341_v15  ;;  %v3220_v8 = vld [vmem:[%s12339_s3 + $0x1e08] sm:$0xff]  ;;  %v2549_v19 = vld [vmem:[%s12339_s3 + $0x910] sm:$0xff] }
 0x327   :  { %3697 = vmatpush.msra.mxu1 %v2469_v1  ;;  %3717 = vmatpush.msra.mxu2 %v2621_v21  ;;  %v3212_v17 = vld [vmem:[%s12339_s3 + $0x1dc8] sm:$0xff]  ;;  %v2261_v39 = vld [vmem:[%s12339_s3 + $0x10] sm:$0xff] }
 0x328   :  { %3648 = vmatpush.msrb.mxu3 %v3260_v9  ;;  %3675 = vmatpush.msra.mxu0 %v2333_v40  ;;  %v3204_v50 = vld [vmem:[%s12339_s3 + $0x1d88] sm:$0xff]  ;;  %v2893_v55 = vld [vmem:[%s12339_s3 + $0x13d0] sm:$0xff] }
 0x329   :  { %3698 = vmatpush.msra.mxu1 %v2461_v20  ;;  %3718 = vmatpush.msra.mxu2 %v2613_v35  ;;  %v3021_v63 = vld [vmem:[%s12339_s3 + $0x17d0] sm:$0xff]  ;;  %v3196_v62 = vld [vmem:[%s12339_s3 + $0x1d48] sm:$0xff] }
 0x32a   :  { %3649 = vmatpush.msrb.mxu3 %v3252_v33  ;;  %3676 = vmatpush.msra.mxu0 %v2325_v59  ;;  %v2885_v2 = vld [vmem:[%s12339_s3 + $0x1390] sm:$0xff]  ;;  %v3188_v27 = vld [vmem:[%s12339_s3 + $0x1d08] sm:$0xff] }
 0x32b   :  { %3699 = vmatpush.msra.mxu1 %v2453_v0  ;;  %3719 = vmatpush.msra.mxu2 %v2605_v12  ;;  %v3013_v15 = vld [vmem:[%s12339_s3 + $0x1790] sm:$0xff]  ;;  %v3180_v33 = vld [vmem:[%s12339_s3 + $0x1cc8] sm:$0xff] }
 0x32c   :  { %3642 = vmatmul.f32.gmra.mxu2 %v9090_v46  ;;  %3677 = vmatpush.msra.mxu0 %v2317_v32  ;;  %v2525_v1 = vld [vmem:[%s12339_s3 + $0x850] sm:$0xff]  ;;  %v3172_v32 = vld [vmem:[%s12339_s3 + $0x1c88] sm:$0xff] }
 0x32d   :  { %3700 = vmatpush.msra.mxu1 %v2445_v4  ;;  %3720 = vmatpush.msra.mxu2 %v2597_v53  ;;  %v2877_v21 = vld [vmem:[%s12339_s3 + $0x1350] sm:$0xff] }
 0x32e   :  { %3678 = vmatpush.msra.mxu0 %v2309_v6  ;;  %3650 = vmatpush.msrb.mxu3 %v3244_v47  ;;  %v3005_v28 = vld [vmem:[%s12339_s3 + $0x1750] sm:$0xff]  ;;  %v3164_v47 = vld [vmem:[%s12339_s3 + $0x1c48] sm:$0xff] }
 0x32f   :  { %3701 = vmatpush.msra.mxu1 %v2437_v54  ;;  %3721 = vmatpush.msra.mxu2 %v2589_v51  ;;  %v2517_v9 = vld [vmem:[%s12339_s3 + $0x810] sm:$0xff] }
 0x330   :  { %3679 = vmatpush.msra.mxu0 %v2301_v42  ;;  %3651 = vmatpush.msrb.mxu3 %v3236_v23  ;;  %v2869_v40 = vld [vmem:[%s12339_s3 + $0x1310] sm:$0xff]  ;;  %v3156_v23 = vld [vmem:[%s12339_s3 + $0x1c08] sm:$0xff] }
 0x331   :  { %3702 = vmatpush.msra.mxu1 %v2429_v14  ;;  %3722 = vmatpush.msra.mxu2 %v2581_v58  ;;  %v2997_v20 = vld [vmem:[%s12339_s3 + $0x1710] sm:$0xff] }
 0x332   :  { %3680 = vmatpush.msra.mxu0 %v2293_v60  ;;  %3652 = vmatpush.msrb.mxu3 %v3228_v36  ;;  %v3149_v35 = vld [vmem:[%s12339_s3 + $0x1bd0] sm:$0xff] }
 0x333   :  { %3703 = vmatpush.msra.mxu1 %v2421_v3  ;;  %3723 = vmatpush.msra.mxu2 %v2573_v45  ;;  %v2861_v59 = vld [vmem:[%s12339_s3 + $0x12d0] sm:$0xff] }
 0x334   :  { %3681 = vmatpush.msra.mxu0 %v2285_v57  ;;  %3653 = vmatpush.msrb.mxu3 %v3220_v8  ;;  %v2989_v0 = vld [vmem:[%s12339_s3 + $0x16d0] sm:$0xff] }
 0x335   :  { %3704 = vmatpush.msra.mxu1 %v2413_v29  ;;  %3724 = vmatpush.msra.mxu2 %v2565_v49  ;;  %v3141_v12 = vld [vmem:[%s12339_s3 + $0x1b90] sm:$0xff] }
 0x336   :  { %3682 = vmatpush.msra.mxu0 %v2277_v13  ;;  %3570 = vmatmul.f32.vlgmr.msra.gmra.mxu3 %v8637_v34  ;;  %v2853_v4 = vld [vmem:[%s12339_s3 + $0x1290] sm:$0xff] }
 0x337   :  { %3705 = vmatpush.msra.mxu1 %v2405_v43  ;;  %3725 = vmatpush.msra.mxu2 %v2557_v44  ;;  %v2981_v53 = vld [vmem:[%s12339_s3 + $0x1690] sm:$0xff] }
 0x338   :  { %3683 = vmatpush.msra.mxu0 %v2269_v10  ;;  %3654 = vmatpush.msrb.mxu3 %v3212_v17  ;;  %v3133_v6 = vld [vmem:[%s12339_s3 + $0x1b50] sm:$0xff] }
 0x339   :  { %3706 = vmatpush.msra.mxu1 %v2397_v16  ;;  %3726 = vmatpush.msra.mxu2 %v2549_v19  ;;  %v2845_v54 = vld [vmem:[%s12339_s3 + $0x1250] sm:$0xff] }
 0x33a   :  { %3684 = vmatpush.msra.mxu0 %v2261_v39  ;;  %3655 = vmatpush.msrb.mxu3 %v3204_v50  ;;  %v2973_v51 = vld [vmem:[%s12339_s3 + $0x1650] sm:$0xff] }
 0x33b   :  { %3707 = vmatpush.msra.mxu1 %v2389_v24  ;;  %3727 = vmatpush.msra.mxu2 %v2541_v31  ;;  %v3125_v42 = vld [vmem:[%s12339_s3 + $0x1b10] sm:$0xff] }
 0x33c   :  { %3685 = vmatmul.f32.vlgmr.msra.gmra.mxu0 %v8629_v56  ;;  %3708 = vmatmul.f32.vlgmr.msra.gmra.mxu1 %v8632_v41  ;;  %v2765_v14 = vld [vmem:[%s12339_s3 + $0xfd0] sm:$0xff] }
 0x33d   :  { %3761 = vmatpush.msrb.mxu0 %v2893_v55  ;;  %3784 = vmatpush.msrb.mxu1 %v3021_v63  ;;  %v2837_v58 = vld [vmem:[%s12339_s3 + $0x1210] sm:$0xff] }
 0x33e   :  { %3728 = vmatpush.msra.mxu2 %v2533_v38  ;;  %3656 = vmatpush.msrb.mxu3 %v3196_v62  ;;  %v2965_v60 = vld [vmem:[%s12339_s3 + $0x1610] sm:$0xff] }
 0x33f   :  { %3762 = vmatpush.msrb.mxu0 %v2885_v2  ;;  %3785 = vmatpush.msrb.mxu1 %v3013_v15  ;;  %v3117_v36 = vld [vmem:[%s12339_s3 + $0x1ad0] sm:$0xff] }
 0x340   :  { %3729 = vmatpush.msra.mxu2 %v2525_v1  ;;  %3657 = vmatpush.msrb.mxu3 %v3188_v27  ;;  %v2829_v3 = vld [vmem:[%s12339_s3 + $0x11d0] sm:$0xff] }
 0x341   :  { %3763 = vmatpush.msrb.mxu0 %v2877_v21  ;;  %3786 = vmatpush.msrb.mxu1 %v3005_v28  ;;  %v2757_v45 = vld [vmem:[%s12339_s3 + $0xf90] sm:$0xff] }
 0x342   :  { %3730 = vmatpush.msra.mxu2 %v2517_v9  ;;  %3573 = vmatmul.f32.gmra.mxu3 %v8694_v61  ;;  %v2957_v57 = vld [vmem:[%s12339_s3 + $0x15d0] sm:$0xff] }
 0x343   :  { %3731 = vmatmul.f32.vlgmr.msra.gmra.mxu2 %v8635_v30  ;;  %3764 = vmatpush.msrb.mxu0 %v2869_v40  ;;  %v3109_v8 = vld [vmem:[%s12339_s3 + $0x1a90] sm:$0xff] }
 0x344   :  { %3787 = vmatpush.msrb.mxu1 %v2997_v20  ;;  %3807 = vmatpush.msrb.mxu2 %v3149_v35  ;;  %v2821_v29 = vld [vmem:[%s12339_s3 + $0x1190] sm:$0xff] }
 0x345   :  { %3658 = vmatpush.msrb.mxu3 %v3180_v33  ;;  %3688 = vmatmul.f32.gmra.mxu0 %v8687_v5  ;;  %v2749_v49 = vld [vmem:[%s12339_s3 + $0xf50] sm:$0xff] }
 0x346   :  { %3711 = vmatmul.f32.gmra.mxu1 %v8689_v22  ;;  %3765 = vmatpush.msrb.mxu0 %v2861_v59  ;;  %v2949_v13 = vld [vmem:[%s12339_s3 + $0x1590] sm:$0xff]  ;;  %v2382_v59 = vld [vmem:[%s12339_s3 + $0x3d8] sm:$0xff] }
 0x347   :  { %3788 = vmatpush.msrb.mxu1 %v2989_v0  ;;  %3808 = vmatpush.msrb.mxu2 %v3141_v12  ;;  %v3101_v43 = vld [vmem:[%s12339_s3 + $0x1a50] sm:$0xff]  ;;  %v2510_v0 = vld [vmem:[%s12339_s3 + $0x7d8] sm:$0xff] }
 0x348   :  { %3659 = vmatpush.msrb.mxu3 %v3172_v32  ;;  %3766 = vmatpush.msrb.mxu0 %v2853_v4  ;;  %v2813_v44 = vld [vmem:[%s12339_s3 + $0x1150] sm:$0xff]  ;;  %v2374_v4 = vld [vmem:[%s12339_s3 + $0x398] sm:$0xff] }
 0x349   :  { %3789 = vmatpush.msrb.mxu1 %v2981_v53  ;;  %3809 = vmatpush.msrb.mxu2 %v3133_v6  ;;  %v2741_v10 = vld [vmem:[%s12339_s3 + $0xf10] sm:$0xff]  ;;  %v2502_v53 = vld [vmem:[%s12339_s3 + $0x798] sm:$0xff] }
 0x34a   :  { %3660 = vmatpush.msrb.mxu3 %v3164_v47  ;;  %3767 = vmatpush.msrb.mxu0 %v2845_v54  ;;  %v2941_v17 = vld [vmem:[%s12339_s3 + $0x1550] sm:$0xff]  ;;  %v2366_v54 = vld [vmem:[%s12339_s3 + $0x358] sm:$0xff] }
 0x34b   :  { %3790 = vmatpush.msrb.mxu1 %v2973_v51  ;;  %3810 = vmatpush.msrb.mxu2 %v3125_v42  ;;  %v3093_v16 = vld [vmem:[%s12339_s3 + $0x1a10] sm:$0xff]  ;;  %v2494_v51 = vld [vmem:[%s12339_s3 + $0x758] sm:$0xff] }
 0x34c   :  { %3661 = vmatpush.msrb.mxu3 %v3156_v23  ;;  %3734 = vmatmul.f32.gmra.mxu2 %v8692_v18  ;;  %v2805_v19 = vld [vmem:[%s12339_s3 + $0x1110] sm:$0xff] }
 0x34d   :  { %3768 = vmatpush.msrb.mxu0 %v2837_v58  ;;  %3791 = vmatpush.msrb.mxu1 %v2965_v60  ;;  %v2733_v39 = vld [vmem:[%s12339_s3 + $0xed0] sm:$0xff]  ;;  %v2486_v58 = vld [vmem:[%s12339_s3 + $0x718] sm:$0xff] }
 0x34e   :  { %3738 = vmatpush.msra.mxu3 %v2765_v14  ;;  %3811 = vmatpush.msrb.mxu2 %v3117_v36  ;;  %v2933_v50 = vld [vmem:[%s12339_s3 + $0x1510] sm:$0xff]  ;;  %v2358_v14 = vld [vmem:[%s12339_s3 + $0x318] sm:$0xff] }
 0x34f   :  { %3662 = vmatmul.f32.vlgmr.msrb.gmra.mxu3 %v9259_v37  ;;  %3769 = vmatpush.msrb.mxu0 %v2829_v3  ;;  %v3085_v24 = vld [vmem:[%s12339_s3 + $0x19d0] sm:$0xff]  ;;  %v2638_v60 = vld [vmem:[%s12339_s3 + $0xbd8] sm:$0xff] }
 0x350   :  { %3739 = vmatpush.msra.mxu3 %v2757_v45  ;;  %3792 = vmatpush.msrb.mxu1 %v2957_v57  ;;  %v2725_v31 = vld [vmem:[%s12339_s3 + $0xe90] sm:$0xff]  ;;  %v2350_v3 = vld [vmem:[%s12339_s3 + $0x2d8] sm:$0xff] }
 0x351   :  { %3812 = vmatpush.msrb.mxu2 %v3109_v8  ;;  %3770 = vmatpush.msrb.mxu0 %v2821_v29  ;;  %v2797_v55 = vld [vmem:[%s12339_s3 + $0x10d0] sm:$0xff]  ;;  %v2478_v45 = vld [vmem:[%s12339_s3 + $0x6d8] sm:$0xff] }
 0x352   :  { %3740 = vmatpush.msra.mxu3 %v2749_v49  ;;  %3793 = vmatpush.msrb.mxu1 %v2949_v13  ;;  %v2925_v63 = vld [vmem:[%s12339_s3 + $0x14d0] sm:$0xff]  ;;  %v2630_v57 = vld [vmem:[%s12339_s3 + $0xb98] sm:$0xff] }
 0x353   :  { %3813 = vmatpush.msrb.mxu2 %v3101_v43  ;;  %3771 = vmatpush.msrb.mxu0 %v2813_v44  ;;  %v3077_v38 = vld [vmem:[%s12339_s3 + $0x1990] sm:$0xff]  ;;  %v2342_v29 = vld [vmem:[%s12339_s3 + $0x298] sm:$0xff] }
 0x354   :  { %3741 = vmatpush.msra.mxu3 %v2741_v10  ;;  %3794 = vmatpush.msrb.mxu1 %v2941_v17  ;;  %v2717_v62 = vld [vmem:[%s12339_s3 + $0xe50] sm:$0xff]  ;;  %v2470_v49 = vld [vmem:[%s12339_s3 + $0x698] sm:$0xff] }
 0x355   :  { %3814 = vmatpush.msrb.mxu2 %v3093_v16  ;;  %3772 = vmatpush.msrb.mxu0 %v2805_v19  ;;  %v2789_v2 = vld [vmem:[%s12339_s3 + $0x1090] sm:$0xff]  ;;  %v2622_v13 = vld [vmem:[%s12339_s3 + $0xb58] sm:$0xff] }
 0x356   :  { %3742 = vmatpush.msra.mxu3 %v2733_v39  ;;  %3795 = vmatpush.msrb.mxu1 %v2933_v50  ;;  %v2917_v15 = vld [vmem:[%s12339_s3 + $0x1490] sm:$0xff]  ;;  %v2334_v44 = vld [vmem:[%s12339_s3 + $0x258] sm:$0xff] }
 0x357   :  { %3815 = vmatpush.msrb.mxu2 %v3085_v24  ;;  %3665 = vmatmul.f32.gmra.mxu3 %v9322_v48  ;;  %v3069_v1 = vld [vmem:[%s12339_s3 + $0x1950] sm:$0xff]  ;;  %v2462_v10 = vld [vmem:[%s12339_s3 + $0x658] sm:$0xff] }
 0x358   :  { %3743 = vmatpush.msra.mxu3 %v2725_v31  ;;  %3773 = vmatpush.msrb.mxu0 %v2797_v55  ;;  %v2709_v27 = vld [vmem:[%s12339_s3 + $0xe10] sm:$0xff]  ;;  %v2614_v17 = vld [vmem:[%s12339_s3 + $0xb18] sm:$0xff] }
 0x359   :  { %3796 = vmatpush.msrb.mxu1 %v2925_v63  ;;  %3816 = vmatpush.msrb.mxu2 %v3077_v38  ;;  %v2781_v21 = vld [vmem:[%s12339_s3 + $0x1050] sm:$0xff]  ;;  %v2326_v19 = vld [vmem:[%s12339_s3 + $0x218] sm:$0xff] }
 0x35a   :  { %3744 = vmatpush.msra.mxu3 %v2717_v62  ;;  %3774 = vmatpush.msrb.mxu0 %v2789_v2  ;;  %v2909_v28 = vld [vmem:[%s12339_s3 + $0x1450] sm:$0xff]  ;;  %v2454_v50 = vld [vmem:[%s12339_s3 + $0x618] sm:$0xff] }
 0x35b   :  { %v3061_v9 = vld [vmem:[%s12339_s3 + $0x1910] sm:$0xff]  ;;  %3797 = vmatpush.msrb.mxu1 %v2917_v15  ;;  %3817 = vmatpush.msrb.mxu2 %v3069_v1  ;;  %v2606_v24 = vld [vmem:[%s12339_s3 + $0xad8] sm:$0xff] }
 0x35c   :  { %v2701_v40 = vld [vmem:[%s12339_s3 + $0xdd0] sm:$0xff]  ;;  %3745 = vmatpush.msra.mxu3 %v2709_v27  ;;  %3775 = vmatpush.msrb.mxu0 %v2781_v21  ;;  %v2318_v31 = vld [vmem:[%s12339_s3 + $0x1d8] sm:$0xff] }
 0x35d   :  { %v2773_v20 = vld [vmem:[%s12339_s3 + $0x1010] sm:$0xff]  ;;  %3798 = vmatpush.msrb.mxu1 %v2909_v28  ;;  %3818 = vmatpush.msrb.mxu2 %v3061_v9  ;;  %v2446_v63 = vld [vmem:[%s12339_s3 + $0x5d8] sm:$0xff] }
 0x35e   :  { %v2901_v35 = vld [vmem:[%s12339_s3 + $0x1410] sm:$0xff]  ;;  %3746 = vmatpush.msra.mxu3 %v2701_v40  ;;  %3776 = vmatpush.msrb.mxu0 %v2773_v20  ;;  %v2598_v38 = vld [vmem:[%s12339_s3 + $0xa98] sm:$0xff] }
 0x35f   :  { %v3053_v33 = vld [vmem:[%s12339_s3 + $0x18d0] sm:$0xff]  ;;  %3799 = vmatpush.msrb.mxu1 %v2901_v35  ;;  %3777 = vmatmul.f32.vlgmr.msrb.gmra.mxu0 %v8839_v26  ;;  %v2310_v62 = vld [vmem:[%s12339_s3 + $0x198] sm:$0xff] }
 0x360   :  { %3819 = vmatpush.msrb.mxu2 %v3053_v33  ;;  %v2693_v12 = vld [vmem:[%s12339_s3 + $0xd90] sm:$0xff]  ;;  %3800 = vmatmul.f32.vlgmr.msrb.gmra.mxu1 %v8842_v52  ;;  %v2438_v15 = vld [vmem:[%s12339_s3 + $0x598] sm:$0xff] }
 0x361   :  { %v3045_v32 = vld [vmem:[%s12339_s3 + $0x1890] sm:$0xff]  ;;  %3853 = vmatpush.msra.mxu0 %v2382_v59  ;;  %3876 = vmatpush.msra.mxu1 %v2510_v0  ;;  %v2590_v1 = vld [vmem:[%s12339_s3 + $0xa58] sm:$0xff] }
 0x362   :  { %v2685_v6 = vld [vmem:[%s12339_s3 + $0xd50] sm:$0xff]  ;;  %3747 = vmatpush.msra.mxu3 %v2693_v12  ;;  %3820 = vmatpush.msrb.mxu2 %v3045_v32  ;;  %v2302_v27 = vld [vmem:[%s12339_s3 + $0x158] sm:$0xff] }
 0x363   :  { %v3037_v47 = vld [vmem:[%s12339_s3 + $0x1850] sm:$0xff]  ;;  %3854 = vmatpush.msra.mxu0 %v2374_v4  ;;  %3877 = vmatpush.msra.mxu1 %v2502_v53  ;;  %v2430_v28 = vld [vmem:[%s12339_s3 + $0x558] sm:$0xff] }
 0x364   :  { %v2677_v42 = vld [vmem:[%s12339_s3 + $0xd10] sm:$0xff]  ;;  %3748 = vmatpush.msra.mxu3 %v2685_v6  ;;  %3821 = vmatpush.msrb.mxu2 %v3037_v47  ;;  %v2582_v9 = vld [vmem:[%s12339_s3 + $0xa18] sm:$0xff] }
 0x365   :  { %v3029_v23 = vld [vmem:[%s12339_s3 + $0x1810] sm:$0xff]  ;;  %3855 = vmatpush.msra.mxu0 %v2366_v54  ;;  %3878 = vmatpush.msra.mxu1 %v2494_v51  ;;  %v2294_v20 = vld [vmem:[%s12339_s3 + $0x118] sm:$0xff] }
 0x366   :  { %3749 = vmatpush.msra.mxu3 %v2677_v42  ;;  %3822 = vmatpush.msrb.mxu2 %v3029_v23  ;;  %v2669_v36 = vld [vmem:[%s12339_s3 + $0xcd0] sm:$0xff]  ;;  %v2422_v35 = vld [vmem:[%s12339_s3 + $0x518] sm:$0xff] }
 0x367   :  { %3823 = vmatmul.f32.vlgmr.msrb.gmra.mxu2 %v9043_v11  ;;  %3856 = vmatpush.msra.mxu0 %v2358_v14  ;;  %v2661_v8 = vld [vmem:[%s12339_s3 + $0xc90] sm:$0xff]  ;;  %v2574_v33 = vld [vmem:[%s12339_s3 + $0x9d8] sm:$0xff] }
 0x368   :  { %3879 = vmatpush.msra.mxu1 %v2486_v58  ;;  %3899 = vmatpush.msra.mxu2 %v2638_v60  ;;  %v2653_v43 = vld [vmem:[%s12339_s3 + $0xc50] sm:$0xff]  ;;  %v2286_v0 = vld [vmem:[%s12339_s3 + $0xd8] sm:$0xff] }
 0x369   :  { %3750 = vmatpush.msra.mxu3 %v2669_v36  ;;  %3780 = vmatmul.f32.gmra.mxu0 %v8890_v7  ;;  %v2645_v16 = vld [vmem:[%s12339_s3 + $0xc10] sm:$0xff]  ;;  %v2414_v12 = vld [vmem:[%s12339_s3 + $0x4d8] sm:$0xff] }
 0x36a   :  { %3803 = vmatmul.f32.gmra.mxu1 %v8892_v25  ;;  %3857 = vmatpush.msra.mxu0 %v2350_v3  ;;  %v3277_v39 = vld [vmem:[%s12339_s3 + $0x1fd0] sm:$0xff]  ;;  %v2566_v32 = vld [vmem:[%s12339_s3 + $0x998] sm:$0xff] }
 0x36b   :  { %3880 = vmatpush.msra.mxu1 %v2478_v45  ;;  %3900 = vmatpush.msra.mxu2 %v2630_v57  ;;  %v3269_v55 = vld [vmem:[%s12339_s3 + $0x1f90] sm:$0xff]  ;;  %v2278_v53 = vld [vmem:[%s12339_s3 + $0x98] sm:$0xff] }
 0x36c   :  { %3751 = vmatpush.msra.mxu3 %v2661_v8  ;;  %3858 = vmatpush.msra.mxu0 %v2342_v29  ;;  %v3261_v2 = vld [vmem:[%s12339_s3 + $0x1f50] sm:$0xff]  ;;  %v2406_v6 = vld [vmem:[%s12339_s3 + $0x498] sm:$0xff] }
 0x36d   :  { %3881 = vmatpush.msra.mxu1 %v2470_v49  ;;  %3901 = vmatpush.msra.mxu2 %v2622_v13  ;;  %v3253_v21 = vld [vmem:[%s12339_s3 + $0x1f10] sm:$0xff]  ;;  %v2558_v47 = vld [vmem:[%s12339_s3 + $0x958] sm:$0xff] }
 0x36e   :  { %3752 = vmatpush.msra.mxu3 %v2653_v43  ;;  %3859 = vmatpush.msra.mxu0 %v2334_v44  ;;  %v3245_v40 = vld [vmem:[%s12339_s3 + $0x1ed0] sm:$0xff]  ;;  %v2270_v51 = vld [vmem:[%s12339_s3 + $0x58] sm:$0xff] }
 0x36f   :  { %3882 = vmatpush.msra.mxu1 %v2462_v10  ;;  %3902 = vmatpush.msra.mxu2 %v2614_v17  ;;  %v3237_v59 = vld [vmem:[%s12339_s3 + $0x1e90] sm:$0xff]  ;;  %v2398_v42 = vld [vmem:[%s12339_s3 + $0x458] sm:$0xff] }
 0x370   :  { %3753 = vmatpush.msra.mxu3 %v2645_v16  ;;  %3826 = vmatmul.f32.gmra.mxu2 %v9090_v46  ;;  %v3229_v4 = vld [vmem:[%s12339_s3 + $0x1e50] sm:$0xff]  ;;  %v2550_v23 = vld [vmem:[%s12339_s3 + $0x918] sm:$0xff] }
 0x371   :  { %3754 = vmatmul.f32.vlgmr.msra.gmra.mxu3 %v8637_v34  ;;  %3860 = vmatpush.msra.mxu0 %v2326_v19  ;;  %v3221_v54 = vld [vmem:[%s12339_s3 + $0x1e10] sm:$0xff]  ;;  %v2262_v58 = vld [vmem:[%s12339_s3 + $0x18] sm:$0xff] }
 0x372   :  { %3830 = vmatpush.msrb.mxu3 %v3277_v39  ;;  %3883 = vmatpush.msra.mxu1 %v2454_v50  ;;  %v3213_v14 = vld [vmem:[%s12339_s3 + $0x1dd0] sm:$0xff]  ;;  %v2390_v60 = vld [vmem:[%s12339_s3 + $0x418] sm:$0xff] }
 0x373   :  { %3903 = vmatpush.msra.mxu2 %v2606_v24  ;;  %3861 = vmatpush.msra.mxu0 %v2318_v31  ;;  %v2542_v36 = vld [vmem:[%s12339_s3 + $0x8d8] sm:$0xff]  ;;  %v3205_v57 = vld [vmem:[%s12339_s3 + $0x1d90] sm:$0xff] }
 0x374   :  { %3831 = vmatpush.msrb.mxu3 %v3269_v55  ;;  %3884 = vmatpush.msra.mxu1 %v2446_v63  ;;  %v2894_v3 = vld [vmem:[%s12339_s3 + $0x13d8] sm:$0xff]  ;;  %v3197_v13 = vld [vmem:[%s12339_s3 + $0x1d50] sm:$0xff] }
 0x375   :  { %3904 = vmatpush.msra.mxu2 %v2598_v38  ;;  %3862 = vmatpush.msra.mxu0 %v2310_v62  ;;  %v3022_v45 = vld [vmem:[%s12339_s3 + $0x17d8] sm:$0xff]  ;;  %v3189_v17 = vld [vmem:[%s12339_s3 + $0x1d10] sm:$0xff] }
 0x376   :  { %3832 = vmatpush.msrb.mxu3 %v3261_v2  ;;  %3885 = vmatpush.msra.mxu1 %v2438_v15  ;;  %v2534_v8 = vld [vmem:[%s12339_s3 + $0x898] sm:$0xff]  ;;  %v3181_v24 = vld [vmem:[%s12339_s3 + $0x1cd0] sm:$0xff] }
 0x377   :  { %3905 = vmatpush.msra.mxu2 %v2590_v1  ;;  %3863 = vmatpush.msra.mxu0 %v2302_v27  ;;  %v2886_v29 = vld [vmem:[%s12339_s3 + $0x1398] sm:$0xff]  ;;  %v3173_v38 = vld [vmem:[%s12339_s3 + $0x1c90] sm:$0xff] }
 0x378   :  { %3833 = vmatpush.msrb.mxu3 %v3253_v21  ;;  %3886 = vmatpush.msra.mxu1 %v2430_v28  ;;  %v3014_v49 = vld [vmem:[%s12339_s3 + $0x1798] sm:$0xff]  ;;  %v3165_v1 = vld [vmem:[%s12339_s3 + $0x1c50] sm:$0xff] }
 0x379   :  { %3906 = vmatpush.msra.mxu2 %v2582_v9  ;;  %3757 = vmatmul.f32.gmra.mxu3 %v8694_v61  ;;  %v2526_v43 = vld [vmem:[%s12339_s3 + $0x858] sm:$0xff]  ;;  %v3157_v9 = vld [vmem:[%s12339_s3 + $0x1c10] sm:$0xff] }
 0x37a   :  { %3834 = vmatpush.msrb.mxu3 %v3245_v40  ;;  %3864 = vmatpush.msra.mxu0 %v2294_v20  ;;  %v2878_v44 = vld [vmem:[%s12339_s3 + $0x1358] sm:$0xff] }
 0x37b   :  { %3887 = vmatpush.msra.mxu1 %v2422_v35  ;;  %3907 = vmatpush.msra.mxu2 %v2574_v33  ;;  %v3006_v10 = vld [vmem:[%s12339_s3 + $0x1758] sm:$0xff] }
 0x37c   :  { %3835 = vmatpush.msrb.mxu3 %v3237_v59  ;;  %3865 = vmatpush.msra.mxu0 %v2286_v0  ;;  %v2518_v16 = vld [vmem:[%s12339_s3 + $0x818] sm:$0xff]  ;;  %v9923_v0 = vpop.f32.mrf.mxu0 }
 0x37d   :  { %3888 = vmatpush.msra.mxu1 %v2414_v12  ;;  %3908 = vmatpush.msra.mxu2 %v2566_v32  ;;  %v2870_v19 = vld [vmem:[%s12339_s3 + $0x1318] sm:$0xff] }
 0x37e   :  { %3836 = vmatpush.msrb.mxu3 %v3229_v4  ;;  %3866 = vmatpush.msra.mxu0 %v2278_v53  ;;  %v2998_v39 = vld [vmem:[%s12339_s3 + $0x1718] sm:$0xff]  ;;  %v9932_v4 = vpop.f32.mrf.mxu1 }
 0x37f   :  { %3889 = vmatpush.msra.mxu1 %v2406_v6  ;;  %3909 = vmatpush.msra.mxu2 %v2558_v47  ;;  %v3150_v50 = vld [vmem:[%s12339_s3 + $0x1bd8] sm:$0xff] }
 0x380   :  { %3837 = vmatpush.msrb.mxu3 %v3221_v54  ;;  %3867 = vmatpush.msra.mxu0 %v2270_v51  ;;  %v2862_v31 = vld [vmem:[%s12339_s3 + $0x12d8] sm:$0xff] }
 0x381   :  { %3890 = vmatpush.msra.mxu1 %v2398_v42  ;;  %3910 = vmatpush.msra.mxu2 %v2550_v23  ;;  %v2990_v55 = vld [vmem:[%s12339_s3 + $0x16d8] sm:$0xff] }
 0x382   :  { %3838 = vmatpush.msrb.mxu3 %v3213_v14  ;;  %3868 = vmatpush.msra.mxu0 %v2262_v58  ;;  %v3142_v63 = vld [vmem:[%s12339_s3 + $0x1b98] sm:$0xff] }
 0x383   :  { %3891 = vmatpush.msra.mxu1 %v2390_v60  ;;  %3911 = vmatpush.msra.mxu2 %v2542_v36  ;;  %v2854_v62 = vld [vmem:[%s12339_s3 + $0x1298] sm:$0xff] }
 0x384   :  { %3869 = vmatmul.f32.vlgmr.msra.gmra.mxu0 %v8629_v56  ;;  %3892 = vmatmul.f32.vlgmr.msra.gmra.mxu1 %v8632_v41  ;;  %v2982_v2 = vld [vmem:[%s12339_s3 + $0x1698] sm:$0xff] }
 0x385   :  { %3945 = vmatpush.msrb.mxu0 %v2894_v3  ;;  %3968 = vmatpush.msrb.mxu1 %v3022_v45  ;;  %v3134_v15 = vld [vmem:[%s12339_s3 + $0x1b58] sm:$0xff] }
 0x386   :  { %3839 = vmatpush.msrb.mxu3 %v3205_v57  ;;  %3912 = vmatpush.msra.mxu2 %v2534_v8  ;;  %v2846_v27 = vld [vmem:[%s12339_s3 + $0x1258] sm:$0xff] }
 0x387   :  { %3946 = vmatpush.msrb.mxu0 %v2886_v29  ;;  %3969 = vmatpush.msrb.mxu1 %v3014_v49  ;;  %v2974_v21 = vld [vmem:[%s12339_s3 + $0x1658] sm:$0xff]  ;;  %v9980_v29 = vpop.f32.mrf.mxu2 }
 0x388   :  { %3840 = vmatpush.msrb.mxu3 %v3197_v13  ;;  %3913 = vmatpush.msra.mxu2 %v2526_v43  ;;  %v3126_v28 = vld [vmem:[%s12339_s3 + $0x1b18] sm:$0xff]  ;;  %v9988_v43 = vpop.f32.mrf.mxu0 }
 0x389   :  { %3947 = vmatpush.msrb.mxu0 %v2878_v44  ;;  %3970 = vmatpush.msrb.mxu1 %v3006_v10  ;;  %v2838_v40 = vld [vmem:[%s12339_s3 + $0x1218] sm:$0xff] }
 0x38a   :  { %3841 = vmatpush.msrb.mxu3 %v3189_v17  ;;  %3914 = vmatpush.msra.mxu2 %v2518_v16  ;;  %v2766_v20 = vld [vmem:[%s12339_s3 + $0xfd8] sm:$0xff]  ;;  %v9996_v17 = vpop.f32.mrf.mxu1 }
 0x38b   :  { %3915 = vmatmul.f32.vlgmr.msra.gmra.mxu2 %v8635_v30  ;;  %3948 = vmatpush.msrb.mxu0 %v2870_v19  ;;  %v2966_v35 = vld [vmem:[%s12339_s3 + $0x1618] sm:$0xff] }
 0x38c   :  { %3971 = vmatpush.msrb.mxu1 %v2998_v39  ;;  %3991 = vmatpush.msrb.mxu2 %v3150_v50  ;;  %v3118_v33 = vld [vmem:[%s12339_s3 + $0x1ad8] sm:$0xff] }
 0x38d   :  { %3842 = vmatpush.msrb.mxu3 %v3181_v24  ;;  %3872 = vmatmul.f32.gmra.mxu0 %v8687_v5  ;;  %v2830_v59 = vld [vmem:[%s12339_s3 + $0x11d8] sm:$0xff] }
 0x38e   :  { %3895 = vmatmul.f32.gmra.mxu1 %v8689_v22  ;;  %3949 = vmatpush.msrb.mxu0 %v2862_v31  ;;  %v2758_v12 = vld [vmem:[%s12339_s3 + $0xf98] sm:$0xff] }
 0x38f   :  { %3972 = vmatpush.msrb.mxu1 %v2990_v55  ;;  %3992 = vmatpush.msrb.mxu2 %v3142_v63  ;;  %v2958_v32 = vld [vmem:[%s12339_s3 + $0x15d8] sm:$0xff] }
 0x390   :  { %3843 = vmatpush.msrb.mxu3 %v3173_v38  ;;  %3950 = vmatpush.msrb.mxu0 %v2854_v62  ;;  %v3110_v53 = vld [vmem:[%s12339_s3 + $0x1a98] sm:$0xff] }
 0x391   :  { %3973 = vmatpush.msrb.mxu1 %v2982_v2  ;;  %3993 = vmatpush.msrb.mxu2 %v3134_v15  ;;  %v2822_v6 = vld [vmem:[%s12339_s3 + $0x1198] sm:$0xff]  ;;  %v2383_v2 = vld [vmem:[%s12339_s3 + $0x3e0] sm:$0xff] }
 0x392   :  { %3844 = vmatpush.msrb.mxu3 %v3165_v1  ;;  %3951 = vmatpush.msrb.mxu0 %v2846_v27  ;;  %v2750_v47 = vld [vmem:[%s12339_s3 + $0xf58] sm:$0xff]  ;;  %v2511_v15 = vld [vmem:[%s12339_s3 + $0x7e0] sm:$0xff]  ;;  %v10034_v1 = vpop.f32.mrf.mxu0 }
 0x393   :  { %3974 = vmatpush.msrb.mxu1 %v2974_v21  ;;  %3994 = vmatpush.msrb.mxu2 %v3126_v28  ;;  %v2950_v54 = vld [vmem:[%s12339_s3 + $0x1598] sm:$0xff]  ;;  %v10042_v28 = vpop.f32.mrf.mxu2 }
 0x394   :  { %3845 = vmatpush.msrb.mxu3 %v3157_v9  ;;  %3918 = vmatmul.f32.gmra.mxu2 %v8692_v18  ;;  %v3102_v51 = vld [vmem:[%s12339_s3 + $0x1a58] sm:$0xff]  ;;  %v10044_v9 = vpop.f32.mrf.mxu1 }
 0x395   :  { %3846 = vmatmul.f32.vlgmr.msrb.gmra.mxu3 %v9259_v37  ;;  %3952 = vmatpush.msrb.mxu0 %v2838_v40  ;;  %v2814_v42 = vld [vmem:[%s12339_s3 + $0x1158] sm:$0xff]  ;;  %v2375_v40 = vld [vmem:[%s12339_s3 + $0x3a0] sm:$0xff] }
 0x396   :  { %3922 = vmatpush.msra.mxu3 %v2766_v20  ;;  %3975 = vmatpush.msrb.mxu1 %v2966_v35  ;;  %v2742_v23 = vld [vmem:[%s12339_s3 + $0xf18] sm:$0xff]  ;;  %v2503_v20 = vld [vmem:[%s12339_s3 + $0x7a0] sm:$0xff] }
 0x397   :  { %3995 = vmatpush.msrb.mxu2 %v3118_v33  ;;  %3953 = vmatpush.msrb.mxu0 %v2830_v59  ;;  %v2942_v14 = vld [vmem:[%s12339_s3 + $0x1558] sm:$0xff]  ;;  %v2367_v59 = vld [vmem:[%s12339_s3 + $0x360] sm:$0xff] }
 0x398   :  { %3923 = vmatpush.msra.mxu3 %v2758_v12  ;;  %3976 = vmatpush.msrb.mxu1 %v2958_v32  ;;  %v3094_v58 = vld [vmem:[%s12339_s3 + $0x1a18] sm:$0xff]  ;;  %v2495_v12 = vld [vmem:[%s12339_s3 + $0x760] sm:$0xff] }
 0x399   :  { %3996 = vmatpush.msrb.mxu2 %v3110_v53  ;;  %3954 = vmatpush.msrb.mxu0 %v2822_v6  ;;  %v2734_v60 = vld [vmem:[%s12339_s3 + $0xed8] sm:$0xff]  ;;  %v2359_v6 = vld [vmem:[%s12339_s3 + $0x320] sm:$0xff] }
 0x39a   :  { %3924 = vmatpush.msra.mxu3 %v2750_v47  ;;  %3977 = vmatpush.msrb.mxu1 %v2950_v54  ;;  %v2806_v36 = vld [vmem:[%s12339_s3 + $0x1118] sm:$0xff]  ;;  %v2487_v47 = vld [vmem:[%s12339_s3 + $0x720] sm:$0xff] }
 0x39b   :  { %3997 = vmatpush.msrb.mxu2 %v3102_v51  ;;  %3955 = vmatpush.msrb.mxu0 %v2814_v42  ;;  %v2934_v3 = vld [vmem:[%s12339_s3 + $0x1518] sm:$0xff]  ;;  %v2639_v54 = vld [vmem:[%s12339_s3 + $0xbe0] sm:$0xff] }
 0x39c   :  { %3925 = vmatpush.msra.mxu3 %v2742_v23  ;;  %3978 = vmatpush.msrb.mxu1 %v2942_v14  ;;  %v3086_v45 = vld [vmem:[%s12339_s3 + $0x19d8] sm:$0xff]  ;;  %v2351_v42 = vld [vmem:[%s12339_s3 + $0x2e0] sm:$0xff]  ;;  %v10088_v23 = vpop.f32.mrf.mxu2 }
 0x39d   :  { %3998 = vmatpush.msrb.mxu2 %v3094_v58  ;;  %3849 = vmatmul.f32.gmra.mxu3 %v9322_v48  ;;  %v2726_v57 = vld [vmem:[%s12339_s3 + $0xe98] sm:$0xff]  ;;  %v2479_v14 = vld [vmem:[%s12339_s3 + $0x6e0] sm:$0xff] }
 0x39e   :  { %v2798_v8 = vld [vmem:[%s12339_s3 + $0x10d8] sm:$0xff]  ;;  %3926 = vmatpush.msra.mxu3 %v2734_v60  ;;  %3956 = vmatpush.msrb.mxu0 %v2806_v36  ;;  %v2631_v58 = vld [vmem:[%s12339_s3 + $0xba0] sm:$0xff]  ;;  %v10096_v60 = vpop.f32.mrf.mxu0 }
 0x39f   :  { %v2926_v49 = vld [vmem:[%s12339_s3 + $0x14d8] sm:$0xff]  ;;  %3979 = vmatpush.msrb.mxu1 %v2934_v3  ;;  %3999 = vmatpush.msrb.mxu2 %v3086_v45  ;;  %12374 = vst [vmem:[#allocation7_spill] sm:$0xff] %v10096_v60  ;;  %v2343_v3 = vld [vmem:[%s12339_s3 + $0x2a0] sm:$0xff]  ;;  %v10105_v45 = vpop.f32.mrf.mxu1 }
 0x3a0   :  { %v3078_v13 = vld [vmem:[%s12339_s3 + $0x1998] sm:$0xff]  ;;  %3927 = vmatpush.msra.mxu3 %v2726_v57  ;;  %3957 = vmatpush.msrb.mxu0 %v2798_v8  ;;  %12375 = vst [vmem:[#allocation11_spill] sm:$0xff] %v10105_v45  ;;  %v2471_v57 = vld [vmem:[%s12339_s3 + $0x6a0] sm:$0xff]  ;;  %v2584_v45 = vld [vmem:[%s12339_s3 + $0xa28] sm:$0xff] }
 0x3a1   :  { %v2718_v44 = vld [vmem:[%s12339_s3 + $0xe58] sm:$0xff]  ;;  %3980 = vmatpush.msrb.mxu1 %v2926_v49  ;;  %4000 = vmatpush.msrb.mxu2 %v3078_v13  ;;  %v2623_v8 = vld [vmem:[%s12339_s3 + $0xb60] sm:$0xff] }
 0x3a2   :  { %v2790_v10 = vld [vmem:[%s12339_s3 + $0x1098] sm:$0xff]  ;;  %3928 = vmatpush.msra.mxu3 %v2718_v44  ;;  %v2335_v13 = vld [vmem:[%s12339_s3 + $0x260] sm:$0xff] }
 0x3a3   :  { %v2918_v16 = vld [vmem:[%s12339_s3 + $0x1498] sm:$0xff]  ;;  %3958 = vmatpush.msrb.mxu0 %v2790_v10  ;;  %v2463_v44 = vld [vmem:[%s12339_s3 + $0x660] sm:$0xff] }
 0x3a4   :  { %v3070_v19 = vld [vmem:[%s12339_s3 + $0x1958] sm:$0xff]  ;;  %3981 = vmatpush.msrb.mxu1 %v2918_v16  ;;  %v2615_v10 = vld [vmem:[%s12339_s3 + $0xb20] sm:$0xff] }
 0x3a5   :  { %v2710_v39 = vld [vmem:[%s12339_s3 + $0xe18] sm:$0xff]  ;;  %4001 = vmatpush.msrb.mxu2 %v3070_v19  ;;  %v2327_v19 = vld [vmem:[%s12339_s3 + $0x220] sm:$0xff] }
 0x3a6   :  { %v2782_v50 = vld [vmem:[%s12339_s3 + $0x1058] sm:$0xff]  ;;  %3929 = vmatpush.msra.mxu3 %v2710_v39 }
 0x3a7   :  { %v2910_v24 = vld [vmem:[%s12339_s3 + $0x1458] sm:$0xff]  ;;  %3959 = vmatpush.msrb.mxu0 %v2782_v50  ;;  %v2455_v50 = vld [vmem:[%s12339_s3 + $0x620] sm:$0xff] }
 0x3a8   :  { %v3062_v31 = vld [vmem:[%s12339_s3 + $0x1918] sm:$0xff]  ;;  %3982 = vmatpush.msrb.mxu1 %v2910_v24  ;;  %v2607_v24 = vld [vmem:[%s12339_s3 + $0xae0] sm:$0xff] }
 0x3a9   :  { %v2702_v55 = vld [vmem:[%s12339_s3 + $0xdd8] sm:$0xff]  ;;  %4002 = vmatpush.msrb.mxu2 %v3062_v31  ;;  %v2319_v31 = vld [vmem:[%s12339_s3 + $0x1e0] sm:$0xff] }
 0x3aa   :  { %v2774_v63 = vld [vmem:[%s12339_s3 + $0x1018] sm:$0xff]  ;;  %3930 = vmatpush.msra.mxu3 %v2702_v55  ;;  %v10145_v55 = vpop.f32.mrf.mxu0 }
 0x3ab   :  { %v2902_v38 = vld [vmem:[%s12339_s3 + $0x1418] sm:$0xff]  ;;  %3960 = vmatpush.msrb.mxu0 %v2774_v63 }
 0x3ac   :  { %v3054_v62 = vld [vmem:[%s12339_s3 + $0x18d8] sm:$0xff]  ;;  %3983 = vmatpush.msrb.mxu1 %v2902_v38  ;;  %3961 = vmatmul.f32.vlgmr.msrb.gmra.mxu0 %v8839_v26  ;;  %v2447_v38 = vld [vmem:[%s12339_s3 + $0x5e0] sm:$0xff] }
 0x3ad   :  { %4003 = vmatpush.msrb.mxu2 %v3054_v62  ;;  %v2694_v27 = vld [vmem:[%s12339_s3 + $0xd98] sm:$0xff]  ;;  %3984 = vmatmul.f32.vlgmr.msrb.gmra.mxu1 %v8842_v52  ;;  %v10154_v62 = vpop.f32.mrf.mxu1 }
 0x3ae   :  { %v3046_v21 = vld [vmem:[%s12339_s3 + $0x1898] sm:$0xff]  ;;  %4037 = vmatpush.msra.mxu0 %v2383_v2  ;;  %4060 = vmatpush.msra.mxu1 %v2511_v15  ;;  %v10156_v2 = vpop.f32.mrf.mxu2  ;;  %v2599_v15 = vld [vmem:[%s12339_s3 + $0xaa0] sm:$0xff] }
 0x3af   :  { %v2686_v35 = vld [vmem:[%s12339_s3 + $0xd58] sm:$0xff]  ;;  %3931 = vmatpush.msra.mxu3 %v2694_v27  ;;  %4004 = vmatpush.msrb.mxu2 %v3046_v21  ;;  %12376 = vst [vmem:[#allocation15_spill] sm:$0xff] %v10156_v2  ;;  %v2311_v27 = vld [vmem:[%s12339_s3 + $0x1a0] sm:$0xff] }
 0x3b0   :  { %v3038_v33 = vld [vmem:[%s12339_s3 + $0x1858] sm:$0xff]  ;;  %4038 = vmatpush.msra.mxu0 %v2375_v40  ;;  %4061 = vmatpush.msra.mxu1 %v2503_v20  ;;  %v2439_v40 = vld [vmem:[%s12339_s3 + $0x5a0] sm:$0xff] }
 0x3b1   :  { %v2678_v32 = vld [vmem:[%s12339_s3 + $0xd18] sm:$0xff]  ;;  %3932 = vmatpush.msra.mxu3 %v2686_v35  ;;  %4005 = vmatpush.msrb.mxu2 %v3038_v33  ;;  %v2591_v20 = vld [vmem:[%s12339_s3 + $0xa60] sm:$0xff] }
 0x3b2   :  { %v3030_v53 = vld [vmem:[%s12339_s3 + $0x1818] sm:$0xff]  ;;  %4039 = vmatpush.msra.mxu0 %v2367_v59  ;;  %4062 = vmatpush.msra.mxu1 %v2495_v12  ;;  %v2303_v35 = vld [vmem:[%s12339_s3 + $0x160] sm:$0xff] }
 0x3b3   :  { %3933 = vmatpush.msra.mxu3 %v2678_v32  ;;  %4006 = vmatpush.msrb.mxu2 %v3030_v53  ;;  %v2670_v51 = vld [vmem:[%s12339_s3 + $0xcd8] sm:$0xff]  ;;  %v2431_v59 = vld [vmem:[%s12339_s3 + $0x560] sm:$0xff] }
 0x3b4   :  { %4007 = vmatmul.f32.vlgmr.msrb.gmra.mxu2 %v9043_v11  ;;  %4040 = vmatpush.msra.mxu0 %v2359_v6  ;;  %v2662_v36 = vld [vmem:[%s12339_s3 + $0xc98] sm:$0xff]  ;;  %v2583_v12 = vld [vmem:[%s12339_s3 + $0xa20] sm:$0xff] }
 0x3b5   :  { %4063 = vmatpush.msra.mxu1 %v2487_v47  ;;  %4083 = vmatpush.msra.mxu2 %v2639_v54  ;;  %v2654_v49 = vld [vmem:[%s12339_s3 + $0xc58] sm:$0xff]  ;;  %v2295_v53 = vld [vmem:[%s12339_s3 + $0x120] sm:$0xff] }
 0x3b6   :  { %3934 = vmatpush.msra.mxu3 %v2670_v51  ;;  %3964 = vmatmul.f32.gmra.mxu0 %v8890_v7  ;;  %v2646_v16 = vld [vmem:[%s12339_s3 + $0xc18] sm:$0xff]  ;;  %v2423_v6 = vld [vmem:[%s12339_s3 + $0x520] sm:$0xff] }
 0x3b7   :  { %3987 = vmatmul.f32.gmra.mxu1 %v8892_v25  ;;  %4041 = vmatpush.msra.mxu0 %v2351_v42  ;;  %v3278_v39 = vld [vmem:[%s12339_s3 + $0x1fd8] sm:$0xff]  ;;  %v2575_v47 = vld [vmem:[%s12339_s3 + $0x9e0] sm:$0xff] }
 0x3b8   :  { %4064 = vmatpush.msra.mxu1 %v2479_v14  ;;  %4084 = vmatpush.msra.mxu2 %v2631_v58  ;;  %v3270_v63 = vld [vmem:[%s12339_s3 + $0x1f98] sm:$0xff]  ;;  %v2287_v51 = vld [vmem:[%s12339_s3 + $0xe0] sm:$0xff]  ;;  %v10210_v58 = vpop.f32.mrf.mxu0 }
 0x3b9   :  { %3935 = vmatpush.msra.mxu3 %v2662_v36  ;;  %4042 = vmatpush.msra.mxu0 %v2343_v3  ;;  %v3262_v21 = vld [vmem:[%s12339_s3 + $0x1f58] sm:$0xff]  ;;  %v2415_v42 = vld [vmem:[%s12339_s3 + $0x4e0] sm:$0xff] }
 0x3ba   :  { %4065 = vmatpush.msra.mxu1 %v2471_v57  ;;  %4085 = vmatpush.msra.mxu2 %v2623_v8  ;;  %v3254_v33 = vld [vmem:[%s12339_s3 + $0x1f18] sm:$0xff]  ;;  %v2567_v14 = vld [vmem:[%s12339_s3 + $0x9a0] sm:$0xff]  ;;  %v10218_v57 = vpop.f32.mrf.mxu1  ;;  %v10220_v8 = vpop.f32.mrf.mxu2 }
 0x3bb   :  { %3936 = vmatpush.msra.mxu3 %v2654_v49  ;;  %4043 = vmatpush.msra.mxu0 %v2335_v13  ;;  %v3246_v32 = vld [vmem:[%s12339_s3 + $0x1ed8] sm:$0xff]  ;;  %v2279_v3 = vld [vmem:[%s12339_s3 + $0xa0] sm:$0xff] }
 0x3bc   :  { %4066 = vmatpush.msra.mxu1 %v2463_v44  ;;  %4086 = vmatpush.msra.mxu2 %v2615_v10  ;;  %v3238_v54 = vld [vmem:[%s12339_s3 + $0x1e98] sm:$0xff]  ;;  %v2407_v49 = vld [vmem:[%s12339_s3 + $0x4a0] sm:$0xff] }
 0x3bd   :  { %3937 = vmatpush.msra.mxu3 %v2646_v16  ;;  %4010 = vmatmul.f32.gmra.mxu2 %v9090_v46  ;;  %v3230_v36 = vld [vmem:[%s12339_s3 + $0x1e58] sm:$0xff]  ;;  %v2559_v13 = vld [vmem:[%s12339_s3 + $0x960] sm:$0xff] }
 0x3be   :  { %3938 = vmatmul.f32.vlgmr.msra.gmra.mxu3 %v8637_v34  ;;  %4044 = vmatpush.msra.mxu0 %v2327_v19  ;;  %v3222_v44 = vld [vmem:[%s12339_s3 + $0x1e18] sm:$0xff]  ;;  %v2271_v10 = vld [vmem:[%s12339_s3 + $0x60] sm:$0xff] }
 0x3bf   :  { %4014 = vmatpush.msrb.mxu3 %v3278_v39  ;;  %4067 = vmatpush.msra.mxu1 %v2455_v50  ;;  %v2399_v16 = vld [vmem:[%s12339_s3 + $0x460] sm:$0xff]  ;;  %v3214_v39 = vld [vmem:[%s12339_s3 + $0x1dd8] sm:$0xff] }
 0x3c0   :  { %4087 = vmatpush.msra.mxu2 %v2607_v24  ;;  %4045 = vmatpush.msra.mxu0 %v2319_v31  ;;  %v2551_v19 = vld [vmem:[%s12339_s3 + $0x920] sm:$0xff] }
 0x3c1   :  { %4015 = vmatpush.msrb.mxu3 %v3270_v63  ;;  %4068 = vmatpush.msra.mxu1 %v2447_v38  ;;  %v2263_v50 = vld [vmem:[%s12339_s3 + $0x20] sm:$0xff] }
 0x3c2   :  { %4088 = vmatpush.msra.mxu2 %v2599_v15  ;;  %4046 = vmatpush.msra.mxu0 %v2311_v27  ;;  %v2391_v24 = vld [vmem:[%s12339_s3 + $0x420] sm:$0xff]  ;;  %v10258_v15 = vpop.f32.mrf.mxu0  ;;  %v3206_v27 = vld [vmem:[%s12339_s3 + $0x1d98] sm:$0xff] }
 0x3c3   :  { %4016 = vmatpush.msrb.mxu3 %v3262_v21  ;;  %4069 = vmatpush.msra.mxu1 %v2439_v40  ;;  %v2543_v31 = vld [vmem:[%s12339_s3 + $0x8e0] sm:$0xff]  ;;  %v10266_v40 = vpop.f32.mrf.mxu3 }
 0x3c4   :  { %4089 = vmatpush.msra.mxu2 %v2591_v20  ;;  %4047 = vmatpush.msra.mxu0 %v2303_v35  ;;  %v2895_v63 = vld [vmem:[%s12339_s3 + $0x13e0] sm:$0xff]  ;;  %v10268_v20 = vpop.f32.mrf.mxu1 }
 0x3c5   :  { %4017 = vmatpush.msrb.mxu3 %v3254_v33  ;;  %4070 = vmatpush.msra.mxu1 %v2431_v59  ;;  %v3023_v38 = vld [vmem:[%s12339_s3 + $0x17e0] sm:$0xff]  ;;  %v3198_v59 = vld [vmem:[%s12339_s3 + $0x1d58] sm:$0xff] }
 0x3c6   :  { %4090 = vmatpush.msra.mxu2 %v2583_v12  ;;  %3941 = vmatmul.f32.gmra.mxu3 %v8694_v61  ;;  %v2535_v21 = vld [vmem:[%s12339_s3 + $0x8a0] sm:$0xff] }
 0x3c7   :  { %4018 = vmatpush.msrb.mxu3 %v3246_v32  ;;  %4048 = vmatpush.msra.mxu0 %v2295_v53  ;;  %v2887_v35 = vld [vmem:[%s12339_s3 + $0x13a0] sm:$0xff]  ;;  %v10284_v32 = vpop.f32.mrf.mxu2 }
 0x3c8   :  { %4071 = vmatpush.msra.mxu1 %v2423_v6  ;;  %4091 = vmatpush.msra.mxu2 %v2575_v47  ;;  %v3015_v33 = vld [vmem:[%s12339_s3 + $0x17a0] sm:$0xff]  ;;  %v3190_v47 = vld [vmem:[%s12339_s3 + $0x1d18] sm:$0xff] }
 0x3c9   :  { %4019 = vmatpush.msrb.mxu3 %v3238_v54  ;;  %4049 = vmatpush.msra.mxu0 %v2287_v51  ;;  %v2527_v12 = vld [vmem:[%s12339_s3 + $0x860] sm:$0xff] }
 0x3ca   :  { %4072 = vmatpush.msra.mxu1 %v2415_v42  ;;  %4092 = vmatpush.msra.mxu2 %v2567_v14  ;;  %v2879_v53 = vld [vmem:[%s12339_s3 + $0x1360] sm:$0xff] }
 0x3cb   :  { %4020 = vmatpush.msrb.mxu3 %v3230_v36  ;;  %4050 = vmatpush.msra.mxu0 %v2279_v3  ;;  %v3007_v6 = vld [vmem:[%s12339_s3 + $0x1760] sm:$0xff]  ;;  %v3182_v36 = vld [vmem:[%s12339_s3 + $0x1cd8] sm:$0xff] }
 0x3cc   :  { %4073 = vmatpush.msra.mxu1 %v2407_v49  ;;  %4093 = vmatpush.msra.mxu2 %v2559_v13  ;;  %v2519_v54 = vld [vmem:[%s12339_s3 + $0x820] sm:$0xff] }
 0x3cd   :  { %4021 = vmatpush.msrb.mxu3 %v3222_v44  ;;  %4051 = vmatpush.msra.mxu0 %v2271_v10  ;;  %v2871_v51 = vld [vmem:[%s12339_s3 + $0x1320] sm:$0xff]  ;;  %v10320_v44 = vpop.f32.mrf.mxu0  ;;  %v3174_v10 = vld [vmem:[%s12339_s3 + $0x1c98] sm:$0xff] }
 0x3ce   :  { %4074 = vmatpush.msra.mxu1 %v2399_v16  ;;  %4094 = vmatpush.msra.mxu2 %v2551_v19  ;;  %v2999_v42 = vld [vmem:[%s12339_s3 + $0x1720] sm:$0xff]  ;;  %v10329_v19 = vpop.f32.mrf.mxu3 }
 0x3cf   :  { %4022 = vmatpush.msrb.mxu3 %v3214_v39  ;;  %4052 = vmatpush.msra.mxu0 %v2263_v50  ;;  %v3151_v14 = vld [vmem:[%s12339_s3 + $0x1be0] sm:$0xff]  ;;  %v10331_v39 = vpop.f32.mrf.mxu1 }
 0x3d0   :  { %4075 = vmatpush.msra.mxu1 %v2391_v24  ;;  %4095 = vmatpush.msra.mxu2 %v2543_v31  ;;  %v2863_v3 = vld [vmem:[%s12339_s3 + $0x12e0] sm:$0xff]  ;;  %12377 = vst [vmem:[#allocation10_spill] sm:$0xff] %v10331_v39  ;;  %v3166_v31 = vld [vmem:[%s12339_s3 + $0x1c58] sm:$0xff] }
 0x3d1   :  { %4053 = vmatmul.f32.vlgmr.msra.gmra.mxu0 %v8629_v56  ;;  %4076 = vmatmul.f32.vlgmr.msra.gmra.mxu1 %v8632_v41  ;;  %v2991_v49 = vld [vmem:[%s12339_s3 + $0x16e0] sm:$0xff] }
 0x3d2   :  { %4129 = vmatpush.msrb.mxu0 %v2895_v63  ;;  %4152 = vmatpush.msrb.mxu1 %v3023_v38  ;;  %v3143_v13 = vld [vmem:[%s12339_s3 + $0x1ba0] sm:$0xff]  ;;  %v10346_v38 = vpop.f32.mrf.mxu2 }
 0x3d3   :  { %4023 = vmatpush.msrb.mxu3 %v3206_v27  ;;  %4096 = vmatpush.msra.mxu2 %v2535_v21  ;;  %v2855_v16 = vld [vmem:[%s12339_s3 + $0x12a0] sm:$0xff] }
 0x3d4   :  { %4130 = vmatpush.msrb.mxu0 %v2887_v35  ;;  %4153 = vmatpush.msrb.mxu1 %v3015_v33  ;;  %v2983_v50 = vld [vmem:[%s12339_s3 + $0x16a0] sm:$0xff]  ;;  %v3158_v35 = vld [vmem:[%s12339_s3 + $0x1c18] sm:$0xff] }
 0x3d5   :  { %4024 = vmatpush.msrb.mxu3 %v3198_v59  ;;  %4097 = vmatpush.msra.mxu2 %v2527_v12  ;;  %v3135_v24 = vld [vmem:[%s12339_s3 + $0x1b60] sm:$0xff] }
 0x3d6   :  { %4131 = vmatpush.msrb.mxu0 %v2879_v53  ;;  %4154 = vmatpush.msrb.mxu1 %v3007_v6  ;;  %v2847_v63 = vld [vmem:[%s12339_s3 + $0x1260] sm:$0xff] }
 0x3d7   :  { %4025 = vmatpush.msrb.mxu3 %v3190_v47  ;;  %4098 = vmatpush.msra.mxu2 %v2519_v54  ;;  %v2975_v27 = vld [vmem:[%s12339_s3 + $0x1660] sm:$0xff]  ;;  %v10373_v47 = vpop.f32.mrf.mxu0 }
 0x3d8   :  { %4099 = vmatmul.f32.vlgmr.msra.gmra.mxu2 %v8635_v30  ;;  %4132 = vmatpush.msrb.mxu0 %v2871_v51  ;;  %v3127_v21 = vld [vmem:[%s12339_s3 + $0x1b20] sm:$0xff] }
 0x3d9   :  { %4155 = vmatpush.msrb.mxu1 %v2999_v42  ;;  %4175 = vmatpush.msrb.mxu2 %v3151_v14  ;;  %v2839_v33 = vld [vmem:[%s12339_s3 + $0x1220] sm:$0xff]  ;;  %v10382_v42 = vpop.f32.mrf.mxu3  ;;  %v10384_v14 = vpop.f32.mrf.mxu1 }
 0x3da   :  { %4026 = vmatpush.msrb.mxu3 %v3182_v36  ;;  %4056 = vmatmul.f32.gmra.mxu0 %v8687_v5  ;;  %v2767_v59 = vld [vmem:[%s12339_s3 + $0xfe0] sm:$0xff] }
 0x3db   :  { %4079 = vmatmul.f32.gmra.mxu1 %v8689_v22  ;;  %4133 = vmatpush.msrb.mxu0 %v2863_v3  ;;  %v2967_v12 = vld [vmem:[%s12339_s3 + $0x1620] sm:$0xff] }
 0x3dc   :  { %4156 = vmatpush.msrb.mxu1 %v2991_v49  ;;  %4176 = vmatpush.msrb.mxu2 %v3143_v13  ;;  %v3119_v53 = vld [vmem:[%s12339_s3 + $0x1ae0] sm:$0xff] }
 0x3dd   :  { %4027 = vmatpush.msrb.mxu3 %v3174_v10  ;;  %4134 = vmatpush.msrb.mxu0 %v2855_v16  ;;  %v2831_v6 = vld [vmem:[%s12339_s3 + $0x11e0] sm:$0xff] }
 0x3de   :  { %4157 = vmatpush.msrb.mxu1 %v2983_v50  ;;  %4177 = vmatpush.msrb.mxu2 %v3135_v24  ;;  %v2759_v54 = vld [vmem:[%s12339_s3 + $0xfa0] sm:$0xff] }
 0x3df   :  { %4028 = vmatpush.msrb.mxu3 %v3166_v31  ;;  %4135 = vmatpush.msrb.mxu0 %v2847_v63  ;;  %v2959_v51 = vld [vmem:[%s12339_s3 + $0x15e0] sm:$0xff]  ;;  %v10410_v31 = vpop.f32.mrf.mxu2 }
 0x3e0   :  { %4158 = vmatpush.msrb.mxu1 %v2975_v27  ;;  %4178 = vmatpush.msrb.mxu2 %v3127_v21  ;;  %v3111_v36 = vld [vmem:[%s12339_s3 + $0x1aa0] sm:$0xff]  ;;  %12378 = vst [vmem:[#allocation14_spill] sm:$0xff] %v10410_v31 }
 0x3e1   :  { %4029 = vmatpush.msrb.mxu3 %v3158_v35  ;;  %4102 = vmatmul.f32.gmra.mxu2 %v8692_v18  ;;  %v2823_v3 = vld [vmem:[%s12339_s3 + $0x11a0] sm:$0xff] }
 0x3e2   :  { %4030 = vmatmul.f32.vlgmr.msrb.gmra.mxu3 %v9259_v37  ;;  %4136 = vmatpush.msrb.mxu0 %v2839_v33  ;;  %v2751_v49 = vld [vmem:[%s12339_s3 + $0xf60] sm:$0xff] }
 0x3e3   :  { %4106 = vmatpush.msra.mxu3 %v2767_v59  ;;  %4159 = vmatpush.msrb.mxu1 %v2967_v12  ;;  %v2951_v13 = vld [vmem:[%s12339_s3 + $0x15a0] sm:$0xff] }
 0x3e4   :  { %4179 = vmatpush.msrb.mxu2 %v3119_v53  ;;  %4137 = vmatpush.msrb.mxu0 %v2831_v6  ;;  %v3103_v10 = vld [vmem:[%s12339_s3 + $0x1a60] sm:$0xff] }
 0x3e5   :  { %4107 = vmatpush.msra.mxu3 %v2759_v54  ;;  %4160 = vmatpush.msrb.mxu1 %v2959_v51  ;;  %v2815_v16 = vld [vmem:[%s12339_s3 + $0x1160] sm:$0xff]  ;;  %v10440_v54 = vpop.f32.mrf.mxu0 }
 0x3e6   :  { %4180 = vmatpush.msrb.mxu2 %v3111_v36  ;;  %4138 = vmatpush.msrb.mxu0 %v2823_v3  ;;  %v2743_v50 = vld [vmem:[%s12339_s3 + $0xf20] sm:$0xff]  ;;  %v10448_v3 = vpop.f32.mrf.mxu3 }
 0x3e7   :  { %v2943_v24 = vld [vmem:[%s12339_s3 + $0x1560] sm:$0xff]  ;;  %4108 = vmatpush.msra.mxu3 %v2751_v49  ;;  %4161 = vmatpush.msrb.mxu1 %v2951_v13  ;;  %12379 = vst [vmem:[#allocation5_spill] sm:$0xff] %v10448_v3  ;;  %v10450_v49 = vpop.f32.mrf.mxu1 }
 0x3e8   :  { %v3095_v63 = vld [vmem:[%s12339_s3 + $0x1a20] sm:$0xff]  ;;  %4181 = vmatpush.msrb.mxu2 %v3103_v10  ;;  %4139 = vmatpush.msrb.mxu0 %v2815_v16 }
 0x3e9   :  { %v2735_v27 = vld [vmem:[%s12339_s3 + $0xee0] sm:$0xff]  ;;  %4109 = vmatpush.msra.mxu3 %v2743_v50  ;;  %4162 = vmatpush.msrb.mxu1 %v2943_v24  ;;  %v10464_v24 = vpop.f32.mrf.mxu2 }
 0x3ea   :  { %v2807_v21 = vld [vmem:[%s12339_s3 + $0x1120] sm:$0xff]  ;;  %4182 = vmatpush.msrb.mxu2 %v3095_v63  ;;  %4033 = vmatmul.f32.gmra.mxu3 %v9322_v48 }
 0x3eb   :  { %v2935_v35 = vld [vmem:[%s12339_s3 + $0x1520] sm:$0xff]  ;;  %4110 = vmatpush.msra.mxu3 %v2735_v27  ;;  %4140 = vmatpush.msrb.mxu0 %v2807_v21 }
 0x3ec   :  { %v3087_v33 = vld [vmem:[%s12339_s3 + $0x19e0] sm:$0xff]  ;;  %4163 = vmatpush.msrb.mxu1 %v2935_v35 }
 0x3ed   :  { %v2727_v59 = vld [vmem:[%s12339_s3 + $0xea0] sm:$0xff]  ;;  %4183 = vmatpush.msrb.mxu2 %v3087_v33 }
 0x3ee   :  { %v2799_v12 = vld [vmem:[%s12339_s3 + $0x10e0] sm:$0xff]  ;;  %4111 = vmatpush.msra.mxu3 %v2727_v59 }
 0x3ef   :  { %v2927_v53 = vld [vmem:[%s12339_s3 + $0x14e0] sm:$0xff]  ;;  %4141 = vmatpush.msrb.mxu0 %v2799_v12  ;;  %v2384_v12 = vld [vmem:[%s12339_s3 + $0x3e8] sm:$0xff] }
 0x3f0   :  { %v3079_v6 = vld [vmem:[%s12339_s3 + $0x19a0] sm:$0xff]  ;;  %4164 = vmatpush.msrb.mxu1 %v2927_v53  ;;  %v2512_v53 = vld [vmem:[%s12339_s3 + $0x7e8] sm:$0xff] }
 0x3f1   :  { %v2719_v51 = vld [vmem:[%s12339_s3 + $0xe60] sm:$0xff]  ;;  %4184 = vmatpush.msrb.mxu2 %v3079_v6  ;;  %v10490_v6 = vpop.f32.mrf.mxu0 }
 0x3f2   :  { %v2791_v36 = vld [vmem:[%s12339_s3 + $0x10a0] sm:$0xff]  ;;  %4112 = vmatpush.msra.mxu3 %v2719_v51 }
 0x3f3   :  { %v2919_v13 = vld [vmem:[%s12339_s3 + $0x14a0] sm:$0xff]  ;;  %4142 = vmatpush.msrb.mxu0 %v2791_v36 }
 0x3f4   :  { %v3071_v10 = vld [vmem:[%s12339_s3 + $0x1960] sm:$0xff]  ;;  %4165 = vmatpush.msrb.mxu1 %v2919_v13  ;;  %v10500_v13 = vpop.f32.mrf.mxu1 }
 0x3f5   :  { %v2711_v16 = vld [vmem:[%s12339_s3 + $0xe20] sm:$0xff]  ;;  %4185 = vmatpush.msrb.mxu2 %v3071_v10  ;;  %12380 = vst [vmem:[#allocation8_spill] sm:$0xff] %v10500_v13  ;;  %v2376_v10 = vld [vmem:[%s12339_s3 + $0x3a8] sm:$0xff] }
 0x3f6   :  { %v2783_v50 = vld [vmem:[%s12339_s3 + $0x1060] sm:$0xff]  ;;  %4113 = vmatpush.msra.mxu3 %v2711_v16  ;;  %v2504_v16 = vld [vmem:[%s12339_s3 + $0x7a8] sm:$0xff] }
 0x3f7   :  { %v2911_v63 = vld [vmem:[%s12339_s3 + $0x1460] sm:$0xff]  ;;  %4143 = vmatpush.msrb.mxu0 %v2783_v50 }
 0x3f8   :  { %v3063_v27 = vld [vmem:[%s12339_s3 + $0x1920] sm:$0xff]  ;;  %4166 = vmatpush.msrb.mxu1 %v2911_v63 }
 0x3f9   :  { %v2703_v21 = vld [vmem:[%s12339_s3 + $0xde0] sm:$0xff]  ;;  %4186 = vmatpush.msrb.mxu2 %v3063_v27  ;;  %v10514_v27 = vpop.f32.mrf.mxu3 }
 0x3fa   :  { %v2775_v35 = vld [vmem:[%s12339_s3 + $0x1020] sm:$0xff]  ;;  %4114 = vmatpush.msra.mxu3 %v2703_v21  ;;  %v2368_v21 = vld [vmem:[%s12339_s3 + $0x368] sm:$0xff] }
 0x3fb   :  { %v2903_v33 = vld [vmem:[%s12339_s3 + $0x1420] sm:$0xff]  ;;  %4144 = vmatpush.msrb.mxu0 %v2775_v35  ;;  %v2496_v35 = vld [vmem:[%s12339_s3 + $0x768] sm:$0xff] }
 0x3fc   :  { %v3055_v59 = vld [vmem:[%s12339_s3 + $0x18e0] sm:$0xff]  ;;  %4167 = vmatpush.msrb.mxu1 %v2903_v33  ;;  %4145 = vmatmul.f32.vlgmr.msrb.gmra.mxu0 %v8839_v26 }
 0x3fd   :  { %4187 = vmatpush.msrb.mxu2 %v3055_v59  ;;  %v2695_v51 = vld [vmem:[%s12339_s3 + $0xda0] sm:$0xff]  ;;  %4168 = vmatmul.f32.vlgmr.msrb.gmra.mxu1 %v8842_v52 }
 0x3fe   :  { %v3047_v36 = vld [vmem:[%s12339_s3 + $0x18a0] sm:$0xff]  ;;  %4221 = vmatpush.msra.mxu0 %v2384_v12  ;;  %4244 = vmatpush.msra.mxu1 %v2512_v53  ;;  %v10528_v12 = vpop.f32.mrf.mxu2  ;;  %v2360_v53 = vld [vmem:[%s12339_s3 + $0x328] sm:$0xff] }
 0x3ff   :  { %v2687_v50 = vld [vmem:[%s12339_s3 + $0xd60] sm:$0xff]  ;;  %4115 = vmatpush.msra.mxu3 %v2695_v51  ;;  %4188 = vmatpush.msrb.mxu2 %v3047_v36  ;;  %v2488_v51 = vld [vmem:[%s12339_s3 + $0x728] sm:$0xff] }
 0x400   :  { %v3039_v63 = vld [vmem:[%s12339_s3 + $0x1860] sm:$0xff]  ;;  %4222 = vmatpush.msra.mxu0 %v2376_v10  ;;  %4245 = vmatpush.msra.mxu1 %v2504_v16  ;;  %v2640_v36 = vld [vmem:[%s12339_s3 + $0xbe8] sm:$0xff] }
 0x401   :  { %v2679_v33 = vld [vmem:[%s12339_s3 + $0xd20] sm:$0xff]  ;;  %4116 = vmatpush.msra.mxu3 %v2687_v50  ;;  %4189 = vmatpush.msrb.mxu2 %v3039_v63  ;;  %v2352_v16 = vld [vmem:[%s12339_s3 + $0x2e8] sm:$0xff] }
 0x402   :  { %v3031_v59 = vld [vmem:[%s12339_s3 + $0x1820] sm:$0xff]  ;;  %4223 = vmatpush.msra.mxu0 %v2368_v21  ;;  %4246 = vmatpush.msra.mxu1 %v2496_v35  ;;  %v2480_v50 = vld [vmem:[%s12339_s3 + $0x6e8] sm:$0xff]  ;;  %v10553_v21 = vpop.f32.mrf.mxu0 }
 0x403   :  { %4117 = vmatpush.msra.mxu3 %v2679_v33  ;;  %4190 = vmatpush.msrb.mxu2 %v3031_v59  ;;  %v2671_v10 = vld [vmem:[%s12339_s3 + $0xce0] sm:$0xff]  ;;  %v2632_v63 = vld [vmem:[%s12339_s3 + $0xba8] sm:$0xff]  ;;  %12381 = vst [vmem:[#allocation12_spill] sm:$0xff] %v10553_v21  ;;  %v10562_v59 = vpop.f32.mrf.mxu1 }
 0x404   :  { %4191 = vmatmul.f32.vlgmr.msrb.gmra.mxu2 %v9043_v11  ;;  %4224 = vmatpush.msra.mxu0 %v2360_v53  ;;  %v2663_v35 = vld [vmem:[%s12339_s3 + $0xca0] sm:$0xff]  ;;  %v2344_v33 = vld [vmem:[%s12339_s3 + $0x2a8] sm:$0xff]  ;;  %12382 = vst [vmem:[#allocation17_spill] sm:$0xff] %v10562_v59 }
 0x405   :  { %4247 = vmatpush.msra.mxu1 %v2488_v51  ;;  %4267 = vmatpush.msra.mxu2 %v2640_v36  ;;  %v2472_v53 = vld [vmem:[%s12339_s3 + $0x6a8] sm:$0xff]  ;;  %v2655_v36 = vld [vmem:[%s12339_s3 + $0xc60] sm:$0xff] }
 0x406   :  { %4118 = vmatpush.msra.mxu3 %v2671_v10  ;;  %4148 = vmatmul.f32.gmra.mxu0 %v8890_v7  ;;  %v2624_v51 = vld [vmem:[%s12339_s3 + $0xb68] sm:$0xff]  ;;  %v10589_v3 = vld [vmem:[%s12340_s4] sm:$0xff] }
 0x407   :  { %4171 = vmatmul.f32.gmra.mxu1 %v8892_v25  ;;  %4225 = vmatpush.msra.mxu0 %v2352_v16  ;;  %v2336_v10 = vld [vmem:[%s12339_s3 + $0x268] sm:$0xff]  ;;  %v10576_v16 = vpop.f32.mrf.mxu3  ;;  %v3288_v31 = vperm.slane %v10589_v3, 3  ;;  %v3279_v2 = vld [vmem:[%s12339_s3 + $0x1fe0] sm:$0xff] }
 0x408   :  { %4248 = vmatpush.msra.mxu1 %v2480_v50  ;;  %4268 = vmatpush.msra.mxu2 %v2632_v63  ;;  %v2464_v59 = vld [vmem:[%s12339_s3 + $0x668] sm:$0xff]  ;;  %v10584_v63 = vpop.f32.mrf.mxu2  ;;  %v3263_v21 = vld [vmem:[%s12339_s3 + $0x1f60] sm:$0xff] }
 0x409   :  { %4119 = vmatpush.msra.mxu3 %v2663_v35  ;;  %4226 = vmatpush.msra.mxu0 %v2344_v33  ;;  %v2616_v50 = vld [vmem:[%s12339_s3 + $0xb28] sm:$0xff]  ;;  %12383 = vst [vmem:[#allocation6_spill] sm:$0xff] %v10584_v63  ;;  %v2647_v35 = vld [vmem:[%s12339_s3 + $0xc20] sm:$0xff] }
 0x40a   :  { %4249 = vmatpush.msra.mxu1 %v2472_v53  ;;  %4269 = vmatpush.msra.mxu2 %v2624_v51  ;;  %v2328_v33 = vld [vmem:[%s12339_s3 + $0x228] sm:$0xff] }
 0x40b   :  { %4120 = vmatpush.msra.mxu3 %v2655_v36  ;;  %4227 = vmatpush.msra.mxu0 %v2336_v10  ;;  %v2456_v53 = vld [vmem:[%s12339_s3 + $0x628] sm:$0xff]  ;;  %v3870_v10 = vpop.f32.mrf.mxu0  ;;  %v3893_v63 = vpop.f32.mrf.mxu1 }
 0x40c   :  { %4250 = vmatpush.msra.mxu1 %v2464_v59  ;;  %4270 = vmatpush.msra.mxu2 %v2616_v50  ;;  %v2608_v51 = vld [vmem:[%s12339_s3 + $0xae8] sm:$0xff]  ;;  %v3271_v59 = vld [vmem:[%s12339_s3 + $0x1fa0] sm:$0xff] }
 0x40d   :  { %4121 = vmatpush.msra.mxu3 %v2647_v35  ;;  %4194 = vmatmul.f32.gmra.mxu2 %v9090_v46  ;;  %v2320_v3 = vld [vmem:[%s12339_s3 + $0x1e8] sm:$0xff] }
 0x40e   :  { %4122 = vmatmul.f32.vlgmr.msra.gmra.mxu3 %v8637_v34  ;;  %4228 = vmatpush.msra.mxu0 %v2328_v33  ;;  %v2448_v36 = vld [vmem:[%s12339_s3 + $0x5e8] sm:$0xff]  ;;  %v3871_v33 = vadd.f32 %v3870_v10, %v3288_v31 }
 0x40f   :  { %4198 = vmatpush.msrb.mxu3 %v3279_v2  ;;  %4251 = vmatpush.msra.mxu1 %v2456_v53  ;;  %v2600_v50 = vld [vmem:[%s12339_s3 + $0xaa8] sm:$0xff] }
 0x410   :  { %v2312_v35 = vld [vmem:[%s12339_s3 + $0x1a8] sm:$0xff]  ;;  %4271 = vmatpush.msra.mxu2 %v2608_v51  ;;  %4229 = vmatpush.msra.mxu0 %v2320_v3  ;;  %v3894_v51 = vadd.f32 %v3893_v63, %v3871_v33  ;;  %v3255_v3 = vld [vmem:[%s12339_s3 + $0x1f20] sm:$0xff]  ;;  %v10647_v39 = vpop.f32.mrf.mxu2 }
 0x411   :  { %v2440_v2 = vld [vmem:[%s12339_s3 + $0x5a8] sm:$0xff]  ;;  %4199 = vmatpush.msrb.mxu3 %v3271_v59  ;;  %4252 = vmatpush.msra.mxu1 %v2448_v36  ;;  %v10642_v36 = vpop.f32.mrf.mxu3  ;;  %12384 = vst [vmem:[#allocation9_spill] sm:$0xff] %v10647_v39  ;;  %v3247_v63 = vld [vmem:[%s12339_s3 + $0x1ee0] sm:$0xff] }
 0x412   :  { %v2592_v53 = vld [vmem:[%s12339_s3 + $0xa68] sm:$0xff]  ;;  %4272 = vmatpush.msra.mxu2 %v2600_v50  ;;  %4230 = vmatpush.msra.mxu0 %v2312_v35  ;;  %v3239_v33 = vld [vmem:[%s12339_s3 + $0x1ea0] sm:$0xff] }
 0x413   :  { %v2304_v10 = vld [vmem:[%s12339_s3 + $0x168] sm:$0xff]  ;;  %4200 = vmatpush.msrb.mxu3 %v3263_v21  ;;  %4253 = vmatpush.msra.mxu1 %v2440_v2  ;;  %v3223_v39 = vld [vmem:[%s12339_s3 + $0x1e20] sm:$0xff] }
 0x414   :  { %v2432_v59 = vld [vmem:[%s12339_s3 + $0x568] sm:$0xff]  ;;  %4273 = vmatpush.msra.mxu2 %v2592_v53  ;;  %4231 = vmatpush.msra.mxu0 %v2304_v10  ;;  %v3873_v10 = vpop.f32.mrf.mxu0 }
 0x415   :  { %v2296_v50 = vld [vmem:[%s12339_s3 + $0x128] sm:$0xff]  ;;  %4201 = vmatpush.msrb.mxu3 %v3255_v3  ;;  %4254 = vmatpush.msra.mxu1 %v2432_v59  ;;  %v3231_v3 = vld [vmem:[%s12339_s3 + $0x1e60] sm:$0xff] }
 0x416   :  { %v2424_v21 = vld [vmem:[%s12339_s3 + $0x528] sm:$0xff]  ;;  %4274 = vmatpush.msra.mxu2 %v2584_v45  ;;  %4125 = vmatmul.f32.gmra.mxu3 %v8694_v61 }
 0x417   :  { %v2576_v35 = vld [vmem:[%s12339_s3 + $0x9e8] sm:$0xff]  ;;  %4202 = vmatpush.msrb.mxu3 %v3247_v63  ;;  %4232 = vmatpush.msra.mxu0 %v2296_v50  ;;  %v3874_v63 = vadd.f32 %v3873_v10, %v3288_v31  ;;  %v3215_v10 = vld [vmem:[%s12339_s3 + $0x1de0] sm:$0xff] }
 0x418   :  { %v2288_v2 = vld [vmem:[%s12339_s3 + $0xe8] sm:$0xff]  ;;  %4255 = vmatpush.msra.mxu1 %v2424_v21  ;;  %4275 = vmatpush.msra.mxu2 %v2576_v35  ;;  %v3896_v35 = vpop.f32.mrf.mxu1 }
 0x419   :  { %v2416_v53 = vld [vmem:[%s12339_s3 + $0x4e8] sm:$0xff]  ;;  %4203 = vmatpush.msrb.mxu3 %v3239_v33  ;;  %4233 = vmatpush.msra.mxu0 %v2288_v2  ;;  %v3897_v33 = vadd.f32 %v3896_v35, %v3874_v63  ;;  %v10706_v63 = vpop.f32.mrf.mxu3 }
 0x41a   :  { %v2568_v45 = vld [vmem:[%s12339_s3 + $0x9a8] sm:$0xff]  ;;  %4256 = vmatpush.msra.mxu1 %v2416_v53  ;;  %12385 = vst [vmem:[#allocation16_spill] sm:$0xff] %v10706_v63 }
 0x41b   :  { %v2280_v59 = vld [vmem:[%s12339_s3 + $0xa8] sm:$0xff]  ;;  %4276 = vmatpush.msra.mxu2 %v2568_v45  ;;  %4204 = vmatpush.msrb.mxu3 %v3231_v3  ;;  %v3916_v45 = vpop.f32.mrf.mxu2 }
 0x41c   :  { %v2408_v50 = vld [vmem:[%s12339_s3 + $0x4a8] sm:$0xff]  ;;  %4234 = vmatpush.msra.mxu0 %v2280_v59  ;;  %v10704_v59 = vadd.f32 %v3916_v45, %v3894_v51  ;;  %v3199_v45 = vld [vmem:[%s12339_s3 + $0x1d60] sm:$0xff] }
 0x41d   :  { %v2560_v21 = vld [vmem:[%s12339_s3 + $0x968] sm:$0xff]  ;;  %4257 = vmatpush.msra.mxu1 %v2408_v50  ;;  %4205 = vmatpush.msrb.mxu3 %v3223_v39 }
 0x41e   :  { %v2272_v31 = vld [vmem:[%s12339_s3 + $0x68] sm:$0xff]  ;;  %4277 = vmatpush.msra.mxu2 %v2560_v21  ;;  %v3207_v21 = vld [vmem:[%s12339_s3 + $0x1da0] sm:$0xff] }
 0x41f   :  { %v2400_v2 = vld [vmem:[%s12339_s3 + $0x468] sm:$0xff]  ;;  %4235 = vmatpush.msra.mxu0 %v2272_v31  ;;  %4206 = vmatpush.msrb.mxu3 %v3215_v10 }
 0x420   :  { %v2552_v53 = vld [vmem:[%s12339_s3 + $0x928] sm:$0xff]  ;;  %4258 = vmatpush.msra.mxu1 %v2400_v2 }
 0x421   :  { %v2264_v3 = vld [vmem:[%s12339_s3 + $0x28] sm:$0xff]  ;;  %4278 = vmatpush.msra.mxu2 %v2552_v53  ;;  %4207 = vmatpush.msrb.mxu3 %v3207_v21  ;;  %v10752_v21 = vpop.f32.mrf.mxu3 }
 0x422   :  { %v2392_v35 = vld [vmem:[%s12339_s3 + $0x428] sm:$0xff]  ;;  %4236 = vmatpush.msra.mxu0 %v2264_v3 }
 0x423   :  { %v2544_v50 = vld [vmem:[%s12339_s3 + $0x8e8] sm:$0xff]  ;;  %4259 = vmatpush.msra.mxu1 %v2392_v35  ;;  %4237 = vmatmul.f32.vlgmr.msra.gmra.mxu0 %v8629_v56 }
 0x424   :  { %v2896_v51 = vld [vmem:[%s12339_s3 + $0x13e8] sm:$0xff]  ;;  %4279 = vmatpush.msra.mxu2 %v2544_v50  ;;  %4260 = vmatmul.f32.vlgmr.msra.gmra.mxu1 %v8632_v41  ;;  %v3191_v50 = vld [vmem:[%s12339_s3 + $0x1d20] sm:$0xff] }
 0x425   :  { %v3024_v39 = vld [vmem:[%s12339_s3 + $0x17e8] sm:$0xff]  ;;  %4313 = vmatpush.msrb.mxu0 %v2896_v51  ;;  %4208 = vmatpush.msrb.mxu3 %v3199_v45  ;;  %v3183_v45 = vld [vmem:[%s12339_s3 + $0x1ce0] sm:$0xff] }
 0x426   :  { %v2536_v31 = vld [vmem:[%s12339_s3 + $0x8a8] sm:$0xff]  ;;  %4336 = vmatpush.msrb.mxu1 %v3024_v39  ;;  %v3919_v39 = vpop.f32.mrf.mxu2 }
 0x427   :  { %v2888_v2 = vld [vmem:[%s12339_s3 + $0x13a8] sm:$0xff]  ;;  %4280 = vmatpush.msra.mxu2 %v2536_v31  ;;  %v10757_v63 = vadd.f32 %v3919_v39, %v3897_v33  ;;  %4209 = vmatpush.msrb.mxu3 %v3191_v50 }
 0x428   :  { %v3016_v53 = vld [vmem:[%s12339_s3 + $0x17a8] sm:$0xff]  ;;  %4314 = vmatpush.msrb.mxu0 %v2888_v2 }
 0x429   :  { %v2528_v10 = vld [vmem:[%s12339_s3 + $0x868] sm:$0xff]  ;;  %4337 = vmatpush.msrb.mxu1 %v3016_v53  ;;  %4210 = vmatpush.msrb.mxu3 %v3183_v45 }
 0x42a   :  { %v2880_v3 = vld [vmem:[%s12339_s3 + $0x1368] sm:$0xff]  ;;  %4281 = vmatpush.msra.mxu2 %v2528_v10  ;;  %v3985_v60 = vpop.f32.mrf.mxu1 }
 0x42b   :  { %v3008_v35 = vld [vmem:[%s12339_s3 + $0x1768] sm:$0xff]  ;;  %4315 = vmatpush.msrb.mxu0 %v2880_v3 }
 0x42c   :  { %v2520_v51 = vld [vmem:[%s12339_s3 + $0x828] sm:$0xff]  ;;  %4338 = vmatpush.msrb.mxu1 %v3008_v35  ;;  %4240 = vmatmul.f32.gmra.mxu0 %v8687_v5  ;;  %v3175_v35 = vld [vmem:[%s12339_s3 + $0x1ca0] sm:$0xff] }
 0x42d   :  { %v2872_v31 = vld [vmem:[%s12339_s3 + $0x1328] sm:$0xff]  ;;  %4282 = vmatpush.msra.mxu2 %v2520_v51  ;;  %4263 = vmatmul.f32.gmra.mxu1 %v8689_v22 }
 0x42e   :  { %v3000_v2 = vld [vmem:[%s12339_s3 + $0x1728] sm:$0xff]  ;;  %4283 = vmatmul.f32.vlgmr.msra.gmra.mxu2 %v8635_v30  ;;  %4316 = vmatpush.msrb.mxu0 %v2872_v31  ;;  %v3167_v31 = vld [vmem:[%s12339_s3 + $0x1c60] sm:$0xff] }
 0x42f   :  { %v3152_v53 = vld [vmem:[%s12339_s3 + $0x1be8] sm:$0xff]  ;;  %4339 = vmatpush.msrb.mxu1 %v3000_v2  ;;  %4211 = vmatpush.msrb.mxu3 %v3175_v35 }
 0x430   :  { %v2864_v33 = vld [vmem:[%s12339_s3 + $0x12e8] sm:$0xff]  ;;  %4359 = vmatpush.msrb.mxu2 %v3152_v53 }
 0x431   :  { %v2992_v10 = vld [vmem:[%s12339_s3 + $0x16e8] sm:$0xff]  ;;  %4317 = vmatpush.msrb.mxu0 %v2864_v33  ;;  %v3159_v33 = vld [vmem:[%s12339_s3 + $0x1c20] sm:$0xff]  ;;  %4212 = vmatpush.msrb.mxu3 %v3167_v31 }
 0x432   :  { %v3144_v3 = vld [vmem:[%s12339_s3 + $0x1ba8] sm:$0xff]  ;;  %4340 = vmatpush.msrb.mxu1 %v2992_v10  ;;  %v10807_v10 = vpop.f32.mrf.mxu3 }
 0x433   :  { %v2856_v50 = vld [vmem:[%s12339_s3 + $0x12a8] sm:$0xff]  ;;  %4360 = vmatpush.msrb.mxu2 %v3144_v3  ;;  %12386 = vst [vmem:[#allocation13_spill] sm:$0xff] %v10807_v10  ;;  %4213 = vmatpush.msrb.mxu3 %v3159_v33 }
 0x434   :  { %v2984_v51 = vld [vmem:[%s12339_s3 + $0x16a8] sm:$0xff]  ;;  %4318 = vmatpush.msrb.mxu0 %v2856_v50  ;;  %4214 = vmatmul.f32.vlgmr.msrb.gmra.mxu3 %v9259_v37 }
 0x435   :  { %v3136_v39 = vld [vmem:[%s12339_s3 + $0x1b68] sm:$0xff]  ;;  %4341 = vmatpush.msrb.mxu1 %v2984_v51 }
 0x436   :  { %v2848_v2 = vld [vmem:[%s12339_s3 + $0x1268] sm:$0xff]  ;;  %4361 = vmatpush.msrb.mxu2 %v3136_v39 }
 0x437   :  { %v2976_v53 = vld [vmem:[%s12339_s3 + $0x1668] sm:$0xff]  ;;  %4319 = vmatpush.msrb.mxu0 %v2848_v2  ;;  %4286 = vmatmul.f32.gmra.mxu2 %v8692_v18 }
 0x438   :  { %v3128_v45 = vld [vmem:[%s12339_s3 + $0x1b28] sm:$0xff]  ;;  %4342 = vmatpush.msrb.mxu1 %v2976_v53 }
 0x439   :  { %v2840_v3 = vld [vmem:[%s12339_s3 + $0x1228] sm:$0xff]  ;;  %4362 = vmatpush.msrb.mxu2 %v3128_v45 }
 0x43a   :  { %v2768_v35 = vld [vmem:[%s12339_s3 + $0xfe8] sm:$0xff]  ;;  %4320 = vmatpush.msrb.mxu0 %v2840_v3 }
 0x43b   :  { %v2968_v50 = vld [vmem:[%s12339_s3 + $0x1628] sm:$0xff]  ;;  %4290 = vmatpush.msra.mxu3 %v2768_v35 }
 0x43c   :  { %v3120_v51 = vld [vmem:[%s12339_s3 + $0x1ae8] sm:$0xff]  ;;  %4343 = vmatpush.msrb.mxu1 %v2968_v50  ;;  %4217 = vmatmul.f32.gmra.mxu3 %v9322_v48 }
 0x43d   :  { %v2832_v39 = vld [vmem:[%s12339_s3 + $0x11e8] sm:$0xff]  ;;  %4363 = vmatpush.msrb.mxu2 %v3120_v51 }
 0x43e   :  { %v2760_v31 = vld [vmem:[%s12339_s3 + $0xfa8] sm:$0xff]  ;;  %4321 = vmatpush.msrb.mxu0 %v2832_v39 }
 0x43f   :  { %v2960_v2 = vld [vmem:[%s12339_s3 + $0x15e8] sm:$0xff]  ;;  %4291 = vmatpush.msra.mxu3 %v2760_v31 }
 0x440   :  { %v3112_v53 = vld [vmem:[%s12339_s3 + $0x1aa8] sm:$0xff]  ;;  %4344 = vmatpush.msrb.mxu1 %v2960_v2  ;;  %v10859_v2 = vpop.f32.mrf.mxu3 }
 0x441   :  { %v2824_v45 = vld [vmem:[%s12339_s3 + $0x11a8] sm:$0xff]  ;;  %4364 = vmatpush.msrb.mxu2 %v3112_v53  ;;  %12387 = vst [vmem:[#allocation18_spill] sm:$0xff] %v10859_v2 }
 0x442   :  { %v2752_v33 = vld [vmem:[%s12339_s3 + $0xf68] sm:$0xff]  ;;  %4322 = vmatpush.msrb.mxu0 %v2824_v45 }
 0x443   :  { %v2952_v3 = vld [vmem:[%s12339_s3 + $0x15a8] sm:$0xff]  ;;  %4292 = vmatpush.msra.mxu3 %v2752_v33 }
 0x444   :  { %v3104_v35 = vld [vmem:[%s12339_s3 + $0x1a68] sm:$0xff]  ;;  %4345 = vmatpush.msrb.mxu1 %v2952_v3 }
 0x445   :  { %v2816_v50 = vld [vmem:[%s12339_s3 + $0x1168] sm:$0xff]  ;;  %4365 = vmatpush.msrb.mxu2 %v3104_v35 }
 0x446   :  { %v2744_v51 = vld [vmem:[%s12339_s3 + $0xf28] sm:$0xff]  ;;  %4323 = vmatpush.msrb.mxu0 %v2816_v50 }
 0x447   :  { %v2944_v39 = vld [vmem:[%s12339_s3 + $0x1568] sm:$0xff]  ;;  %4293 = vmatpush.msra.mxu3 %v2744_v51 }
 0x448   :  { %v3096_v31 = vld [vmem:[%s12339_s3 + $0x1a28] sm:$0xff]  ;;  %4346 = vmatpush.msrb.mxu1 %v2944_v39 }
 0x449   :  { %v2736_v53 = vld [vmem:[%s12339_s3 + $0xee8] sm:$0xff]  ;;  %4366 = vmatpush.msrb.mxu2 %v3096_v31 }
 0x44a   :  { %v2808_v45 = vld [vmem:[%s12339_s3 + $0x1128] sm:$0xff]  ;;  %4294 = vmatpush.msra.mxu3 %v2736_v53 }
 0x44b   :  { %v2936_v33 = vld [vmem:[%s12339_s3 + $0x1528] sm:$0xff]  ;;  %4324 = vmatpush.msrb.mxu0 %v2808_v45 }
 0x44c   :  { %v3088_v3 = vld [vmem:[%s12339_s3 + $0x19e8] sm:$0xff]  ;;  %4347 = vmatpush.msrb.mxu1 %v2936_v33 }
 0x44d   :  { %v2728_v35 = vld [vmem:[%s12339_s3 + $0xea8] sm:$0xff]  ;;  %4367 = vmatpush.msrb.mxu2 %v3088_v3 }
 0x44e   :  { %v2800_v50 = vld [vmem:[%s12339_s3 + $0x10e8] sm:$0xff]  ;;  %4295 = vmatpush.msra.mxu3 %v2728_v35 }
 0x44f   :  { %v2928_v51 = vld [vmem:[%s12339_s3 + $0x14e8] sm:$0xff]  ;;  %4325 = vmatpush.msrb.mxu0 %v2800_v50 }
 0x450   :  { %v3080_v39 = vld [vmem:[%s12339_s3 + $0x19a8] sm:$0xff]  ;;  %4348 = vmatpush.msrb.mxu1 %v2928_v51 }
 0x451   :  { %v2720_v31 = vld [vmem:[%s12339_s3 + $0xe68] sm:$0xff]  ;;  %4368 = vmatpush.msrb.mxu2 %v3080_v39 }
 0x452   :  { %v2792_v2 = vld [vmem:[%s12339_s3 + $0x10a8] sm:$0xff]  ;;  %4296 = vmatpush.msra.mxu3 %v2720_v31 }
 0x453   :  { %v2920_v53 = vld [vmem:[%s12339_s3 + $0x14a8] sm:$0xff]  ;;  %4326 = vmatpush.msrb.mxu0 %v2792_v2  ;;  %v10916_v2 = vpop.f32.mrf.mxu3 }
 0x454   :  { %v3072_v45 = vld [vmem:[%s12339_s3 + $0x1968] sm:$0xff]  ;;  %4349 = vmatpush.msrb.mxu1 %v2920_v53  ;;  %12388 = vst [vmem:[#allocation19_spill] sm:$0xff] %v10916_v2  ;;  %v2497_v2 = vld [vmem:[%s12339_s3 + $0x770] sm:$0xff] }
 0x455   :  { %v2712_v33 = vld [vmem:[%s12339_s3 + $0xe28] sm:$0xff]  ;;  %4369 = vmatpush.msrb.mxu2 %v3072_v45  ;;  %v2385_v45 = vld [vmem:[%s12339_s3 + $0x3f0] sm:$0xff] }
 0x456   :  { %v2784_v3 = vld [vmem:[%s12339_s3 + $0x1068] sm:$0xff]  ;;  %4297 = vmatpush.msra.mxu3 %v2712_v33  ;;  %v2513_v33 = vld [vmem:[%s12339_s3 + $0x7f0] sm:$0xff] }
 0x457   :  { %v2912_v35 = vld [vmem:[%s12339_s3 + $0x1468] sm:$0xff]  ;;  %4327 = vmatpush.msrb.mxu0 %v2784_v3 }
 0x458   :  { %v3064_v50 = vld [vmem:[%s12339_s3 + $0x1928] sm:$0xff]  ;;  %4350 = vmatpush.msrb.mxu1 %v2912_v35 }
 0x459   :  { %v2704_v51 = vld [vmem:[%s12339_s3 + $0xde8] sm:$0xff]  ;;  %4370 = vmatpush.msrb.mxu2 %v3064_v50  ;;  %v2377_v50 = vld [vmem:[%s12339_s3 + $0x3b0] sm:$0xff] }
 0x45a   :  { %v2776_v39 = vld [vmem:[%s12339_s3 + $0x1028] sm:$0xff]  ;;  %4298 = vmatpush.msra.mxu3 %v2704_v51  ;;  %v2505_v51 = vld [vmem:[%s12339_s3 + $0x7b0] sm:$0xff] }
 0x45b   :  { %v2904_v31 = vld [vmem:[%s12339_s3 + $0x1428] sm:$0xff]  ;;  %4328 = vmatpush.msrb.mxu0 %v2776_v39  ;;  %v3939_v13 = vpop.f32.mrf.mxu3 }
 0x45c   :  { %v3056_v53 = vld [vmem:[%s12339_s3 + $0x18e8] sm:$0xff]  ;;  %4351 = vmatpush.msrb.mxu1 %v2904_v31  ;;  %4329 = vmatmul.f32.vlgmr.msrb.gmra.mxu0 %v8839_v26  ;;  %v3940_v10 = vadd.f32 %v3939_v13, %v10704_v59  ;;  %v2481_v13 = vld [vmem:[%s12339_s3 + $0x6f0] sm:$0xff] }
 0x45d   :  { %4371 = vmatpush.msrb.mxu2 %v3056_v53  ;;  %v2696_v3 = vld [vmem:[%s12339_s3 + $0xda8] sm:$0xff]  ;;  %4352 = vmatmul.f32.vlgmr.msrb.gmra.mxu1 %v8842_v52  ;;  %v2369_v53 = vld [vmem:[%s12339_s3 + $0x370] sm:$0xff] }
 0x45e   :  { %v3048_v35 = vld [vmem:[%s12339_s3 + $0x18a8] sm:$0xff]  ;;  %4405 = vmatpush.msra.mxu0 %v2385_v45  ;;  %4428 = vmatpush.msra.mxu1 %v2513_v33  ;;  %v2633_v59 = vld [vmem:[%s12339_s3 + $0xbb0] sm:$0xff] }
 0x45f   :  { %v2688_v39 = vld [vmem:[%s12339_s3 + $0xd68] sm:$0xff]  ;;  %4299 = vmatpush.msra.mxu3 %v2696_v3  ;;  %4372 = vmatpush.msrb.mxu2 %v3048_v35  ;;  %v3962_v3 = vpop.f32.mrf.mxu0  ;;  %v2361_v35 = vld [vmem:[%s12339_s3 + $0x330] sm:$0xff] }
 0x460   :  { %v3040_v31 = vld [vmem:[%s12339_s3 + $0x1868] sm:$0xff]  ;;  %4406 = vmatpush.msra.mxu0 %v2377_v50  ;;  %4429 = vmatpush.msra.mxu1 %v2505_v51  ;;  %v2489_v50 = vld [vmem:[%s12339_s3 + $0x730] sm:$0xff] }
 0x461   :  { %v2680_v45 = vld [vmem:[%s12339_s3 + $0xd28] sm:$0xff]  ;;  %4300 = vmatpush.msra.mxu3 %v2688_v39  ;;  %4373 = vmatpush.msrb.mxu2 %v3040_v31  ;;  %v2641_v51 = vld [vmem:[%s12339_s3 + $0xbf0] sm:$0xff]  ;;  %v3963_v31 = vadd.f32 %v3962_v3, %v3940_v10 }
 0x462   :  { %v3032_v33 = vld [vmem:[%s12339_s3 + $0x1828] sm:$0xff]  ;;  %4407 = vmatpush.msra.mxu0 %v2369_v53  ;;  %4430 = vmatpush.msra.mxu1 %v2497_v2  ;;  %v2353_v2 = vld [vmem:[%s12339_s3 + $0x2f0] sm:$0xff]  ;;  %v4008_v53 = vpop.f32.mrf.mxu2 }
 0x463   :  { %4301 = vmatpush.msra.mxu3 %v2680_v45  ;;  %4374 = vmatpush.msrb.mxu2 %v3032_v33  ;;  %v2672_v39 = vld [vmem:[%s12339_s3 + $0xce8] sm:$0xff]  ;;  %v2345_v10 = vld [vmem:[%s12339_s3 + $0x2b0] sm:$0xff]  ;;  %v3986_v33 = vadd.f32 %v3985_v60, %v3963_v31  ;;  %v3942_v31 = vpop.f32.mrf.mxu3 }
 0x464   :  { %4375 = vmatmul.f32.vlgmr.msrb.gmra.mxu2 %v9043_v11  ;;  %4408 = vmatpush.msra.mxu0 %v2361_v35  ;;  %v2664_v45 = vld [vmem:[%s12339_s3 + $0xca8] sm:$0xff]  ;;  %v2473_v3 = vld [vmem:[%s12339_s3 + $0x6b0] sm:$0xff] }
 0x465   :  { %4431 = vmatpush.msra.mxu1 %v2489_v50  ;;  %4451 = vmatpush.msra.mxu2 %v2641_v51  ;;  %v2625_v35 = vld [vmem:[%s12339_s3 + $0xb70] sm:$0xff]  ;;  %v2656_v50 = vld [vmem:[%s12339_s3 + $0xc68] sm:$0xff]  ;;  %v11005_v51 = vadd.f32 %v4008_v53, %v3986_v33 }
 0x466   :  { %4302 = vmatpush.msra.mxu3 %v2672_v39  ;;  %4332 = vmatmul.f32.gmra.mxu0 %v8890_v7  ;;  %v2337_v60 = vld [vmem:[%s12339_s3 + $0x270] sm:$0xff] }
 0x467   :  { %4355 = vmatmul.f32.gmra.mxu1 %v8892_v25  ;;  %4409 = vmatpush.msra.mxu0 %v2353_v2  ;;  %v2465_v39 = vld [vmem:[%s12339_s3 + $0x670] sm:$0xff]  ;;  %v3965_v53 = vpop.f32.mrf.mxu0 }
 0x468   :  { %4432 = vmatpush.msra.mxu1 %v2481_v13  ;;  %4452 = vmatpush.msra.mxu2 %v2633_v59  ;;  %v2617_v2 = vld [vmem:[%s12339_s3 + $0xb30] sm:$0xff]  ;;  %v2648_v13 = vld [vmem:[%s12339_s3 + $0xc28] sm:$0xff]  ;;  %v3943_v59 = vadd.f32 %v3942_v31, %v10757_v63 }
 0x469   :  { %4303 = vmatpush.msra.mxu3 %v2664_v45  ;;  %4410 = vmatpush.msra.mxu0 %v2345_v10  ;;  %v2329_v45 = vld [vmem:[%s12339_s3 + $0x230] sm:$0xff]  ;;  %v3280_v10 = vld [vmem:[%s12339_s3 + $0x1fe8] sm:$0xff] }
 0x46a   :  { %4433 = vmatpush.msra.mxu1 %v2473_v3  ;;  %4453 = vmatpush.msra.mxu2 %v2625_v35  ;;  %v2457_v33 = vld [vmem:[%s12339_s3 + $0x630] sm:$0xff]  ;;  %v3966_v3 = vadd.f32 %v3965_v53, %v3943_v59  ;;  %v3988_v35 = vpop.f32.mrf.mxu1  ;;  %v4011_v59 = vpop.f32.mrf.mxu2  ;;  %v3264_v53 = vld [vmem:[%s12339_s3 + $0x1f68] sm:$0xff] }
 0x46b   :  { %4304 = vmatpush.msra.mxu3 %v2656_v50  ;;  %4411 = vmatpush.msra.mxu0 %v2337_v60  ;;  %v2609_v63 = vld [vmem:[%s12339_s3 + $0xaf0] sm:$0xff]  ;;  %v3272_v60 = vld [vmem:[%s12339_s3 + $0x1fa8] sm:$0xff] }
 0x46c   :  { %4434 = vmatpush.msra.mxu1 %v2465_v39  ;;  %4454 = vmatpush.msra.mxu2 %v2617_v2  ;;  %v2321_v50 = vld [vmem:[%s12339_s3 + $0x1f0] sm:$0xff]  ;;  %v3989_v2 = vadd.f32 %v3988_v35, %v3966_v3  ;;  %v3256_v35 = vld [vmem:[%s12339_s3 + $0x1f28] sm:$0xff] }
 0x46d   :  { %4305 = vmatpush.msra.mxu3 %v2648_v13  ;;  %4378 = vmatmul.f32.gmra.mxu2 %v9090_v46  ;;  %v2449_v39 = vld [vmem:[%s12339_s3 + $0x5f0] sm:$0xff] }
 0x46e   :  { %4306 = vmatmul.f32.vlgmr.msra.gmra.mxu3 %v8637_v34  ;;  %4412 = vmatpush.msra.mxu0 %v2329_v45  ;;  %v2601_v31 = vld [vmem:[%s12339_s3 + $0xab0] sm:$0xff] }
 0x46f   :  { %4382 = vmatpush.msrb.mxu3 %v3280_v10  ;;  %4435 = vmatpush.msra.mxu1 %v2457_v33  ;;  %v2313_v13 = vld [vmem:[%s12339_s3 + $0x1b0] sm:$0xff]  ;;  %v11052_v10 = vadd.f32 %v4011_v59, %v3989_v2 }
 0x470   :  { %4455 = vmatpush.msra.mxu2 %v2609_v63  ;;  %4413 = vmatpush.msra.mxu0 %v2321_v50  ;;  %v2441_v45 = vld [vmem:[%s12339_s3 + $0x5b0] sm:$0xff] }
 0x471   :  { %4383 = vmatpush.msrb.mxu3 %v3272_v60  ;;  %4436 = vmatpush.msra.mxu1 %v2449_v39  ;;  %v2593_v33 = vld [vmem:[%s12339_s3 + $0xa70] sm:$0xff]  ;;  %v3248_v60 = vld [vmem:[%s12339_s3 + $0x1ee8] sm:$0xff] }
 0x472   :  { %v2305_v3 = vld [vmem:[%s12339_s3 + $0x170] sm:$0xff]  ;;  %4456 = vmatpush.msra.mxu2 %v2601_v31  ;;  %4414 = vmatpush.msra.mxu0 %v2313_v13  ;;  %v3240_v13 = vld [vmem:[%s12339_s3 + $0x1ea8] sm:$0xff] }
 0x473   :  { %v2433_v63 = vld [vmem:[%s12339_s3 + $0x570] sm:$0xff]  ;;  %4384 = vmatpush.msrb.mxu3 %v3264_v53  ;;  %4437 = vmatpush.msra.mxu1 %v2441_v45 }
 0x474   :  { %v2585_v50 = vld [vmem:[%s12339_s3 + $0xa30] sm:$0xff]  ;;  %4457 = vmatpush.msra.mxu2 %v2593_v33  ;;  %4415 = vmatpush.msra.mxu0 %v2305_v3  ;;  %v3232_v33 = vld [vmem:[%s12339_s3 + $0x1e68] sm:$0xff] }
 0x475   :  { %v2297_v39 = vld [vmem:[%s12339_s3 + $0x130] sm:$0xff]  ;;  %4385 = vmatpush.msrb.mxu3 %v3256_v35  ;;  %4438 = vmatpush.msra.mxu1 %v2433_v63 }
 0x476   :  { %v2425_v2 = vld [vmem:[%s12339_s3 + $0x530] sm:$0xff]  ;;  %4458 = vmatpush.msra.mxu2 %v2585_v50  ;;  %4309 = vmatmul.f32.gmra.mxu3 %v8694_v61  ;;  %v3224_v50 = vld [vmem:[%s12339_s3 + $0x1e28] sm:$0xff] }
 0x477   :  { %v2577_v31 = vld [vmem:[%s12339_s3 + $0x9f0] sm:$0xff]  ;;  %4386 = vmatpush.msrb.mxu3 %v3248_v60  ;;  %4416 = vmatpush.msra.mxu0 %v2297_v39 }
 0x478   :  { %v2289_v59 = vld [vmem:[%s12339_s3 + $0xf0] sm:$0xff]  ;;  %4439 = vmatpush.msra.mxu1 %v2425_v2  ;;  %4459 = vmatpush.msra.mxu2 %v2577_v31  ;;  %v3216_v31 = vld [vmem:[%s12339_s3 + $0x1de8] sm:$0xff] }
 0x479   :  { %v2417_v53 = vld [vmem:[%s12339_s3 + $0x4f0] sm:$0xff]  ;;  %4387 = vmatpush.msrb.mxu3 %v3240_v13  ;;  %4417 = vmatpush.msra.mxu0 %v2289_v59 }
 0x47a   :  { %v2569_v45 = vld [vmem:[%s12339_s3 + $0x9b0] sm:$0xff]  ;;  %4440 = vmatpush.msra.mxu1 %v2417_v53 }
 0x47b   :  { %v2281_v3 = vld [vmem:[%s12339_s3 + $0xb0] sm:$0xff]  ;;  %4460 = vmatpush.msra.mxu2 %v2569_v45  ;;  %4388 = vmatpush.msrb.mxu3 %v3232_v33 }
 0x47c   :  { %v2409_v35 = vld [vmem:[%s12339_s3 + $0x4b0] sm:$0xff]  ;;  %4418 = vmatpush.msra.mxu0 %v2281_v3  ;;  %v3208_v3 = vld [vmem:[%s12339_s3 + $0x1da8] sm:$0xff] }
 0x47d   :  { %v2561_v63 = vld [vmem:[%s12339_s3 + $0x970] sm:$0xff]  ;;  %4441 = vmatpush.msra.mxu1 %v2409_v35  ;;  %4389 = vmatpush.msrb.mxu3 %v3224_v50 }
 0x47e   :  { %v2273_v60 = vld [vmem:[%s12339_s3 + $0x70] sm:$0xff]  ;;  %4461 = vmatpush.msra.mxu2 %v2561_v63 }
 0x47f   :  { %v2401_v39 = vld [vmem:[%s12339_s3 + $0x470] sm:$0xff]  ;;  %4419 = vmatpush.msra.mxu0 %v2273_v60  ;;  %4390 = vmatpush.msrb.mxu3 %v3216_v31  ;;  %v3200_v60 = vld [vmem:[%s12339_s3 + $0x1d68] sm:$0xff] }
 0x480   :  { %v2553_v2 = vld [vmem:[%s12339_s3 + $0x930] sm:$0xff]  ;;  %4442 = vmatpush.msra.mxu1 %v2401_v39 }
 0x481   :  { %v2265_v13 = vld [vmem:[%s12339_s3 + $0x30] sm:$0xff]  ;;  %4462 = vmatpush.msra.mxu2 %v2553_v2  ;;  %4391 = vmatpush.msrb.mxu3 %v3208_v3 }
 0x482   :  { %v2393_v59 = vld [vmem:[%s12339_s3 + $0x430] sm:$0xff]  ;;  %4420 = vmatpush.msra.mxu0 %v2265_v13  ;;  %v3192_v13 = vld [vmem:[%s12339_s3 + $0x1d28] sm:$0xff] }
 0x483   :  { %v2545_v53 = vld [vmem:[%s12339_s3 + $0x8f0] sm:$0xff]  ;;  %4443 = vmatpush.msra.mxu1 %v2393_v59  ;;  %4421 = vmatmul.f32.vlgmr.msra.gmra.mxu0 %v8629_v56 }
 0x484   :  { %v2897_v45 = vld [vmem:[%s12339_s3 + $0x13f0] sm:$0xff]  ;;  %4463 = vmatpush.msra.mxu2 %v2545_v53  ;;  %4444 = vmatmul.f32.vlgmr.msra.gmra.mxu1 %v8632_v41 }
 0x485   :  { %v3025_v33 = vld [vmem:[%s12339_s3 + $0x17f0] sm:$0xff]  ;;  %4497 = vmatpush.msrb.mxu0 %v2897_v45  ;;  %4392 = vmatpush.msrb.mxu3 %v3200_v60  ;;  %v4031_v45 = vpop.f32.mrf.mxu3 }
 0x486   :  { %v2537_v35 = vld [vmem:[%s12339_s3 + $0x8b0] sm:$0xff]  ;;  %4520 = vmatpush.msrb.mxu1 %v3025_v33 }
 0x487   :  { %v2889_v63 = vld [vmem:[%s12339_s3 + $0x13b0] sm:$0xff]  ;;  %4464 = vmatpush.msra.mxu2 %v2537_v35  ;;  %v11178_v35 = vadd.f32 %v4031_v45, %v11005_v51  ;;  %4393 = vmatpush.msrb.mxu3 %v3192_v13 }
 0x488   :  { %v3017_v50 = vld [vmem:[%s12339_s3 + $0x17b0] sm:$0xff]  ;;  %4498 = vmatpush.msrb.mxu0 %v2889_v63  ;;  %v3184_v63 = vld [vmem:[%s12339_s3 + $0x1ce8] sm:$0xff] }
 0x489   :  { %v2529_v39 = vld [vmem:[%s12339_s3 + $0x870] sm:$0xff]  ;;  %4521 = vmatpush.msrb.mxu1 %v3017_v50  ;;  %4394 = vmatpush.msrb.mxu3 %v3184_v63  ;;  %v3160_v63 = vld [vmem:[%s12339_s3 + $0x1c28] sm:$0xff] }
 0x48a   :  { %v2881_v2 = vld [vmem:[%s12339_s3 + $0x1370] sm:$0xff]  ;;  %4465 = vmatpush.msra.mxu2 %v2529_v39  ;;  %v3176_v39 = vld [vmem:[%s12339_s3 + $0x1ca8] sm:$0xff] }
 0x48b   :  { %v3009_v31 = vld [vmem:[%s12339_s3 + $0x1770] sm:$0xff]  ;;  %4499 = vmatpush.msrb.mxu0 %v2881_v2  ;;  %4395 = vmatpush.msrb.mxu3 %v3176_v39 }
 0x48c   :  { %v2521_v59 = vld [vmem:[%s12339_s3 + $0x830] sm:$0xff]  ;;  %4522 = vmatpush.msrb.mxu1 %v3009_v31  ;;  %4424 = vmatmul.f32.gmra.mxu0 %v8687_v5 }
 0x48d   :  { %v2873_v53 = vld [vmem:[%s12339_s3 + $0x1330] sm:$0xff]  ;;  %4466 = vmatpush.msra.mxu2 %v2521_v59  ;;  %4447 = vmatmul.f32.gmra.mxu1 %v8689_v22  ;;  %v3168_v59 = vld [vmem:[%s12339_s3 + $0x1c68] sm:$0xff] }
 0x48e   :  { %v3001_v33 = vld [vmem:[%s12339_s3 + $0x1730] sm:$0xff]  ;;  %4467 = vmatmul.f32.vlgmr.msra.gmra.mxu2 %v8635_v30  ;;  %4500 = vmatpush.msrb.mxu0 %v2873_v53 }
 0x48f   :  { %v3153_v3 = vld [vmem:[%s12339_s3 + $0x1bf0] sm:$0xff]  ;;  %4523 = vmatpush.msrb.mxu1 %v3001_v33  ;;  %4396 = vmatpush.msrb.mxu3 %v3168_v59 }
 0x490   :  { %v2865_v50 = vld [vmem:[%s12339_s3 + $0x12f0] sm:$0xff]  ;;  %4543 = vmatpush.msrb.mxu2 %v3153_v3  ;;  %v4034_v3 = vpop.f32.mrf.mxu3 }
 0x491   :  { %v2993_v51 = vld [vmem:[%s12339_s3 + $0x16f0] sm:$0xff]  ;;  %4501 = vmatpush.msrb.mxu0 %v2865_v50  ;;  %v11223_v50 = vadd.f32 %v4034_v3, %v11052_v10  ;;  %4397 = vmatpush.msrb.mxu3 %v3160_v63 }
 0x492   :  { %v3145_v60 = vld [vmem:[%s12339_s3 + $0x1bb0] sm:$0xff]  ;;  %4524 = vmatpush.msrb.mxu1 %v2993_v51  ;;  %4398 = vmatmul.f32.vlgmr.msrb.gmra.mxu3 %v9259_v37 }
 0x493   :  { %v2857_v2 = vld [vmem:[%s12339_s3 + $0x12b0] sm:$0xff]  ;;  %4544 = vmatpush.msrb.mxu2 %v3145_v60 }
 0x494   :  { %v2985_v31 = vld [vmem:[%s12339_s3 + $0x16b0] sm:$0xff]  ;;  %4502 = vmatpush.msrb.mxu0 %v2857_v2 }
 0x495   :  { %v3137_v13 = vld [vmem:[%s12339_s3 + $0x1b70] sm:$0xff]  ;;  %4525 = vmatpush.msrb.mxu1 %v2985_v31 }
 0x496   :  { %v2849_v53 = vld [vmem:[%s12339_s3 + $0x1270] sm:$0xff]  ;;  %4545 = vmatpush.msrb.mxu2 %v3137_v13 }
 0x497   :  { %v2977_v45 = vld [vmem:[%s12339_s3 + $0x1670] sm:$0xff]  ;;  %4503 = vmatpush.msrb.mxu0 %v2849_v53  ;;  %4470 = vmatmul.f32.gmra.mxu2 %v8692_v18 }
 0x498   :  { %v3129_v33 = vld [vmem:[%s12339_s3 + $0x1b30] sm:$0xff]  ;;  %4526 = vmatpush.msrb.mxu1 %v2977_v45 }
 0x499   :  { %v2841_v51 = vld [vmem:[%s12339_s3 + $0x1230] sm:$0xff]  ;;  %4546 = vmatpush.msrb.mxu2 %v3129_v33 }
 0x49a   :  { %v2769_v60 = vld [vmem:[%s12339_s3 + $0xff0] sm:$0xff]  ;;  %4504 = vmatpush.msrb.mxu0 %v2841_v51  ;;  %4401 = vmatmul.f32.gmra.mxu3 %v9322_v48 }
 0x49b   :  { %v2969_v39 = vld [vmem:[%s12339_s3 + $0x1630] sm:$0xff]  ;;  %4474 = vmatpush.msra.mxu3 %v2769_v60 }
 0x49c   :  { %v3121_v10 = vld [vmem:[%s12339_s3 + $0x1af0] sm:$0xff]  ;;  %4527 = vmatpush.msrb.mxu1 %v2969_v39 }
 0x49d   :  { %v2833_v2 = vld [vmem:[%s12339_s3 + $0x11f0] sm:$0xff]  ;;  %4547 = vmatpush.msrb.mxu2 %v3121_v10 }
 0x49e   :  { %v2761_v31 = vld [vmem:[%s12339_s3 + $0xfb0] sm:$0xff]  ;;  %4505 = vmatpush.msrb.mxu0 %v2833_v2 }
 0x49f   :  { %v2961_v13 = vld [vmem:[%s12339_s3 + $0x15f0] sm:$0xff]  ;;  %4475 = vmatpush.msra.mxu3 %v2761_v31 }
 0x4a0   :  { %v3113_v59 = vld [vmem:[%s12339_s3 + $0x1ab0] sm:$0xff]  ;;  %4528 = vmatpush.msrb.mxu1 %v2961_v13 }
 0x4a1   :  { %v2825_v53 = vld [vmem:[%s12339_s3 + $0x11b0] sm:$0xff]  ;;  %4548 = vmatpush.msrb.mxu2 %v3113_v59 }
 0x4a2   :  { %v2753_v45 = vld [vmem:[%s12339_s3 + $0xf70] sm:$0xff]  ;;  %4506 = vmatpush.msrb.mxu0 %v2825_v53 }
 0x4a3   :  { %v2953_v33 = vld [vmem:[%s12339_s3 + $0x15b0] sm:$0xff]  ;;  %4476 = vmatpush.msra.mxu3 %v2753_v45 }
 0x4a4   :  { %v3105_v3 = vld [vmem:[%s12339_s3 + $0x1a70] sm:$0xff]  ;;  %4529 = vmatpush.msrb.mxu1 %v2953_v33 }
 0x4a5   :  { %v2817_v63 = vld [vmem:[%s12339_s3 + $0x1170] sm:$0xff]  ;;  %4549 = vmatpush.msrb.mxu2 %v3105_v3 }
 0x4a6   :  { %v2745_v51 = vld [vmem:[%s12339_s3 + $0xf30] sm:$0xff]  ;;  %4507 = vmatpush.msrb.mxu0 %v2817_v63 }
 0x4a7   :  { %v2945_v60 = vld [vmem:[%s12339_s3 + $0x1570] sm:$0xff]  ;;  %4477 = vmatpush.msra.mxu3 %v2745_v51 }
 0x4a8   :  { %v3097_v39 = vld [vmem:[%s12339_s3 + $0x1a30] sm:$0xff]  ;;  %4530 = vmatpush.msrb.mxu1 %v2945_v60 }
 0x4a9   :  { %v2737_v10 = vld [vmem:[%s12339_s3 + $0xef0] sm:$0xff]  ;;  %4550 = vmatpush.msrb.mxu2 %v3097_v39 }
 0x4aa   :  { %v2809_v2 = vld [vmem:[%s12339_s3 + $0x1130] sm:$0xff]  ;;  %4478 = vmatpush.msra.mxu3 %v2737_v10 }
 0x4ab   :  { %v2937_v31 = vld [vmem:[%s12339_s3 + $0x1530] sm:$0xff]  ;;  %4508 = vmatpush.msrb.mxu0 %v2809_v2 }
 0x4ac   :  { %v3089_v13 = vld [vmem:[%s12339_s3 + $0x19f0] sm:$0xff]  ;;  %4531 = vmatpush.msrb.mxu1 %v2937_v31 }
 0x4ad   :  { %v2729_v59 = vld [vmem:[%s12339_s3 + $0xeb0] sm:$0xff]  ;;  %4551 = vmatpush.msrb.mxu2 %v3089_v13 }
 0x4ae   :  { %v2801_v53 = vld [vmem:[%s12339_s3 + $0x10f0] sm:$0xff]  ;;  %4479 = vmatpush.msra.mxu3 %v2729_v59 }
 0x4af   :  { %v2929_v45 = vld [vmem:[%s12339_s3 + $0x14f0] sm:$0xff]  ;;  %4509 = vmatpush.msrb.mxu0 %v2801_v53 }
 0x4b0   :  { %v3081_v33 = vld [vmem:[%s12339_s3 + $0x19b0] sm:$0xff]  ;;  %4532 = vmatpush.msrb.mxu1 %v2929_v45 }
 0x4b1   :  { %v2721_v3 = vld [vmem:[%s12339_s3 + $0xe70] sm:$0xff]  ;;  %4552 = vmatpush.msrb.mxu2 %v3081_v33  ;;  %v2386_v33 = vld [vmem:[%s12339_s3 + $0x3f8] sm:$0xff] }
 0x4b2   :  { %v2793_v63 = vld [vmem:[%s12339_s3 + $0x10b0] sm:$0xff]  ;;  %4480 = vmatpush.msra.mxu3 %v2721_v3  ;;  %v2514_v3 = vld [vmem:[%s12339_s3 + $0x7f8] sm:$0xff] }
 0x4b3   :  { %v2921_v51 = vld [vmem:[%s12339_s3 + $0x14b0] sm:$0xff]  ;;  %4510 = vmatpush.msrb.mxu0 %v2793_v63 }
 0x4b4   :  { %v3073_v60 = vld [vmem:[%s12339_s3 + $0x1970] sm:$0xff]  ;;  %4533 = vmatpush.msrb.mxu1 %v2921_v51 }
 0x4b5   :  { %v2713_v39 = vld [vmem:[%s12339_s3 + $0xe30] sm:$0xff]  ;;  %4553 = vmatpush.msrb.mxu2 %v3073_v60  ;;  %v2378_v60 = vld [vmem:[%s12339_s3 + $0x3b8] sm:$0xff] }
 0x4b6   :  { %v2785_v10 = vld [vmem:[%s12339_s3 + $0x1070] sm:$0xff]  ;;  %4481 = vmatpush.msra.mxu3 %v2713_v39  ;;  %v2506_v39 = vld [vmem:[%s12339_s3 + $0x7b8] sm:$0xff] }
 0x4b7   :  { %v2913_v2 = vld [vmem:[%s12339_s3 + $0x1470] sm:$0xff]  ;;  %4511 = vmatpush.msrb.mxu0 %v2785_v10 }
 0x4b8   :  { %v3065_v31 = vld [vmem:[%s12339_s3 + $0x1930] sm:$0xff]  ;;  %4534 = vmatpush.msrb.mxu1 %v2913_v2 }
 0x4b9   :  { %v2705_v13 = vld [vmem:[%s12339_s3 + $0xdf0] sm:$0xff]  ;;  %4554 = vmatpush.msrb.mxu2 %v3065_v31  ;;  %v2370_v31 = vld [vmem:[%s12339_s3 + $0x378] sm:$0xff] }
 0x4ba   :  { %v2777_v59 = vld [vmem:[%s12339_s3 + $0x1030] sm:$0xff]  ;;  %4482 = vmatpush.msra.mxu3 %v2705_v13  ;;  %v2498_v13 = vld [vmem:[%s12339_s3 + $0x778] sm:$0xff] }
 0x4bb   :  { %v2905_v53 = vld [vmem:[%s12339_s3 + $0x1430] sm:$0xff]  ;;  %4512 = vmatpush.msrb.mxu0 %v2777_v59 }
 0x4bc   :  { %v3057_v45 = vld [vmem:[%s12339_s3 + $0x18f0] sm:$0xff]  ;;  %4535 = vmatpush.msrb.mxu1 %v2905_v53  ;;  %4513 = vmatmul.f32.vlgmr.msrb.gmra.mxu0 %v8839_v26 }
 0x4bd   :  { %4555 = vmatpush.msrb.mxu2 %v3057_v45  ;;  %v2697_v63 = vld [vmem:[%s12339_s3 + $0xdb0] sm:$0xff]  ;;  %4536 = vmatmul.f32.vlgmr.msrb.gmra.mxu1 %v8842_v52  ;;  %v2362_v45 = vld [vmem:[%s12339_s3 + $0x338] sm:$0xff] }
 0x4be   :  { %v3049_v51 = vld [vmem:[%s12339_s3 + $0x18b0] sm:$0xff]  ;;  %4589 = vmatpush.msra.mxu0 %v2386_v33  ;;  %4612 = vmatpush.msra.mxu1 %v2514_v3  ;;  %v2490_v33 = vld [vmem:[%s12339_s3 + $0x738] sm:$0xff] }
 0x4bf   :  { %v2689_v10 = vld [vmem:[%s12339_s3 + $0xd70] sm:$0xff]  ;;  %4483 = vmatpush.msra.mxu3 %v2697_v63  ;;  %4556 = vmatpush.msrb.mxu2 %v3049_v51  ;;  %v2642_v3 = vld [vmem:[%s12339_s3 + $0xbf8] sm:$0xff] }
 0x4c0   :  { %v3041_v2 = vld [vmem:[%s12339_s3 + $0x1870] sm:$0xff]  ;;  %4590 = vmatpush.msra.mxu0 %v2378_v60  ;;  %4613 = vmatpush.msra.mxu1 %v2506_v39  ;;  %v2354_v51 = vld [vmem:[%s12339_s3 + $0x2f8] sm:$0xff] }
 0x4c1   :  { %v2681_v59 = vld [vmem:[%s12339_s3 + $0xd30] sm:$0xff]  ;;  %4484 = vmatpush.msra.mxu3 %v2689_v10  ;;  %4557 = vmatpush.msrb.mxu2 %v3041_v2  ;;  %v2482_v60 = vld [vmem:[%s12339_s3 + $0x6f8] sm:$0xff] }
 0x4c2   :  { %v3033_v53 = vld [vmem:[%s12339_s3 + $0x1830] sm:$0xff]  ;;  %4591 = vmatpush.msra.mxu0 %v2370_v31  ;;  %4614 = vmatpush.msra.mxu1 %v2498_v13  ;;  %v2634_v39 = vld [vmem:[%s12339_s3 + $0xbb8] sm:$0xff] }
 0x4c3   :  { %4485 = vmatpush.msra.mxu3 %v2681_v59  ;;  %4558 = vmatpush.msrb.mxu2 %v3033_v53  ;;  %v2673_v63 = vld [vmem:[%s12339_s3 + $0xcf0] sm:$0xff]  ;;  %v2346_v2 = vld [vmem:[%s12339_s3 + $0x2b8] sm:$0xff] }
 0x4c4   :  { %4559 = vmatmul.f32.vlgmr.msrb.gmra.mxu2 %v9043_v11  ;;  %4592 = vmatpush.msra.mxu0 %v2362_v45  ;;  %v2665_v10 = vld [vmem:[%s12339_s3 + $0xcb0] sm:$0xff]  ;;  %v2474_v31 = vld [vmem:[%s12339_s3 + $0x6b8] sm:$0xff] }
 0x4c5   :  { %4615 = vmatpush.msra.mxu1 %v2490_v33  ;;  %4635 = vmatpush.msra.mxu2 %v2642_v3  ;;  %v2626_v13 = vld [vmem:[%s12339_s3 + $0xb78] sm:$0xff]  ;;  %v2657_v59 = vld [vmem:[%s12339_s3 + $0xc70] sm:$0xff] }
 0x4c6   :  { %4486 = vmatpush.msra.mxu3 %v2673_v63  ;;  %4516 = vmatmul.f32.gmra.mxu0 %v8890_v7  ;;  %v2338_v53 = vld [vmem:[%s12339_s3 + $0x278] sm:$0xff]  ;;  %v2649_v3 = vld [vmem:[%s12339_s3 + $0xc30] sm:$0xff] }
 0x4c7   :  { %4539 = vmatmul.f32.gmra.mxu1 %v8892_v25  ;;  %4593 = vmatpush.msra.mxu0 %v2354_v51  ;;  %v2466_v45 = vld [vmem:[%s12339_s3 + $0x678] sm:$0xff]  ;;  %v3281_v51 = vld [vmem:[%s12339_s3 + $0x1ff0] sm:$0xff] }
 0x4c8   :  { %4616 = vmatpush.msra.mxu1 %v2482_v60  ;;  %4636 = vmatpush.msra.mxu2 %v2634_v39  ;;  %v2618_v33 = vld [vmem:[%s12339_s3 + $0xb38] sm:$0xff] }
 0x4c9   :  { %4487 = vmatpush.msra.mxu3 %v2665_v10  ;;  %4594 = vmatpush.msra.mxu0 %v2346_v2  ;;  %v2330_v63 = vld [vmem:[%s12339_s3 + $0x238] sm:$0xff]  ;;  %v3273_v2 = vld [vmem:[%s12339_s3 + $0x1fb0] sm:$0xff] }
 0x4ca   :  { %4617 = vmatpush.msra.mxu1 %v2474_v31  ;;  %4637 = vmatpush.msra.mxu2 %v2626_v13  ;;  %v2458_v60 = vld [vmem:[%s12339_s3 + $0x638] sm:$0xff] }
 0x4cb   :  { %4488 = vmatpush.msra.mxu3 %v2657_v59  ;;  %4595 = vmatpush.msra.mxu0 %v2338_v53  ;;  %v2610_v39 = vld [vmem:[%s12339_s3 + $0xaf8] sm:$0xff]  ;;  %v3265_v53 = vld [vmem:[%s12339_s3 + $0x1f70] sm:$0xff] }
 0x4cc   :  { %4618 = vmatpush.msra.mxu1 %v2466_v45  ;;  %4638 = vmatpush.msra.mxu2 %v2618_v33  ;;  %v2322_v10 = vld [vmem:[%s12339_s3 + $0x1f8] sm:$0xff] }
 0x4cd   :  { %4489 = vmatpush.msra.mxu3 %v2649_v3  ;;  %4562 = vmatmul.f32.gmra.mxu2 %v9090_v46  ;;  %v2450_v31 = vld [vmem:[%s12339_s3 + $0x5f8] sm:$0xff] }
 0x4ce   :  { %4490 = vmatmul.f32.vlgmr.msra.gmra.mxu3 %v8637_v34  ;;  %4596 = vmatpush.msra.mxu0 %v2330_v63  ;;  %v2602_v13 = vld [vmem:[%s12339_s3 + $0xab8] sm:$0xff]  ;;  %v3257_v63 = vld [vmem:[%s12339_s3 + $0x1f30] sm:$0xff] }
 0x4cf   :  { %4566 = vmatpush.msrb.mxu3 %v3281_v51  ;;  %4619 = vmatpush.msra.mxu1 %v2458_v60  ;;  %v2314_v59 = vld [vmem:[%s12339_s3 + $0x1b8] sm:$0xff] }
 0x4d0   :  { %4639 = vmatpush.msra.mxu2 %v2610_v39  ;;  %4597 = vmatpush.msra.mxu0 %v2322_v10  ;;  %v2442_v45 = vld [vmem:[%s12339_s3 + $0x5b8] sm:$0xff]  ;;  %v3249_v39 = vld [vmem:[%s12339_s3 + $0x1ef0] sm:$0xff] }
 0x4d1   :  { %4567 = vmatpush.msrb.mxu3 %v3273_v2  ;;  %4620 = vmatpush.msra.mxu1 %v2450_v31  ;;  %v2594_v33 = vld [vmem:[%s12339_s3 + $0xa78] sm:$0xff] }
 0x4d2   :  { %v2306_v3 = vld [vmem:[%s12339_s3 + $0x178] sm:$0xff]  ;;  %4640 = vmatpush.msra.mxu2 %v2602_v13  ;;  %4598 = vmatpush.msra.mxu0 %v2314_v59  ;;  %v3241_v13 = vld [vmem:[%s12339_s3 + $0x1eb0] sm:$0xff] }
 0x4d3   :  { %v2434_v51 = vld [vmem:[%s12339_s3 + $0x578] sm:$0xff]  ;;  %4568 = vmatpush.msrb.mxu3 %v3265_v53  ;;  %4621 = vmatpush.msra.mxu1 %v2442_v45 }
 0x4d4   :  { %v2586_v60 = vld [vmem:[%s12339_s3 + $0xa38] sm:$0xff]  ;;  %4641 = vmatpush.msra.mxu2 %v2594_v33  ;;  %4599 = vmatpush.msra.mxu0 %v2306_v3  ;;  %v3233_v33 = vld [vmem:[%s12339_s3 + $0x1e70] sm:$0xff] }
 0x4d5   :  { %v2298_v10 = vld [vmem:[%s12339_s3 + $0x138] sm:$0xff]  ;;  %4569 = vmatpush.msrb.mxu3 %v3257_v63  ;;  %4622 = vmatpush.msra.mxu1 %v2434_v51 }
 0x4d6   :  { %v2426_v2 = vld [vmem:[%s12339_s3 + $0x538] sm:$0xff]  ;;  %4642 = vmatpush.msra.mxu2 %v2586_v60  ;;  %4493 = vmatmul.f32.gmra.mxu3 %v8694_v61  ;;  %v3225_v60 = vld [vmem:[%s12339_s3 + $0x1e30] sm:$0xff] }
 0x4d7   :  { %v2578_v31 = vld [vmem:[%s12339_s3 + $0x9f8] sm:$0xff]  ;;  %4570 = vmatpush.msrb.mxu3 %v3249_v39  ;;  %4600 = vmatpush.msra.mxu0 %v2298_v10 }
 0x4d8   :  { %v2290_v59 = vld [vmem:[%s12339_s3 + $0xf8] sm:$0xff]  ;;  %4623 = vmatpush.msra.mxu1 %v2426_v2  ;;  %4643 = vmatpush.msra.mxu2 %v2578_v31  ;;  %v3217_v31 = vld [vmem:[%s12339_s3 + $0x1df0] sm:$0xff] }
 0x4d9   :  { %v2418_v53 = vld [vmem:[%s12339_s3 + $0x4f8] sm:$0xff]  ;;  %4571 = vmatpush.msrb.mxu3 %v3241_v13  ;;  %4601 = vmatpush.msra.mxu0 %v2290_v59 }
 0x4da   :  { %v2570_v45 = vld [vmem:[%s12339_s3 + $0x9b8] sm:$0xff]  ;;  %4624 = vmatpush.msra.mxu1 %v2418_v53 }
 0x4db   :  { %v2282_v3 = vld [vmem:[%s12339_s3 + $0xb8] sm:$0xff]  ;;  %4644 = vmatpush.msra.mxu2 %v2570_v45  ;;  %4572 = vmatpush.msrb.mxu3 %v3233_v33 }
 0x4dc   :  { %v2410_v63 = vld [vmem:[%s12339_s3 + $0x4b8] sm:$0xff]  ;;  %4602 = vmatpush.msra.mxu0 %v2282_v3  ;;  %v3209_v3 = vld [vmem:[%s12339_s3 + $0x1db0] sm:$0xff] }
 0x4dd   :  { %v2562_v51 = vld [vmem:[%s12339_s3 + $0x978] sm:$0xff]  ;;  %4625 = vmatpush.msra.mxu1 %v2410_v63  ;;  %4573 = vmatpush.msrb.mxu3 %v3225_v60 }
 0x4de   :  { %v2274_v39 = vld [vmem:[%s12339_s3 + $0x78] sm:$0xff]  ;;  %4645 = vmatpush.msra.mxu2 %v2562_v51 }
 0x4df   :  { %v2402_v10 = vld [vmem:[%s12339_s3 + $0x478] sm:$0xff]  ;;  %4603 = vmatpush.msra.mxu0 %v2274_v39  ;;  %4574 = vmatpush.msrb.mxu3 %v3217_v31  ;;  %v3201_v39 = vld [vmem:[%s12339_s3 + $0x1d70] sm:$0xff] }
 0x4e0   :  { %v2554_v2 = vld [vmem:[%s12339_s3 + $0x938] sm:$0xff]  ;;  %4626 = vmatpush.msra.mxu1 %v2402_v10 }
 0x4e1   :  { %v2266_v13 = vld [vmem:[%s12339_s3 + $0x38] sm:$0xff]  ;;  %4646 = vmatpush.msra.mxu2 %v2554_v2  ;;  %4575 = vmatpush.msrb.mxu3 %v3209_v3  ;;  %v3193_v2 = vld [vmem:[%s12339_s3 + $0x1d30] sm:$0xff] }
 0x4e2   :  { %v2394_v59 = vld [vmem:[%s12339_s3 + $0x438] sm:$0xff]  ;;  %4604 = vmatpush.msra.mxu0 %v2266_v13 }
 0x4e3   :  { %v2546_v53 = vld [vmem:[%s12339_s3 + $0x8f8] sm:$0xff]  ;;  %4627 = vmatpush.msra.mxu1 %v2394_v59  ;;  %4605 = vmatmul.f32.vlgmr.msra.gmra.mxu0 %v8629_v56 }
 0x4e4   :  { %v2898_v45 = vld [vmem:[%s12339_s3 + $0x13f8] sm:$0xff]  ;;  %4647 = vmatpush.msra.mxu2 %v2546_v53  ;;  %4628 = vmatmul.f32.vlgmr.msra.gmra.mxu1 %v8632_v41 }
 0x4e5   :  { %v3026_v33 = vld [vmem:[%s12339_s3 + $0x17f8] sm:$0xff]  ;;  %4681 = vmatpush.msrb.mxu0 %v2898_v45  ;;  %4576 = vmatpush.msrb.mxu3 %v3201_v39  ;;  %v3185_v45 = vld [vmem:[%s12339_s3 + $0x1cf0] sm:$0xff] }
 0x4e6   :  { %v2538_v63 = vld [vmem:[%s12339_s3 + $0x8b8] sm:$0xff]  ;;  %4704 = vmatpush.msrb.mxu1 %v3026_v33 }
 0x4e7   :  { %v2890_v51 = vld [vmem:[%s12339_s3 + $0x13b8] sm:$0xff]  ;;  %4648 = vmatpush.msra.mxu2 %v2538_v63  ;;  %4577 = vmatpush.msrb.mxu3 %v3193_v2 }
 0x4e8   :  { %v3018_v60 = vld [vmem:[%s12339_s3 + $0x17b8] sm:$0xff]  ;;  %4682 = vmatpush.msrb.mxu0 %v2890_v51 }
 0x4e9   :  { %v2530_v56 = vld [vmem:[%s12339_s3 + $0x878] sm:$0xff]  ;;  %4705 = vmatpush.msrb.mxu1 %v3018_v60  ;;  %4578 = vmatpush.msrb.mxu3 %v3185_v45 }
 0x4ea   :  { %v2882_v41 = vld [vmem:[%s12339_s3 + $0x1378] sm:$0xff]  ;;  %4649 = vmatpush.msra.mxu2 %v2530_v56 }
 0x4eb   :  { %v3010_v10 = vld [vmem:[%s12339_s3 + $0x1778] sm:$0xff]  ;;  %4683 = vmatpush.msrb.mxu0 %v2882_v41 }
 0x4ec   :  { %v2522_v31 = vld [vmem:[%s12339_s3 + $0x838] sm:$0xff]  ;;  %4706 = vmatpush.msrb.mxu1 %v3010_v10  ;;  %4608 = vmatmul.f32.gmra.mxu0 %v8687_v5  ;;  %v3169_v5 = vld [vmem:[%s12339_s3 + $0x1c70] sm:$0xff] }
 0x4ed   :  { %v2874_v13 = vld [vmem:[%s12339_s3 + $0x1338] sm:$0xff]  ;;  %4650 = vmatpush.msra.mxu2 %v2522_v31  ;;  %4631 = vmatmul.f32.gmra.mxu1 %v8689_v22  ;;  %v3161_v10 = vld [vmem:[%s12339_s3 + $0x1c30] sm:$0xff] }
 0x4ee   :  { %v3002_v59 = vld [vmem:[%s12339_s3 + $0x1738] sm:$0xff]  ;;  %4651 = vmatmul.f32.vlgmr.msra.gmra.mxu2 %v8635_v30  ;;  %4684 = vmatpush.msrb.mxu0 %v2874_v13  ;;  %v3177_v30 = vld [vmem:[%s12339_s3 + $0x1cb0] sm:$0xff] }
 0x4ef   :  { %v3154_v53 = vld [vmem:[%s12339_s3 + $0x1bf8] sm:$0xff]  ;;  %4707 = vmatpush.msrb.mxu1 %v3002_v59  ;;  %4579 = vmatpush.msrb.mxu3 %v3177_v30 }
 0x4f0   :  { %v2866_v33 = vld [vmem:[%s12339_s3 + $0x12f8] sm:$0xff]  ;;  %4727 = vmatpush.msrb.mxu2 %v3154_v53 }
 0x4f1   :  { %v2994_v3 = vld [vmem:[%s12339_s3 + $0x16f8] sm:$0xff]  ;;  %4685 = vmatpush.msrb.mxu0 %v2866_v33  ;;  %4580 = vmatpush.msrb.mxu3 %v3169_v5 }
 0x4f2   :  { %v3146_v63 = vld [vmem:[%s12339_s3 + $0x1bb8] sm:$0xff]  ;;  %4708 = vmatpush.msrb.mxu1 %v2994_v3 }
 0x4f3   :  { %v2858_v51 = vld [vmem:[%s12339_s3 + $0x12b8] sm:$0xff]  ;;  %4728 = vmatpush.msrb.mxu2 %v3146_v63  ;;  %4581 = vmatpush.msrb.mxu3 %v3161_v10 }
 0x4f4   :  { %v2986_v60 = vld [vmem:[%s12339_s3 + $0x16b8] sm:$0xff]  ;;  %4686 = vmatpush.msrb.mxu0 %v2858_v51  ;;  %4582 = vmatmul.f32.vlgmr.msrb.gmra.mxu3 %v9259_v37 }
 0x4f5   :  { %v3138_v39 = vld [vmem:[%s12339_s3 + $0x1b78] sm:$0xff]  ;;  %4709 = vmatpush.msrb.mxu1 %v2986_v60 }
 0x4f6   :  { %v2850_v56 = vld [vmem:[%s12339_s3 + $0x1278] sm:$0xff]  ;;  %4729 = vmatpush.msrb.mxu2 %v3138_v39 }
 0x4f7   :  { %v2978_v22 = vld [vmem:[%s12339_s3 + $0x1678] sm:$0xff]  ;;  %4687 = vmatpush.msrb.mxu0 %v2850_v56  ;;  %4654 = vmatmul.f32.gmra.mxu2 %v8692_v18 }
 0x4f8   :  { %v3130_v41 = vld [vmem:[%s12339_s3 + $0x1b38] sm:$0xff]  ;;  %4710 = vmatpush.msrb.mxu1 %v2978_v22 }
 0x4f9   :  { %v2842_v2 = vld [vmem:[%s12339_s3 + $0x1238] sm:$0xff]  ;;  %4730 = vmatpush.msrb.mxu2 %v3130_v41 }
 0x4fa   :  { %v2770_v31 = vld [vmem:[%s12339_s3 + $0xff8] sm:$0xff]  ;;  %4688 = vmatpush.msrb.mxu0 %v2842_v2 }
 0x4fb   :  { %v2970_v13 = vld [vmem:[%s12339_s3 + $0x1638] sm:$0xff]  ;;  %4658 = vmatpush.msra.mxu3 %v2770_v31 }
 0x4fc   :  { %v3122_v59 = vld [vmem:[%s12339_s3 + $0x1af8] sm:$0xff]  ;;  %4711 = vmatpush.msrb.mxu1 %v2970_v13  ;;  %4585 = vmatmul.f32.gmra.mxu3 %v9322_v48 }
 0x4fd   :  { %v2834_v53 = vld [vmem:[%s12339_s3 + $0x11f8] sm:$0xff]  ;;  %4731 = vmatpush.msrb.mxu2 %v3122_v59 }
 0x4fe   :  { %v2762_v45 = vld [vmem:[%s12339_s3 + $0xfb8] sm:$0xff]  ;;  %4689 = vmatpush.msrb.mxu0 %v2834_v53 }
 0x4ff   :  { %v2962_v33 = vld [vmem:[%s12339_s3 + $0x15f8] sm:$0xff]  ;;  %4659 = vmatpush.msra.mxu3 %v2762_v45 }
 0x500   :  { %v3114_v18 = vld [vmem:[%s12339_s3 + $0x1ab8] sm:$0xff]  ;;  %4712 = vmatpush.msrb.mxu1 %v2962_v33 }
 0x501   :  { %v2826_v3 = vld [vmem:[%s12339_s3 + $0x11b8] sm:$0xff]  ;;  %4732 = vmatpush.msrb.mxu2 %v3114_v18 }
 0x502   :  { %v2754_v63 = vld [vmem:[%s12339_s3 + $0xf78] sm:$0xff]  ;;  %4690 = vmatpush.msrb.mxu0 %v2826_v3 }
 0x503   :  { %v2954_v30 = vld [vmem:[%s12339_s3 + $0x15b8] sm:$0xff]  ;;  %4660 = vmatpush.msra.mxu3 %v2754_v63 }
 0x504   :  { %v3106_v51 = vld [vmem:[%s12339_s3 + $0x1a78] sm:$0xff]  ;;  %4713 = vmatpush.msrb.mxu1 %v2954_v30 }
 0x505   :  { %v2818_v60 = vld [vmem:[%s12339_s3 + $0x1178] sm:$0xff]  ;;  %4733 = vmatpush.msrb.mxu2 %v3106_v51 }
 0x506   :  { %v2746_v39 = vld [vmem:[%s12339_s3 + $0xf38] sm:$0xff]  ;;  %4691 = vmatpush.msrb.mxu0 %v2818_v60 }
 0x507   :  { %v2946_v5 = vld [vmem:[%s12339_s3 + $0x1578] sm:$0xff]  ;;  %4661 = vmatpush.msra.mxu3 %v2746_v39 }
 0x508   :  { %v3098_v56 = vld [vmem:[%s12339_s3 + $0x1a38] sm:$0xff]  ;;  %4714 = vmatpush.msrb.mxu1 %v2946_v5 }
 0x509   :  { %v2738_v22 = vld [vmem:[%s12339_s3 + $0xef8] sm:$0xff]  ;;  %4734 = vmatpush.msrb.mxu2 %v3098_v56 }
 0x50a   :  { %v2810_v41 = vld [vmem:[%s12339_s3 + $0x1138] sm:$0xff]  ;;  %4662 = vmatpush.msra.mxu3 %v2738_v22 }
 0x50b   :  { %v2938_v10 = vld [vmem:[%s12339_s3 + $0x1538] sm:$0xff]  ;;  %4692 = vmatpush.msrb.mxu0 %v2810_v41  ;;  %v11736_v41 = vpop.f32.mrf.mxu0 }
 0x50c   :  { %v3090_v2 = vld [vmem:[%s12339_s3 + $0x19f8] sm:$0xff]  ;;  %4715 = vmatpush.msrb.mxu1 %v2938_v10 }
 0x50d   :  { %v2730_v31 = vld [vmem:[%s12339_s3 + $0xeb8] sm:$0xff]  ;;  %4735 = vmatpush.msrb.mxu2 %v3090_v2 }
 0x50e   :  { %v2802_v13 = vld [vmem:[%s12339_s3 + $0x10f8] sm:$0xff]  ;;  %4663 = vmatpush.msra.mxu3 %v2730_v31 }
 0x50f   :  { %v2930_v59 = vld [vmem:[%s12339_s3 + $0x14f8] sm:$0xff]  ;;  %4693 = vmatpush.msrb.mxu0 %v2802_v13 }
 0x510   :  { %v3082_v53 = vld [vmem:[%s12339_s3 + $0x19b8] sm:$0xff]  ;;  %4716 = vmatpush.msrb.mxu1 %v2930_v59  ;;  %v4803_v59 = vld [vmem:[%s12341_s5 + $0x70] sm:$0xff] }
 0x511   :  { %v2722_v45 = vld [vmem:[%s12339_s3 + $0xe78] sm:$0xff]  ;;  %4736 = vmatpush.msrb.mxu2 %v3082_v53  ;;  %v4819_v53 = vld [vmem:[%s12341_s5 + $0xf0] sm:$0xff] }
 0x512   :  { %v2794_v33 = vld [vmem:[%s12339_s3 + $0x10b8] sm:$0xff]  ;;  %4664 = vmatpush.msra.mxu3 %v2722_v45  ;;  %v11758_v45 = vpop.f32.mrf.mxu1 }
 0x513   :  { %v2922_v18 = vld [vmem:[%s12339_s3 + $0x14b8] sm:$0xff]  ;;  %4694 = vmatpush.msrb.mxu0 %v2794_v33 }
 0x514   :  { %v3074_v3 = vld [vmem:[%s12339_s3 + $0x1978] sm:$0xff]  ;;  %4717 = vmatpush.msrb.mxu1 %v2922_v18  ;;  %v4818_v18 = vld [vmem:[%s12341_s5 + $0xe8] sm:$0xff] }
 0x515   :  { %v2714_v63 = vld [vmem:[%s12339_s3 + $0xe38] sm:$0xff]  ;;  %4737 = vmatpush.msrb.mxu2 %v3074_v3 }
 0x516   :  { %v2786_v30 = vld [vmem:[%s12339_s3 + $0x1078] sm:$0xff]  ;;  %4665 = vmatpush.msra.mxu3 %v2714_v63 }
 0x517   :  { %v2914_v51 = vld [vmem:[%s12339_s3 + $0x1478] sm:$0xff]  ;;  %4695 = vmatpush.msrb.mxu0 %v2786_v30  ;;  %v11781_v30 = vld [vmem:[%s12340_s4] sm:$0xff] }
 0x518   :  { %v3066_v60 = vld [vmem:[%s12339_s3 + $0x1938] sm:$0xff]  ;;  %4718 = vmatpush.msrb.mxu1 %v2914_v51  ;;  %v3286_v51 = vperm.slane %v11781_v30, 1 }
 0x519   :  { %v2706_v39 = vld [vmem:[%s12339_s3 + $0xdf8] sm:$0xff]  ;;  %4738 = vmatpush.msrb.mxu2 %v3066_v60  ;;  %v11784_v60 = vpop.f32.mrf.mxu2 }
 0x51a   :  { %v2778_v5 = vld [vmem:[%s12339_s3 + $0x1038] sm:$0xff]  ;;  %4666 = vmatpush.msra.mxu3 %v2706_v39  ;;  %v4801_v39 = vld [vmem:[%s12341_s5 + $0x60] sm:$0xff] }
 0x51b   :  { %v2906_v56 = vld [vmem:[%s12339_s3 + $0x1438] sm:$0xff]  ;;  %4696 = vmatpush.msrb.mxu0 %v2778_v5  ;;  %v11789_v5 = vpop.f32.mrf.mxu3 }
 0x51c   :  { %v3058_v22 = vld [vmem:[%s12339_s3 + $0x18f8] sm:$0xff]  ;;  %4719 = vmatpush.msrb.mxu1 %v2906_v56  ;;  %4697 = vmatmul.f32.vlgmr.msrb.gmra.mxu0 %v8839_v26  ;;  %v4817_v56 = vld [vmem:[%s12341_s5 + $0xe0] sm:$0xff] }
 0x51d   :  { %v4804_v10 = vld [vmem:[%s12341_s5 + $0x78] sm:$0xff]  ;;  %4739 = vmatpush.msrb.mxu2 %v3058_v22  ;;  %4720 = vmatmul.f32.vlgmr.msrb.gmra.mxu1 %v8842_v52  ;;  %v4802_v52 = vld [vmem:[%s12341_s5 + $0x68] sm:$0xff] }
 0x51e   :  { %v4820_v2 = vld [vmem:[%s12341_s5 + $0xf8] sm:$0xff]  ;;  %4921 = vmatpush.msra.mxu0 %v4804_v10  ;;  %v3285_v10 = vperm.slane %v11781_v30, 0 }
 0x51f   :  { %v2698_v31 = vld [vmem:[%s12339_s3 + $0xdb8] sm:$0xff]  ;;  %4944 = vmatpush.msra.mxu1 %v4820_v2 }
 0x520   :  { %v3050_v13 = vld [vmem:[%s12339_s3 + $0x18b8] sm:$0xff]  ;;  %4667 = vmatpush.msra.mxu3 %v2698_v31  ;;  %4922 = vmatpush.msra.mxu0 %v4803_v59  ;;  %v11801_v31 = vpop.f32.mrf.mxu0  ;;  %v3503_v59 = vadd.f32 %v10145_v55, %v3286_v51  ;;  %v4799_v55 = vld [vmem:[%s12341_s5 + $0x50] sm:$0xff] }
 0x521   :  { %v2690_v33 = vld [vmem:[%s12339_s3 + $0xd78] sm:$0xff]  ;;  %4740 = vmatpush.msrb.mxu2 %v3050_v13  ;;  %4945 = vmatpush.msra.mxu1 %v4819_v53 }
 0x522   :  { %v3042_v26 = vld [vmem:[%s12339_s3 + $0x1878] sm:$0xff]  ;;  %4668 = vmatpush.msra.mxu3 %v2690_v33  ;;  %4923 = vmatpush.msra.mxu0 %v4802_v52  ;;  %v4835_v33 = vld [vmem:[%s12341_s5 + $0x170] sm:$0xff] }
 0x523   :  { %v2682_v3 = vld [vmem:[%s12339_s3 + $0xd38] sm:$0xff]  ;;  %4741 = vmatpush.msrb.mxu2 %v3042_v26  ;;  %4946 = vmatpush.msra.mxu1 %v4818_v18  ;;  %v3319_v26 = vadd.f32 %v9923_v0, %v3285_v10  ;;  %v4815_v52 = vld [vmem:[%s12341_s5 + $0xd0] sm:$0xff]  ;;  %v3287_v18 = vperm.slane %v11781_v30, 2 }
 0x524   :  { %v3034_v63 = vld [vmem:[%s12339_s3 + $0x1838] sm:$0xff]  ;;  %4669 = vmatpush.msra.mxu3 %v2682_v3  ;;  %4924 = vmatpush.msra.mxu0 %v4801_v39  ;;  %v11832_v3 = vpop.f32.mrf.mxu1  ;;  %v4814_v39 = vld [vmem:[%s12341_s5 + $0xc8] sm:$0xff] }
 0x525   :  { %v4836_v22 = vld [vmem:[%s12341_s5 + $0x178] sm:$0xff]  ;;  %4742 = vmatpush.msrb.mxu2 %v3034_v63  ;;  %4947 = vmatpush.msra.mxu1 %v4817_v56  ;;  %v3526_v63 = vadd.f32 %v10154_v62, %v3503_v59  ;;  %v4833_v56 = vld [vmem:[%s12341_s5 + $0x160] sm:$0xff] }
 0x526   :  { %v2674_v2 = vld [vmem:[%s12339_s3 + $0xcf8] sm:$0xff]  ;;  %4743 = vmatmul.f32.vlgmr.msrb.gmra.mxu2 %v9043_v11  ;;  %4700 = vmatmul.f32.gmra.mxu0 %v8890_v7  ;;  %v4834_v7 = vld [vmem:[%s12341_s5 + $0x168] sm:$0xff]  ;;  %v4797_v59 = vld [vmem:[%s12341_s5 + $0x40] sm:$0xff] }
 0x527   :  { %v4800_v13 = vld [vmem:[%s12341_s5 + $0x58] sm:$0xff]  ;;  %4967 = vmatpush.msra.mxu2 %v4836_v22  ;;  %4670 = vmatpush.msra.mxu3 %v2674_v2  ;;  %v3342_v2 = vadd.f32 %v9932_v4, %v3319_v26  ;;  %v3549_v62 = vadd.f32 %v10220_v8, %v3526_v63  ;;  %v4813_v8 = vld [vmem:[%s12341_s5 + $0xc0] sm:$0xff] }
 0x528   :  { %v4816_v53 = vld [vmem:[%s12341_s5 + $0xd8] sm:$0xff]  ;;  %4723 = vmatmul.f32.gmra.mxu1 %v8892_v25  ;;  %4925 = vmatpush.msra.mxu0 %v4800_v13  ;;  %v4798_v25 = vld [vmem:[%s12341_s5 + $0x48] sm:$0xff]  ;;  %v11852_v13 = vpop.f32.mrf.mxu2 }
 0x529   :  { %v2666_v11 = vld [vmem:[%s12339_s3 + $0xcb8] sm:$0xff]  ;;  %4948 = vmatpush.msra.mxu1 %v4816_v53  ;;  %4968 = vmatpush.msra.mxu2 %v4835_v33  ;;  %v3687_v53 = vadd.f32 %v10373_v47, %v3287_v18  ;;  %v11860_v33 = vpop.f32.mrf.mxu0  ;;  %v3572_v26 = vadd.f32 %v10514_v27, %v3549_v62  ;;  %v3322_v27 = vadd.f32 %v9988_v43, %v3285_v10  ;;  %v4811_v10 = vld [vmem:[%s12341_s5 + $0xb0] sm:$0xff] }
 0x52a   :  { %v2658_v0 = vld [vmem:[%s12339_s3 + $0xc78] sm:$0xff]  ;;  %4671 = vmatpush.msra.mxu3 %v2666_v11  ;;  %4926 = vmatpush.msra.mxu0 %v4799_v55  ;;  %v11862_v11 = vpop.f32.mrf.mxu3  ;;  %v3365_v55 = vadd.f32 %v9980_v29, %v3342_v2 }
 0x52b   :  { %4949 = vmatpush.msra.mxu1 %v4815_v52  ;;  %4969 = vmatpush.msra.mxu2 %v4834_v7  ;;  %v2650_v22 = vld [vmem:[%s12339_s3 + $0xc38] sm:$0xff]  ;;  %v3506_v7 = vadd.f32 %v10210_v58, %v3286_v51  ;;  %v3710_v58 = vadd.f32 %v10384_v14, %v3687_v53  ;;  %v3595_v63 = vadd.f32 %v10258_v15, %v3572_v26  ;;  %v4830_v14 = vld [vmem:[%s12341_s5 + $0x148] sm:$0xff] }
 0x52c   :  { %4672 = vmatpush.msra.mxu3 %v2658_v0  ;;  %4927 = vmatpush.msra.mxu0 %v4798_v25  ;;  %v3282_v4 = vld [vmem:[%s12339_s3 + $0x1ff8] sm:$0xff]  ;;  %v4831_v0 = vld [vmem:[%s12341_s5 + $0x150] sm:$0xff]  ;;  %v11897_v51 = vpop.f32.mrf.mxu1  ;;  %v3388_v25 = vadd.f32 %v10266_v40, %v3365_v55  ;;  %v4810_v40 = vld [vmem:[%s12341_s5 + $0xa8] sm:$0xff]  ;;  %v3345_v2 = vadd.f32 %v9996_v17, %v3322_v27  ;;  %v3690_v53 = vadd.f32 %v10440_v54, %v3287_v18 }
 0x52d   :  { %4950 = vmatpush.msra.mxu1 %v4814_v39  ;;  %4970 = vmatpush.msra.mxu2 %v4833_v56  ;;  %v4832_v47 = vld [vmem:[%s12341_s5 + $0x158] sm:$0xff]  ;;  %v4794_v39 = vld [vmem:[%s12341_s5 + $0x28] sm:$0xff]  ;;  %v3529_v56 = vadd.f32 %v10218_v57, %v3506_v7  ;;  %v4829_v57 = vld [vmem:[%s12341_s5 + $0x140] sm:$0xff] }
 0x52e   :  { %4673 = vmatpush.msra.mxu3 %v2650_v22  ;;  %4746 = vmatmul.f32.gmra.mxu2 %v9090_v46  ;;  %v4796_v52 = vld [vmem:[%s12341_s5 + $0x38] sm:$0xff]  ;;  %v3733_v22 = vadd.f32 %v10464_v24, %v3710_v58  ;;  %v3411_v62 = vadd.f32 %v10034_v1, %v3388_v25  ;;  %v4793_v1 = vld [vmem:[%s12341_s5 + $0x20] sm:$0xff]  ;;  %v3368_v18 = vadd.f32 %v10042_v28, %v3345_v2 }
 0x52f   :  { %4674 = vmatmul.f32.vlgmr.msra.gmra.mxu3 %v8637_v34  ;;  %4928 = vmatpush.msra.mxu0 %v4797_v59  ;;  %v3274_v29 = vld [vmem:[%s12339_s3 + $0x1fb8] sm:$0xff]  ;;  %v4795_v34 = vld [vmem:[%s12341_s5 + $0x30] sm:$0xff]  ;;  %v3552_v24 = vadd.f32 %v10284_v32, %v3529_v56  ;;  %v3618_v32 = vadd.f32 %v10268_v20, %v3595_v63  ;;  %v4809_v54 = vld [vmem:[%s12341_s5 + $0xa0] sm:$0xff] }
 0x530   :  { %v4812_v46 = vld [vmem:[%s12341_s5 + $0xb8] sm:$0xff]  ;;  %4750 = vmatpush.msrb.mxu3 %v3282_v4  ;;  %4951 = vmatpush.msra.mxu1 %v4813_v8  ;;  %v11923_v59 = vpop.f32.mrf.mxu2  ;;  %v3756_v4 = vadd.f32 %v10752_v21, %v3733_v22  ;;  %v12389_v25 = vld [vmem:[#allocation7_spill] sm:$0xff]  ;;  %v12391_v56 = vld [vmem:[#allocation8_spill] sm:$0xff] }
 0x531   :  { %4971 = vmatpush.msra.mxu2 %v4832_v47  ;;  %4929 = vmatpush.msra.mxu0 %v4796_v52  ;;  %v3266_v43 = vld [vmem:[%s12339_s3 + $0x1f78] sm:$0xff]  ;;  %v3575_v55 = vadd.f32 %v10576_v16, %v3552_v24  ;;  %v11950_v26 = vpop.f32.mrf.mxu0  ;;  %v3434_v52 = vadd.f32 %v10044_v9, %v3411_v62  ;;  %v3713_v16 = vadd.f32 %v10450_v49, %v3690_v53  ;;  %v4807_v49 = vld [vmem:[%s12341_s5 + $0x90] sm:$0xff] }
 0x532   :  { %4751 = vmatpush.msrb.mxu3 %v3274_v29  ;;  %4952 = vmatpush.msra.mxu1 %v4812_v46  ;;  %v3258_v15 = vld [vmem:[%s12339_s3 + $0x1f38] sm:$0xff]  ;;  %v11933_v8 = vpop.f32.mrf.mxu3  ;;  %v3779_v7 = vadd.f32 %v10490_v6, %v3756_v4  ;;  %v4791_v29 = vld [vmem:[%s12341_s5 + $0x10] sm:$0xff]  ;;  %v3641_v27 = vadd.f32 %v10346_v38, %v3618_v32  ;;  %v4826_v6 = vld [vmem:[%s12341_s5 + $0x128] sm:$0xff] }
 0x533   :  { %4972 = vmatpush.msra.mxu2 %v4831_v0  ;;  %4930 = vmatpush.msra.mxu0 %v4795_v34  ;;  %v3250_v17 = vld [vmem:[%s12339_s3 + $0x1ef8] sm:$0xff]  ;;  %v3457_v46 = vadd.f32 %v10088_v23, %v3434_v52  ;;  %v3391_v0 = vadd.f32 %v10329_v19, %v3368_v18  ;;  %v3598_v34 = vadd.f32 %v10320_v44, %v3575_v55  ;;  %v4790_v38 = vld [vmem:[%s12341_s5 + $0x8] sm:$0xff] }
 0x534   :  { %4752 = vmatpush.msrb.mxu3 %v3266_v43  ;;  %4953 = vmatpush.msra.mxu1 %v4811_v10  ;;  %v4828_v21 = vld [vmem:[%s12341_s5 + $0x138] sm:$0xff]  ;;  %v3736_v58 = vadd.f32 %v10528_v12, %v3713_v16  ;;  %v11985_v43 = vpop.f32.mrf.mxu1  ;;  %v3664_v19 = vadd.f32 %v10642_v36, %v3641_v27  ;;  %v4806_v44 = vld [vmem:[%s12341_s5 + $0x88] sm:$0xff]  ;;  %v4825_v12 = vld [vmem:[%s12341_s5 + $0x120] sm:$0xff]  ;;  %v3802_v22 = vadd.f32 %v12391_v56, %v3779_v7 }
 0x535   :  { %4973 = vmatpush.msra.mxu2 %v4830_v14  ;;  %4931 = vmatpush.msra.mxu0 %v4794_v39  ;;  %v3242_v20 = vld [vmem:[%s12339_s3 + $0x1eb8] sm:$0xff]  ;;  %v3480_v10 = vadd.f32 %v10382_v42, %v3457_v46  ;;  %v3414_v63 = vadd.f32 %v12389_v25, %v3391_v0  ;;  %v12390_v14 = vld [vmem:[#allocation13_spill] sm:$0xff]  ;;  %v4789_v36 = vld [vmem:[%s12341_s5] sm:$0xff] }
 0x536   :  { %4753 = vmatpush.msrb.mxu3 %v3258_v15  ;;  %4954 = vmatpush.msra.mxu1 %v4810_v40  ;;  %v4792_v47 = vld [vmem:[%s12341_s5 + $0x18] sm:$0xff]  ;;  %v3759_v39 = vadd.f32 %v12390_v14, %v3736_v58  ;;  %v4805_v40 = vld [vmem:[%s12341_s5 + $0x80] sm:$0xff]  ;;  %v12394_v18 = vld [vmem:[#allocation12_spill] sm:$0xff] }
 0x537   :  { %4974 = vmatpush.msra.mxu2 %v4829_v57  ;;  %4677 = vmatmul.f32.gmra.mxu3 %v8694_v61  ;;  %v4808_v28 = vld [vmem:[%s12341_s5 + $0x98] sm:$0xff]  ;;  %v4827_v61 = vld [vmem:[%s12341_s5 + $0x130] sm:$0xff]  ;;  %v4773_v4 = vmax.f32 %v3480_v10, 0.0  ;;  %v12396_v7 = vld [vmem:[#allocation15_spill] sm:$0xff] }
 0x538   :  { %4754 = vmatpush.msrb.mxu3 %v3250_v17  ;;  %4932 = vmatpush.msra.mxu0 %v4793_v1  ;;  %v3234_v9 = vld [vmem:[%s12339_s3 + $0x1e78] sm:$0xff]  ;;  %v12010_v15 = vpop.f32.mrf.mxu2  ;;  %v4774_v17 = vmax.f32 %v3664_v19, 0.0  ;;  %v3782_v55 = vadd.f32 %v12394_v18, %v3759_v39  ;;  %v4883_v16 = vld [vmem:[%s12341_s5 + $0x2f0] sm:$0xff]  ;;  %v4822_v58 = vld [vmem:[%s12341_s5 + $0x108] sm:$0xff] }
 0x539   :  { %4955 = vmatpush.msra.mxu1 %v4809_v54  ;;  %4975 = vmatpush.msra.mxu2 %v4828_v21  ;;  %v3226_v23 = vld [vmem:[%s12339_s3 + $0x1e38] sm:$0xff]  ;;  %v4238_v24 = vpop.f32.mrf.mxu0  ;;  %v12393_v54 = vld [vmem:[#allocation11_spill] sm:$0xff]  ;;  %v4882_v10 = vld [vmem:[%s12341_s5 + $0x2e8] sm:$0xff] }
 0x53a   :  { %4755 = vmatpush.msrb.mxu3 %v3242_v20  ;;  %4933 = vmatpush.msra.mxu0 %v4792_v47  ;;  %v3218_v42 = vld [vmem:[%s12339_s3 + $0x1df8] sm:$0xff]  ;;  %v12019_v53 = vpop.f32.mrf.mxu3  ;;  %v3437_v21 = vadd.f32 %v12393_v54, %v3414_v63  ;;  %v12399_v19 = vld [vmem:[#allocation5_spill] sm:$0xff]  ;;  %v4821_v56 = vld [vmem:[%s12341_s5 + $0x100] sm:$0xff] }
 0x53b   :  { %4956 = vmatpush.msra.mxu1 %v4808_v28  ;;  %4976 = vmatpush.msra.mxu2 %v4827_v61  ;;  %v4824_v2 = vld [vmem:[%s12341_s5 + $0x118] sm:$0xff]  ;;  %v4823_v28 = vld [vmem:[%s12341_s5 + $0x110] sm:$0xff] }
 0x53c   :  { %4756 = vmatpush.msrb.mxu3 %v3234_v9  ;;  %4934 = vmatpush.msra.mxu0 %v4791_v29  ;;  %v12392_v62 = vld [vmem:[#allocation10_spill] sm:$0xff]  ;;  %v4867_v61 = vld [vmem:[%s12341_s5 + $0x270] sm:$0xff]  ;;  %v3460_v9 = vadd.f32 %v12396_v7, %v3437_v21  ;;  %v4261_v0 = vpop.f32.mrf.mxu1 }
 0x53d   :  { %4957 = vmatpush.msra.mxu1 %v4807_v49  ;;  %4977 = vmatpush.msra.mxu2 %v4826_v6  ;;  %v3621_v57 = vadd.f32 %v12392_v62, %v3598_v34  ;;  %v4868_v1 = vld [vmem:[%s12341_s5 + $0x278] sm:$0xff]  ;;  %v3289_v6 = vperm.slane %v11781_v30, 4  ;;  %v12401_v63 = vld [vmem:[#allocation17_spill] sm:$0xff]  ;;  %v4881_v62 = vld [vmem:[%s12341_s5 + $0x2e0] sm:$0xff] }
 0x53e   :  { %4757 = vmatpush.msrb.mxu3 %v3226_v23  ;;  %4935 = vmatpush.msra.mxu0 %v4790_v38  ;;  %v4884_v32 = vld [vmem:[%s12341_s5 + $0x2f8] sm:$0xff]  ;;  %v3290_v23 = vperm.slane %v11781_v30, 5  ;;  %v4866_v38 = vld [vmem:[%s12341_s5 + $0x268] sm:$0xff]  ;;  %v3805_v14 = vadd.f32 %v12401_v63, %v3782_v55  ;;  %v12403_v55 = vld [vmem:[#allocation19_spill] sm:$0xff] }
 0x53f   :  { %4958 = vmatpush.msra.mxu1 %v4806_v44  ;;  %4978 = vmatpush.msra.mxu2 %v4825_v12  ;;  %v12395_v20 = vld [vmem:[#allocation6_spill] sm:$0xff]  ;;  %v3483_v44 = vadd.f32 %v12399_v19, %v3460_v9  ;;  %v12400_v12 = vld [vmem:[#allocation16_spill] sm:$0xff]  ;;  %v4859_v63 = vld [vmem:[%s12341_s5 + $0x230] sm:$0xff] }
 0x540   :  { %4758 = vmatpush.msrb.mxu3 %v3218_v42  ;;  %4936 = vmatpush.msra.mxu0 %v4789_v36  ;;  %v3825_v47 = vadd.f32 %v12395_v20, %v3802_v22  ;;  %v3210_v52 = vld [vmem:[%s12339_s3 + $0x1db8] sm:$0xff]  ;;  %v4284_v22 = vpop.f32.mrf.mxu2  ;;  %v4865_v42 = vld [vmem:[%s12341_s5 + $0x260] sm:$0xff]  ;;  %v4862_v9 = vld [vmem:[%s12341_s5 + $0x248] sm:$0xff] }
 0x541   :  { %4959 = vmatpush.msra.mxu1 %v4805_v40  ;;  %4979 = vmatpush.msra.mxu2 %v4824_v2  ;;  %v12397_v29 = vld [vmem:[#allocation14_spill] sm:$0xff]  ;;  %v4055_v40 = vadd.f32 %v11736_v41, %v3289_v6  ;;  %v4241_v21 = vpop.f32.mrf.mxu0 }
 0x542   :  { %4937 = vmatmul.f32.vlgmr.msra.gmra.mxu0 %v4773_v4  ;;  %4960 = vmatmul.f32.vlgmr.msra.gmra.mxu1 %v4774_v17  ;;  %v3644_v46 = vadd.f32 %v12397_v29, %v3621_v57  ;;  %v12398_v27 = vld [vmem:[#allocation18_spill] sm:$0xff]  ;;  %v4307_v2 = vpop.f32.mrf.mxu3  ;;  %v4239_v4 = vadd.f32 %v4238_v24, %v3290_v23  ;;  %v4781_v17 = vmax.f32 %v3483_v44, 0.0  ;;  %v4878_v29 = vld [vmem:[%s12341_s5 + $0x2c8] sm:$0xff] }
 0x543   :  { %v3848_v49 = vadd.f32 %v12398_v27, %v3825_v47  ;;  %5013 = vmatpush.msrb.mxu0 %v4868_v1  ;;  %5036 = vmatpush.msrb.mxu1 %v4884_v32  ;;  %v3202_v34 = vld [vmem:[%s12339_s3 + $0x1d78] sm:$0xff]  ;;  %v12402_v32 = vld [vmem:[#allocation9_spill] sm:$0xff]  ;;  %v4078_v47 = vadd.f32 %v11758_v45, %v4055_v40  ;;  %v4849_v40 = vld [vmem:[%s12341_s5 + $0x1e0] sm:$0xff] }
 0x544   :  { %4759 = vmatpush.msrb.mxu3 %v3210_v52  ;;  %4980 = vmatpush.msra.mxu2 %v4823_v28  ;;  %v3667_v25 = vadd.f32 %v12400_v12, %v3644_v46  ;;  %v3194_v39 = vld [vmem:[%s12339_s3 + $0x1d38] sm:$0xff]  ;;  %v3828_v54 = vadd.f32 %v12402_v32, %v3805_v14  ;;  %v4863_v52 = vld [vmem:[%s12341_s5 + $0x250] sm:$0xff]  ;;  %v4264_v45 = vpop.f32.mrf.mxu1  ;;  %v4873_v32 = vld [vmem:[%s12341_s5 + $0x2a0] sm:$0xff] }
 0x545   :  { %5014 = vmatpush.msrb.mxu0 %v4867_v61  ;;  %5037 = vmatpush.msrb.mxu1 %v4883_v16  ;;  %v4775_v36 = vmax.f32 %v3848_v49, 0.0  ;;  %v3186_v57 = vld [vmem:[%s12339_s3 + $0x1cf8] sm:$0xff]  ;;  %v4879_v28 = vld [vmem:[%s12341_s5 + $0x2d0] sm:$0xff]  ;;  %v4262_v61 = vadd.f32 %v4261_v0, %v4239_v4  ;;  %v4101_v7 = vadd.f32 %v11784_v60, %v4078_v47  ;;  %v4861_v0 = vld [vmem:[%s12341_s5 + $0x240] sm:$0xff] }
 0x546   :  { %4760 = vmatpush.msrb.mxu3 %v3202_v34  ;;  %4981 = vmatpush.msra.mxu2 %v4822_v58  ;;  %v4782_v1 = vmax.f32 %v3667_v25, 0.0  ;;  %v4864_v41 = vld [vmem:[%s12341_s5 + $0x258] sm:$0xff]  ;;  %v3851_v20 = vadd.f32 %v12403_v55, %v3828_v54  ;;  %v4058_v34 = vadd.f32 %v11801_v31, %v3289_v6  ;;  %v4242_v58 = vadd.f32 %v4241_v21, %v3290_v23  ;;  %v4851_v6 = vld [vmem:[%s12341_s5 + $0x1f0] sm:$0xff] }
 0x547   :  { %5015 = vmatpush.msrb.mxu0 %v4866_v38  ;;  %5038 = vmatpush.msrb.mxu1 %v4882_v10  ;;  %v4880_v18 = vld [vmem:[%s12341_s5 + $0x2d8] sm:$0xff]  ;;  %v4285_v46 = vadd.f32 %v4284_v22, %v4262_v61  ;;  %v4124_v60 = vadd.f32 %v11789_v5, %v4101_v7  ;;  %v4877_v5 = vld [vmem:[%s12341_s5 + $0x2c0] sm:$0xff]  ;;  %v4875_v22 = vld [vmem:[%s12341_s5 + $0x2b0] sm:$0xff] }
 0x548   :  { %4761 = vmatpush.msrb.mxu3 %v3194_v39  ;;  %4982 = vmatpush.msra.mxu2 %v4821_v56  ;;  %v3178_v24 = vld [vmem:[%s12339_s3 + $0x1cb8] sm:$0xff]  ;;  %v4783_v49 = vmax.f32 %v3851_v20, 0.0  ;;  %v4287_v38 = vpop.f32.mrf.mxu2  ;;  %v4081_v14 = vadd.f32 %v11832_v3, %v4058_v34  ;;  %v4850_v56 = vld [vmem:[%s12341_s5 + $0x1e8] sm:$0xff]  ;;  %v4899_v20 = vld [vmem:[%s12341_s5 + $0x370] sm:$0xff] }
 0x549   :  { %4983 = vmatmul.f32.vlgmr.msra.gmra.mxu2 %v4775_v36  ;;  %5016 = vmatpush.msrb.mxu0 %v4865_v42  ;;  %v3170_v16 = vld [vmem:[%s12339_s3 + $0x1c78] sm:$0xff]  ;;  %v4308_v10 = vadd.f32 %v4307_v2, %v4285_v46  ;;  %v4330_v44 = vpop.f32.mrf.mxu0  ;;  %v4147_v25 = vadd.f32 %v11860_v33, %v4124_v60  ;;  %v4858_v42 = vld [vmem:[%s12341_s5 + $0x228] sm:$0xff]  ;;  %v4871_v61 = vld [vmem:[%s12341_s5 + $0x290] sm:$0xff] }
 0x54a   :  { %5039 = vmatpush.msrb.mxu1 %v4881_v62  ;;  %4762 = vmatpush.msrb.mxu3 %v3186_v57  ;;  %v3162_v27 = vld [vmem:[%s12339_s3 + $0x1c38] sm:$0xff]  ;;  %v4310_v12 = vpop.f32.mrf.mxu3  ;;  %v4104_v3 = vadd.f32 %v11852_v13, %v4081_v14  ;;  %v4874_v2 = vld [vmem:[%s12341_s5 + $0x2a8] sm:$0xff]  ;;  %v4857_v57 = vld [vmem:[%s12341_s5 + $0x220] sm:$0xff] }
 0x54b   :  { %4940 = vmatmul.f32.gmra.mxu0 %v4781_v17  ;;  %4963 = vmatmul.f32.gmra.mxu1 %v4782_v1  ;;  %v4852_v19 = vld [vmem:[%s12341_s5 + $0x1f8] sm:$0xff]  ;;  %v4331_v39 = vadd.f32 %v4330_v44, %v4308_v10  ;;  %v4170_v62 = vadd.f32 %v11897_v51, %v4147_v25  ;;  %v4869_v34 = vld [vmem:[%s12341_s5 + $0x280] sm:$0xff] }
 0x54c   :  { %5017 = vmatpush.msrb.mxu0 %v4864_v41  ;;  %5040 = vmatpush.msrb.mxu1 %v4880_v18  ;;  %v4860_v31 = vld [vmem:[%s12341_s5 + $0x238] sm:$0xff]  ;;  %v4353_v33 = vpop.f32.mrf.mxu1  ;;  %v4127_v13 = vadd.f32 %v11862_v11, %v4104_v3  ;;  %v4847_v11 = vld [vmem:[%s12341_s5 + $0x1d0] sm:$0xff]  ;;  %v4837_v3 = vld [vmem:[%s12341_s5 + $0x180] sm:$0xff] }
 0x54d   :  { %4763 = vmatpush.msrb.mxu3 %v3178_v24  ;;  %v4876_v23 = vld [vmem:[%s12341_s5 + $0x2b8] sm:$0xff]  ;;  %v4354_v17 = vadd.f32 %v4353_v33, %v4331_v39  ;;  %v4193_v24 = vadd.f32 %v11923_v59, %v4170_v62  ;;  %v4846_v59 = vld [vmem:[%s12341_s5 + $0x1c8] sm:$0xff]  ;;  %v4889_v62 = vld [vmem:[%s12341_s5 + $0x320] sm:$0xff] }
 0x54e   :  { %5018 = vmatpush.msrb.mxu0 %v4863_v52  ;;  %5041 = vmatpush.msrb.mxu1 %v4879_v28  ;;  %v4848_v1 = vld [vmem:[%s12341_s5 + $0x1d8] sm:$0xff]  ;;  %v4150_v47 = vadd.f32 %v11950_v26, %v4127_v13  ;;  %v4898_v26 = vld [vmem:[%s12341_s5 + $0x368] sm:$0xff] }
 0x54f   :  { %4764 = vmatpush.msrb.mxu3 %v3170_v16  ;;  %v4856_v21 = vld [vmem:[%s12341_s5 + $0x218] sm:$0xff]  ;;  %v4854_v16 = vld [vmem:[%s12341_s5 + $0x208] sm:$0xff]  ;;  %v4216_v7 = vadd.f32 %v11933_v8, %v4193_v24  ;;  %v4897_v8 = vld [vmem:[%s12341_s5 + $0x360] sm:$0xff] }
 0x550   :  { %5019 = vmatpush.msrb.mxu0 %v4862_v9  ;;  %5042 = vmatpush.msrb.mxu1 %v4878_v29  ;;  %v4376_v51 = vpop.f32.mrf.mxu2  ;;  %v4872_v41 = vld [vmem:[%s12341_s5 + $0x298] sm:$0xff]  ;;  %v4845_v9 = vld [vmem:[%s12341_s5 + $0x1c0] sm:$0xff]  ;;  %v4870_v29 = vld [vmem:[%s12341_s5 + $0x288] sm:$0xff] }
 0x551   :  { %4765 = vmatpush.msrb.mxu3 %v3162_v27  ;;  %4986 = vmatmul.f32.gmra.mxu2 %v4783_v49  ;;  %v4900_v18 = vld [vmem:[%s12341_s5 + $0x378] sm:$0xff]  ;;  %v4333_v55 = vpop.f32.mrf.mxu0  ;;  %v4377_v28 = vadd.f32 %v4376_v51, %v4354_v17  ;;  %v4853_v27 = vld [vmem:[%s12341_s5 + $0x200] sm:$0xff]  ;;  %v4173_v49 = vadd.f32 %v11985_v43, %v4150_v47  ;;  %v4843_v43 = vld [vmem:[%s12341_s5 + $0x1b0] sm:$0xff] }
 0x552   :  { %4766 = vmatmul.f32.vlgmr.msrb.gmra.mxu3 %v9259_v37  ;;  %5020 = vmatpush.msrb.mxu0 %v4861_v0  ;;  %v4265_v37 = vadd.f32 %v4264_v45, %v4242_v58  ;;  %v4399_v54 = vpop.f32.mrf.mxu3  ;;  %v4844_v0 = vld [vmem:[%s12341_s5 + $0x1b8] sm:$0xff]  ;;  %v4777_v58 = vmax.f32 %v4216_v7, 0.0  ;;  %v4838_v33 = vld [vmem:[%s12341_s5 + $0x188] sm:$0xff]  ;;  %v4885_v51 = vld [vmem:[%s12341_s5 + $0x300] sm:$0xff] }
 0x553   :  { %4990 = vmatpush.msra.mxu3 %v4852_v19  ;;  %5043 = vmatpush.msrb.mxu1 %v4877_v5  ;;  %v4400_v45 = vadd.f32 %v4399_v54, %v4377_v28  ;;  %v4896_v10 = vld [vmem:[%s12341_s5 + $0x358] sm:$0xff]  ;;  %v4196_v44 = vadd.f32 %v12010_v15, %v4173_v49  ;;  %v4841_v15 = vld [vmem:[%s12341_s5 + $0x1a0] sm:$0xff]  ;;  %v4886_v17 = vld [vmem:[%s12341_s5 + $0x308] sm:$0xff] }
 0x554   :  { %5021 = vmatpush.msrb.mxu0 %v4860_v31  ;;  %v4288_v36 = vadd.f32 %v4287_v38, %v4265_v37  ;;  %5059 = vmatpush.msrb.mxu2 %v4900_v18  ;;  %v4356_v46 = vpop.f32.mrf.mxu1  ;;  %v4842_v31 = vld [vmem:[%s12341_s5 + $0x1a8] sm:$0xff]  ;;  %v4840_v14 = vld [vmem:[%s12341_s5 + $0x198] sm:$0xff]  ;;  %v4893_v37 = vld [vmem:[%s12341_s5 + $0x340] sm:$0xff] }
 0x555   :  { %4991 = vmatpush.msra.mxu3 %v4851_v6  ;;  %5044 = vmatpush.msrb.mxu1 %v4876_v23  ;;  %v4778_v38 = vmax.f32 %v4400_v45, 0.0  ;;  %v4895_v6 = vld [vmem:[%s12341_s5 + $0x350] sm:$0xff]  ;;  %v4219_v23 = vadd.f32 %v12019_v53, %v4196_v44  ;;  %v4913_v44 = vld [vmem:[%s12341_s5 + $0x3e0] sm:$0xff] }
 0x556   :  { %5022 = vmatpush.msrb.mxu0 %v4859_v63  ;;  %v4311_v4 = vadd.f32 %v4310_v12, %v4288_v36  ;;  %5060 = vmatpush.msrb.mxu2 %v4899_v20  ;;  %v4894_v63 = vld [vmem:[%s12341_s5 + $0x348] sm:$0xff] }
 0x557   :  { %4992 = vmatpush.msra.mxu3 %v4850_v56  ;;  %5045 = vmatpush.msrb.mxu1 %v4875_v22  ;;  %v4785_v53 = vmax.f32 %v4219_v23, 0.0  ;;  %v4839_v56 = vld [vmem:[%s12341_s5 + $0x190] sm:$0xff]  ;;  %v4892_v22 = vld [vmem:[%s12341_s5 + $0x338] sm:$0xff]  ;;  %v4890_v36 = vld [vmem:[%s12341_s5 + $0x328] sm:$0xff] }
 0x558   :  { %5023 = vmatpush.msrb.mxu0 %v4858_v42  ;;  %v4334_v52 = vadd.f32 %v4333_v55, %v4311_v4  ;;  %5061 = vmatpush.msrb.mxu2 %v4898_v26  ;;  %v4379_v19 = vpop.f32.mrf.mxu2  ;;  %v4891_v42 = vld [vmem:[%s12341_s5 + $0x330] sm:$0xff]  ;;  %v4909_v23 = vld [vmem:[%s12341_s5 + $0x3c0] sm:$0xff] }
 0x559   :  { %4993 = vmatpush.msra.mxu3 %v4849_v40  ;;  %5046 = vmatpush.msrb.mxu1 %v4874_v2  ;;  %v4776_v40 = vmax.f32 %v11178_v35, 0.0  ;;  %v4422_v2 = vpop.f32.mrf.mxu0  ;;  %v4887_v4 = vld [vmem:[%s12341_s5 + $0x310] sm:$0xff]  ;;  %v3291_v35 = vperm.slane %v11781_v30, 6 }
 0x55a   :  { %4769 = vmatmul.f32.gmra.mxu3 %v9322_v48  ;;  %5024 = vmatpush.msrb.mxu0 %v4857_v57  ;;  %v4855_v48 = vld [vmem:[%s12341_s5 + $0x210] sm:$0xff]  ;;  %v4357_v60 = vadd.f32 %v4356_v46, %v4334_v52  ;;  %v4402_v5 = vpop.f32.mrf.mxu3  ;;  %v4888_v57 = vld [vmem:[%s12341_s5 + $0x318] sm:$0xff] }
 0x55b   :  { %4994 = vmatpush.msra.mxu3 %v4848_v1  ;;  %5047 = vmatpush.msrb.mxu1 %v4873_v32  ;;  %v4784_v1 = vmax.f32 %v11223_v50, 0.0  ;;  %v4423_v54 = vadd.f32 %v4422_v2, %v3291_v35 }
 0x55c   :  { %5025 = vmatpush.msrb.mxu0 %v4856_v21  ;;  %5062 = vmatpush.msrb.mxu2 %v4897_v8  ;;  %v4380_v12 = vadd.f32 %v4379_v19, %v4357_v60  ;;  %v4445_v13 = vpop.f32.mrf.mxu1 }
 0x55d   :  { %4995 = vmatpush.msra.mxu3 %v4847_v11  ;;  %5048 = vmatpush.msrb.mxu1 %v4872_v41  ;;  %v4446_v41 = vadd.f32 %v4445_v13, %v4423_v54 }
 0x55e   :  { %5026 = vmatpush.msrb.mxu0 %v4855_v48  ;;  %5063 = vmatpush.msrb.mxu2 %v4896_v10  ;;  %v4403_v25 = vadd.f32 %v4402_v5, %v4380_v12  ;;  %v4914_v5 = vld [vmem:[%s12341_s5 + $0x3e8] sm:$0xff]  ;;  %v4912_v12 = vld [vmem:[%s12341_s5 + $0x3d8] sm:$0xff] }
 0x55f   :  { %4996 = vmatpush.msra.mxu3 %v4846_v59  ;;  %5049 = vmatpush.msrb.mxu1 %v4871_v61 }
 0x560   :  { %5027 = vmatpush.msrb.mxu0 %v4854_v16  ;;  %5064 = vmatpush.msrb.mxu2 %v4895_v6  ;;  %v4786_v39 = vmax.f32 %v4403_v25, 0.0  ;;  %v4468_v32 = vpop.f32.mrf.mxu2  ;;  %v4910_v6 = vld [vmem:[%s12341_s5 + $0x3c8] sm:$0xff]  ;;  %v4908_v25 = vld [vmem:[%s12341_s5 + $0x3b8] sm:$0xff] }
 0x561   :  { %4997 = vmatpush.msra.mxu3 %v4845_v9  ;;  %5050 = vmatpush.msrb.mxu1 %v4870_v29  ;;  %v4425_v21 = vpop.f32.mrf.mxu0  ;;  %v4469_v24 = vadd.f32 %v4468_v32, %v4446_v41 }
 0x562   :  { %5028 = vmatpush.msrb.mxu0 %v4853_v27  ;;  %5065 = vmatpush.msrb.mxu2 %v4894_v63  ;;  %v4491_v11 = vpop.f32.mrf.mxu3  ;;  %v4426_v55 = vadd.f32 %v4425_v21, %v3291_v35  ;;  %v4906_v63 = vld [vmem:[%s12341_s5 + $0x3a8] sm:$0xff] }
 0x563   :  { %4998 = vmatpush.msra.mxu3 %v4844_v0  ;;  %5051 = vmatpush.msrb.mxu1 %v4869_v34  ;;  %v4492_v48 = vadd.f32 %v4491_v11, %v4469_v24 }
 0x564   :  { %5029 = vmatmul.f32.vlgmr.msrb.gmra.mxu0 %v4777_v58  ;;  %5052 = vmatmul.f32.vlgmr.msrb.gmra.mxu1 %v4778_v38  ;;  %v4448_v18 = vpop.f32.mrf.mxu1  ;;  %v4916_v58 = vld [vmem:[%s12341_s5 + $0x3f8] sm:$0xff]  ;;  %v4915_v38 = vld [vmem:[%s12341_s5 + $0x3f0] sm:$0xff] }
 0x565   :  { %4999 = vmatpush.msra.mxu3 %v4843_v43  ;;  %5066 = vmatpush.msrb.mxu2 %v4893_v37  ;;  %v4449_v52 = vadd.f32 %v4448_v18, %v4426_v55  ;;  %v4904_v37 = vld [vmem:[%s12341_s5 + $0x398] sm:$0xff] }
 0x567   :  { %5000 = vmatpush.msra.mxu3 %v4842_v31  ;;  %5067 = vmatpush.msrb.mxu2 %v4892_v22  ;;  %v4911_v31 = vld [vmem:[%s12341_s5 + $0x3d0] sm:$0xff]  ;;  %v4901_v22 = vld [vmem:[%s12341_s5 + $0x380] sm:$0xff] }
 0x568   :  { %v4471_v20 = vpop.f32.mrf.mxu2 }
 0x569   :  { %5001 = vmatpush.msra.mxu3 %v4841_v15  ;;  %5068 = vmatpush.msrb.mxu2 %v4891_v42  ;;  %v4514_v47 = vpop.f32.mrf.mxu0  ;;  %v4472_v61 = vadd.f32 %v4471_v20, %v4449_v52  ;;  %v4907_v15 = vld [vmem:[%s12341_s5 + $0x3b0] sm:$0xff]  ;;  %v3292_v42 = vperm.slane %v11781_v30, 7 }
 0x56a   :  { %v4515_v50 = vadd.f32 %v4514_v47, %v4492_v48  ;;  %v4494_v59 = vpop.f32.mrf.mxu3 }
 0x56b   :  { %5002 = vmatpush.msra.mxu3 %v4840_v14  ;;  %5069 = vmatpush.msrb.mxu2 %v4890_v36  ;;  %v4495_v16 = vadd.f32 %v4494_v59, %v4472_v61  ;;  %v4905_v14 = vld [vmem:[%s12341_s5 + $0x3a0] sm:$0xff] }
 0x56c   :  { %5032 = vmatmul.f32.gmra.mxu0 %v4785_v53  ;;  %5055 = vmatmul.f32.gmra.mxu1 %v4786_v39  ;;  %v4537_v28 = vpop.f32.mrf.mxu1  ;;  %v4903_v53 = vld [vmem:[%s12341_s5 + $0x390] sm:$0xff] }
 0x56d   :  { %5003 = vmatpush.msra.mxu3 %v4839_v56  ;;  %5070 = vmatpush.msrb.mxu2 %v4889_v62  ;;  %v4538_v26 = vadd.f32 %v4537_v28, %v4515_v50  ;;  %v4902_v56 = vld [vmem:[%s12341_s5 + $0x388] sm:$0xff] }
 0x56f   :  { %5004 = vmatpush.msra.mxu3 %v4838_v33  ;;  %5071 = vmatpush.msrb.mxu2 %v4888_v57 }
 0x570   :  { %v4560_v7 = vpop.f32.mrf.mxu2 }
 0x571   :  { %5005 = vmatpush.msra.mxu3 %v4837_v3  ;;  %5072 = vmatpush.msrb.mxu2 %v4887_v4  ;;  %v4517_v45 = vpop.f32.mrf.mxu0  ;;  %v4561_v29 = vadd.f32 %v4560_v7, %v4538_v26 }
 0x572   :  { %5006 = vmatmul.f32.vlgmr.msra.gmra.mxu3 %v4776_v40  ;;  %v4518_v9 = vadd.f32 %v4517_v45, %v4495_v16 }
 0x573   :  { %5073 = vmatpush.msrb.mxu2 %v4886_v17  ;;  %5082 = vmatpush.msrb.mxu3 %v4916_v58 }
 0x574   :  { %v4540_v8 = vpop.f32.mrf.mxu1 }
 0x575   :  { %5074 = vmatpush.msrb.mxu2 %v4885_v51  ;;  %v4541_v60 = vadd.f32 %v4540_v8, %v4518_v9  ;;  %5083 = vmatpush.msrb.mxu3 %v4915_v38 }
 0x577   :  { %v4583_v46 = vpop.f32.mrf.mxu3  ;;  %5084 = vmatpush.msrb.mxu3 %v4914_v5 }
 0x578   :  { %v4584_v27 = vadd.f32 %v4583_v46, %v4561_v29  ;;  %v4563_v0 = vpop.f32.mrf.mxu2  ;;  %v5128_v46 = vld [vmem:[%s12342_s6] ss:$0 sm:$0xff]  ;;  %s5185_s6 = smov [#allocation2]  }
 0x579   :  { %v4564_v34 = vadd.f32 %v4563_v0, %v4541_v60  ;;  %5085 = vmatpush.msrb.mxu3 %v4913_v44  ;;  %v4606_v39 = vpop.f32.mrf.mxu0  ;;  %s5111_s9 = sshll.u32 %s5185_s6, 4  ;;  %s5112_s9 = int_to_ptr.vmem [resolvable:$true] %s5111_s9 }
 0x57a   :  { %5009 = vmatmul.f32.gmra.mxu3 %v4784_v1  ;;  %v4779_v49 = vmax.f32 %v4584_v27, 0.0  ;;  %v4607_v36 = vadd.f32 %v4606_v39, %v3292_v42 }
 0x57b   :  { %5086 = vmatpush.msrb.mxu3 %v4912_v12 }
 0x57c   :  { %5075 = vmatmul.f32.vlgmr.msrb.gmra.mxu2 %v4779_v49  ;;  %v4629_v33 = vpop.f32.mrf.mxu1 }
 0x57d   :  { %5087 = vmatpush.msrb.mxu3 %v4911_v31  ;;  %v4630_v62 = vadd.f32 %v4629_v33, %v4607_v36 }
 0x57f   :  { %v4586_v43 = vpop.f32.mrf.mxu3  ;;  %5088 = vmatpush.msrb.mxu3 %v4910_v6 }
 0x580   :  { %v4587_v10 = vadd.f32 %v4586_v43, %v4564_v34  ;;  %v4652_v3 = vpop.f32.mrf.mxu2 }
 0x581   :  { %5089 = vmatpush.msrb.mxu3 %v4909_v23  ;;  %v4609_v40 = vpop.f32.mrf.mxu0  ;;  %v4653_v13 = vadd.f32 %v4652_v3, %v4630_v62 }
 0x582   :  { %v4787_v19 = vmax.f32 %v4587_v10, 0.0  ;;  %v4610_v4 = vadd.f32 %v4609_v40, %v3292_v42 }
 0x583   :  { %5090 = vmatpush.msrb.mxu3 %v4908_v25 }
 0x584   :  { %5078 = vmatmul.f32.gmra.mxu2 %v4787_v19  ;;  %v4632_v57 = vpop.f32.mrf.mxu1 }
 0x585   :  { %5091 = vmatpush.msrb.mxu3 %v4907_v15  ;;  %v4633_v32 = vadd.f32 %v4632_v57, %v4610_v4 }
 0x587   :  { %5092 = vmatpush.msrb.mxu3 %v4906_v63 }
 0x588   :  { %v4655_v17 = vpop.f32.mrf.mxu2 }
 0x589   :  { %5093 = vmatpush.msrb.mxu3 %v4905_v14  ;;  %v4656_v11 = vadd.f32 %v4655_v17, %v4633_v32 }
 0x58b   :  { %5094 = vmatpush.msrb.mxu3 %v4904_v37 }
 0x58d   :  { %5095 = vmatpush.msrb.mxu3 %v4903_v53 }
 0x58f   :  { %5096 = vmatpush.msrb.mxu3 %v4902_v56 }
 0x591   :  { %5097 = vmatpush.msrb.mxu3 %v4901_v22 }
 0x599   :  { %v4698_v1 = vpop.f32.mrf.mxu0 }
 0x59a   :  { %v4721_v54 = vpop.f32.mrf.mxu1 }
 0x5a3   :  { %v4701_v30 = vpop.f32.mrf.mxu0 }
 0x5a5   :  { %v4724_v52 = vpop.f32.mrf.mxu1 }
 0x5a9   :  { %v4744_v24 = vpop.f32.mrf.mxu2 }
 0x5b1   :  { %v4747_v59 = vpop.f32.mrf.mxu2 }
 0x5b2   :  { %v4675_v2 = vpop.f32.mrf.mxu3 }
 0x5b3   :  { %v4676_v35 = vadd.f32 %v4675_v2, %v4653_v13 }
 0x5b5   :  { %v4699_v51 = vadd.f32 %v4698_v1, %v4676_v35 }
 0x5b7   :  { %v4722_v18 = vadd.f32 %v4721_v54, %v4699_v51 }
 0x5b9   :  { %v4745_v48 = vadd.f32 %v4744_v24, %v4722_v18 }
 0x5ba   :  { %v4678_v21 = vpop.f32.mrf.mxu3 }
 0x5bb   :  { %v4679_v41 = vadd.f32 %v4678_v21, %v4656_v11 }
 0x5bd   :  { %v4702_v55 = vadd.f32 %v4701_v30, %v4679_v41 }
 0x5bf   :  { %v4725_v28 = vadd.f32 %v4724_v52, %v4702_v55  ;;  %v4938_v45 = vpop.f32.mrf.mxu0  ;;  %v4961_v9 = vpop.f32.mrf.mxu1 }
 0x5c0   :  { %v4939_v27 = vadd.f32 %v5128_v46, %v4938_v45 }
 0x5c1   :  { %v4748_v61 = vadd.f32 %v4747_v59, %v4725_v28 }
 0x5c2   :  { %v4962_v60 = vadd.f32 %v4961_v9, %v4939_v27 }
 0x5c8   :  { %v4941_v8 = vpop.f32.mrf.mxu0  ;;  %v4964_v0 = vpop.f32.mrf.mxu1 }
 0x5c9   :  { %v4942_v38 = vadd.f32 %v5128_v46, %v4941_v8 }
 0x5cb   :  { %v4965_v5 = vadd.f32 %v4964_v0, %v4942_v38 }
 0x5cc   :  { %v4984_v29 = vpop.f32.mrf.mxu2 }
 0x5cd   :  { %v4985_v58 = vadd.f32 %v4984_v29, %v4962_v60 }
 0x5d4   :  { %v4987_v34 = vpop.f32.mrf.mxu2 }
 0x5d5   :  { %v4767_v20 = vpop.f32.mrf.mxu3  ;;  %v4988_v6 = vadd.f32 %v4987_v34, %v4965_v5 }
 0x5d6   :  { %v4768_v47 = vadd.f32 %v4767_v20, %v4745_v48 }
 0x5d8   :  { %v4780_v50 = vmax.f32 %v4768_v47, 0.0 }
 0x5da   :  { %5098 = vmatmul.f32.vlgmr.msrb.gmra.mxu3 %v4780_v50 }
 0x5dd   :  { %v4770_v16 = vpop.f32.mrf.mxu3 }
 0x5de   :  { %v4771_v26 = vadd.f32 %v4770_v16, %v4748_v61 }
 0x5e0   :  { %v4788_v7 = vmax.f32 %v4771_v26, 0.0 }
 0x5e1   :  { %v5030_v10 = vpop.f32.mrf.mxu0  ;;  %v5053_v12 = vpop.f32.mrf.mxu1 }
 0x5e2   :  { %5101 = vmatmul.f32.gmra.mxu3 %v4788_v7 }
 0x5e9   :  { %v5033_v63 = vpop.f32.mrf.mxu0  ;;  %v5056_v39 = vpop.f32.mrf.mxu1 }
 0x5f5   :  { %v5007_v49 = vpop.f32.mrf.mxu3 }
 0x5f6   :  { %v5008_v43 = vadd.f32 %v5007_v49, %v4985_v58 }
 0x5f8   :  { %v5031_v44 = vadd.f32 %v5030_v10, %v5008_v43 }
 0x5fa   :  { %v5054_v25 = vadd.f32 %v5053_v12, %v5031_v44 }
 0x5fd   :  { %v5010_v19 = vpop.f32.mrf.mxu3 }
 0x5fe   :  { %v5011_v23 = vadd.f32 %v5010_v19, %v4988_v6 }
 0x5ff   :  { %v5076_v31 = vpop.f32.mrf.mxu2 }
 0x600   :  { %v5077_v15 = vadd.f32 %v5076_v31, %v5054_v25  ;;  %v5034_v37 = vadd.f32 %v5033_v63, %v5011_v23 }
 0x602   :  { %v5057_v22 = vadd.f32 %v5056_v39, %v5034_v37 }
 0x607   :  { %v5079_v56 = vpop.f32.mrf.mxu2 }
 0x608   :  { %v5080_v33 = vadd.f32 %v5079_v56, %v5057_v22 }
 0x65d   :  { %v5099_v14 = vpop.f32.mrf.mxu3 }
 0x65e   :  { %v5100_v53 = vadd.f32 %v5099_v14, %v5077_v15 }
 0x660   :  { %5105 = vst [vmem:[#allocation2] sm:$0xff] %v5100_v53 }
 0x665   :  { %v5102_v42 = vpop.f32.mrf.mxu3 }
 0x666   :  { %v5103_v3 = vadd.f32 %v5102_v42, %v5080_v33 }
 0x668   :  { %5106 = vst [vmem:[#allocation2 + $0x8] sm:$0xff] %v5103_v3 }
 0x669   :  { %5119 = dma.vmem_to_hbm [thread:$0]  %s5112_s9, 256, %s5114_s12, [#allocation3], %s5186_s13, %s5186_s13, %s5187_s14  }
 0x66a   :  { %5183 = dma.done.wait [#allocation3], 256  }
 0x66b   :  { %5184 = vsyncadd [#allocation3], 4294967040 }
 0x66c   :  { %5124 = vsyncpa [#allocation3], 1 }

</bundles_post_ra>
